<compile_context>
chip_gen: v5e
topology: v5e:2x2
jax: 0.10.0
libtpu: 0.0.40
codegen_flags: <defaults>
</compile_context>

<pallas_src>
import functools
import math

import jax
import jax.numpy as jnp
from jax.experimental import pallas as pl
from jax.experimental.pallas import tpu as pltpu

# ----------------------------- small BERT config -----------------------------
HIDDEN = 32
HEADS = 4
HEAD_DIM = HIDDEN // HEADS
INTER = 64
VOCAB = 64
MAX_POS = 16
TYPE_VOCAB = 2
NUM_CLASSES = 3
NUM_BLOCKS = 4
NUM_REPS = NUM_BLOCKS + 2          # emb + 4 encoder blocks + SNNFC
LN_EPS = 1e-12
INIT_RANGE = 0.02
TIME_STEP = 3                      # small stand-in for t_conv=100
VTH = 1.0
LEAKY = 1.0


# ----------------------------- fused Pallas kernel ----------------------------
def _snn_ide_fused_kernel(
    emb_ref, mask_ref, eln_g_ref, eln_b_ref,
    qkv_w_ref, qkv_b_ref, ao_w_ref, ao_b_ref, ao_ln_g_ref, ao_ln_b_ref,
    inter_w_ref, inter_b_ref, out_w_ref, out_b_ref, out_ln_g_ref, out_ln_b_ref,
    s25_w_ref, s25_b_ref, fit_w_ref, fit_b_ref,
    fitted_ref, atts_ref,
    *, batch, seq, time_step, vth, leaky,
):
    """Full SNN-IDE forward, batch folded into rows (B*S, H)."""
    B, S = batch, seq
    BS = B * S
    scale = 1.0 / math.sqrt(HEAD_DIM)
    bf16 = jnp.bfloat16
    n_spk = NUM_BLOCKS + 1          # 4 encoder-block LIF layers + SNNFC LIF layer

    def layernorm(x, g, b):
        mean = jnp.mean(x, axis=-1, keepdims=True)
        var = jnp.mean(jnp.square(x - mean), axis=-1, keepdims=True)
        return (x - mean) * jax.lax.rsqrt(var + LN_EPS) * g + b

    def gelu(y):
        # TODO(synk): PyTorch BertIntermediate uses erf-based GELU; tanh approx used here.
        c = math.sqrt(2.0 / math.pi)
        return 0.5 * y * (1.0 + jnp.tanh(c * (y + 0.044715 * y * y * y)))

    # ---- hoisted parameter loads (fori_loop body is traced once; weights bf16) ----
    eln_g = eln_g_ref[...]
    eln_b = eln_b_ref[...]
    mask_bd = mask_ref[...]                                  # (BS, BS) additive mask
    qkv_w = [qkv_w_ref[k].astype(bf16) for k in range(NUM_BLOCKS)]
    qkv_b = [qkv_b_ref[k] for k in range(NUM_BLOCKS)]
    ao_w = [ao_w_ref[k].astype(bf16) for k in range(NUM_BLOCKS)]
    ao_b = [ao_b_ref[k] for k in range(NUM_BLOCKS)]
    ao_g = [ao_ln_g_ref[k] for k in range(NUM_BLOCKS)]
    ao_beta = [ao_ln_b_ref[k] for k in range(NUM_BLOCKS)]
    inter_w = [inter_w_ref[k].astype(bf16) for k in range(NUM_BLOCKS)]
    inter_b = [inter_b_ref[k] for k in range(NUM_BLOCKS)]
    out_w = [out_w_ref[k].astype(bf16) for k in range(NUM_BLOCKS)]
    out_b = [out_b_ref[k] for k in range(NUM_BLOCKS)]
    out_g = [out_ln_g_ref[k] for k in range(NUM_BLOCKS)]
    out_beta = [out_ln_b_ref[k] for k in range(NUM_BLOCKS)]
    s25_w = s25_w_ref[...].astype(bf16)
    s25_b = s25_b_ref[...]
    fit_w = fit_w_ref[...].astype(bf16)
    fit_b = fit_b_ref[...]

    # Embedding LayerNorm = constant input current of the spiking system.
    emb = layernorm(emb_ref[...], eln_g, eln_b)              # (BS, H) f32

    def heads_stack(m, base):
        # (BS, 3H) lanes -> (HEADS, BS, HEAD_DIM): heads become a leading batch axis.
        return jnp.stack(
            [m[:, base + h * HEAD_DIM: base + (h + 1) * HEAD_DIM] for h in range(HEADS)],
            axis=0)

    def encoder_block(kb, x):
        """BertFC(q/k) + SelfAttentionSplit + SelfOutput + Intermediate + Output."""
        x_bf = x.astype(bf16)
        qkv = jnp.dot(x_bf, qkv_w[kb], preferred_element_type=jnp.float32) + qkv_b[kb]
        q3 = heads_stack(qkv, 0)                             # (HEADS, BS, D)
        k3 = heads_stack(qkv, HIDDEN)
        v3 = heads_stack(qkv, 2 * HIDDEN)
        # One batched score matmul + one softmax over all heads (batch handled by
        # the block-diagonal additive mask; cross-batch entries exp to exactly 0).
        s = jnp.einsum('hqd,hkd->hqk', q3, k3,
                       preferred_element_type=jnp.float32) * scale + mask_bd
        s = s - jnp.max(s, axis=-1, keepdims=True)
        e = jnp.exp(s)
        p = e * pl.reciprocal(jnp.sum(e, axis=-1, keepdims=True), approx=True)
        ctx3 = jnp.einsum('hqk,hkd->hqd', p, v3,
                          preferred_element_type=jnp.float32)  # (HEADS, BS, D)
        ctx = jnp.concatenate([ctx3[h] for h in range(HEADS)], axis=-1)   # (BS, H)

        ao = jnp.dot(ctx.astype(bf16), ao_w[kb],
                     preferred_element_type=jnp.float32) + ao_b[kb]
        h1 = layernorm(ao + x, ao_g[kb], ao_beta[kb])
        it = gelu(jnp.dot(h1.astype(bf16), inter_w[kb],
                          preferred_element_type=jnp.float32) + inter_b[kb])
        out = jnp.dot(it.astype(bf16), out_w[kb],
                      preferred_element_type=jnp.float32) + out_b[kb]
        h2 = layernorm(out + h1, out_g[kb], out_beta[kb])
        return h2, p

    # ------------------ T-step LIF dynamics as a fori_loop ------------------
    zeros_xh = jnp.zeros((BS, HIDDEN), jnp.float32)
    zeros_att = jnp.zeros((HEADS, BS, BS), jnp.float32)
    init = (tuple(zeros_xh for _ in range(n_spk)),           # membrane potentials
            tuple(zeros_xh for _ in range(n_spk)),           # spike counters
            tuple(zeros_att for _ in range(NUM_BLOCKS)))     # attention-prob sums

    def step(t, carry):
        u, cnt, att = carry
        rate_scale = vth / t.astype(jnp.float32)
        u_n, cnt_n, att_n = list(u), list(cnt), list(att)
        prev = emb
        for kb in range(NUM_BLOCKS):
            cur, p = encoder_block(kb, prev)
            u_new = leaky * u[kb] + cur
            spike = (u_new >= vth).astype(jnp.float32)
            u_n[kb] = u_new - vth * spike                    # soft reset by vth
            cnt_n[kb] = cnt[kb] + spike
            att_n[kb] = att[kb] + p
            prev = cnt_n[kb] * rate_scale                    # running-average rate
        # network_s25: SNNFC(hidden, hidden) + LIF
        cur25 = jnp.dot(prev.astype(bf16), s25_w,
                        preferred_element_type=jnp.float32) + s25_b
        u_new = leaky * u[n_spk - 1] + cur25
        spike = (u_new >= vth).astype(jnp.float32)
        u_n[n_spk - 1] = u_new - vth * spike
        cnt_n[n_spk - 1] = cnt[n_spk - 1] + spike
        return (tuple(u_n), tuple(cnt_n), tuple(att_n))

    _, cnt_fin, att_fin = jax.lax.fori_loop(1, time_step + 1, step, init)

    # ------------------------------- epilogue --------------------------------
    inv_t = 1.0 / float(time_step)
    rate_final = [cnt_fin[i] * (vth * inv_t) for i in range(n_spk)]

    # fit_dense applied to [emb] + all 5 spiking representations in one matmul;
    # the raw SNNFC rate is appended as a 7th group (classifier input) so no
    # separate CLS output buffer is needed.  One store of the whole (7*BS, H) slab.
    reps = jnp.concatenate([emb] + rate_final, axis=0)                     # (6*BS, H)
    fitted = jnp.dot(reps.astype(bf16), fit_w,
                     preferred_element_type=jnp.float32) + fit_b           # (6*BS, H)
    fitted_ref[...] = jnp.concatenate([fitted, rate_final[n_spk - 1]], axis=0)

    # Time-averaged attention probabilities, packed lane-dense as one
    # (BS, NUM_BLOCKS*HEADS*S) = (16, 128) slab -> single unmasked store.
    att_avg = [att_fin[kb] * inv_t for kb in range(NUM_BLOCKS)]
    rows = []
    for b in range(B):
        pieces = []
        for kb in range(NUM_BLOCKS):
            for h in range(HEADS):
                pieces.append(att_avg[kb][h, b * S:(b + 1) * S, b * S:(b + 1) * S])
        rows.append(jnp.concatenate(pieces, axis=-1))                      # (S, NB*HEADS*S)
    atts_ref[...] = jnp.concatenate(rows, axis=0)                          # (BS, NB*HEADS*S)


def snn_ide_fused(packed, emb_flat, bigmask, batch, seq, time_step, vth, leaky):
    kernel = functools.partial(
        _snn_ide_fused_kernel, batch=batch, seq=seq,
        time_step=time_step, vth=vth, leaky=leaky)

    def full(shape):
        n = len(shape)
        return pl.BlockSpec(shape, lambda *_: (0,) * n)

    operands = (
        emb_flat, bigmask,
        packed["eln_g"], packed["eln_b"],
        packed["qkv_w"], packed["qkv_b"],
        packed["ao_w"], packed["ao_b"], packed["ao_ln_g"], packed["ao_ln_b"],
        packed["inter_w"], packed["inter_b"], packed["out_w"], packed["out_b"],
        packed["out_ln_g"], packed["out_ln_b"],
        packed["s25_w"], packed["s25_b"], packed["fit_w"], packed["fit_b"],
    )
    in_specs = [full(op.shape) for op in operands]
    out_shapes = (
        # fit_dense of [emb, 4 blocks, SNNFC] stacked + raw SNNFC rate (7 groups).
        jax.ShapeDtypeStruct(((NUM_REPS + 1) * batch * seq, HIDDEN), jnp.float32),
        # lane-dense attention-probability slab.
        jax.ShapeDtypeStruct((batch * seq, NUM_BLOCKS * HEADS * seq), jnp.float32),
    )
    out_specs = (full(out_shapes[0].shape), full(out_shapes[1].shape))

    # Batch is folded: a single grid step keeps every weight block resident and
    # avoids serial per-batch grid overhead on single-TC chips (v5e/v6e).
    # TODO(synk): on v7x, splitting the batch across the 2 TensorCores
    # (core_parallel / core_map) could recover a ~2x if profiling shows an idle TC.
    return pl.pallas_call(
        kernel,
        out_shape=out_shapes,
        grid=(1,),
        in_specs=in_specs,
        out_specs=out_specs,
        compiler_params=pltpu.CompilerParams(dimension_semantics=("arbitrary",)),
    )(*operands)


# ------------------------------ parameter setup -------------------------------
def init_params(key):
    keys = iter(jax.random.split(key, 32))

    def lin(din, dout):
        return {
            "w": jax.random.normal(next(keys), (din, dout), jnp.float32) * INIT_RANGE,
            "b": jnp.zeros((dout,), jnp.float32),
        }

    def ln():
        return {"g": jnp.ones((HIDDEN,), jnp.float32),
                "b": jnp.zeros((HIDDEN,), jnp.float32)}

    emb = {
        "word": jax.random.normal(next(keys), (VOCAB, HIDDEN), jnp.float32) * INIT_RANGE,
        "pos": jax.random.normal(next(keys), (MAX_POS, HIDDEN), jnp.float32) * INIT_RANGE,
        "type": jax.random.normal(next(keys), (TYPE_VOCAB, HIDDEN), jnp.float32) * INIT_RANGE,
        "ln": ln(),
    }
    blocks = []
    for _ in range(NUM_BLOCKS):
        blocks.append({
            "q": lin(HIDDEN, HIDDEN),          # network_s(6k-5): BertFC (query)
            "k": lin(HIDDEN, HIDDEN),          # network_s(6k-4): BertFC (key)
            "v": lin(HIDDEN, HIDDEN),          # value proj inside BertSelfAttentionSplit
            "ao": lin(HIDDEN, HIDDEN),         # BertSelfOutput dense
            "ao_ln": ln(),                     # BertSelfOutput LayerNorm
            "inter": lin(HIDDEN, INTER),       # BertIntermediate dense (+gelu)
            "out": lin(INTER, HIDDEN),         # BertOutput dense
            "out_ln": ln(),                    # BertOutput LayerNorm
        })
    return {
        "emb": emb,
        "blocks": blocks,
        "s25": lin(HIDDEN, HIDDEN),            # SNNFC
        "fit": lin(HIDDEN, HIDDEN),            # fit_dense
        "cls": lin(HIDDEN, NUM_CLASSES),       # classification
    }


def pack_params(params):
    """Stack per-block weights and fuse Q/K/V so the kernel takes few, resident refs."""
    blks = params["blocks"]
    emb = params["emb"]

    def stack_w(name):
        return jnp.stack([b[name]["w"] for b in blks])

    def stack_b(name):
        return jnp.stack([b[name]["b"][None, :] for b in blks])

    def stack_ln(name, field):
        return jnp.stack([b[name][field][None, :] for b in blks])

    qkv_w = jnp.stack([jnp.concatenate([b["q"]["w"], b["k"]["w"], b["v"]["w"]], axis=1)
                       for b in blks])                                    # (4, H, 3H)
    qkv_b = jnp.stack([jnp.concatenate([b["q"]["b"], b["k"]["b"], b["v"]["b"]], axis=0)[None, :]
                       for b in blks])                                    # (4, 1, 3H)
    return {
        "eln_g": emb["ln"]["g"][None, :], "eln_b": emb["ln"]["b"][None, :],
        "qkv_w": qkv_w, "qkv_b": qkv_b,
        "ao_w": stack_w("ao"), "ao_b": stack_b("ao"),
        "ao_ln_g": stack_ln("ao_ln", "g"), "ao_ln_b": stack_ln("ao_ln", "b"),
        "inter_w": stack_w("inter"), "inter_b": stack_b("inter"),
        "out_w": stack_w("out"), "out_b": stack_b("out"),
        "out_ln_g": stack_ln("out_ln", "g"), "out_ln_b": stack_ln("out_ln", "b"),
        "s25_w": params["s25"]["w"], "s25_b": params["s25"]["b"][None, :],
        "fit_w": params["fit"]["w"], "fit_b": params["fit"]["b"][None, :],
    }


# --------------------------------- model glue ---------------------------------
def forward(params, input_ids, segment_ids, attention_mask,
            time_step=TIME_STEP, vth=VTH, leaky=LEAKY):
    B, S = input_ids.shape
    emb_p = params["emb"]
    # Embedding gathers stay in plain JAX (data-dependent gather); LN is in-kernel.
    emb_raw = (emb_p["word"][input_ids]
               + emb_p["pos"][jnp.arange(S)][None, :, :]
               + emb_p["type"][segment_ids])                              # (B, S, H)
    emb_flat = emb_raw.reshape(B * S, HIDDEN)

    # Additive mask over the folded batch: padding mask on same-batch keys,
    # -1e9 on cross-batch keys (block-diagonal attention within the kernel).
    pad = (1.0 - attention_mask.astype(jnp.float32)) * -10000.0           # (B, S)
    pad_flat = pad.reshape(B * S)
    tok_b = jnp.arange(B * S) // S
    same = tok_b[:, None] == tok_b[None, :]
    bigmask = jnp.where(same, pad_flat[None, :], jnp.float32(-1e9)).astype(jnp.float32)

    packed = pack_params(params)
    fitted, atts = snn_ide_fused(packed, emb_flat, bigmask, B, S, time_step, vth, leaky)

    groups = fitted.reshape(NUM_REPS + 1, B, S, HIDDEN)
    student_rep = [groups[j] for j in range(NUM_REPS)]                    # fit_dense(layer)
    raw_last = groups[NUM_REPS]                                           # raw SNNFC rate
    # PyTorch reference: logits are computed from the RAW last representation
    # (pre-fit_dense) CLS token, then fit_dense is applied to the rep list.
    cls_tok = jnp.maximum(raw_last[:, 0, :], 0.0)                         # (B, H)
    logits = cls_tok @ params["cls"]["w"] + params["cls"]["b"]            # (B, num_classes)

    atts5 = atts.reshape(B, S, NUM_BLOCKS, HEADS, S).transpose(0, 2, 3, 1, 4)
    atts_avg = [atts5[:, kb] for kb in range(NUM_BLOCKS)]                 # (B, HEADS, S, S)
    return logits, student_rep, atts_avg


# ------------------------------------ main ------------------------------------
if __name__ == "__main__":
    root = jax.random.PRNGKey(0)
    pkey, idkey, segkey = jax.random.split(root, 3)
    params = init_params(pkey)

    B, S = 2, 8
    input_ids = jax.random.randint(idkey, (B, S), 0, VOCAB)
    segment_ids = jax.random.randint(segkey, (B, S), 0, TYPE_VOCAB)
    attention_mask = jnp.ones((B, S), jnp.float32)

    fwd = jax.jit(functools.partial(forward, time_step=TIME_STEP, vth=VTH, leaky=LEAKY))
    logits, student_rep, atts_avg = fwd(params, input_ids, segment_ids, attention_mask)
    jax.block_until_ready((logits, student_rep, atts_avg))

    assert logits.shape == (B, NUM_CLASSES)
    assert len(student_rep) == NUM_REPS and student_rep[0].shape == (B, S, HIDDEN)
    assert len(atts_avg) == NUM_BLOCKS and atts_avg[0].shape == (B, HEADS, S, S)
    print("KERNEL_OK")
</pallas_src>

<mosaic_0001>
module attributes {stable_mosaic.version = 11 : i64} {
  func.func @_snn_ide_fused_kernel(%arg0: i32, %arg1: memref<16x32xf32, #tpu.memory_space<vmem>>, %arg2: memref<16x16xf32, #tpu.memory_space<vmem>>, %arg3: memref<1x32xf32, #tpu.memory_space<vmem>>, %arg4: memref<1x32xf32, #tpu.memory_space<vmem>>, %arg5: memref<4x32x96xf32, #tpu.memory_space<vmem>>, %arg6: memref<4x1x96xf32, #tpu.memory_space<vmem>>, %arg7: memref<4x32x32xf32, #tpu.memory_space<vmem>>, %arg8: memref<4x1x32xf32, #tpu.memory_space<vmem>>, %arg9: memref<4x1x32xf32, #tpu.memory_space<vmem>>, %arg10: memref<4x1x32xf32, #tpu.memory_space<vmem>>, %arg11: memref<4x32x64xf32, #tpu.memory_space<vmem>>, %arg12: memref<4x1x64xf32, #tpu.memory_space<vmem>>, %arg13: memref<4x64x32xf32, #tpu.memory_space<vmem>>, %arg14: memref<4x1x32xf32, #tpu.memory_space<vmem>>, %arg15: memref<4x1x32xf32, #tpu.memory_space<vmem>>, %arg16: memref<4x1x32xf32, #tpu.memory_space<vmem>>, %arg17: memref<32x32xf32, #tpu.memory_space<vmem>>, %arg18: memref<1x32xf32, #tpu.memory_space<vmem>>, %arg19: memref<32x32xf32, #tpu.memory_space<vmem>>, %arg20: memref<1x32xf32, #tpu.memory_space<vmem>>, %arg21: memref<112x32xf32, #tpu.memory_space<vmem>>, %arg22: memref<16x128xf32, #tpu.memory_space<vmem>>) attributes {dimension_semantics = [#tpu.dimension_semantics<arbitrary>], iteration_bounds = array<i64: 1>, scalar_prefetch = 0 : i64, scratch_operands = 0 : i64, tpu.core_type = #tpu.core_type<tc>, window_params = [{pipeline_mode = #tpu.pipeline_mode<synchronous>, transform_indices = @transform_0, window_bounds = array<i64: 16, 32>}, {pipeline_mode = #tpu.pipeline_mode<synchronous>, transform_indices = @transform_1, window_bounds = array<i64: 16, 16>}, {pipeline_mode = #tpu.pipeline_mode<synchronous>, transform_indices = @transform_2, window_bounds = array<i64: 1, 32>}, {pipeline_mode = #tpu.pipeline_mode<synchronous>, transform_indices = @transform_3, window_bounds = array<i64: 1, 32>}, {pipeline_mode = #tpu.pipeline_mode<synchronous>, transform_indices = @transform_4, window_bounds = array<i64: 4, 32, 96>}, {pipeline_mode = #tpu.pipeline_mode<synchronous>, transform_indices = @transform_5, window_bounds = array<i64: 4, 1, 96>}, {pipeline_mode = #tpu.pipeline_mode<synchronous>, transform_indices = @transform_6, window_bounds = array<i64: 4, 32, 32>}, {pipeline_mode = #tpu.pipeline_mode<synchronous>, transform_indices = @transform_7, window_bounds = array<i64: 4, 1, 32>}, {pipeline_mode = #tpu.pipeline_mode<synchronous>, transform_indices = @transform_8, window_bounds = array<i64: 4, 1, 32>}, {pipeline_mode = #tpu.pipeline_mode<synchronous>, transform_indices = @transform_9, window_bounds = array<i64: 4, 1, 32>}, {pipeline_mode = #tpu.pipeline_mode<synchronous>, transform_indices = @transform_10, window_bounds = array<i64: 4, 32, 64>}, {pipeline_mode = #tpu.pipeline_mode<synchronous>, transform_indices = @transform_11, window_bounds = array<i64: 4, 1, 64>}, {pipeline_mode = #tpu.pipeline_mode<synchronous>, transform_indices = @transform_12, window_bounds = array<i64: 4, 64, 32>}, {pipeline_mode = #tpu.pipeline_mode<synchronous>, transform_indices = @transform_13, window_bounds = array<i64: 4, 1, 32>}, {pipeline_mode = #tpu.pipeline_mode<synchronous>, transform_indices = @transform_14, window_bounds = array<i64: 4, 1, 32>}, {pipeline_mode = #tpu.pipeline_mode<synchronous>, transform_indices = @transform_15, window_bounds = array<i64: 4, 1, 32>}, {pipeline_mode = #tpu.pipeline_mode<synchronous>, transform_indices = @transform_16, window_bounds = array<i64: 32, 32>}, {pipeline_mode = #tpu.pipeline_mode<synchronous>, transform_indices = @transform_17, window_bounds = array<i64: 1, 32>}, {pipeline_mode = #tpu.pipeline_mode<synchronous>, transform_indices = @transform_18, window_bounds = array<i64: 32, 32>}, {pipeline_mode = #tpu.pipeline_mode<synchronous>, transform_indices = @transform_19, window_bounds = array<i64: 1, 32>}, {pipeline_mode = #tpu.pipeline_mode<synchronous>, transform_indices = @transform_20, window_bounds = array<i64: 112, 32>}, {pipeline_mode = #tpu.pipeline_mode<synchronous>, transform_indices = @transform_21, window_bounds = array<i64: 16, 128>}]} {
    %c0 = arith.constant 0 : index
    %c0_0 = arith.constant 0 : index
    %0 = vector.load %arg3[%c0, %c0_0] : memref<1x32xf32, #tpu.memory_space<vmem>>, vector<1x32xf32>
    %c0_1 = arith.constant 0 : index
    %c0_2 = arith.constant 0 : index
    %1 = vector.load %arg4[%c0_1, %c0_2] : memref<1x32xf32, #tpu.memory_space<vmem>>, vector<1x32xf32>
    %c0_3 = arith.constant 0 : index
    %c0_4 = arith.constant 0 : index
    %2 = vector.load %arg2[%c0_3, %c0_4] : memref<16x16xf32, #tpu.memory_space<vmem>>, vector<16x16xf32>
    %c0_5 = arith.constant 0 : index
    %c0_6 = arith.constant 0 : index
    %c0_7 = arith.constant 0 : index
    %3 = vector.load %arg5[%c0_5, %c0_6, %c0_7] : memref<4x32x96xf32, #tpu.memory_space<vmem>>, vector<1x32x96xf32>
    %4 = vector.shape_cast %3 : vector<1x32x96xf32> to vector<32x96xf32>
    %5 = arith.truncf %4 : vector<32x96xf32> to vector<32x96xbf16>
    %c1 = arith.constant 1 : index
    %c0_8 = arith.constant 0 : index
    %c0_9 = arith.constant 0 : index
    %6 = vector.load %arg5[%c1, %c0_8, %c0_9] : memref<4x32x96xf32, #tpu.memory_space<vmem>>, vector<1x32x96xf32>
    %7 = vector.shape_cast %6 : vector<1x32x96xf32> to vector<32x96xf32>
    %8 = arith.truncf %7 : vector<32x96xf32> to vector<32x96xbf16>
    %c2 = arith.constant 2 : index
    %c0_10 = arith.constant 0 : index
    %c0_11 = arith.constant 0 : index
    %9 = vector.load %arg5[%c2, %c0_10, %c0_11] : memref<4x32x96xf32, #tpu.memory_space<vmem>>, vector<1x32x96xf32>
    %10 = vector.shape_cast %9 : vector<1x32x96xf32> to vector<32x96xf32>
    %11 = arith.truncf %10 : vector<32x96xf32> to vector<32x96xbf16>
    %c3 = arith.constant 3 : index
    %c0_12 = arith.constant 0 : index
    %c0_13 = arith.constant 0 : index
    %12 = vector.load %arg5[%c3, %c0_12, %c0_13] : memref<4x32x96xf32, #tpu.memory_space<vmem>>, vector<1x32x96xf32>
    %13 = vector.shape_cast %12 : vector<1x32x96xf32> to vector<32x96xf32>
    %14 = arith.truncf %13 : vector<32x96xf32> to vector<32x96xbf16>
    %c0_14 = arith.constant 0 : index
    %c0_15 = arith.constant 0 : index
    %c0_16 = arith.constant 0 : index
    %15 = vector.load %arg6[%c0_14, %c0_15, %c0_16] : memref<4x1x96xf32, #tpu.memory_space<vmem>>, vector<1x1x96xf32>
    %16 = vector.shape_cast %15 : vector<1x1x96xf32> to vector<1x96xf32>
    %c1_17 = arith.constant 1 : index
    %c0_18 = arith.constant 0 : index
    %c0_19 = arith.constant 0 : index
    %17 = vector.load %arg6[%c1_17, %c0_18, %c0_19] : memref<4x1x96xf32, #tpu.memory_space<vmem>>, vector<1x1x96xf32>
    %18 = vector.shape_cast %17 : vector<1x1x96xf32> to vector<1x96xf32>
    %c2_20 = arith.constant 2 : index
    %c0_21 = arith.constant 0 : index
    %c0_22 = arith.constant 0 : index
    %19 = vector.load %arg6[%c2_20, %c0_21, %c0_22] : memref<4x1x96xf32, #tpu.memory_space<vmem>>, vector<1x1x96xf32>
    %20 = vector.shape_cast %19 : vector<1x1x96xf32> to vector<1x96xf32>
    %c3_23 = arith.constant 3 : index
    %c0_24 = arith.constant 0 : index
    %c0_25 = arith.constant 0 : index
    %21 = vector.load %arg6[%c3_23, %c0_24, %c0_25] : memref<4x1x96xf32, #tpu.memory_space<vmem>>, vector<1x1x96xf32>
    %22 = vector.shape_cast %21 : vector<1x1x96xf32> to vector<1x96xf32>
    %c0_26 = arith.constant 0 : index
    %c0_27 = arith.constant 0 : index
    %c0_28 = arith.constant 0 : index
    %23 = vector.load %arg7[%c0_26, %c0_27, %c0_28] : memref<4x32x32xf32, #tpu.memory_space<vmem>>, vector<1x32x32xf32>
    %24 = vector.shape_cast %23 : vector<1x32x32xf32> to vector<32x32xf32>
    %25 = arith.truncf %24 : vector<32x32xf32> to vector<32x32xbf16>
    %c1_29 = arith.constant 1 : index
    %c0_30 = arith.constant 0 : index
    %c0_31 = arith.constant 0 : index
    %26 = vector.load %arg7[%c1_29, %c0_30, %c0_31] : memref<4x32x32xf32, #tpu.memory_space<vmem>>, vector<1x32x32xf32>
    %27 = vector.shape_cast %26 : vector<1x32x32xf32> to vector<32x32xf32>
    %28 = arith.truncf %27 : vector<32x32xf32> to vector<32x32xbf16>
    %c2_32 = arith.constant 2 : index
    %c0_33 = arith.constant 0 : index
    %c0_34 = arith.constant 0 : index
    %29 = vector.load %arg7[%c2_32, %c0_33, %c0_34] : memref<4x32x32xf32, #tpu.memory_space<vmem>>, vector<1x32x32xf32>
    %30 = vector.shape_cast %29 : vector<1x32x32xf32> to vector<32x32xf32>
    %31 = arith.truncf %30 : vector<32x32xf32> to vector<32x32xbf16>
    %c3_35 = arith.constant 3 : index
    %c0_36 = arith.constant 0 : index
    %c0_37 = arith.constant 0 : index
    %32 = vector.load %arg7[%c3_35, %c0_36, %c0_37] : memref<4x32x32xf32, #tpu.memory_space<vmem>>, vector<1x32x32xf32>
    %33 = vector.shape_cast %32 : vector<1x32x32xf32> to vector<32x32xf32>
    %34 = arith.truncf %33 : vector<32x32xf32> to vector<32x32xbf16>
    %c0_38 = arith.constant 0 : index
    %c0_39 = arith.constant 0 : index
    %c0_40 = arith.constant 0 : index
    %35 = vector.load %arg8[%c0_38, %c0_39, %c0_40] : memref<4x1x32xf32, #tpu.memory_space<vmem>>, vector<1x1x32xf32>
    %36 = vector.shape_cast %35 : vector<1x1x32xf32> to vector<1x32xf32>
    %c1_41 = arith.constant 1 : index
    %c0_42 = arith.constant 0 : index
    %c0_43 = arith.constant 0 : index
    %37 = vector.load %arg8[%c1_41, %c0_42, %c0_43] : memref<4x1x32xf32, #tpu.memory_space<vmem>>, vector<1x1x32xf32>
    %38 = vector.shape_cast %37 : vector<1x1x32xf32> to vector<1x32xf32>
    %c2_44 = arith.constant 2 : index
    %c0_45 = arith.constant 0 : index
    %c0_46 = arith.constant 0 : index
    %39 = vector.load %arg8[%c2_44, %c0_45, %c0_46] : memref<4x1x32xf32, #tpu.memory_space<vmem>>, vector<1x1x32xf32>
    %40 = vector.shape_cast %39 : vector<1x1x32xf32> to vector<1x32xf32>
    %c3_47 = arith.constant 3 : index
    %c0_48 = arith.constant 0 : index
    %c0_49 = arith.constant 0 : index
    %41 = vector.load %arg8[%c3_47, %c0_48, %c0_49] : memref<4x1x32xf32, #tpu.memory_space<vmem>>, vector<1x1x32xf32>
    %42 = vector.shape_cast %41 : vector<1x1x32xf32> to vector<1x32xf32>
    %c0_50 = arith.constant 0 : index
    %c0_51 = arith.constant 0 : index
    %c0_52 = arith.constant 0 : index
    %43 = vector.load %arg9[%c0_50, %c0_51, %c0_52] : memref<4x1x32xf32, #tpu.memory_space<vmem>>, vector<1x1x32xf32>
    %44 = vector.shape_cast %43 : vector<1x1x32xf32> to vector<1x32xf32>
    %c1_53 = arith.constant 1 : index
    %c0_54 = arith.constant 0 : index
    %c0_55 = arith.constant 0 : index
    %45 = vector.load %arg9[%c1_53, %c0_54, %c0_55] : memref<4x1x32xf32, #tpu.memory_space<vmem>>, vector<1x1x32xf32>
    %46 = vector.shape_cast %45 : vector<1x1x32xf32> to vector<1x32xf32>
    %c2_56 = arith.constant 2 : index
    %c0_57 = arith.constant 0 : index
    %c0_58 = arith.constant 0 : index
    %47 = vector.load %arg9[%c2_56, %c0_57, %c0_58] : memref<4x1x32xf32, #tpu.memory_space<vmem>>, vector<1x1x32xf32>
    %48 = vector.shape_cast %47 : vector<1x1x32xf32> to vector<1x32xf32>
    %c3_59 = arith.constant 3 : index
    %c0_60 = arith.constant 0 : index
    %c0_61 = arith.constant 0 : index
    %49 = vector.load %arg9[%c3_59, %c0_60, %c0_61] : memref<4x1x32xf32, #tpu.memory_space<vmem>>, vector<1x1x32xf32>
    %50 = vector.shape_cast %49 : vector<1x1x32xf32> to vector<1x32xf32>
    %c0_62 = arith.constant 0 : index
    %c0_63 = arith.constant 0 : index
    %c0_64 = arith.constant 0 : index
    %51 = vector.load %arg10[%c0_62, %c0_63, %c0_64] : memref<4x1x32xf32, #tpu.memory_space<vmem>>, vector<1x1x32xf32>
    %52 = vector.shape_cast %51 : vector<1x1x32xf32> to vector<1x32xf32>
    %c1_65 = arith.constant 1 : index
    %c0_66 = arith.constant 0 : index
    %c0_67 = arith.constant 0 : index
    %53 = vector.load %arg10[%c1_65, %c0_66, %c0_67] : memref<4x1x32xf32, #tpu.memory_space<vmem>>, vector<1x1x32xf32>
    %54 = vector.shape_cast %53 : vector<1x1x32xf32> to vector<1x32xf32>
    %c2_68 = arith.constant 2 : index
    %c0_69 = arith.constant 0 : index
    %c0_70 = arith.constant 0 : index
    %55 = vector.load %arg10[%c2_68, %c0_69, %c0_70] : memref<4x1x32xf32, #tpu.memory_space<vmem>>, vector<1x1x32xf32>
    %56 = vector.shape_cast %55 : vector<1x1x32xf32> to vector<1x32xf32>
    %c3_71 = arith.constant 3 : index
    %c0_72 = arith.constant 0 : index
    %c0_73 = arith.constant 0 : index
    %57 = vector.load %arg10[%c3_71, %c0_72, %c0_73] : memref<4x1x32xf32, #tpu.memory_space<vmem>>, vector<1x1x32xf32>
    %58 = vector.shape_cast %57 : vector<1x1x32xf32> to vector<1x32xf32>
    %c0_74 = arith.constant 0 : index
    %c0_75 = arith.constant 0 : index
    %c0_76 = arith.constant 0 : index
    %59 = vector.load %arg11[%c0_74, %c0_75, %c0_76] : memref<4x32x64xf32, #tpu.memory_space<vmem>>, vector<1x32x64xf32>
    %60 = vector.shape_cast %59 : vector<1x32x64xf32> to vector<32x64xf32>
    %61 = arith.truncf %60 : vector<32x64xf32> to vector<32x64xbf16>
    %c1_77 = arith.constant 1 : index
    %c0_78 = arith.constant 0 : index
    %c0_79 = arith.constant 0 : index
    %62 = vector.load %arg11[%c1_77, %c0_78, %c0_79] : memref<4x32x64xf32, #tpu.memory_space<vmem>>, vector<1x32x64xf32>
    %63 = vector.shape_cast %62 : vector<1x32x64xf32> to vector<32x64xf32>
    %64 = arith.truncf %63 : vector<32x64xf32> to vector<32x64xbf16>
    %c2_80 = arith.constant 2 : index
    %c0_81 = arith.constant 0 : index
    %c0_82 = arith.constant 0 : index
    %65 = vector.load %arg11[%c2_80, %c0_81, %c0_82] : memref<4x32x64xf32, #tpu.memory_space<vmem>>, vector<1x32x64xf32>
    %66 = vector.shape_cast %65 : vector<1x32x64xf32> to vector<32x64xf32>
    %67 = arith.truncf %66 : vector<32x64xf32> to vector<32x64xbf16>
    %c3_83 = arith.constant 3 : index
    %c0_84 = arith.constant 0 : index
    %c0_85 = arith.constant 0 : index
    %68 = vector.load %arg11[%c3_83, %c0_84, %c0_85] : memref<4x32x64xf32, #tpu.memory_space<vmem>>, vector<1x32x64xf32>
    %69 = vector.shape_cast %68 : vector<1x32x64xf32> to vector<32x64xf32>
    %70 = arith.truncf %69 : vector<32x64xf32> to vector<32x64xbf16>
    %c0_86 = arith.constant 0 : index
    %c0_87 = arith.constant 0 : index
    %c0_88 = arith.constant 0 : index
    %71 = vector.load %arg12[%c0_86, %c0_87, %c0_88] : memref<4x1x64xf32, #tpu.memory_space<vmem>>, vector<1x1x64xf32>
    %72 = vector.shape_cast %71 : vector<1x1x64xf32> to vector<1x64xf32>
    %c1_89 = arith.constant 1 : index
    %c0_90 = arith.constant 0 : index
    %c0_91 = arith.constant 0 : index
    %73 = vector.load %arg12[%c1_89, %c0_90, %c0_91] : memref<4x1x64xf32, #tpu.memory_space<vmem>>, vector<1x1x64xf32>
    %74 = vector.shape_cast %73 : vector<1x1x64xf32> to vector<1x64xf32>
    %c2_92 = arith.constant 2 : index
    %c0_93 = arith.constant 0 : index
    %c0_94 = arith.constant 0 : index
    %75 = vector.load %arg12[%c2_92, %c0_93, %c0_94] : memref<4x1x64xf32, #tpu.memory_space<vmem>>, vector<1x1x64xf32>
    %76 = vector.shape_cast %75 : vector<1x1x64xf32> to vector<1x64xf32>
    %c3_95 = arith.constant 3 : index
    %c0_96 = arith.constant 0 : index
    %c0_97 = arith.constant 0 : index
    %77 = vector.load %arg12[%c3_95, %c0_96, %c0_97] : memref<4x1x64xf32, #tpu.memory_space<vmem>>, vector<1x1x64xf32>
    %78 = vector.shape_cast %77 : vector<1x1x64xf32> to vector<1x64xf32>
    %c0_98 = arith.constant 0 : index
    %c0_99 = arith.constant 0 : index
    %c0_100 = arith.constant 0 : index
    %79 = vector.load %arg13[%c0_98, %c0_99, %c0_100] : memref<4x64x32xf32, #tpu.memory_space<vmem>>, vector<1x64x32xf32>
    %80 = vector.shape_cast %79 : vector<1x64x32xf32> to vector<64x32xf32>
    %81 = arith.truncf %80 : vector<64x32xf32> to vector<64x32xbf16>
    %c1_101 = arith.constant 1 : index
    %c0_102 = arith.constant 0 : index
    %c0_103 = arith.constant 0 : index
    %82 = vector.load %arg13[%c1_101, %c0_102, %c0_103] : memref<4x64x32xf32, #tpu.memory_space<vmem>>, vector<1x64x32xf32>
    %83 = vector.shape_cast %82 : vector<1x64x32xf32> to vector<64x32xf32>
    %84 = arith.truncf %83 : vector<64x32xf32> to vector<64x32xbf16>
    %c2_104 = arith.constant 2 : index
    %c0_105 = arith.constant 0 : index
    %c0_106 = arith.constant 0 : index
    %85 = vector.load %arg13[%c2_104, %c0_105, %c0_106] : memref<4x64x32xf32, #tpu.memory_space<vmem>>, vector<1x64x32xf32>
    %86 = vector.shape_cast %85 : vector<1x64x32xf32> to vector<64x32xf32>
    %87 = arith.truncf %86 : vector<64x32xf32> to vector<64x32xbf16>
    %c3_107 = arith.constant 3 : index
    %c0_108 = arith.constant 0 : index
    %c0_109 = arith.constant 0 : index
    %88 = vector.load %arg13[%c3_107, %c0_108, %c0_109] : memref<4x64x32xf32, #tpu.memory_space<vmem>>, vector<1x64x32xf32>
    %89 = vector.shape_cast %88 : vector<1x64x32xf32> to vector<64x32xf32>
    %90 = arith.truncf %89 : vector<64x32xf32> to vector<64x32xbf16>
    %c0_110 = arith.constant 0 : index
    %c0_111 = arith.constant 0 : index
    %c0_112 = arith.constant 0 : index
    %91 = vector.load %arg14[%c0_110, %c0_111, %c0_112] : memref<4x1x32xf32, #tpu.memory_space<vmem>>, vector<1x1x32xf32>
    %92 = vector.shape_cast %91 : vector<1x1x32xf32> to vector<1x32xf32>
    %c1_113 = arith.constant 1 : index
    %c0_114 = arith.constant 0 : index
    %c0_115 = arith.constant 0 : index
    %93 = vector.load %arg14[%c1_113, %c0_114, %c0_115] : memref<4x1x32xf32, #tpu.memory_space<vmem>>, vector<1x1x32xf32>
    %94 = vector.shape_cast %93 : vector<1x1x32xf32> to vector<1x32xf32>
    %c2_116 = arith.constant 2 : index
    %c0_117 = arith.constant 0 : index
    %c0_118 = arith.constant 0 : index
    %95 = vector.load %arg14[%c2_116, %c0_117, %c0_118] : memref<4x1x32xf32, #tpu.memory_space<vmem>>, vector<1x1x32xf32>
    %96 = vector.shape_cast %95 : vector<1x1x32xf32> to vector<1x32xf32>
    %c3_119 = arith.constant 3 : index
    %c0_120 = arith.constant 0 : index
    %c0_121 = arith.constant 0 : index
    %97 = vector.load %arg14[%c3_119, %c0_120, %c0_121] : memref<4x1x32xf32, #tpu.memory_space<vmem>>, vector<1x1x32xf32>
    %98 = vector.shape_cast %97 : vector<1x1x32xf32> to vector<1x32xf32>
    %c0_122 = arith.constant 0 : index
    %c0_123 = arith.constant 0 : index
    %c0_124 = arith.constant 0 : index
    %99 = vector.load %arg15[%c0_122, %c0_123, %c0_124] : memref<4x1x32xf32, #tpu.memory_space<vmem>>, vector<1x1x32xf32>
    %100 = vector.shape_cast %99 : vector<1x1x32xf32> to vector<1x32xf32>
    %c1_125 = arith.constant 1 : index
    %c0_126 = arith.constant 0 : index
    %c0_127 = arith.constant 0 : index
    %101 = vector.load %arg15[%c1_125, %c0_126, %c0_127] : memref<4x1x32xf32, #tpu.memory_space<vmem>>, vector<1x1x32xf32>
    %102 = vector.shape_cast %101 : vector<1x1x32xf32> to vector<1x32xf32>
    %c2_128 = arith.constant 2 : index
    %c0_129 = arith.constant 0 : index
    %c0_130 = arith.constant 0 : index
    %103 = vector.load %arg15[%c2_128, %c0_129, %c0_130] : memref<4x1x32xf32, #tpu.memory_space<vmem>>, vector<1x1x32xf32>
    %104 = vector.shape_cast %103 : vector<1x1x32xf32> to vector<1x32xf32>
    %c3_131 = arith.constant 3 : index
    %c0_132 = arith.constant 0 : index
    %c0_133 = arith.constant 0 : index
    %105 = vector.load %arg15[%c3_131, %c0_132, %c0_133] : memref<4x1x32xf32, #tpu.memory_space<vmem>>, vector<1x1x32xf32>
    %106 = vector.shape_cast %105 : vector<1x1x32xf32> to vector<1x32xf32>
    %c0_134 = arith.constant 0 : index
    %c0_135 = arith.constant 0 : index
    %c0_136 = arith.constant 0 : index
    %107 = vector.load %arg16[%c0_134, %c0_135, %c0_136] : memref<4x1x32xf32, #tpu.memory_space<vmem>>, vector<1x1x32xf32>
    %108 = vector.shape_cast %107 : vector<1x1x32xf32> to vector<1x32xf32>
    %c1_137 = arith.constant 1 : index
    %c0_138 = arith.constant 0 : index
    %c0_139 = arith.constant 0 : index
    %109 = vector.load %arg16[%c1_137, %c0_138, %c0_139] : memref<4x1x32xf32, #tpu.memory_space<vmem>>, vector<1x1x32xf32>
    %110 = vector.shape_cast %109 : vector<1x1x32xf32> to vector<1x32xf32>
    %c2_140 = arith.constant 2 : index
    %c0_141 = arith.constant 0 : index
    %c0_142 = arith.constant 0 : index
    %111 = vector.load %arg16[%c2_140, %c0_141, %c0_142] : memref<4x1x32xf32, #tpu.memory_space<vmem>>, vector<1x1x32xf32>
    %112 = vector.shape_cast %111 : vector<1x1x32xf32> to vector<1x32xf32>
    %c3_143 = arith.constant 3 : index
    %c0_144 = arith.constant 0 : index
    %c0_145 = arith.constant 0 : index
    %113 = vector.load %arg16[%c3_143, %c0_144, %c0_145] : memref<4x1x32xf32, #tpu.memory_space<vmem>>, vector<1x1x32xf32>
    %114 = vector.shape_cast %113 : vector<1x1x32xf32> to vector<1x32xf32>
    %c0_146 = arith.constant 0 : index
    %c0_147 = arith.constant 0 : index
    %115 = vector.load %arg17[%c0_146, %c0_147] : memref<32x32xf32, #tpu.memory_space<vmem>>, vector<32x32xf32>
    %116 = arith.truncf %115 : vector<32x32xf32> to vector<32x32xbf16>
    %c0_148 = arith.constant 0 : index
    %c0_149 = arith.constant 0 : index
    %117 = vector.load %arg18[%c0_148, %c0_149] : memref<1x32xf32, #tpu.memory_space<vmem>>, vector<1x32xf32>
    %c0_150 = arith.constant 0 : index
    %c0_151 = arith.constant 0 : index
    %118 = vector.load %arg19[%c0_150, %c0_151] : memref<32x32xf32, #tpu.memory_space<vmem>>, vector<32x32xf32>
    %119 = arith.truncf %118 : vector<32x32xf32> to vector<32x32xbf16>
    %c0_152 = arith.constant 0 : index
    %c0_153 = arith.constant 0 : index
    %120 = vector.load %arg20[%c0_152, %c0_153] : memref<1x32xf32, #tpu.memory_space<vmem>>, vector<1x32xf32>
    %c0_154 = arith.constant 0 : index
    %c0_155 = arith.constant 0 : index
    %121 = vector.load %arg1[%c0_154, %c0_155] : memref<16x32xf32, #tpu.memory_space<vmem>>, vector<16x32xf32>
    %cst = arith.constant dense<0.000000e+00> : vector<16xf32>
    %122 = vector.multi_reduction <add>, %121, %cst [1] : vector<16x32xf32> to vector<16xf32>
    %123 = vector.shape_cast %122 : vector<16xf32> to vector<16x1xf32>
    %cst_156 = arith.constant 3.200000e+01 : f32
    %124 = vector.broadcast %cst_156 : f32 to vector<16x1xf32>
    %125 = arith.divf %123, %124 : vector<16x1xf32>
    %126 = vector.broadcast %125 : vector<16x1xf32> to vector<16x32xf32>
    %127 = arith.subf %121, %126 : vector<16x32xf32>
    %128 = arith.mulf %127, %127 : vector<16x32xf32>
    %cst_157 = arith.constant dense<0.000000e+00> : vector<16xf32>
    %129 = vector.multi_reduction <add>, %128, %cst_157 [1] : vector<16x32xf32> to vector<16xf32>
    %130 = vector.shape_cast %129 : vector<16xf32> to vector<16x1xf32>
    %cst_158 = arith.constant 3.200000e+01 : f32
    %131 = vector.broadcast %cst_158 : f32 to vector<16x1xf32>
    %132 = arith.divf %130, %131 : vector<16x1xf32>
    %133 = vector.broadcast %125 : vector<16x1xf32> to vector<16x32xf32>
    %134 = arith.subf %121, %133 : vector<16x32xf32>
    %cst_159 = arith.constant 9.99999996E-13 : f32
    %135 = vector.broadcast %cst_159 : f32 to vector<16x1xf32>
    %136 = arith.addf %132, %135 : vector<16x1xf32>
    %137 = math.rsqrt %136 : vector<16x1xf32>
    %138 = vector.broadcast %137 : vector<16x1xf32> to vector<16x32xf32>
    %139 = arith.mulf %134, %138 : vector<16x32xf32>
    %140 = vector.broadcast %0 : vector<1x32xf32> to vector<16x32xf32>
    %141 = arith.mulf %139, %140 : vector<16x32xf32>
    %142 = vector.broadcast %1 : vector<1x32xf32> to vector<16x32xf32>
    %143 = arith.addf %141, %142 : vector<16x32xf32>
    %cst_160 = arith.constant 0.000000e+00 : f32
    %144 = vector.broadcast %cst_160 : f32 to vector<16x32xf32>
    %cst_161 = arith.constant 0.000000e+00 : f32
    %145 = vector.broadcast %cst_161 : f32 to vector<4x16x16xf32>
    %c1_i32 = arith.constant 1 : i32
    %c3_i32 = arith.constant 3 : i32
    %146 = arith.addi %c1_i32, %c3_i32 : i32
    %c1_i32_162 = arith.constant 1 : i32
    %147:14 = scf.for %arg23 = %c1_i32 to %146 step %c1_i32_162 iter_args(%arg24 = %144, %arg25 = %144, %arg26 = %144, %arg27 = %144, %arg28 = %144, %arg29 = %144, %arg30 = %144, %arg31 = %144, %arg32 = %144, %arg33 = %144, %arg34 = %145, %arg35 = %145, %arg36 = %145, %arg37 = %145) -> (vector<16x32xf32>, vector<16x32xf32>, vector<16x32xf32>, vector<16x32xf32>, vector<16x32xf32>, vector<16x32xf32>, vector<16x32xf32>, vector<16x32xf32>, vector<16x32xf32>, vector<16x32xf32>, vector<4x16x16xf32>, vector<4x16x16xf32>, vector<4x16x16xf32>, vector<4x16x16xf32>)  : i32 {
      %241 = arith.sitofp %arg23 : i32 to f32
      %cst_178 = arith.constant 1.000000e+00 : f32
      %242 = arith.divf %cst_178, %241 : f32
      %243 = arith.truncf %143 : vector<16x32xf32> to vector<16x32xbf16>
      %cst_179 = arith.constant dense<0.000000e+00> : vector<16x96xf32>
      %244 = tpu.matmul %243, %5, %cst_179 {dimension_numbers = #tpu.dot_dimension_numbers<[1], [0], [0], [1], [0, 0, 1, 1], [], []>} : vector<16x32xbf16>, vector<32x96xbf16>, vector<16x96xf32> -> vector<16x96xf32>
      %245 = vector.broadcast %16 : vector<1x96xf32> to vector<16x96xf32>
      %246 = arith.addf %244, %245 : vector<16x96xf32>
      %247 = vector.extract_strided_slice %246 {offsets = [0, 0], sizes = [16, 8], strides = [1, 1]} : vector<16x96xf32> to vector<16x8xf32>
      %248 = vector.extract_strided_slice %246 {offsets = [0, 8], sizes = [16, 8], strides = [1, 1]} : vector<16x96xf32> to vector<16x8xf32>
      %249 = vector.extract_strided_slice %246 {offsets = [0, 16], sizes = [16, 8], strides = [1, 1]} : vector<16x96xf32> to vector<16x8xf32>
      %250 = vector.extract_strided_slice %246 {offsets = [0, 24], sizes = [16, 8], strides = [1, 1]} : vector<16x96xf32> to vector<16x8xf32>
      %251 = vector.shape_cast %247 : vector<16x8xf32> to vector<1x16x8xf32>
      %252 = vector.shape_cast %248 : vector<16x8xf32> to vector<1x16x8xf32>
      %253 = vector.shape_cast %249 : vector<16x8xf32> to vector<1x16x8xf32>
      %254 = vector.shape_cast %250 : vector<16x8xf32> to vector<1x16x8xf32>
      %255 = tpu.concatenate %251, %252, %253, %254 in 0 : vector<1x16x8xf32>, vector<1x16x8xf32>, vector<1x16x8xf32>, vector<1x16x8xf32> -> vector<4x16x8xf32>
      %256 = vector.extract_strided_slice %246 {offsets = [0, 32], sizes = [16, 8], strides = [1, 1]} : vector<16x96xf32> to vector<16x8xf32>
      %257 = vector.extract_strided_slice %246 {offsets = [0, 40], sizes = [16, 8], strides = [1, 1]} : vector<16x96xf32> to vector<16x8xf32>
      %258 = vector.extract_strided_slice %246 {offsets = [0, 48], sizes = [16, 8], strides = [1, 1]} : vector<16x96xf32> to vector<16x8xf32>
      %259 = vector.extract_strided_slice %246 {offsets = [0, 56], sizes = [16, 8], strides = [1, 1]} : vector<16x96xf32> to vector<16x8xf32>
      %260 = vector.shape_cast %256 : vector<16x8xf32> to vector<1x16x8xf32>
      %261 = vector.shape_cast %257 : vector<16x8xf32> to vector<1x16x8xf32>
      %262 = vector.shape_cast %258 : vector<16x8xf32> to vector<1x16x8xf32>
      %263 = vector.shape_cast %259 : vector<16x8xf32> to vector<1x16x8xf32>
      %264 = tpu.concatenate %260, %261, %262, %263 in 0 : vector<1x16x8xf32>, vector<1x16x8xf32>, vector<1x16x8xf32>, vector<1x16x8xf32> -> vector<4x16x8xf32>
      %265 = vector.extract_strided_slice %246 {offsets = [0, 64], sizes = [16, 8], strides = [1, 1]} : vector<16x96xf32> to vector<16x8xf32>
      %266 = vector.extract_strided_slice %246 {offsets = [0, 72], sizes = [16, 8], strides = [1, 1]} : vector<16x96xf32> to vector<16x8xf32>
      %267 = vector.extract_strided_slice %246 {offsets = [0, 80], sizes = [16, 8], strides = [1, 1]} : vector<16x96xf32> to vector<16x8xf32>
      %268 = vector.extract_strided_slice %246 {offsets = [0, 88], sizes = [16, 8], strides = [1, 1]} : vector<16x96xf32> to vector<16x8xf32>
      %269 = vector.shape_cast %265 : vector<16x8xf32> to vector<1x16x8xf32>
      %270 = vector.shape_cast %266 : vector<16x8xf32> to vector<1x16x8xf32>
      %271 = vector.shape_cast %267 : vector<16x8xf32> to vector<1x16x8xf32>
      %272 = vector.shape_cast %268 : vector<16x8xf32> to vector<1x16x8xf32>
      %273 = tpu.concatenate %269, %270, %271, %272 in 0 : vector<1x16x8xf32>, vector<1x16x8xf32>, vector<1x16x8xf32>, vector<1x16x8xf32> -> vector<4x16x8xf32>
      "tpu.trace_start"() <{level = 10 : i32, message = "hqd,hkd->hqk"}> : () -> ()
      %cst_180 = arith.constant dense<0.000000e+00> : vector<4x16x16xf32>
      %274 = tpu.matmul %255, %264, %cst_180 {dimension_numbers = #tpu.dot_dimension_numbers<[2], [2], [1], [1], [0, 0, 0, 1, 1, 1], [0], [0]>} : vector<4x16x8xf32>, vector<4x16x8xf32>, vector<4x16x16xf32> -> vector<4x16x16xf32>
      "tpu.trace_stop"() : () -> ()
      %cst_181 = arith.constant 0.353553385 : f32
      %275 = vector.broadcast %cst_181 : f32 to vector<4x16x16xf32>
      %276 = arith.mulf %274, %275 : vector<4x16x16xf32>
      %277 = vector.shape_cast %2 : vector<16x16xf32> to vector<1x16x16xf32>
      %278 = vector.broadcast %277 : vector<1x16x16xf32> to vector<4x16x16xf32>
      %279 = arith.addf %276, %278 : vector<4x16x16xf32>
      %cst_182 = arith.constant dense<0xFF800000> : vector<4x16xf32>
      %280 = vector.multi_reduction <maximumf>, %279, %cst_182 [2] : vector<4x16x16xf32> to vector<4x16xf32>
      %281 = vector.shape_cast %280 : vector<4x16xf32> to vector<4x16x1xf32>
      %282 = vector.broadcast %281 : vector<4x16x1xf32> to vector<4x16x16xf32>
      %283 = arith.subf %279, %282 : vector<4x16x16xf32>
      %284 = math.exp %283 : vector<4x16x16xf32>
      %cst_183 = arith.constant dense<0.000000e+00> : vector<4x16xf32>
      %285 = vector.multi_reduction <add>, %284, %cst_183 [2] : vector<4x16x16xf32> to vector<4x16xf32>
      %286 = vector.shape_cast %285 : vector<4x16xf32> to vector<4x16x1xf32>
      %287 = tpu.reciprocal %286 {approx = true} : vector<4x16x1xf32> -> vector<4x16x1xf32>
      %288 = vector.broadcast %287 : vector<4x16x1xf32> to vector<4x16x16xf32>
      %289 = arith.mulf %284, %288 : vector<4x16x16xf32>
      "tpu.trace_start"() <{level = 10 : i32, message = "hqk,hkd->hqd"}> : () -> ()
      %cst_184 = arith.constant dense<0.000000e+00> : vector<4x16x8xf32>
      %290 = tpu.matmul %289, %273, %cst_184 {dimension_numbers = #tpu.dot_dimension_numbers<[2], [1], [1], [2], [0, 0, 0, 1, 1, 2], [0], [0]>} : vector<4x16x16xf32>, vector<4x16x8xf32>, vector<4x16x8xf32> -> vector<4x16x8xf32>
      "tpu.trace_stop"() : () -> ()
      %291 = vector.extract_strided_slice %290 {offsets = [0, 0, 0], sizes = [1, 16, 8], strides = [1, 1, 1]} : vector<4x16x8xf32> to vector<1x16x8xf32>
      %292 = vector.shape_cast %291 : vector<1x16x8xf32> to vector<16x8xf32>
      %293 = vector.extract_strided_slice %290 {offsets = [1, 0, 0], sizes = [1, 16, 8], strides = [1, 1, 1]} : vector<4x16x8xf32> to vector<1x16x8xf32>
      %294 = vector.shape_cast %293 : vector<1x16x8xf32> to vector<16x8xf32>
      %295 = vector.extract_strided_slice %290 {offsets = [2, 0, 0], sizes = [1, 16, 8], strides = [1, 1, 1]} : vector<4x16x8xf32> to vector<1x16x8xf32>
      %296 = vector.shape_cast %295 : vector<1x16x8xf32> to vector<16x8xf32>
      %297 = vector.extract_strided_slice %290 {offsets = [3, 0, 0], sizes = [1, 16, 8], strides = [1, 1, 1]} : vector<4x16x8xf32> to vector<1x16x8xf32>
      %298 = vector.shape_cast %297 : vector<1x16x8xf32> to vector<16x8xf32>
      %299 = tpu.concatenate %292, %294, %296, %298 in 1 : vector<16x8xf32>, vector<16x8xf32>, vector<16x8xf32>, vector<16x8xf32> -> vector<16x32xf32>
      %300 = arith.truncf %299 : vector<16x32xf32> to vector<16x32xbf16>
      %cst_185 = arith.constant dense<0.000000e+00> : vector<16x32xf32>
      %301 = tpu.matmul %300, %25, %cst_185 {dimension_numbers = #tpu.dot_dimension_numbers<[1], [0], [0], [1], [0, 0, 1, 1], [], []>} : vector<16x32xbf16>, vector<32x32xbf16>, vector<16x32xf32> -> vector<16x32xf32>
      %302 = vector.broadcast %36 : vector<1x32xf32> to vector<16x32xf32>
      %303 = arith.addf %301, %302 : vector<16x32xf32>
      %304 = arith.addf %303, %143 : vector<16x32xf32>
      %cst_186 = arith.constant dense<0.000000e+00> : vector<16xf32>
      %305 = vector.multi_reduction <add>, %304, %cst_186 [1] : vector<16x32xf32> to vector<16xf32>
      %306 = vector.shape_cast %305 : vector<16xf32> to vector<16x1xf32>
      %cst_187 = arith.constant 3.200000e+01 : f32
      %307 = vector.broadcast %cst_187 : f32 to vector<16x1xf32>
      %308 = arith.divf %306, %307 : vector<16x1xf32>
      %309 = vector.broadcast %308 : vector<16x1xf32> to vector<16x32xf32>
      %310 = arith.subf %304, %309 : vector<16x32xf32>
      %311 = arith.mulf %310, %310 : vector<16x32xf32>
      %cst_188 = arith.constant dense<0.000000e+00> : vector<16xf32>
      %312 = vector.multi_reduction <add>, %311, %cst_188 [1] : vector<16x32xf32> to vector<16xf32>
      %313 = vector.shape_cast %312 : vector<16xf32> to vector<16x1xf32>
      %cst_189 = arith.constant 3.200000e+01 : f32
      %314 = vector.broadcast %cst_189 : f32 to vector<16x1xf32>
      %315 = arith.divf %313, %314 : vector<16x1xf32>
      %316 = vector.broadcast %308 : vector<16x1xf32> to vector<16x32xf32>
      %317 = arith.subf %304, %316 : vector<16x32xf32>
      %cst_190 = arith.constant 9.99999996E-13 : f32
      %318 = vector.broadcast %cst_190 : f32 to vector<16x1xf32>
      %319 = arith.addf %315, %318 : vector<16x1xf32>
      %320 = math.rsqrt %319 : vector<16x1xf32>
      %321 = vector.broadcast %320 : vector<16x1xf32> to vector<16x32xf32>
      %322 = arith.mulf %317, %321 : vector<16x32xf32>
      %323 = vector.broadcast %44 : vector<1x32xf32> to vector<16x32xf32>
      %324 = arith.mulf %322, %323 : vector<16x32xf32>
      %325 = vector.broadcast %52 : vector<1x32xf32> to vector<16x32xf32>
      %326 = arith.addf %324, %325 : vector<16x32xf32>
      %327 = arith.truncf %326 : vector<16x32xf32> to vector<16x32xbf16>
      %cst_191 = arith.constant dense<0.000000e+00> : vector<16x64xf32>
      %328 = tpu.matmul %327, %61, %cst_191 {dimension_numbers = #tpu.dot_dimension_numbers<[1], [0], [0], [1], [0, 0, 1, 1], [], []>} : vector<16x32xbf16>, vector<32x64xbf16>, vector<16x64xf32> -> vector<16x64xf32>
      %329 = vector.broadcast %72 : vector<1x64xf32> to vector<16x64xf32>
      %330 = arith.addf %328, %329 : vector<16x64xf32>
      %cst_192 = arith.constant 5.000000e-01 : f32
      %331 = vector.broadcast %cst_192 : f32 to vector<16x64xf32>
      %332 = arith.mulf %331, %330 : vector<16x64xf32>
      %cst_193 = arith.constant 4.471500e-02 : f32
      %333 = vector.broadcast %cst_193 : f32 to vector<16x64xf32>
      %334 = arith.mulf %333, %330 : vector<16x64xf32>
      %335 = arith.mulf %334, %330 : vector<16x64xf32>
      %336 = arith.mulf %335, %330 : vector<16x64xf32>
      %337 = arith.addf %330, %336 : vector<16x64xf32>
      %cst_194 = arith.constant 0.797884583 : f32
      %338 = vector.broadcast %cst_194 : f32 to vector<16x64xf32>
      %339 = arith.mulf %338, %337 : vector<16x64xf32>
      %340 = math.tanh %339 : vector<16x64xf32>
      %cst_195 = arith.constant 1.000000e+00 : f32
      %341 = vector.broadcast %cst_195 : f32 to vector<16x64xf32>
      %342 = arith.addf %341, %340 : vector<16x64xf32>
      %343 = arith.mulf %332, %342 : vector<16x64xf32>
      %344 = arith.truncf %343 : vector<16x64xf32> to vector<16x64xbf16>
      %cst_196 = arith.constant dense<0.000000e+00> : vector<16x32xf32>
      %345 = tpu.matmul %344, %81, %cst_196 {dimension_numbers = #tpu.dot_dimension_numbers<[1], [0], [0], [1], [0, 0, 1, 1], [], []>} : vector<16x64xbf16>, vector<64x32xbf16>, vector<16x32xf32> -> vector<16x32xf32>
      %346 = vector.broadcast %92 : vector<1x32xf32> to vector<16x32xf32>
      %347 = arith.addf %345, %346 : vector<16x32xf32>
      %348 = arith.addf %347, %326 : vector<16x32xf32>
      %cst_197 = arith.constant dense<0.000000e+00> : vector<16xf32>
      %349 = vector.multi_reduction <add>, %348, %cst_197 [1] : vector<16x32xf32> to vector<16xf32>
      %350 = vector.shape_cast %349 : vector<16xf32> to vector<16x1xf32>
      %cst_198 = arith.constant 3.200000e+01 : f32
      %351 = vector.broadcast %cst_198 : f32 to vector<16x1xf32>
      %352 = arith.divf %350, %351 : vector<16x1xf32>
      %353 = vector.broadcast %352 : vector<16x1xf32> to vector<16x32xf32>
      %354 = arith.subf %348, %353 : vector<16x32xf32>
      %355 = arith.mulf %354, %354 : vector<16x32xf32>
      %cst_199 = arith.constant dense<0.000000e+00> : vector<16xf32>
      %356 = vector.multi_reduction <add>, %355, %cst_199 [1] : vector<16x32xf32> to vector<16xf32>
      %357 = vector.shape_cast %356 : vector<16xf32> to vector<16x1xf32>
      %cst_200 = arith.constant 3.200000e+01 : f32
      %358 = vector.broadcast %cst_200 : f32 to vector<16x1xf32>
      %359 = arith.divf %357, %358 : vector<16x1xf32>
      %360 = vector.broadcast %352 : vector<16x1xf32> to vector<16x32xf32>
      %361 = arith.subf %348, %360 : vector<16x32xf32>
      %cst_201 = arith.constant 9.99999996E-13 : f32
      %362 = vector.broadcast %cst_201 : f32 to vector<16x1xf32>
      %363 = arith.addf %359, %362 : vector<16x1xf32>
      %364 = math.rsqrt %363 : vector<16x1xf32>
      %365 = vector.broadcast %364 : vector<16x1xf32> to vector<16x32xf32>
      %366 = arith.mulf %361, %365 : vector<16x32xf32>
      %367 = vector.broadcast %100 : vector<1x32xf32> to vector<16x32xf32>
      %368 = arith.mulf %366, %367 : vector<16x32xf32>
      %369 = vector.broadcast %108 : vector<1x32xf32> to vector<16x32xf32>
      %370 = arith.addf %368, %369 : vector<16x32xf32>
      %cst_202 = arith.constant 1.000000e+00 : f32
      %371 = vector.broadcast %cst_202 : f32 to vector<16x32xf32>
      %372 = arith.mulf %371, %arg24 : vector<16x32xf32>
      %373 = arith.addf %372, %370 : vector<16x32xf32>
      %cst_203 = arith.constant 1.000000e+00 : f32
      %374 = vector.broadcast %cst_203 : f32 to vector<16x32xf32>
      %375 = arith.cmpf oge, %373, %374 : vector<16x32xf32>
      %376 = arith.extui %375 : vector<16x32xi1> to vector<16x32xi32>
      %377 = arith.sitofp %376 : vector<16x32xi32> to vector<16x32xf32>
      %cst_204 = arith.constant 1.000000e+00 : f32
      %378 = vector.broadcast %cst_204 : f32 to vector<16x32xf32>
      %379 = arith.mulf %378, %377 : vector<16x32xf32>
      %380 = arith.subf %373, %379 : vector<16x32xf32>
      %381 = arith.addf %arg29, %377 : vector<16x32xf32>
      %382 = arith.addf %arg34, %289 : vector<4x16x16xf32>
      %383 = vector.broadcast %242 : f32 to vector<16x32xf32>
      %384 = arith.mulf %381, %383 : vector<16x32xf32>
      %385 = arith.truncf %384 : vector<16x32xf32> to vector<16x32xbf16>
      %cst_205 = arith.constant dense<0.000000e+00> : vector<16x96xf32>
      %386 = tpu.matmul %385, %8, %cst_205 {dimension_numbers = #tpu.dot_dimension_numbers<[1], [0], [0], [1], [0, 0, 1, 1], [], []>} : vector<16x32xbf16>, vector<32x96xbf16>, vector<16x96xf32> -> vector<16x96xf32>
      %387 = vector.broadcast %18 : vector<1x96xf32> to vector<16x96xf32>
      %388 = arith.addf %386, %387 : vector<16x96xf32>
      %389 = vector.extract_strided_slice %388 {offsets = [0, 0], sizes = [16, 8], strides = [1, 1]} : vector<16x96xf32> to vector<16x8xf32>
      %390 = vector.extract_strided_slice %388 {offsets = [0, 8], sizes = [16, 8], strides = [1, 1]} : vector<16x96xf32> to vector<16x8xf32>
      %391 = vector.extract_strided_slice %388 {offsets = [0, 16], sizes = [16, 8], strides = [1, 1]} : vector<16x96xf32> to vector<16x8xf32>
      %392 = vector.extract_strided_slice %388 {offsets = [0, 24], sizes = [16, 8], strides = [1, 1]} : vector<16x96xf32> to vector<16x8xf32>
      %393 = vector.shape_cast %389 : vector<16x8xf32> to vector<1x16x8xf32>
      %394 = vector.shape_cast %390 : vector<16x8xf32> to vector<1x16x8xf32>
      %395 = vector.shape_cast %391 : vector<16x8xf32> to vector<1x16x8xf32>
      %396 = vector.shape_cast %392 : vector<16x8xf32> to vector<1x16x8xf32>
      %397 = tpu.concatenate %393, %394, %395, %396 in 0 : vector<1x16x8xf32>, vector<1x16x8xf32>, vector<1x16x8xf32>, vector<1x16x8xf32> -> vector<4x16x8xf32>
      %398 = vector.extract_strided_slice %388 {offsets = [0, 32], sizes = [16, 8], strides = [1, 1]} : vector<16x96xf32> to vector<16x8xf32>
      %399 = vector.extract_strided_slice %388 {offsets = [0, 40], sizes = [16, 8], strides = [1, 1]} : vector<16x96xf32> to vector<16x8xf32>
      %400 = vector.extract_strided_slice %388 {offsets = [0, 48], sizes = [16, 8], strides = [1, 1]} : vector<16x96xf32> to vector<16x8xf32>
      %401 = vector.extract_strided_slice %388 {offsets = [0, 56], sizes = [16, 8], strides = [1, 1]} : vector<16x96xf32> to vector<16x8xf32>
      %402 = vector.shape_cast %398 : vector<16x8xf32> to vector<1x16x8xf32>
      %403 = vector.shape_cast %399 : vector<16x8xf32> to vector<1x16x8xf32>
      %404 = vector.shape_cast %400 : vector<16x8xf32> to vector<1x16x8xf32>
      %405 = vector.shape_cast %401 : vector<16x8xf32> to vector<1x16x8xf32>
      %406 = tpu.concatenate %402, %403, %404, %405 in 0 : vector<1x16x8xf32>, vector<1x16x8xf32>, vector<1x16x8xf32>, vector<1x16x8xf32> -> vector<4x16x8xf32>
      %407 = vector.extract_strided_slice %388 {offsets = [0, 64], sizes = [16, 8], strides = [1, 1]} : vector<16x96xf32> to vector<16x8xf32>
      %408 = vector.extract_strided_slice %388 {offsets = [0, 72], sizes = [16, 8], strides = [1, 1]} : vector<16x96xf32> to vector<16x8xf32>
      %409 = vector.extract_strided_slice %388 {offsets = [0, 80], sizes = [16, 8], strides = [1, 1]} : vector<16x96xf32> to vector<16x8xf32>
      %410 = vector.extract_strided_slice %388 {offsets = [0, 88], sizes = [16, 8], strides = [1, 1]} : vector<16x96xf32> to vector<16x8xf32>
      %411 = vector.shape_cast %407 : vector<16x8xf32> to vector<1x16x8xf32>
      %412 = vector.shape_cast %408 : vector<16x8xf32> to vector<1x16x8xf32>
      %413 = vector.shape_cast %409 : vector<16x8xf32> to vector<1x16x8xf32>
      %414 = vector.shape_cast %410 : vector<16x8xf32> to vector<1x16x8xf32>
      %415 = tpu.concatenate %411, %412, %413, %414 in 0 : vector<1x16x8xf32>, vector<1x16x8xf32>, vector<1x16x8xf32>, vector<1x16x8xf32> -> vector<4x16x8xf32>
      "tpu.trace_start"() <{level = 10 : i32, message = "hqd,hkd->hqk"}> : () -> ()
      %cst_206 = arith.constant dense<0.000000e+00> : vector<4x16x16xf32>
      %416 = tpu.matmul %397, %406, %cst_206 {dimension_numbers = #tpu.dot_dimension_numbers<[2], [2], [1], [1], [0, 0, 0, 1, 1, 1], [0], [0]>} : vector<4x16x8xf32>, vector<4x16x8xf32>, vector<4x16x16xf32> -> vector<4x16x16xf32>
      "tpu.trace_stop"() : () -> ()
      %cst_207 = arith.constant 0.353553385 : f32
      %417 = vector.broadcast %cst_207 : f32 to vector<4x16x16xf32>
      %418 = arith.mulf %416, %417 : vector<4x16x16xf32>
      %419 = vector.shape_cast %2 : vector<16x16xf32> to vector<1x16x16xf32>
      %420 = vector.broadcast %419 : vector<1x16x16xf32> to vector<4x16x16xf32>
      %421 = arith.addf %418, %420 : vector<4x16x16xf32>
      %cst_208 = arith.constant dense<0xFF800000> : vector<4x16xf32>
      %422 = vector.multi_reduction <maximumf>, %421, %cst_208 [2] : vector<4x16x16xf32> to vector<4x16xf32>
      %423 = vector.shape_cast %422 : vector<4x16xf32> to vector<4x16x1xf32>
      %424 = vector.broadcast %423 : vector<4x16x1xf32> to vector<4x16x16xf32>
      %425 = arith.subf %421, %424 : vector<4x16x16xf32>
      %426 = math.exp %425 : vector<4x16x16xf32>
      %cst_209 = arith.constant dense<0.000000e+00> : vector<4x16xf32>
      %427 = vector.multi_reduction <add>, %426, %cst_209 [2] : vector<4x16x16xf32> to vector<4x16xf32>
      %428 = vector.shape_cast %427 : vector<4x16xf32> to vector<4x16x1xf32>
      %429 = tpu.reciprocal %428 {approx = true} : vector<4x16x1xf32> -> vector<4x16x1xf32>
      %430 = vector.broadcast %429 : vector<4x16x1xf32> to vector<4x16x16xf32>
      %431 = arith.mulf %426, %430 : vector<4x16x16xf32>
      "tpu.trace_start"() <{level = 10 : i32, message = "hqk,hkd->hqd"}> : () -> ()
      %cst_210 = arith.constant dense<0.000000e+00> : vector<4x16x8xf32>
      %432 = tpu.matmul %431, %415, %cst_210 {dimension_numbers = #tpu.dot_dimension_numbers<[2], [1], [1], [2], [0, 0, 0, 1, 1, 2], [0], [0]>} : vector<4x16x16xf32>, vector<4x16x8xf32>, vector<4x16x8xf32> -> vector<4x16x8xf32>
      "tpu.trace_stop"() : () -> ()
      %433 = vector.extract_strided_slice %432 {offsets = [0, 0, 0], sizes = [1, 16, 8], strides = [1, 1, 1]} : vector<4x16x8xf32> to vector<1x16x8xf32>
      %434 = vector.shape_cast %433 : vector<1x16x8xf32> to vector<16x8xf32>
      %435 = vector.extract_strided_slice %432 {offsets = [1, 0, 0], sizes = [1, 16, 8], strides = [1, 1, 1]} : vector<4x16x8xf32> to vector<1x16x8xf32>
      %436 = vector.shape_cast %435 : vector<1x16x8xf32> to vector<16x8xf32>
      %437 = vector.extract_strided_slice %432 {offsets = [2, 0, 0], sizes = [1, 16, 8], strides = [1, 1, 1]} : vector<4x16x8xf32> to vector<1x16x8xf32>
      %438 = vector.shape_cast %437 : vector<1x16x8xf32> to vector<16x8xf32>
      %439 = vector.extract_strided_slice %432 {offsets = [3, 0, 0], sizes = [1, 16, 8], strides = [1, 1, 1]} : vector<4x16x8xf32> to vector<1x16x8xf32>
      %440 = vector.shape_cast %439 : vector<1x16x8xf32> to vector<16x8xf32>
      %441 = tpu.concatenate %434, %436, %438, %440 in 1 : vector<16x8xf32>, vector<16x8xf32>, vector<16x8xf32>, vector<16x8xf32> -> vector<16x32xf32>
      %442 = arith.truncf %441 : vector<16x32xf32> to vector<16x32xbf16>
      %cst_211 = arith.constant dense<0.000000e+00> : vector<16x32xf32>
      %443 = tpu.matmul %442, %28, %cst_211 {dimension_numbers = #tpu.dot_dimension_numbers<[1], [0], [0], [1], [0, 0, 1, 1], [], []>} : vector<16x32xbf16>, vector<32x32xbf16>, vector<16x32xf32> -> vector<16x32xf32>
      %444 = vector.broadcast %38 : vector<1x32xf32> to vector<16x32xf32>
      %445 = arith.addf %443, %444 : vector<16x32xf32>
      %446 = arith.addf %445, %384 : vector<16x32xf32>
      %cst_212 = arith.constant dense<0.000000e+00> : vector<16xf32>
      %447 = vector.multi_reduction <add>, %446, %cst_212 [1] : vector<16x32xf32> to vector<16xf32>
      %448 = vector.shape_cast %447 : vector<16xf32> to vector<16x1xf32>
      %cst_213 = arith.constant 3.200000e+01 : f32
      %449 = vector.broadcast %cst_213 : f32 to vector<16x1xf32>
      %450 = arith.divf %448, %449 : vector<16x1xf32>
      %451 = vector.broadcast %450 : vector<16x1xf32> to vector<16x32xf32>
      %452 = arith.subf %446, %451 : vector<16x32xf32>
      %453 = arith.mulf %452, %452 : vector<16x32xf32>
      %cst_214 = arith.constant dense<0.000000e+00> : vector<16xf32>
      %454 = vector.multi_reduction <add>, %453, %cst_214 [1] : vector<16x32xf32> to vector<16xf32>
      %455 = vector.shape_cast %454 : vector<16xf32> to vector<16x1xf32>
      %cst_215 = arith.constant 3.200000e+01 : f32
      %456 = vector.broadcast %cst_215 : f32 to vector<16x1xf32>
      %457 = arith.divf %455, %456 : vector<16x1xf32>
      %458 = vector.broadcast %450 : vector<16x1xf32> to vector<16x32xf32>
      %459 = arith.subf %446, %458 : vector<16x32xf32>
      %cst_216 = arith.constant 9.99999996E-13 : f32
      %460 = vector.broadcast %cst_216 : f32 to vector<16x1xf32>
      %461 = arith.addf %457, %460 : vector<16x1xf32>
      %462 = math.rsqrt %461 : vector<16x1xf32>
      %463 = vector.broadcast %462 : vector<16x1xf32> to vector<16x32xf32>
      %464 = arith.mulf %459, %463 : vector<16x32xf32>
      %465 = vector.broadcast %46 : vector<1x32xf32> to vector<16x32xf32>
      %466 = arith.mulf %464, %465 : vector<16x32xf32>
      %467 = vector.broadcast %54 : vector<1x32xf32> to vector<16x32xf32>
      %468 = arith.addf %466, %467 : vector<16x32xf32>
      %469 = arith.truncf %468 : vector<16x32xf32> to vector<16x32xbf16>
      %cst_217 = arith.constant dense<0.000000e+00> : vector<16x64xf32>
      %470 = tpu.matmul %469, %64, %cst_217 {dimension_numbers = #tpu.dot_dimension_numbers<[1], [0], [0], [1], [0, 0, 1, 1], [], []>} : vector<16x32xbf16>, vector<32x64xbf16>, vector<16x64xf32> -> vector<16x64xf32>
      %471 = vector.broadcast %74 : vector<1x64xf32> to vector<16x64xf32>
      %472 = arith.addf %470, %471 : vector<16x64xf32>
      %cst_218 = arith.constant 5.000000e-01 : f32
      %473 = vector.broadcast %cst_218 : f32 to vector<16x64xf32>
      %474 = arith.mulf %473, %472 : vector<16x64xf32>
      %cst_219 = arith.constant 4.471500e-02 : f32
      %475 = vector.broadcast %cst_219 : f32 to vector<16x64xf32>
      %476 = arith.mulf %475, %472 : vector<16x64xf32>
      %477 = arith.mulf %476, %472 : vector<16x64xf32>
      %478 = arith.mulf %477, %472 : vector<16x64xf32>
      %479 = arith.addf %472, %478 : vector<16x64xf32>
      %cst_220 = arith.constant 0.797884583 : f32
      %480 = vector.broadcast %cst_220 : f32 to vector<16x64xf32>
      %481 = arith.mulf %480, %479 : vector<16x64xf32>
      %482 = math.tanh %481 : vector<16x64xf32>
      %cst_221 = arith.constant 1.000000e+00 : f32
      %483 = vector.broadcast %cst_221 : f32 to vector<16x64xf32>
      %484 = arith.addf %483, %482 : vector<16x64xf32>
      %485 = arith.mulf %474, %484 : vector<16x64xf32>
      %486 = arith.truncf %485 : vector<16x64xf32> to vector<16x64xbf16>
      %cst_222 = arith.constant dense<0.000000e+00> : vector<16x32xf32>
      %487 = tpu.matmul %486, %84, %cst_222 {dimension_numbers = #tpu.dot_dimension_numbers<[1], [0], [0], [1], [0, 0, 1, 1], [], []>} : vector<16x64xbf16>, vector<64x32xbf16>, vector<16x32xf32> -> vector<16x32xf32>
      %488 = vector.broadcast %94 : vector<1x32xf32> to vector<16x32xf32>
      %489 = arith.addf %487, %488 : vector<16x32xf32>
      %490 = arith.addf %489, %468 : vector<16x32xf32>
      %cst_223 = arith.constant dense<0.000000e+00> : vector<16xf32>
      %491 = vector.multi_reduction <add>, %490, %cst_223 [1] : vector<16x32xf32> to vector<16xf32>
      %492 = vector.shape_cast %491 : vector<16xf32> to vector<16x1xf32>
      %cst_224 = arith.constant 3.200000e+01 : f32
      %493 = vector.broadcast %cst_224 : f32 to vector<16x1xf32>
      %494 = arith.divf %492, %493 : vector<16x1xf32>
      %495 = vector.broadcast %494 : vector<16x1xf32> to vector<16x32xf32>
      %496 = arith.subf %490, %495 : vector<16x32xf32>
      %497 = arith.mulf %496, %496 : vector<16x32xf32>
      %cst_225 = arith.constant dense<0.000000e+00> : vector<16xf32>
      %498 = vector.multi_reduction <add>, %497, %cst_225 [1] : vector<16x32xf32> to vector<16xf32>
      %499 = vector.shape_cast %498 : vector<16xf32> to vector<16x1xf32>
      %cst_226 = arith.constant 3.200000e+01 : f32
      %500 = vector.broadcast %cst_226 : f32 to vector<16x1xf32>
      %501 = arith.divf %499, %500 : vector<16x1xf32>
      %502 = vector.broadcast %494 : vector<16x1xf32> to vector<16x32xf32>
      %503 = arith.subf %490, %502 : vector<16x32xf32>
      %cst_227 = arith.constant 9.99999996E-13 : f32
      %504 = vector.broadcast %cst_227 : f32 to vector<16x1xf32>
      %505 = arith.addf %501, %504 : vector<16x1xf32>
      %506 = math.rsqrt %505 : vector<16x1xf32>
      %507 = vector.broadcast %506 : vector<16x1xf32> to vector<16x32xf32>
      %508 = arith.mulf %503, %507 : vector<16x32xf32>
      %509 = vector.broadcast %102 : vector<1x32xf32> to vector<16x32xf32>
      %510 = arith.mulf %508, %509 : vector<16x32xf32>
      %511 = vector.broadcast %110 : vector<1x32xf32> to vector<16x32xf32>
      %512 = arith.addf %510, %511 : vector<16x32xf32>
      %cst_228 = arith.constant 1.000000e+00 : f32
      %513 = vector.broadcast %cst_228 : f32 to vector<16x32xf32>
      %514 = arith.mulf %513, %arg25 : vector<16x32xf32>
      %515 = arith.addf %514, %512 : vector<16x32xf32>
      %cst_229 = arith.constant 1.000000e+00 : f32
      %516 = vector.broadcast %cst_229 : f32 to vector<16x32xf32>
      %517 = arith.cmpf oge, %515, %516 : vector<16x32xf32>
      %518 = arith.extui %517 : vector<16x32xi1> to vector<16x32xi32>
      %519 = arith.sitofp %518 : vector<16x32xi32> to vector<16x32xf32>
      %cst_230 = arith.constant 1.000000e+00 : f32
      %520 = vector.broadcast %cst_230 : f32 to vector<16x32xf32>
      %521 = arith.mulf %520, %519 : vector<16x32xf32>
      %522 = arith.subf %515, %521 : vector<16x32xf32>
      %523 = arith.addf %arg30, %519 : vector<16x32xf32>
      %524 = arith.addf %arg35, %431 : vector<4x16x16xf32>
      %525 = vector.broadcast %242 : f32 to vector<16x32xf32>
      %526 = arith.mulf %523, %525 : vector<16x32xf32>
      %527 = arith.truncf %526 : vector<16x32xf32> to vector<16x32xbf16>
      %cst_231 = arith.constant dense<0.000000e+00> : vector<16x96xf32>
      %528 = tpu.matmul %527, %11, %cst_231 {dimension_numbers = #tpu.dot_dimension_numbers<[1], [0], [0], [1], [0, 0, 1, 1], [], []>} : vector<16x32xbf16>, vector<32x96xbf16>, vector<16x96xf32> -> vector<16x96xf32>
      %529 = vector.broadcast %20 : vector<1x96xf32> to vector<16x96xf32>
      %530 = arith.addf %528, %529 : vector<16x96xf32>
      %531 = vector.extract_strided_slice %530 {offsets = [0, 0], sizes = [16, 8], strides = [1, 1]} : vector<16x96xf32> to vector<16x8xf32>
      %532 = vector.extract_strided_slice %530 {offsets = [0, 8], sizes = [16, 8], strides = [1, 1]} : vector<16x96xf32> to vector<16x8xf32>
      %533 = vector.extract_strided_slice %530 {offsets = [0, 16], sizes = [16, 8], strides = [1, 1]} : vector<16x96xf32> to vector<16x8xf32>
      %534 = vector.extract_strided_slice %530 {offsets = [0, 24], sizes = [16, 8], strides = [1, 1]} : vector<16x96xf32> to vector<16x8xf32>
      %535 = vector.shape_cast %531 : vector<16x8xf32> to vector<1x16x8xf32>
      %536 = vector.shape_cast %532 : vector<16x8xf32> to vector<1x16x8xf32>
      %537 = vector.shape_cast %533 : vector<16x8xf32> to vector<1x16x8xf32>
      %538 = vector.shape_cast %534 : vector<16x8xf32> to vector<1x16x8xf32>
      %539 = tpu.concatenate %535, %536, %537, %538 in 0 : vector<1x16x8xf32>, vector<1x16x8xf32>, vector<1x16x8xf32>, vector<1x16x8xf32> -> vector<4x16x8xf32>
      %540 = vector.extract_strided_slice %530 {offsets = [0, 32], sizes = [16, 8], strides = [1, 1]} : vector<16x96xf32> to vector<16x8xf32>
      %541 = vector.extract_strided_slice %530 {offsets = [0, 40], sizes = [16, 8], strides = [1, 1]} : vector<16x96xf32> to vector<16x8xf32>
      %542 = vector.extract_strided_slice %530 {offsets = [0, 48], sizes = [16, 8], strides = [1, 1]} : vector<16x96xf32> to vector<16x8xf32>
      %543 = vector.extract_strided_slice %530 {offsets = [0, 56], sizes = [16, 8], strides = [1, 1]} : vector<16x96xf32> to vector<16x8xf32>
      %544 = vector.shape_cast %540 : vector<16x8xf32> to vector<1x16x8xf32>
      %545 = vector.shape_cast %541 : vector<16x8xf32> to vector<1x16x8xf32>
      %546 = vector.shape_cast %542 : vector<16x8xf32> to vector<1x16x8xf32>
      %547 = vector.shape_cast %543 : vector<16x8xf32> to vector<1x16x8xf32>
      %548 = tpu.concatenate %544, %545, %546, %547 in 0 : vector<1x16x8xf32>, vector<1x16x8xf32>, vector<1x16x8xf32>, vector<1x16x8xf32> -> vector<4x16x8xf32>
      %549 = vector.extract_strided_slice %530 {offsets = [0, 64], sizes = [16, 8], strides = [1, 1]} : vector<16x96xf32> to vector<16x8xf32>
      %550 = vector.extract_strided_slice %530 {offsets = [0, 72], sizes = [16, 8], strides = [1, 1]} : vector<16x96xf32> to vector<16x8xf32>
      %551 = vector.extract_strided_slice %530 {offsets = [0, 80], sizes = [16, 8], strides = [1, 1]} : vector<16x96xf32> to vector<16x8xf32>
      %552 = vector.extract_strided_slice %530 {offsets = [0, 88], sizes = [16, 8], strides = [1, 1]} : vector<16x96xf32> to vector<16x8xf32>
      %553 = vector.shape_cast %549 : vector<16x8xf32> to vector<1x16x8xf32>
      %554 = vector.shape_cast %550 : vector<16x8xf32> to vector<1x16x8xf32>
      %555 = vector.shape_cast %551 : vector<16x8xf32> to vector<1x16x8xf32>
      %556 = vector.shape_cast %552 : vector<16x8xf32> to vector<1x16x8xf32>
      %557 = tpu.concatenate %553, %554, %555, %556 in 0 : vector<1x16x8xf32>, vector<1x16x8xf32>, vector<1x16x8xf32>, vector<1x16x8xf32> -> vector<4x16x8xf32>
      "tpu.trace_start"() <{level = 10 : i32, message = "hqd,hkd->hqk"}> : () -> ()
      %cst_232 = arith.constant dense<0.000000e+00> : vector<4x16x16xf32>
      %558 = tpu.matmul %539, %548, %cst_232 {dimension_numbers = #tpu.dot_dimension_numbers<[2], [2], [1], [1], [0, 0, 0, 1, 1, 1], [0], [0]>} : vector<4x16x8xf32>, vector<4x16x8xf32>, vector<4x16x16xf32> -> vector<4x16x16xf32>
      "tpu.trace_stop"() : () -> ()
      %cst_233 = arith.constant 0.353553385 : f32
      %559 = vector.broadcast %cst_233 : f32 to vector<4x16x16xf32>
      %560 = arith.mulf %558, %559 : vector<4x16x16xf32>
      %561 = vector.shape_cast %2 : vector<16x16xf32> to vector<1x16x16xf32>
      %562 = vector.broadcast %561 : vector<1x16x16xf32> to vector<4x16x16xf32>
      %563 = arith.addf %560, %562 : vector<4x16x16xf32>
      %cst_234 = arith.constant dense<0xFF800000> : vector<4x16xf32>
      %564 = vector.multi_reduction <maximumf>, %563, %cst_234 [2] : vector<4x16x16xf32> to vector<4x16xf32>
      %565 = vector.shape_cast %564 : vector<4x16xf32> to vector<4x16x1xf32>
      %566 = vector.broadcast %565 : vector<4x16x1xf32> to vector<4x16x16xf32>
      %567 = arith.subf %563, %566 : vector<4x16x16xf32>
      %568 = math.exp %567 : vector<4x16x16xf32>
      %cst_235 = arith.constant dense<0.000000e+00> : vector<4x16xf32>
      %569 = vector.multi_reduction <add>, %568, %cst_235 [2] : vector<4x16x16xf32> to vector<4x16xf32>
      %570 = vector.shape_cast %569 : vector<4x16xf32> to vector<4x16x1xf32>
      %571 = tpu.reciprocal %570 {approx = true} : vector<4x16x1xf32> -> vector<4x16x1xf32>
      %572 = vector.broadcast %571 : vector<4x16x1xf32> to vector<4x16x16xf32>
      %573 = arith.mulf %568, %572 : vector<4x16x16xf32>
      "tpu.trace_start"() <{level = 10 : i32, message = "hqk,hkd->hqd"}> : () -> ()
      %cst_236 = arith.constant dense<0.000000e+00> : vector<4x16x8xf32>
      %574 = tpu.matmul %573, %557, %cst_236 {dimension_numbers = #tpu.dot_dimension_numbers<[2], [1], [1], [2], [0, 0, 0, 1, 1, 2], [0], [0]>} : vector<4x16x16xf32>, vector<4x16x8xf32>, vector<4x16x8xf32> -> vector<4x16x8xf32>
      "tpu.trace_stop"() : () -> ()
      %575 = vector.extract_strided_slice %574 {offsets = [0, 0, 0], sizes = [1, 16, 8], strides = [1, 1, 1]} : vector<4x16x8xf32> to vector<1x16x8xf32>
      %576 = vector.shape_cast %575 : vector<1x16x8xf32> to vector<16x8xf32>
      %577 = vector.extract_strided_slice %574 {offsets = [1, 0, 0], sizes = [1, 16, 8], strides = [1, 1, 1]} : vector<4x16x8xf32> to vector<1x16x8xf32>
      %578 = vector.shape_cast %577 : vector<1x16x8xf32> to vector<16x8xf32>
      %579 = vector.extract_strided_slice %574 {offsets = [2, 0, 0], sizes = [1, 16, 8], strides = [1, 1, 1]} : vector<4x16x8xf32> to vector<1x16x8xf32>
      %580 = vector.shape_cast %579 : vector<1x16x8xf32> to vector<16x8xf32>
      %581 = vector.extract_strided_slice %574 {offsets = [3, 0, 0], sizes = [1, 16, 8], strides = [1, 1, 1]} : vector<4x16x8xf32> to vector<1x16x8xf32>
      %582 = vector.shape_cast %581 : vector<1x16x8xf32> to vector<16x8xf32>
      %583 = tpu.concatenate %576, %578, %580, %582 in 1 : vector<16x8xf32>, vector<16x8xf32>, vector<16x8xf32>, vector<16x8xf32> -> vector<16x32xf32>
      %584 = arith.truncf %583 : vector<16x32xf32> to vector<16x32xbf16>
      %cst_237 = arith.constant dense<0.000000e+00> : vector<16x32xf32>
      %585 = tpu.matmul %584, %31, %cst_237 {dimension_numbers = #tpu.dot_dimension_numbers<[1], [0], [0], [1], [0, 0, 1, 1], [], []>} : vector<16x32xbf16>, vector<32x32xbf16>, vector<16x32xf32> -> vector<16x32xf32>
      %586 = vector.broadcast %40 : vector<1x32xf32> to vector<16x32xf32>
      %587 = arith.addf %585, %586 : vector<16x32xf32>
      %588 = arith.addf %587, %526 : vector<16x32xf32>
      %cst_238 = arith.constant dense<0.000000e+00> : vector<16xf32>
      %589 = vector.multi_reduction <add>, %588, %cst_238 [1] : vector<16x32xf32> to vector<16xf32>
      %590 = vector.shape_cast %589 : vector<16xf32> to vector<16x1xf32>
      %cst_239 = arith.constant 3.200000e+01 : f32
      %591 = vector.broadcast %cst_239 : f32 to vector<16x1xf32>
      %592 = arith.divf %590, %591 : vector<16x1xf32>
      %593 = vector.broadcast %592 : vector<16x1xf32> to vector<16x32xf32>
      %594 = arith.subf %588, %593 : vector<16x32xf32>
      %595 = arith.mulf %594, %594 : vector<16x32xf32>
      %cst_240 = arith.constant dense<0.000000e+00> : vector<16xf32>
      %596 = vector.multi_reduction <add>, %595, %cst_240 [1] : vector<16x32xf32> to vector<16xf32>
      %597 = vector.shape_cast %596 : vector<16xf32> to vector<16x1xf32>
      %cst_241 = arith.constant 3.200000e+01 : f32
      %598 = vector.broadcast %cst_241 : f32 to vector<16x1xf32>
      %599 = arith.divf %597, %598 : vector<16x1xf32>
      %600 = vector.broadcast %592 : vector<16x1xf32> to vector<16x32xf32>
      %601 = arith.subf %588, %600 : vector<16x32xf32>
      %cst_242 = arith.constant 9.99999996E-13 : f32
      %602 = vector.broadcast %cst_242 : f32 to vector<16x1xf32>
      %603 = arith.addf %599, %602 : vector<16x1xf32>
      %604 = math.rsqrt %603 : vector<16x1xf32>
      %605 = vector.broadcast %604 : vector<16x1xf32> to vector<16x32xf32>
      %606 = arith.mulf %601, %605 : vector<16x32xf32>
      %607 = vector.broadcast %48 : vector<1x32xf32> to vector<16x32xf32>
      %608 = arith.mulf %606, %607 : vector<16x32xf32>
      %609 = vector.broadcast %56 : vector<1x32xf32> to vector<16x32xf32>
      %610 = arith.addf %608, %609 : vector<16x32xf32>
      %611 = arith.truncf %610 : vector<16x32xf32> to vector<16x32xbf16>
      %cst_243 = arith.constant dense<0.000000e+00> : vector<16x64xf32>
      %612 = tpu.matmul %611, %67, %cst_243 {dimension_numbers = #tpu.dot_dimension_numbers<[1], [0], [0], [1], [0, 0, 1, 1], [], []>} : vector<16x32xbf16>, vector<32x64xbf16>, vector<16x64xf32> -> vector<16x64xf32>
      %613 = vector.broadcast %76 : vector<1x64xf32> to vector<16x64xf32>
      %614 = arith.addf %612, %613 : vector<16x64xf32>
      %cst_244 = arith.constant 5.000000e-01 : f32
      %615 = vector.broadcast %cst_244 : f32 to vector<16x64xf32>
      %616 = arith.mulf %615, %614 : vector<16x64xf32>
      %cst_245 = arith.constant 4.471500e-02 : f32
      %617 = vector.broadcast %cst_245 : f32 to vector<16x64xf32>
      %618 = arith.mulf %617, %614 : vector<16x64xf32>
      %619 = arith.mulf %618, %614 : vector<16x64xf32>
      %620 = arith.mulf %619, %614 : vector<16x64xf32>
      %621 = arith.addf %614, %620 : vector<16x64xf32>
      %cst_246 = arith.constant 0.797884583 : f32
      %622 = vector.broadcast %cst_246 : f32 to vector<16x64xf32>
      %623 = arith.mulf %622, %621 : vector<16x64xf32>
      %624 = math.tanh %623 : vector<16x64xf32>
      %cst_247 = arith.constant 1.000000e+00 : f32
      %625 = vector.broadcast %cst_247 : f32 to vector<16x64xf32>
      %626 = arith.addf %625, %624 : vector<16x64xf32>
      %627 = arith.mulf %616, %626 : vector<16x64xf32>
      %628 = arith.truncf %627 : vector<16x64xf32> to vector<16x64xbf16>
      %cst_248 = arith.constant dense<0.000000e+00> : vector<16x32xf32>
      %629 = tpu.matmul %628, %87, %cst_248 {dimension_numbers = #tpu.dot_dimension_numbers<[1], [0], [0], [1], [0, 0, 1, 1], [], []>} : vector<16x64xbf16>, vector<64x32xbf16>, vector<16x32xf32> -> vector<16x32xf32>
      %630 = vector.broadcast %96 : vector<1x32xf32> to vector<16x32xf32>
      %631 = arith.addf %629, %630 : vector<16x32xf32>
      %632 = arith.addf %631, %610 : vector<16x32xf32>
      %cst_249 = arith.constant dense<0.000000e+00> : vector<16xf32>
      %633 = vector.multi_reduction <add>, %632, %cst_249 [1] : vector<16x32xf32> to vector<16xf32>
      %634 = vector.shape_cast %633 : vector<16xf32> to vector<16x1xf32>
      %cst_250 = arith.constant 3.200000e+01 : f32
      %635 = vector.broadcast %cst_250 : f32 to vector<16x1xf32>
      %636 = arith.divf %634, %635 : vector<16x1xf32>
      %637 = vector.broadcast %636 : vector<16x1xf32> to vector<16x32xf32>
      %638 = arith.subf %632, %637 : vector<16x32xf32>
      %639 = arith.mulf %638, %638 : vector<16x32xf32>
      %cst_251 = arith.constant dense<0.000000e+00> : vector<16xf32>
      %640 = vector.multi_reduction <add>, %639, %cst_251 [1] : vector<16x32xf32> to vector<16xf32>
      %641 = vector.shape_cast %640 : vector<16xf32> to vector<16x1xf32>
      %cst_252 = arith.constant 3.200000e+01 : f32
      %642 = vector.broadcast %cst_252 : f32 to vector<16x1xf32>
      %643 = arith.divf %641, %642 : vector<16x1xf32>
      %644 = vector.broadcast %636 : vector<16x1xf32> to vector<16x32xf32>
      %645 = arith.subf %632, %644 : vector<16x32xf32>
      %cst_253 = arith.constant 9.99999996E-13 : f32
      %646 = vector.broadcast %cst_253 : f32 to vector<16x1xf32>
      %647 = arith.addf %643, %646 : vector<16x1xf32>
      %648 = math.rsqrt %647 : vector<16x1xf32>
      %649 = vector.broadcast %648 : vector<16x1xf32> to vector<16x32xf32>
      %650 = arith.mulf %645, %649 : vector<16x32xf32>
      %651 = vector.broadcast %104 : vector<1x32xf32> to vector<16x32xf32>
      %652 = arith.mulf %650, %651 : vector<16x32xf32>
      %653 = vector.broadcast %112 : vector<1x32xf32> to vector<16x32xf32>
      %654 = arith.addf %652, %653 : vector<16x32xf32>
      %cst_254 = arith.constant 1.000000e+00 : f32
      %655 = vector.broadcast %cst_254 : f32 to vector<16x32xf32>
      %656 = arith.mulf %655, %arg26 : vector<16x32xf32>
      %657 = arith.addf %656, %654 : vector<16x32xf32>
      %cst_255 = arith.constant 1.000000e+00 : f32
      %658 = vector.broadcast %cst_255 : f32 to vector<16x32xf32>
      %659 = arith.cmpf oge, %657, %658 : vector<16x32xf32>
      %660 = arith.extui %659 : vector<16x32xi1> to vector<16x32xi32>
      %661 = arith.sitofp %660 : vector<16x32xi32> to vector<16x32xf32>
      %cst_256 = arith.constant 1.000000e+00 : f32
      %662 = vector.broadcast %cst_256 : f32 to vector<16x32xf32>
      %663 = arith.mulf %662, %661 : vector<16x32xf32>
      %664 = arith.subf %657, %663 : vector<16x32xf32>
      %665 = arith.addf %arg31, %661 : vector<16x32xf32>
      %666 = arith.addf %arg36, %573 : vector<4x16x16xf32>
      %667 = vector.broadcast %242 : f32 to vector<16x32xf32>
      %668 = arith.mulf %665, %667 : vector<16x32xf32>
      %669 = arith.truncf %668 : vector<16x32xf32> to vector<16x32xbf16>
      %cst_257 = arith.constant dense<0.000000e+00> : vector<16x96xf32>
      %670 = tpu.matmul %669, %14, %cst_257 {dimension_numbers = #tpu.dot_dimension_numbers<[1], [0], [0], [1], [0, 0, 1, 1], [], []>} : vector<16x32xbf16>, vector<32x96xbf16>, vector<16x96xf32> -> vector<16x96xf32>
      %671 = vector.broadcast %22 : vector<1x96xf32> to vector<16x96xf32>
      %672 = arith.addf %670, %671 : vector<16x96xf32>
      %673 = vector.extract_strided_slice %672 {offsets = [0, 0], sizes = [16, 8], strides = [1, 1]} : vector<16x96xf32> to vector<16x8xf32>
      %674 = vector.extract_strided_slice %672 {offsets = [0, 8], sizes = [16, 8], strides = [1, 1]} : vector<16x96xf32> to vector<16x8xf32>
      %675 = vector.extract_strided_slice %672 {offsets = [0, 16], sizes = [16, 8], strides = [1, 1]} : vector<16x96xf32> to vector<16x8xf32>
      %676 = vector.extract_strided_slice %672 {offsets = [0, 24], sizes = [16, 8], strides = [1, 1]} : vector<16x96xf32> to vector<16x8xf32>
      %677 = vector.shape_cast %673 : vector<16x8xf32> to vector<1x16x8xf32>
      %678 = vector.shape_cast %674 : vector<16x8xf32> to vector<1x16x8xf32>
      %679 = vector.shape_cast %675 : vector<16x8xf32> to vector<1x16x8xf32>
      %680 = vector.shape_cast %676 : vector<16x8xf32> to vector<1x16x8xf32>
      %681 = tpu.concatenate %677, %678, %679, %680 in 0 : vector<1x16x8xf32>, vector<1x16x8xf32>, vector<1x16x8xf32>, vector<1x16x8xf32> -> vector<4x16x8xf32>
      %682 = vector.extract_strided_slice %672 {offsets = [0, 32], sizes = [16, 8], strides = [1, 1]} : vector<16x96xf32> to vector<16x8xf32>
      %683 = vector.extract_strided_slice %672 {offsets = [0, 40], sizes = [16, 8], strides = [1, 1]} : vector<16x96xf32> to vector<16x8xf32>
      %684 = vector.extract_strided_slice %672 {offsets = [0, 48], sizes = [16, 8], strides = [1, 1]} : vector<16x96xf32> to vector<16x8xf32>
      %685 = vector.extract_strided_slice %672 {offsets = [0, 56], sizes = [16, 8], strides = [1, 1]} : vector<16x96xf32> to vector<16x8xf32>
      %686 = vector.shape_cast %682 : vector<16x8xf32> to vector<1x16x8xf32>
      %687 = vector.shape_cast %683 : vector<16x8xf32> to vector<1x16x8xf32>
      %688 = vector.shape_cast %684 : vector<16x8xf32> to vector<1x16x8xf32>
      %689 = vector.shape_cast %685 : vector<16x8xf32> to vector<1x16x8xf32>
      %690 = tpu.concatenate %686, %687, %688, %689 in 0 : vector<1x16x8xf32>, vector<1x16x8xf32>, vector<1x16x8xf32>, vector<1x16x8xf32> -> vector<4x16x8xf32>
      %691 = vector.extract_strided_slice %672 {offsets = [0, 64], sizes = [16, 8], strides = [1, 1]} : vector<16x96xf32> to vector<16x8xf32>
      %692 = vector.extract_strided_slice %672 {offsets = [0, 72], sizes = [16, 8], strides = [1, 1]} : vector<16x96xf32> to vector<16x8xf32>
      %693 = vector.extract_strided_slice %672 {offsets = [0, 80], sizes = [16, 8], strides = [1, 1]} : vector<16x96xf32> to vector<16x8xf32>
      %694 = vector.extract_strided_slice %672 {offsets = [0, 88], sizes = [16, 8], strides = [1, 1]} : vector<16x96xf32> to vector<16x8xf32>
      %695 = vector.shape_cast %691 : vector<16x8xf32> to vector<1x16x8xf32>
      %696 = vector.shape_cast %692 : vector<16x8xf32> to vector<1x16x8xf32>
      %697 = vector.shape_cast %693 : vector<16x8xf32> to vector<1x16x8xf32>
      %698 = vector.shape_cast %694 : vector<16x8xf32> to vector<1x16x8xf32>
      %699 = tpu.concatenate %695, %696, %697, %698 in 0 : vector<1x16x8xf32>, vector<1x16x8xf32>, vector<1x16x8xf32>, vector<1x16x8xf32> -> vector<4x16x8xf32>
      "tpu.trace_start"() <{level = 10 : i32, message = "hqd,hkd->hqk"}> : () -> ()
      %cst_258 = arith.constant dense<0.000000e+00> : vector<4x16x16xf32>
      %700 = tpu.matmul %681, %690, %cst_258 {dimension_numbers = #tpu.dot_dimension_numbers<[2], [2], [1], [1], [0, 0, 0, 1, 1, 1], [0], [0]>} : vector<4x16x8xf32>, vector<4x16x8xf32>, vector<4x16x16xf32> -> vector<4x16x16xf32>
      "tpu.trace_stop"() : () -> ()
      %cst_259 = arith.constant 0.353553385 : f32
      %701 = vector.broadcast %cst_259 : f32 to vector<4x16x16xf32>
      %702 = arith.mulf %700, %701 : vector<4x16x16xf32>
      %703 = vector.shape_cast %2 : vector<16x16xf32> to vector<1x16x16xf32>
      %704 = vector.broadcast %703 : vector<1x16x16xf32> to vector<4x16x16xf32>
      %705 = arith.addf %702, %704 : vector<4x16x16xf32>
      %cst_260 = arith.constant dense<0xFF800000> : vector<4x16xf32>
      %706 = vector.multi_reduction <maximumf>, %705, %cst_260 [2] : vector<4x16x16xf32> to vector<4x16xf32>
      %707 = vector.shape_cast %706 : vector<4x16xf32> to vector<4x16x1xf32>
      %708 = vector.broadcast %707 : vector<4x16x1xf32> to vector<4x16x16xf32>
      %709 = arith.subf %705, %708 : vector<4x16x16xf32>
      %710 = math.exp %709 : vector<4x16x16xf32>
      %cst_261 = arith.constant dense<0.000000e+00> : vector<4x16xf32>
      %711 = vector.multi_reduction <add>, %710, %cst_261 [2] : vector<4x16x16xf32> to vector<4x16xf32>
      %712 = vector.shape_cast %711 : vector<4x16xf32> to vector<4x16x1xf32>
      %713 = tpu.reciprocal %712 {approx = true} : vector<4x16x1xf32> -> vector<4x16x1xf32>
      %714 = vector.broadcast %713 : vector<4x16x1xf32> to vector<4x16x16xf32>
      %715 = arith.mulf %710, %714 : vector<4x16x16xf32>
      "tpu.trace_start"() <{level = 10 : i32, message = "hqk,hkd->hqd"}> : () -> ()
      %cst_262 = arith.constant dense<0.000000e+00> : vector<4x16x8xf32>
      %716 = tpu.matmul %715, %699, %cst_262 {dimension_numbers = #tpu.dot_dimension_numbers<[2], [1], [1], [2], [0, 0, 0, 1, 1, 2], [0], [0]>} : vector<4x16x16xf32>, vector<4x16x8xf32>, vector<4x16x8xf32> -> vector<4x16x8xf32>
      "tpu.trace_stop"() : () -> ()
      %717 = vector.extract_strided_slice %716 {offsets = [0, 0, 0], sizes = [1, 16, 8], strides = [1, 1, 1]} : vector<4x16x8xf32> to vector<1x16x8xf32>
      %718 = vector.shape_cast %717 : vector<1x16x8xf32> to vector<16x8xf32>
      %719 = vector.extract_strided_slice %716 {offsets = [1, 0, 0], sizes = [1, 16, 8], strides = [1, 1, 1]} : vector<4x16x8xf32> to vector<1x16x8xf32>
      %720 = vector.shape_cast %719 : vector<1x16x8xf32> to vector<16x8xf32>
      %721 = vector.extract_strided_slice %716 {offsets = [2, 0, 0], sizes = [1, 16, 8], strides = [1, 1, 1]} : vector<4x16x8xf32> to vector<1x16x8xf32>
      %722 = vector.shape_cast %721 : vector<1x16x8xf32> to vector<16x8xf32>
      %723 = vector.extract_strided_slice %716 {offsets = [3, 0, 0], sizes = [1, 16, 8], strides = [1, 1, 1]} : vector<4x16x8xf32> to vector<1x16x8xf32>
      %724 = vector.shape_cast %723 : vector<1x16x8xf32> to vector<16x8xf32>
      %725 = tpu.concatenate %718, %720, %722, %724 in 1 : vector<16x8xf32>, vector<16x8xf32>, vector<16x8xf32>, vector<16x8xf32> -> vector<16x32xf32>
      %726 = arith.truncf %725 : vector<16x32xf32> to vector<16x32xbf16>
      %cst_263 = arith.constant dense<0.000000e+00> : vector<16x32xf32>
      %727 = tpu.matmul %726, %34, %cst_263 {dimension_numbers = #tpu.dot_dimension_numbers<[1], [0], [0], [1], [0, 0, 1, 1], [], []>} : vector<16x32xbf16>, vector<32x32xbf16>, vector<16x32xf32> -> vector<16x32xf32>
      %728 = vector.broadcast %42 : vector<1x32xf32> to vector<16x32xf32>
      %729 = arith.addf %727, %728 : vector<16x32xf32>
      %730 = arith.addf %729, %668 : vector<16x32xf32>
      %cst_264 = arith.constant dense<0.000000e+00> : vector<16xf32>
      %731 = vector.multi_reduction <add>, %730, %cst_264 [1] : vector<16x32xf32> to vector<16xf32>
      %732 = vector.shape_cast %731 : vector<16xf32> to vector<16x1xf32>
      %cst_265 = arith.constant 3.200000e+01 : f32
      %733 = vector.broadcast %cst_265 : f32 to vector<16x1xf32>
      %734 = arith.divf %732, %733 : vector<16x1xf32>
      %735 = vector.broadcast %734 : vector<16x1xf32> to vector<16x32xf32>
      %736 = arith.subf %730, %735 : vector<16x32xf32>
      %737 = arith.mulf %736, %736 : vector<16x32xf32>
      %cst_266 = arith.constant dense<0.000000e+00> : vector<16xf32>
      %738 = vector.multi_reduction <add>, %737, %cst_266 [1] : vector<16x32xf32> to vector<16xf32>
      %739 = vector.shape_cast %738 : vector<16xf32> to vector<16x1xf32>
      %cst_267 = arith.constant 3.200000e+01 : f32
      %740 = vector.broadcast %cst_267 : f32 to vector<16x1xf32>
      %741 = arith.divf %739, %740 : vector<16x1xf32>
      %742 = vector.broadcast %734 : vector<16x1xf32> to vector<16x32xf32>
      %743 = arith.subf %730, %742 : vector<16x32xf32>
      %cst_268 = arith.constant 9.99999996E-13 : f32
      %744 = vector.broadcast %cst_268 : f32 to vector<16x1xf32>
      %745 = arith.addf %741, %744 : vector<16x1xf32>
      %746 = math.rsqrt %745 : vector<16x1xf32>
      %747 = vector.broadcast %746 : vector<16x1xf32> to vector<16x32xf32>
      %748 = arith.mulf %743, %747 : vector<16x32xf32>
      %749 = vector.broadcast %50 : vector<1x32xf32> to vector<16x32xf32>
      %750 = arith.mulf %748, %749 : vector<16x32xf32>
      %751 = vector.broadcast %58 : vector<1x32xf32> to vector<16x32xf32>
      %752 = arith.addf %750, %751 : vector<16x32xf32>
      %753 = arith.truncf %752 : vector<16x32xf32> to vector<16x32xbf16>
      %cst_269 = arith.constant dense<0.000000e+00> : vector<16x64xf32>
      %754 = tpu.matmul %753, %70, %cst_269 {dimension_numbers = #tpu.dot_dimension_numbers<[1], [0], [0], [1], [0, 0, 1, 1], [], []>} : vector<16x32xbf16>, vector<32x64xbf16>, vector<16x64xf32> -> vector<16x64xf32>
      %755 = vector.broadcast %78 : vector<1x64xf32> to vector<16x64xf32>
      %756 = arith.addf %754, %755 : vector<16x64xf32>
      %cst_270 = arith.constant 5.000000e-01 : f32
      %757 = vector.broadcast %cst_270 : f32 to vector<16x64xf32>
      %758 = arith.mulf %757, %756 : vector<16x64xf32>
      %cst_271 = arith.constant 4.471500e-02 : f32
      %759 = vector.broadcast %cst_271 : f32 to vector<16x64xf32>
      %760 = arith.mulf %759, %756 : vector<16x64xf32>
      %761 = arith.mulf %760, %756 : vector<16x64xf32>
      %762 = arith.mulf %761, %756 : vector<16x64xf32>
      %763 = arith.addf %756, %762 : vector<16x64xf32>
      %cst_272 = arith.constant 0.797884583 : f32
      %764 = vector.broadcast %cst_272 : f32 to vector<16x64xf32>
      %765 = arith.mulf %764, %763 : vector<16x64xf32>
      %766 = math.tanh %765 : vector<16x64xf32>
      %cst_273 = arith.constant 1.000000e+00 : f32
      %767 = vector.broadcast %cst_273 : f32 to vector<16x64xf32>
      %768 = arith.addf %767, %766 : vector<16x64xf32>
      %769 = arith.mulf %758, %768 : vector<16x64xf32>
      %770 = arith.truncf %769 : vector<16x64xf32> to vector<16x64xbf16>
      %cst_274 = arith.constant dense<0.000000e+00> : vector<16x32xf32>
      %771 = tpu.matmul %770, %90, %cst_274 {dimension_numbers = #tpu.dot_dimension_numbers<[1], [0], [0], [1], [0, 0, 1, 1], [], []>} : vector<16x64xbf16>, vector<64x32xbf16>, vector<16x32xf32> -> vector<16x32xf32>
      %772 = vector.broadcast %98 : vector<1x32xf32> to vector<16x32xf32>
      %773 = arith.addf %771, %772 : vector<16x32xf32>
      %774 = arith.addf %773, %752 : vector<16x32xf32>
      %cst_275 = arith.constant dense<0.000000e+00> : vector<16xf32>
      %775 = vector.multi_reduction <add>, %774, %cst_275 [1] : vector<16x32xf32> to vector<16xf32>
      %776 = vector.shape_cast %775 : vector<16xf32> to vector<16x1xf32>
      %cst_276 = arith.constant 3.200000e+01 : f32
      %777 = vector.broadcast %cst_276 : f32 to vector<16x1xf32>
      %778 = arith.divf %776, %777 : vector<16x1xf32>
      %779 = vector.broadcast %778 : vector<16x1xf32> to vector<16x32xf32>
      %780 = arith.subf %774, %779 : vector<16x32xf32>
      %781 = arith.mulf %780, %780 : vector<16x32xf32>
      %cst_277 = arith.constant dense<0.000000e+00> : vector<16xf32>
      %782 = vector.multi_reduction <add>, %781, %cst_277 [1] : vector<16x32xf32> to vector<16xf32>
      %783 = vector.shape_cast %782 : vector<16xf32> to vector<16x1xf32>
      %cst_278 = arith.constant 3.200000e+01 : f32
      %784 = vector.broadcast %cst_278 : f32 to vector<16x1xf32>
      %785 = arith.divf %783, %784 : vector<16x1xf32>
      %786 = vector.broadcast %778 : vector<16x1xf32> to vector<16x32xf32>
      %787 = arith.subf %774, %786 : vector<16x32xf32>
      %cst_279 = arith.constant 9.99999996E-13 : f32
      %788 = vector.broadcast %cst_279 : f32 to vector<16x1xf32>
      %789 = arith.addf %785, %788 : vector<16x1xf32>
      %790 = math.rsqrt %789 : vector<16x1xf32>
      %791 = vector.broadcast %790 : vector<16x1xf32> to vector<16x32xf32>
      %792 = arith.mulf %787, %791 : vector<16x32xf32>
      %793 = vector.broadcast %106 : vector<1x32xf32> to vector<16x32xf32>
      %794 = arith.mulf %792, %793 : vector<16x32xf32>
      %795 = vector.broadcast %114 : vector<1x32xf32> to vector<16x32xf32>
      %796 = arith.addf %794, %795 : vector<16x32xf32>
      %cst_280 = arith.constant 1.000000e+00 : f32
      %797 = vector.broadcast %cst_280 : f32 to vector<16x32xf32>
      %798 = arith.mulf %797, %arg27 : vector<16x32xf32>
      %799 = arith.addf %798, %796 : vector<16x32xf32>
      %cst_281 = arith.constant 1.000000e+00 : f32
      %800 = vector.broadcast %cst_281 : f32 to vector<16x32xf32>
      %801 = arith.cmpf oge, %799, %800 : vector<16x32xf32>
      %802 = arith.extui %801 : vector<16x32xi1> to vector<16x32xi32>
      %803 = arith.sitofp %802 : vector<16x32xi32> to vector<16x32xf32>
      %cst_282 = arith.constant 1.000000e+00 : f32
      %804 = vector.broadcast %cst_282 : f32 to vector<16x32xf32>
      %805 = arith.mulf %804, %803 : vector<16x32xf32>
      %806 = arith.subf %799, %805 : vector<16x32xf32>
      %807 = arith.addf %arg32, %803 : vector<16x32xf32>
      %808 = arith.addf %arg37, %715 : vector<4x16x16xf32>
      %809 = vector.broadcast %242 : f32 to vector<16x32xf32>
      %810 = arith.mulf %807, %809 : vector<16x32xf32>
      %811 = arith.truncf %810 : vector<16x32xf32> to vector<16x32xbf16>
      %cst_283 = arith.constant dense<0.000000e+00> : vector<16x32xf32>
      %812 = tpu.matmul %811, %116, %cst_283 {dimension_numbers = #tpu.dot_dimension_numbers<[1], [0], [0], [1], [0, 0, 1, 1], [], []>} : vector<16x32xbf16>, vector<32x32xbf16>, vector<16x32xf32> -> vector<16x32xf32>
      %813 = vector.broadcast %117 : vector<1x32xf32> to vector<16x32xf32>
      %814 = arith.addf %812, %813 : vector<16x32xf32>
      %cst_284 = arith.constant 1.000000e+00 : f32
      %815 = vector.broadcast %cst_284 : f32 to vector<16x32xf32>
      %816 = arith.mulf %815, %arg28 : vector<16x32xf32>
      %817 = arith.addf %816, %814 : vector<16x32xf32>
      %cst_285 = arith.constant 1.000000e+00 : f32
      %818 = vector.broadcast %cst_285 : f32 to vector<16x32xf32>
      %819 = arith.cmpf oge, %817, %818 : vector<16x32xf32>
      %820 = arith.extui %819 : vector<16x32xi1> to vector<16x32xi32>
      %821 = arith.sitofp %820 : vector<16x32xi32> to vector<16x32xf32>
      %cst_286 = arith.constant 1.000000e+00 : f32
      %822 = vector.broadcast %cst_286 : f32 to vector<16x32xf32>
      %823 = arith.mulf %822, %821 : vector<16x32xf32>
      %824 = arith.subf %817, %823 : vector<16x32xf32>
      %825 = arith.addf %arg33, %821 : vector<16x32xf32>
      scf.yield %380, %522, %664, %806, %824, %381, %523, %665, %807, %825, %382, %524, %666, %808 : vector<16x32xf32>, vector<16x32xf32>, vector<16x32xf32>, vector<16x32xf32>, vector<16x32xf32>, vector<16x32xf32>, vector<16x32xf32>, vector<16x32xf32>, vector<16x32xf32>, vector<16x32xf32>, vector<4x16x16xf32>, vector<4x16x16xf32>, vector<4x16x16xf32>, vector<4x16x16xf32>
    }
    %c3_i32_163 = arith.constant 3 : i32
    %cst_164 = arith.constant 0.333333343 : f32
    %148 = vector.broadcast %cst_164 : f32 to vector<16x32xf32>
    %149 = arith.mulf %147#5, %148 : vector<16x32xf32>
    %cst_165 = arith.constant 0.333333343 : f32
    %150 = vector.broadcast %cst_165 : f32 to vector<16x32xf32>
    %151 = arith.mulf %147#6, %150 : vector<16x32xf32>
    %cst_166 = arith.constant 0.333333343 : f32
    %152 = vector.broadcast %cst_166 : f32 to vector<16x32xf32>
    %153 = arith.mulf %147#7, %152 : vector<16x32xf32>
    %cst_167 = arith.constant 0.333333343 : f32
    %154 = vector.broadcast %cst_167 : f32 to vector<16x32xf32>
    %155 = arith.mulf %147#8, %154 : vector<16x32xf32>
    %cst_168 = arith.constant 0.333333343 : f32
    %156 = vector.broadcast %cst_168 : f32 to vector<16x32xf32>
    %157 = arith.mulf %147#9, %156 : vector<16x32xf32>
    %158 = tpu.concatenate %143, %149, %151, %153, %155, %157 in 0 : vector<16x32xf32>, vector<16x32xf32>, vector<16x32xf32>, vector<16x32xf32>, vector<16x32xf32>, vector<16x32xf32> -> vector<96x32xf32>
    %159 = arith.truncf %158 : vector<96x32xf32> to vector<96x32xbf16>
    %cst_169 = arith.constant dense<0.000000e+00> : vector<96x32xf32>
    %160 = tpu.matmul %159, %119, %cst_169 {dimension_numbers = #tpu.dot_dimension_numbers<[1], [0], [0], [1], [0, 0, 1, 1], [], []>} : vector<96x32xbf16>, vector<32x32xbf16>, vector<96x32xf32> -> vector<96x32xf32>
    %161 = vector.broadcast %120 : vector<1x32xf32> to vector<96x32xf32>
    %162 = arith.addf %160, %161 : vector<96x32xf32>
    %163 = tpu.concatenate %162, %157 in 0 : vector<96x32xf32>, vector<16x32xf32> -> vector<112x32xf32>
    %c0_170 = arith.constant 0 : index
    %c0_171 = arith.constant 0 : index
    %164 = vector.load %arg21[%c0_170, %c0_171] : memref<112x32xf32, #tpu.memory_space<vmem>>, vector<112x32xf32>
    tpu.vector_store %arg21[%c0_170, %c0_171], %163 {strides = array<i32>} : memref<112x32xf32, #tpu.memory_space<vmem>>, vector<112x32xf32>,
    %cst_172 = arith.constant 0.333333343 : f32
    %165 = vector.broadcast %cst_172 : f32 to vector<4x16x16xf32>
    %166 = arith.mulf %147#10, %165 : vector<4x16x16xf32>
    %cst_173 = arith.constant 0.333333343 : f32
    %167 = vector.broadcast %cst_173 : f32 to vector<4x16x16xf32>
    %168 = arith.mulf %147#11, %167 : vector<4x16x16xf32>
    %cst_174 = arith.constant 0.333333343 : f32
    %169 = vector.broadcast %cst_174 : f32 to vector<4x16x16xf32>
    %170 = arith.mulf %147#12, %169 : vector<4x16x16xf32>
    %cst_175 = arith.constant 0.333333343 : f32
    %171 = vector.broadcast %cst_175 : f32 to vector<4x16x16xf32>
    %172 = arith.mulf %147#13, %171 : vector<4x16x16xf32>
    %173 = vector.extract_strided_slice %166 {offsets = [0, 0, 0], sizes = [1, 8, 8], strides = [1, 1, 1]} : vector<4x16x16xf32> to vector<1x8x8xf32>
    %174 = vector.shape_cast %173 : vector<1x8x8xf32> to vector<8x8xf32>
    %175 = vector.extract_strided_slice %166 {offsets = [1, 0, 0], sizes = [1, 8, 8], strides = [1, 1, 1]} : vector<4x16x16xf32> to vector<1x8x8xf32>
    %176 = vector.shape_cast %175 : vector<1x8x8xf32> to vector<8x8xf32>
    %177 = vector.extract_strided_slice %166 {offsets = [2, 0, 0], sizes = [1, 8, 8], strides = [1, 1, 1]} : vector<4x16x16xf32> to vector<1x8x8xf32>
    %178 = vector.shape_cast %177 : vector<1x8x8xf32> to vector<8x8xf32>
    %179 = vector.extract_strided_slice %166 {offsets = [3, 0, 0], sizes = [1, 8, 8], strides = [1, 1, 1]} : vector<4x16x16xf32> to vector<1x8x8xf32>
    %180 = vector.shape_cast %179 : vector<1x8x8xf32> to vector<8x8xf32>
    %181 = vector.extract_strided_slice %168 {offsets = [0, 0, 0], sizes = [1, 8, 8], strides = [1, 1, 1]} : vector<4x16x16xf32> to vector<1x8x8xf32>
    %182 = vector.shape_cast %181 : vector<1x8x8xf32> to vector<8x8xf32>
    %183 = vector.extract_strided_slice %168 {offsets = [1, 0, 0], sizes = [1, 8, 8], strides = [1, 1, 1]} : vector<4x16x16xf32> to vector<1x8x8xf32>
    %184 = vector.shape_cast %183 : vector<1x8x8xf32> to vector<8x8xf32>
    %185 = vector.extract_strided_slice %168 {offsets = [2, 0, 0], sizes = [1, 8, 8], strides = [1, 1, 1]} : vector<4x16x16xf32> to vector<1x8x8xf32>
    %186 = vector.shape_cast %185 : vector<1x8x8xf32> to vector<8x8xf32>
    %187 = vector.extract_strided_slice %168 {offsets = [3, 0, 0], sizes = [1, 8, 8], strides = [1, 1, 1]} : vector<4x16x16xf32> to vector<1x8x8xf32>
    %188 = vector.shape_cast %187 : vector<1x8x8xf32> to vector<8x8xf32>
    %189 = vector.extract_strided_slice %170 {offsets = [0, 0, 0], sizes = [1, 8, 8], strides = [1, 1, 1]} : vector<4x16x16xf32> to vector<1x8x8xf32>
    %190 = vector.shape_cast %189 : vector<1x8x8xf32> to vector<8x8xf32>
    %191 = vector.extract_strided_slice %170 {offsets = [1, 0, 0], sizes = [1, 8, 8], strides = [1, 1, 1]} : vector<4x16x16xf32> to vector<1x8x8xf32>
    %192 = vector.shape_cast %191 : vector<1x8x8xf32> to vector<8x8xf32>
    %193 = vector.extract_strided_slice %170 {offsets = [2, 0, 0], sizes = [1, 8, 8], strides = [1, 1, 1]} : vector<4x16x16xf32> to vector<1x8x8xf32>
    %194 = vector.shape_cast %193 : vector<1x8x8xf32> to vector<8x8xf32>
    %195 = vector.extract_strided_slice %170 {offsets = [3, 0, 0], sizes = [1, 8, 8], strides = [1, 1, 1]} : vector<4x16x16xf32> to vector<1x8x8xf32>
    %196 = vector.shape_cast %195 : vector<1x8x8xf32> to vector<8x8xf32>
    %197 = vector.extract_strided_slice %172 {offsets = [0, 0, 0], sizes = [1, 8, 8], strides = [1, 1, 1]} : vector<4x16x16xf32> to vector<1x8x8xf32>
    %198 = vector.shape_cast %197 : vector<1x8x8xf32> to vector<8x8xf32>
    %199 = vector.extract_strided_slice %172 {offsets = [1, 0, 0], sizes = [1, 8, 8], strides = [1, 1, 1]} : vector<4x16x16xf32> to vector<1x8x8xf32>
    %200 = vector.shape_cast %199 : vector<1x8x8xf32> to vector<8x8xf32>
    %201 = vector.extract_strided_slice %172 {offsets = [2, 0, 0], sizes = [1, 8, 8], strides = [1, 1, 1]} : vector<4x16x16xf32> to vector<1x8x8xf32>
    %202 = vector.shape_cast %201 : vector<1x8x8xf32> to vector<8x8xf32>
    %203 = vector.extract_strided_slice %172 {offsets = [3, 0, 0], sizes = [1, 8, 8], strides = [1, 1, 1]} : vector<4x16x16xf32> to vector<1x8x8xf32>
    %204 = vector.shape_cast %203 : vector<1x8x8xf32> to vector<8x8xf32>
    %205 = tpu.concatenate %174, %176, %178, %180, %182, %184, %186, %188, %190, %192, %194, %196, %198, %200, %202, %204 in 1 : vector<8x8xf32>, vector<8x8xf32>, vector<8x8xf32>, vector<8x8xf32>, vector<8x8xf32>, vector<8x8xf32>, vector<8x8xf32>, vector<8x8xf32>, vector<8x8xf32>, vector<8x8xf32>, vector<8x8xf32>, vector<8x8xf32>, vector<8x8xf32>, vector<8x8xf32>, vector<8x8xf32>, vector<8x8xf32> -> vector<8x128xf32>
    %206 = vector.extract_strided_slice %166 {offsets = [0, 8, 8], sizes = [1, 8, 8], strides = [1, 1, 1]} : vector<4x16x16xf32> to vector<1x8x8xf32>
    %207 = vector.shape_cast %206 : vector<1x8x8xf32> to vector<8x8xf32>
    %208 = vector.extract_strided_slice %166 {offsets = [1, 8, 8], sizes = [1, 8, 8], strides = [1, 1, 1]} : vector<4x16x16xf32> to vector<1x8x8xf32>
    %209 = vector.shape_cast %208 : vector<1x8x8xf32> to vector<8x8xf32>
    %210 = vector.extract_strided_slice %166 {offsets = [2, 8, 8], sizes = [1, 8, 8], strides = [1, 1, 1]} : vector<4x16x16xf32> to vector<1x8x8xf32>
    %211 = vector.shape_cast %210 : vector<1x8x8xf32> to vector<8x8xf32>
    %212 = vector.extract_strided_slice %166 {offsets = [3, 8, 8], sizes = [1, 8, 8], strides = [1, 1, 1]} : vector<4x16x16xf32> to vector<1x8x8xf32>
    %213 = vector.shape_cast %212 : vector<1x8x8xf32> to vector<8x8xf32>
    %214 = vector.extract_strided_slice %168 {offsets = [0, 8, 8], sizes = [1, 8, 8], strides = [1, 1, 1]} : vector<4x16x16xf32> to vector<1x8x8xf32>
    %215 = vector.shape_cast %214 : vector<1x8x8xf32> to vector<8x8xf32>
    %216 = vector.extract_strided_slice %168 {offsets = [1, 8, 8], sizes = [1, 8, 8], strides = [1, 1, 1]} : vector<4x16x16xf32> to vector<1x8x8xf32>
    %217 = vector.shape_cast %216 : vector<1x8x8xf32> to vector<8x8xf32>
    %218 = vector.extract_strided_slice %168 {offsets = [2, 8, 8], sizes = [1, 8, 8], strides = [1, 1, 1]} : vector<4x16x16xf32> to vector<1x8x8xf32>
    %219 = vector.shape_cast %218 : vector<1x8x8xf32> to vector<8x8xf32>
    %220 = vector.extract_strided_slice %168 {offsets = [3, 8, 8], sizes = [1, 8, 8], strides = [1, 1, 1]} : vector<4x16x16xf32> to vector<1x8x8xf32>
    %221 = vector.shape_cast %220 : vector<1x8x8xf32> to vector<8x8xf32>
    %222 = vector.extract_strided_slice %170 {offsets = [0, 8, 8], sizes = [1, 8, 8], strides = [1, 1, 1]} : vector<4x16x16xf32> to vector<1x8x8xf32>
    %223 = vector.shape_cast %222 : vector<1x8x8xf32> to vector<8x8xf32>
    %224 = vector.extract_strided_slice %170 {offsets = [1, 8, 8], sizes = [1, 8, 8], strides = [1, 1, 1]} : vector<4x16x16xf32> to vector<1x8x8xf32>
    %225 = vector.shape_cast %224 : vector<1x8x8xf32> to vector<8x8xf32>
    %226 = vector.extract_strided_slice %170 {offsets = [2, 8, 8], sizes = [1, 8, 8], strides = [1, 1, 1]} : vector<4x16x16xf32> to vector<1x8x8xf32>
    %227 = vector.shape_cast %226 : vector<1x8x8xf32> to vector<8x8xf32>
    %228 = vector.extract_strided_slice %170 {offsets = [3, 8, 8], sizes = [1, 8, 8], strides = [1, 1, 1]} : vector<4x16x16xf32> to vector<1x8x8xf32>
    %229 = vector.shape_cast %228 : vector<1x8x8xf32> to vector<8x8xf32>
    %230 = vector.extract_strided_slice %172 {offsets = [0, 8, 8], sizes = [1, 8, 8], strides = [1, 1, 1]} : vector<4x16x16xf32> to vector<1x8x8xf32>
    %231 = vector.shape_cast %230 : vector<1x8x8xf32> to vector<8x8xf32>
    %232 = vector.extract_strided_slice %172 {offsets = [1, 8, 8], sizes = [1, 8, 8], strides = [1, 1, 1]} : vector<4x16x16xf32> to vector<1x8x8xf32>
    %233 = vector.shape_cast %232 : vector<1x8x8xf32> to vector<8x8xf32>
    %234 = vector.extract_strided_slice %172 {offsets = [2, 8, 8], sizes = [1, 8, 8], strides = [1, 1, 1]} : vector<4x16x16xf32> to vector<1x8x8xf32>
    %235 = vector.shape_cast %234 : vector<1x8x8xf32> to vector<8x8xf32>
    %236 = vector.extract_strided_slice %172 {offsets = [3, 8, 8], sizes = [1, 8, 8], strides = [1, 1, 1]} : vector<4x16x16xf32> to vector<1x8x8xf32>
    %237 = vector.shape_cast %236 : vector<1x8x8xf32> to vector<8x8xf32>
    %238 = tpu.concatenate %207, %209, %211, %213, %215, %217, %219, %221, %223, %225, %227, %229, %231, %233, %235, %237 in 1 : vector<8x8xf32>, vector<8x8xf32>, vector<8x8xf32>, vector<8x8xf32>, vector<8x8xf32>, vector<8x8xf32>, vector<8x8xf32>, vector<8x8xf32>, vector<8x8xf32>, vector<8x8xf32>, vector<8x8xf32>, vector<8x8xf32>, vector<8x8xf32>, vector<8x8xf32>, vector<8x8xf32>, vector<8x8xf32> -> vector<8x128xf32>
    %239 = tpu.concatenate %205, %238 in 0 : vector<8x128xf32>, vector<8x128xf32> -> vector<16x128xf32>
    %c0_176 = arith.constant 0 : index
    %c0_177 = arith.constant 0 : index
    %240 = vector.load %arg22[%c0_176, %c0_177] : memref<16x128xf32, #tpu.memory_space<vmem>>, vector<16x128xf32>
    tpu.vector_store %arg22[%c0_176, %c0_177], %239 {strides = array<i32>} : memref<16x128xf32, #tpu.memory_space<vmem>>, vector<16x128xf32>,
    return
  }
  func.func @transform_0(%arg0: i32) -> (i32, i32) {
    %c0_i32 = arith.constant 0 : i32
    %c0_i32_0 = arith.constant 0 : i32
    %c0_i32_1 = arith.constant 0 : i32
    return %c0_i32, %c0_i32_0 : i32, i32
  }
  func.func @transform_1(%arg0: i32) -> (i32, i32) {
    %c0_i32 = arith.constant 0 : i32
    %c0_i32_0 = arith.constant 0 : i32
    %c0_i32_1 = arith.constant 0 : i32
    return %c0_i32, %c0_i32_0 : i32, i32
  }
  func.func @transform_2(%arg0: i32) -> (i32, i32) {
    %c0_i32 = arith.constant 0 : i32
    %c0_i32_0 = arith.constant 0 : i32
    %c0_i32_1 = arith.constant 0 : i32
    return %c0_i32, %c0_i32_0 : i32, i32
  }
  func.func @transform_3(%arg0: i32) -> (i32, i32) {
    %c0_i32 = arith.constant 0 : i32
    %c0_i32_0 = arith.constant 0 : i32
    %c0_i32_1 = arith.constant 0 : i32
    return %c0_i32, %c0_i32_0 : i32, i32
  }
  func.func @transform_4(%arg0: i32) -> (i32, i32, i32) {
    %c0_i32 = arith.constant 0 : i32
    %c0_i32_0 = arith.constant 0 : i32
    %c0_i32_1 = arith.constant 0 : i32
    %c0_i32_2 = arith.constant 0 : i32
    return %c0_i32, %c0_i32_0, %c0_i32_1 : i32, i32, i32
  }
  func.func @transform_5(%arg0: i32) -> (i32, i32, i32) {
    %c0_i32 = arith.constant 0 : i32
    %c0_i32_0 = arith.constant 0 : i32
    %c0_i32_1 = arith.constant 0 : i32
    %c0_i32_2 = arith.constant 0 : i32
    return %c0_i32, %c0_i32_0, %c0_i32_1 : i32, i32, i32
  }
  func.func @transform_6(%arg0: i32) -> (i32, i32, i32) {
    %c0_i32 = arith.constant 0 : i32
    %c0_i32_0 = arith.constant 0 : i32
    %c0_i32_1 = arith.constant 0 : i32
    %c0_i32_2 = arith.constant 0 : i32
    return %c0_i32, %c0_i32_0, %c0_i32_1 : i32, i32, i32
  }
  func.func @transform_7(%arg0: i32) -> (i32, i32, i32) {
    %c0_i32 = arith.constant 0 : i32
    %c0_i32_0 = arith.constant 0 : i32
    %c0_i32_1 = arith.constant 0 : i32
    %c0_i32_2 = arith.constant 0 : i32
    return %c0_i32, %c0_i32_0, %c0_i32_1 : i32, i32, i32
  }
  func.func @transform_8(%arg0: i32) -> (i32, i32, i32) {
    %c0_i32 = arith.constant 0 : i32
    %c0_i32_0 = arith.constant 0 : i32
    %c0_i32_1 = arith.constant 0 : i32
    %c0_i32_2 = arith.constant 0 : i32
    return %c0_i32, %c0_i32_0, %c0_i32_1 : i32, i32, i32
  }
  func.func @transform_9(%arg0: i32) -> (i32, i32, i32) {
    %c0_i32 = arith.constant 0 : i32
    %c0_i32_0 = arith.constant 0 : i32
    %c0_i32_1 = arith.constant 0 : i32
    %c0_i32_2 = arith.constant 0 : i32
    return %c0_i32, %c0_i32_0, %c0_i32_1 : i32, i32, i32
  }
  func.func @transform_10(%arg0: i32) -> (i32, i32, i32) {
    %c0_i32 = arith.constant 0 : i32
    %c0_i32_0 = arith.constant 0 : i32
    %c0_i32_1 = arith.constant 0 : i32
    %c0_i32_2 = arith.constant 0 : i32
    return %c0_i32, %c0_i32_0, %c0_i32_1 : i32, i32, i32
  }
  func.func @transform_11(%arg0: i32) -> (i32, i32, i32) {
    %c0_i32 = arith.constant 0 : i32
    %c0_i32_0 = arith.constant 0 : i32
    %c0_i32_1 = arith.constant 0 : i32
    %c0_i32_2 = arith.constant 0 : i32
    return %c0_i32, %c0_i32_0, %c0_i32_1 : i32, i32, i32
  }
  func.func @transform_12(%arg0: i32) -> (i32, i32, i32) {
    %c0_i32 = arith.constant 0 : i32
    %c0_i32_0 = arith.constant 0 : i32
    %c0_i32_1 = arith.constant 0 : i32
    %c0_i32_2 = arith.constant 0 : i32
    return %c0_i32, %c0_i32_0, %c0_i32_1 : i32, i32, i32
  }
  func.func @transform_13(%arg0: i32) -> (i32, i32, i32) {
    %c0_i32 = arith.constant 0 : i32
    %c0_i32_0 = arith.constant 0 : i32
    %c0_i32_1 = arith.constant 0 : i32
    %c0_i32_2 = arith.constant 0 : i32
    return %c0_i32, %c0_i32_0, %c0_i32_1 : i32, i32, i32
  }
  func.func @transform_14(%arg0: i32) -> (i32, i32, i32) {
    %c0_i32 = arith.constant 0 : i32
    %c0_i32_0 = arith.constant 0 : i32
    %c0_i32_1 = arith.constant 0 : i32
    %c0_i32_2 = arith.constant 0 : i32
    return %c0_i32, %c0_i32_0, %c0_i32_1 : i32, i32, i32
  }
  func.func @transform_15(%arg0: i32) -> (i32, i32, i32) {
    %c0_i32 = arith.constant 0 : i32
    %c0_i32_0 = arith.constant 0 : i32
    %c0_i32_1 = arith.constant 0 : i32
    %c0_i32_2 = arith.constant 0 : i32
    return %c0_i32, %c0_i32_0, %c0_i32_1 : i32, i32, i32
  }
  func.func @transform_16(%arg0: i32) -> (i32, i32) {
    %c0_i32 = arith.constant 0 : i32
    %c0_i32_0 = arith.constant 0 : i32
    %c0_i32_1 = arith.constant 0 : i32
    return %c0_i32, %c0_i32_0 : i32, i32
  }
  func.func @transform_17(%arg0: i32) -> (i32, i32) {
    %c0_i32 = arith.constant 0 : i32
    %c0_i32_0 = arith.constant 0 : i32
    %c0_i32_1 = arith.constant 0 : i32
    return %c0_i32, %c0_i32_0 : i32, i32
  }
  func.func @transform_18(%arg0: i32) -> (i32, i32) {
    %c0_i32 = arith.constant 0 : i32
    %c0_i32_0 = arith.constant 0 : i32
    %c0_i32_1 = arith.constant 0 : i32
    return %c0_i32, %c0_i32_0 : i32, i32
  }
  func.func @transform_19(%arg0: i32) -> (i32, i32) {
    %c0_i32 = arith.constant 0 : i32
    %c0_i32_0 = arith.constant 0 : i32
    %c0_i32_1 = arith.constant 0 : i32
    return %c0_i32, %c0_i32_0 : i32, i32
  }
  func.func @transform_20(%arg0: i32) -> (i32, i32) {
    %c0_i32 = arith.constant 0 : i32
    %c0_i32_0 = arith.constant 0 : i32
    %c0_i32_1 = arith.constant 0 : i32
    return %c0_i32, %c0_i32_0 : i32, i32
  }
  func.func @transform_21(%arg0: i32) -> (i32, i32) {
    %c0_i32 = arith.constant 0 : i32
    %c0_i32_0 = arith.constant 0 : i32
    %c0_i32_1 = arith.constant 0 : i32
    return %c0_i32, %c0_i32_0 : i32, i32
  }
}

</mosaic_0001>

<bundles_post_ra>
// kernel: forward.1
= control target key start
LH: loop header
LB: loop body
LE: loop exit
PB: predicated region body
PF: predicated region fallthrough
CT: control target
= control target key end

     0   :  { %vm276_vm0 = vcmask 261120   ;;  %v4986_v4 = vmov 32.0   ;;  %s7653_s0 = inlined_call_operand.vmem [shape: f32[16,32], index: 0, kind: input, shape index: {}]   ;;  %s7654_s2 = inlined_call_operand.vmem [shape: f32[1,32], index: 2, kind: input, shape index: {}]   ;;  %s7655_s3 = inlined_call_operand.vmem [shape: f32[1,32], index: 3, kind: input, shape index: {}]   ;;  %s7656_s20 = inlined_call_operand.vmem [shape: f32[112,32], index: 20, kind: output, shape index: {0}]   ;;  %s7657_s21 = inlined_call_operand.vmem [shape: f32[16,128], index: 21, kind: output, shape index: {1}]   ;;  %s7658_s4 = inlined_call_operand.vmem [shape: f32[4,32,96], index: 4, kind: input, shape index: {}]   ;;  %s7659_s1 = inlined_call_operand.vmem [shape: f32[16,16], index: 1, kind: input, shape index: {}]   ;;  %s7660_s5 = inlined_call_operand.vmem [shape: f32[4,1,96], index: 5, kind: input, shape index: {}]   ;;  %s7661_s6 = inlined_call_operand.vmem [shape: f32[4,32,32], index: 6, kind: input, shape index: {}]   ;;  %s7662_s7 = inlined_call_operand.vmem [shape: f32[4,1,32], index: 7, kind: input, shape index: {}]   ;;  %s7663_s8 = inlined_call_operand.vmem [shape: f32[4,1,32], index: 8, kind: input, shape index: {}]   ;;  %s7664_s10 = inlined_call_operand.vmem [shape: f32[4,32,64], index: 10, kind: input, shape index: {}]   ;;  %s7665_s9 = inlined_call_operand.vmem [shape: f32[4,1,32], index: 9, kind: input, shape index: {}]   ;;  %s7666_s11 = inlined_call_operand.vmem [shape: f32[4,1,64], index: 11, kind: input, shape index: {}]   ;;  %s7667_s12 = inlined_call_operand.vmem [shape: f32[4,64,32], index: 12, kind: input, shape index: {}]   ;;  %s7668_s13 = inlined_call_operand.vmem [shape: f32[4,1,32], index: 13, kind: input, shape index: {}]   ;;  %s7669_s14 = inlined_call_operand.vmem [shape: f32[4,1,32], index: 14, kind: input, shape index: {}]   ;;  %s7670_s15 = inlined_call_operand.vmem [shape: f32[4,1,32], index: 15, kind: input, shape index: {}]   ;;  %s7671_s16 = inlined_call_operand.vmem [shape: f32[32,32], index: 16, kind: input, shape index: {}]   ;;  %s7672_s17 = inlined_call_operand.vmem [shape: f32[1,32], index: 17, kind: input, shape index: {}]   ;;  %s7673_s18 = inlined_call_operand.vmem [shape: f32[32,32], index: 18, kind: input, shape index: {}]   ;;  %s7674_s19 = inlined_call_operand.vmem [shape: f32[1,32], index: 19, kind: input, shape index: {}]  }
   0x1   :  { %7804 = sst [smem:[#allocation201_spill]] %s7653_s0  ;;  %4238 = vrcp.f32 %v4986_v4  ;;  %v5162_v27 = vld [vmem:[%s7659_s1] sm:$0xff]  ;;  %v5167_v28 = vld [vmem:[%s7659_s1 + $0x8] sm:$0xff]  ;;  %v5284_v58 = vld [vmem:[%s7661_s6 + $0x10] sm:$0xff] }
   0x2   :  { %7805 = sst [smem:[#allocation202_spill]] %s7654_s2  ;;  %7816 = vst [vmem:[#allocation6_spill] sm:$0xff] %v5162_v27  ;;  %v5253_v51 = vld [vmem:[%s7660_s5] sm:$0x1]  ;;  %v5258_v52 = vld [vmem:[%s7660_s5 + $0x1] sm:$0x1] }
   0x3   :  { %7806 = sst [smem:[#allocation203_spill]] %s7655_s3  ;;  %7817 = vst [vmem:[#allocation7_spill] sm:$0xff] %v5167_v28  ;;  %v5263_v53 = vld [vmem:[%s7660_s5 + $0x2] sm:$0x1]  ;;  %v5269_v55 = vld [vmem:[%s7660_s5 + $0x3] sm:$0x1] }
   0x4   :  { %7807 = sst [smem:[#allocation204_spill]] %s7656_s20  ;;  %7831 = vst [vmem:[#allocation21_spill] sm:$0xff] %v5253_v51  ;;  %v5274_v56 = vld [vmem:[%s7661_s6] sm:$0xff]  ;;  %v5279_v57 = vld [vmem:[%s7661_s6 + $0x8] sm:$0xff]  ;;  %v5289_v59 = vld [vmem:[%s7661_s6 + $0x18] sm:$0xff] }
   0x5   :  { %7808 = sst [smem:[#allocation205_spill]] %s7657_s21  ;;  %7832 = vst [vmem:[#allocation22_spill] sm:$0xff] %v5258_v52  ;;  %v5296_v61 = vld [vmem:[%s7661_s6 + $0x20] sm:$0xff]  ;;  %v5434_v44 = vld [vmem:[%s7664_s10 + $0x8] sm:$0xff]  ;;  %v5456_v39 = vld [vmem:[%s7664_s10 + $0x10] sm:$0xff]  ;;  %v5943_v52 = vmov 0.0  }
   0x6   :  { %7809 = sst [smem:[#allocation206_spill]] %s7658_s4  ;;  %7833 = vst [vmem:[#allocation23_spill] sm:$0xff] %v5263_v53  ;;  %v5409_v49 = vld [vmem:[%s7663_s8 + $0x1] sm:$0x1]  ;;  %v5419_v50 = vld [vmem:[%s7663_s8 + $0x3] sm:$0x1] }
   0x7   :  { %s7810_s26 = sld [smem:[#allocation201_spill]]  ;;  %v4239_v5 = vpop.eup %4238  ;;  %7834 = vst [vmem:[#allocation24_spill] sm:$0xff] %v5269_v55  ;;  %v5429_v42 = vld [vmem:[%s7665_s9 + $0x1] sm:$0x1]  ;;  %v5451_v36 = vld [vmem:[%s7665_s9 + $0x3] sm:$0x1] }
   0x8   :  { %v284_v6 = vmul.f32 32.0, %v4239_v5  ;;  %vm288_vm1 = vweird.f32 %v4239_v5  ;;  %s7812_s0 = sld [smem:[#allocation206_spill]]  ;;  %7835 = vst [vmem:[#allocation25_spill] sm:$0xff] %v5274_v56  ;;  %v5476_v30 = vld [vmem:[%s7664_s10 + $0x28] sm:$0xff]  ;;  %v5665_v53 = vld [vmem:[%s7667_s12 + $0x70] sm:$0xff]  ;;  %v5985_v56 = vmov 0.0  }
   0x9   :  { %7836 = vst [vmem:[#allocation26_spill] sm:$0xff] %v5279_v57  ;;  %s7872_s27 = sld [smem:[#allocation203_spill]]  ;;  %v5987_v57 = vmov 0.0  }
   0xa   :  { %v285_v7 = vsub.f32 1.0, %v284_v6  ;;  %7837 = vst [vmem:[#allocation27_spill] sm:$0xff] %v5284_v58  ;;  %v5424_v6 = vld [vmem:[%s7665_s9] sm:$0x1]  ;;  %v5989_v58 = vmov 0.0  }
   0xb   :  { %7838 = vst [vmem:[#allocation28_spill] sm:$0xff] %v5289_v59  ;;  %v5991_v59 = vmov 0.0  }
   0xc   :  { %v286_v8 = vmul.f32 %v4239_v5, %v285_v7  ;;  %7839 = vst [vmem:[#allocation29_spill] sm:$0xff] %v5296_v61  ;;  %v5326_v7 = vld [vmem:[%s7661_s6 + $0x40] sm:$0xff]  ;;  %v5712_v61 = vld [vmem:[%s7667_s12 + $0xa8] sm:$0xff] }
   0xd   :  { %v274_v0 = vld [vmem:[%s7810_s26] sm:$0xff]  ;;  %v275_v2 = vld [vmem:[%s7810_s26 + $0x8] sm:$0xff]  ;;  %7843 = vst [vmem:[#allocation33_spill] sm:$0xff] %v5326_v7 }
   0xe   :  { %v277_v1 = vsel %vm276_vm0, %v274_v0, 0.0  ;;  %v280_v3 = vsel %vm276_vm0, %v275_v2, 0.0  ;;  %v287_v9 = vadd.f32 %v4239_v5, %v286_v8  ;;  %v5147_v23 = vld [vmem:[%s7812_s0] sm:$0xff]  ;;  %v5152_v24 = vld [vmem:[%s7812_s0 + $0x8] sm:$0xff]  ;;  %v5157_v25 = vld [vmem:[%s7812_s0 + $0x10] sm:$0xff]  ;;  %7859 = vst [vmem:[#allocation47_spill] sm:$0xff] %v5409_v49 }
   0xf   :  { %278 = vadd.xlane.f32.xlu0 %v277_v1  ;;  %7813 = vst [vmem:[#allocation3_spill] sm:$0xff] %v5147_v23  ;;  %v5172_v29 = vld [vmem:[%s7812_s0 + $0x18] sm:$0xff]  ;;  %v5181_v32 = vld [vmem:[%s7812_s0 + $0x20] sm:$0xff]  ;;  %v5186_v33 = vld [vmem:[%s7812_s0 + $0x28] sm:$0xff] }
  0x10   :  { %v5129_v10 = vsel %vm288_vm1, %v4239_v5, %v287_v9  ;;  %7814 = vst [vmem:[#allocation4_spill] sm:$0xff] %v5152_v24  ;;  %v5191_v34 = vld [vmem:[%s7812_s0 + $0x30] sm:$0xff]  ;;  %v5196_v35 = vld [vmem:[%s7812_s0 + $0x38] sm:$0xff]  ;;  %v5203_v37 = vld [vmem:[%s7812_s0 + $0x40] sm:$0xff] }
  0x11   :  { %7811 = vst [vmem:[#allocation2_spill] sm:$0xff] %v5129_v10  ;;  %v5208_v38 = vld [vmem:[%s7812_s0 + $0x48] sm:$0xff]  ;;  %v5215_v40 = vld [vmem:[%s7812_s0 + $0x50] sm:$0xff]  ;;  %v5220_v41 = vld [vmem:[%s7812_s0 + $0x58] sm:$0xff] }
  0x12   :  { %7815 = vst [vmem:[#allocation5_spill] sm:$0xff] %v5157_v25  ;;  %v5227_v43 = vld [vmem:[%s7812_s0 + $0x60] sm:$0xff]  ;;  %v5234_v45 = vld [vmem:[%s7812_s0 + $0x68] sm:$0xff]  ;;  %v5239_v46 = vld [vmem:[%s7812_s0 + $0x70] sm:$0xff] }
  0x13   :  { %7818 = vst [vmem:[#allocation8_spill] sm:$0xff] %v5172_v29  ;;  %v5244_v47 = vld [vmem:[%s7812_s0 + $0x78] sm:$0xff]  ;;  %v5305_v1 = vld [vmem:[%s7661_s6 + $0x28] sm:$0xff]  ;;  %v5336_v9 = vld [vmem:[%s7661_s6 + $0x50] sm:$0xff] }
  0x14   :  { %7819 = vst [vmem:[#allocation9_spill] sm:$0xff] %v5181_v32  ;;  %v5331_v8 = vld [vmem:[%s7661_s6 + $0x48] sm:$0xff]  ;;  %v5682_v49 = vld [vmem:[%s7667_s12 + $0x80] sm:$0xff]  ;;  %v5993_v32 = vmov 0.0  }
  0x15   :  { %7820 = vst [vmem:[#allocation10_spill] sm:$0xff] %v5186_v33 }
  0x16   :  { %7821 = vst [vmem:[#allocation11_spill] sm:$0xff] %v5191_v34 }
  0x17   :  { %281 = vadd.xlane.f32.xlu0 %v280_v3  ;;  %7822 = vst [vmem:[#allocation12_spill] sm:$0xff] %v5196_v35  ;;  %v5315_v3 = vld [vmem:[%s7661_s6 + $0x38] sm:$0xff] }
  0x18   :  { %7823 = vst [vmem:[#allocation13_spill] sm:$0xff] %v5203_v37  ;;  %v5935_v37 = vmov 0.0  }
  0x19   :  { %7824 = vst [vmem:[#allocation14_spill] sm:$0xff] %v5208_v38  ;;  %v5937_v38 = vmov 0.0  }
  0x1a   :  { %7825 = vst [vmem:[#allocation15_spill] sm:$0xff] %v5215_v40  ;;  %v5939_v40 = vmov 0.0  }
  0x1b   :  { %7826 = vst [vmem:[#allocation16_spill] sm:$0xff] %v5220_v41  ;;  %v5941_v41 = vmov 0.0  }
  0x1c   :  { %7827 = vst [vmem:[#allocation17_spill] sm:$0xff] %v5227_v43  ;;  %v5647_v43 = vld [vmem:[%s7667_s12 + $0x58] sm:$0xff] }
  0x1d   :  { %7828 = vst [vmem:[#allocation18_spill] sm:$0xff] %v5234_v45  ;;  %v5637_v45 = vld [vmem:[%s7667_s12 + $0x48] sm:$0xff] }
  0x1e   :  { %7829 = vst [vmem:[#allocation19_spill] sm:$0xff] %v5239_v46 }
  0x1f   :  { %7830 = vst [vmem:[#allocation20_spill] sm:$0xff] %v5244_v47  ;;  %v5660_v47 = vld [vmem:[%s7667_s12 + $0x68] sm:$0xff] }
  0x20   :  { %7840 = vst [vmem:[#allocation30_spill] sm:$0xff] %v5305_v1  ;;  %v5717_v1 = vld [vmem:[%s7667_s12 + $0xb0] sm:$0xff] }
  0x21   :  { %7842 = vst [vmem:[#allocation32_spill] sm:$0xff] %v5315_v3  ;;  %v5895_v3 = vmov 0.0  }
  0x22   :  { %7844 = vst [vmem:[#allocation34_spill] sm:$0xff] %v5331_v8  ;;  %v5575_v8 = vld [vmem:[%s7666_s11 + $0x3] sm:$0x1] }
  0x23   :  { %7845 = vst [vmem:[#allocation35_spill] sm:$0xff] %v5336_v9  ;;  %v5585_v9 = vld [vmem:[%s7667_s12 + $0x8] sm:$0xff] }
  0x24   :  { %7861 = vst [vmem:[#allocation49_spill] sm:$0xff] %v5419_v50 }
  0x25   :  { %7862 = vst [vmem:[#allocation50_spill] sm:$0xff] %v5424_v6  ;;  %v5953_v6 = vmov 0.0  }
  0x26   :  { %7863 = vst [vmem:[#allocation51_spill] sm:$0xff] %v5429_v42  ;;  %v5704_v42 = vld [vmem:[%s7667_s12 + $0xa0] sm:$0xff] }
  0x27   :  { %7864 = vst [vmem:[#allocation52_spill] sm:$0xff] %v5434_v44  ;;  %v5975_v44 = vmov 0.0  }
  0x28   :  { %7867 = vst [vmem:[#allocation54_spill] sm:$0xff] %v5451_v36  ;;  %v5471_v36 = vld [vmem:[%s7664_s10 + $0x20] sm:$0xff] }
  0x29   :  { %7868 = vst [vmem:[#allocation55_spill] sm:$0xff] %v5456_v39  ;;  %v5981_v39 = vmov 0.0  }
  0x2a   :  { %7870 = vst [vmem:[#allocation57_spill] sm:$0xff] %v5471_v36  ;;  %v5923_v36 = vmov 0.0  }
  0x2b   :  { %7871 = vst [vmem:[#allocation58_spill] sm:$0xff] %v5476_v30  ;;  %v5925_v30 = vmov 0.0  }
  0x2c   :  { %7888 = vst [vmem:[#allocation72_spill] sm:$0xff] %v5575_v8  ;;  %v5603_v8 = vld [vmem:[%s7667_s12 + $0x20] sm:$0xff] }
  0x2d   :  { %7890 = vst [vmem:[#allocation74_spill] sm:$0xff] %v5585_v9  ;;  %v5963_v9 = vmov 0.0  }
  0x2e   :  { %7894 = vst [vmem:[#allocation78_spill] sm:$0xff] %v5603_v8  ;;  %v5969_v8 = vmov 0.0  }
  0x2f   :  { %7899 = vst [vmem:[#allocation83_spill] sm:$0xff] %v5637_v45  ;;  %v5899_v45 = vmov 0.0  }
  0x30   :  { %7901 = vst [vmem:[#allocation85_spill] sm:$0xff] %v5647_v43  ;;  %v5917_v43 = vmov 0.0  }
  0x31   :  { %7903 = vst [vmem:[#allocation87_spill] sm:$0xff] %v5660_v47  ;;  %v5921_v47 = vmov 0.0  }
  0x32   :  { %7904 = vst [vmem:[#allocation88_spill] sm:$0xff] %v5665_v53  ;;  %v5927_v53 = vmov 0.0  }
  0x33   :  { %7906 = vst [vmem:[#allocation90_spill] sm:$0xff] %v5682_v49  ;;  %v5733_v49 = vld [vmem:[%s7667_s12 + $0xc0] sm:$0xff] }
  0x34   :  { %7910 = vst [vmem:[#allocation94_spill] sm:$0xff] %v5704_v42  ;;  %v5782_v42 = vld [vmem:[%s7668_s13] sm:$0x1] }
  0x35   :  { %7911 = vst [vmem:[#allocation95_spill] sm:$0xff] %v5712_v61  ;;  %v5794_v61 = vld [vmem:[%s7668_s13 + $0x2] sm:$0x1] }
  0x36   :  { %7912 = vst [vmem:[#allocation96_spill] sm:$0xff] %v5717_v1  ;;  %v5799_v1 = vld [vmem:[%s7668_s13 + $0x3] sm:$0x1] }
  0x37   :  { %7914 = vst [vmem:[#allocation98_spill] sm:$0xff] %v5733_v49  ;;  %v5809_v49 = vld [vmem:[%s7669_s14 + $0x1] sm:$0x1] }
  0x38   :  { %7923 = vst [vmem:[#allocation107_spill] sm:$0xff] %v5782_v42  ;;  %v5949_v42 = vmov 0.0  }
  0x39   :  { %7925 = vst [vmem:[#allocation109_spill] sm:$0xff] %v5794_v61  ;;  %v5854_v61 = vld [vmem:[%s7671_s16 + $0x10] sm:$0xff] }
  0x3a   :  { %7926 = vst [vmem:[#allocation110_spill] sm:$0xff] %v5799_v1  ;;  %v5824_v1 = vld [vmem:[%s7670_s15] sm:$0x1] }
  0x3b   :  { %7928 = vst [vmem:[#allocation112_spill] sm:$0xff] %v5809_v49  ;;  %v267_v49 = vld [vmem:[%s7673_s18] sm:$0xff] }
  0x3c   :  { %7931 = vst [vmem:[#allocation115_spill] sm:$0xff] %v5824_v1  ;;  %v5945_v1 = vmov 0.0  }
  0x3d   :  { %7937 = vst [vmem:[#allocation121_spill] sm:$0xff] %v5854_v61  ;;  %v5891_v61 = vmov 0.0  }
  0x3e   :  { %7943 = vst [vmem:[#allocation127_spill] sm:$0xff] %v5987_v57 }
  0x3f   :  { %7944 = vst [vmem:[#allocation128_spill] sm:$0xff] %v5989_v58 }
  0x40   :  { %7945 = vst [vmem:[#allocation129_spill] sm:$0xff] %v5991_v59 }
  0x41   :  { %7946 = vst [vmem:[#allocation130_spill] sm:$0xff] %v5993_v32 }
  0x82   :  { %v279_v11 = vpop.xlane.xlu0 %278 }
  0x83   :  { %v290_v12 = vmul.f32 %v5129_v10, %v279_v11  ;;  %v5520_v11 = vld [vmem:[%s7664_s10 + $0x50] sm:$0xff] }
  0x84   :  { %7879 = vst [vmem:[#allocation63_spill] sm:$0xff] %v5520_v11  ;;  %v5621_v11 = vld [vmem:[%s7667_s12 + $0x38] sm:$0xff] }
  0x85   :  { %v5132_v13 = vsub.f32 %v274_v0, %v290_v12  ;;  %v5345_v12 = vld [vmem:[%s7661_s6 + $0x58] sm:$0xff]  ;;  %v5446_v0 = vld [vmem:[%s7665_s9 + $0x2] sm:$0x1]  ;;  %7897 = vst [vmem:[#allocation81_spill] sm:$0xff] %v5621_v11  ;;  %v5979_v11 = vmov 0.0  }
  0x86   :  { %7848 = vst [vmem:[#allocation36_spill] sm:$0xff] %v5345_v12  ;;  %v5565_v12 = vld [vmem:[%s7666_s11 + $0x1] sm:$0x1] }
  0x87   :  { %v294_v14 = vmul.f32 %v5132_v13, %v5132_v13  ;;  %7866 = vst [vmem:[#allocation53_spill] sm:$0xff] %v5446_v0 }
  0x88   :  { %7886 = vst [vmem:[#allocation70_spill] sm:$0xff] %v5565_v12  ;;  %v5687_v12 = vld [vmem:[%s7667_s12 + $0x88] sm:$0xff] }
  0x89   :  { %v296_v15 = vsel %vm276_vm0, %v294_v14, 0.0  ;;  %7907 = vst [vmem:[#allocation91_spill] sm:$0xff] %v5687_v12  ;;  %v5738_v12 = vld [vmem:[%s7667_s12 + $0xc8] sm:$0xff] }
  0x8a   :  { %297 = vadd.xlane.f32.xlu1 %v296_v15  ;;  %v282_v16 = vpop.xlane.xlu0 %281  ;;  %v5352_v15 = vld [vmem:[%s7661_s6 + $0x60] sm:$0xff]  ;;  %7915 = vst [vmem:[#allocation99_spill] sm:$0xff] %v5738_v12 }
  0x8b   :  { %v291_v17 = vmul.f32 %v5129_v10, %v282_v16  ;;  %7849 = vst [vmem:[#allocation37_spill] sm:$0xff] %v5352_v15  ;;  %v5538_v15 = vld [vmem:[%s7664_s10 + $0x68] sm:$0xff]  ;;  %v5789_v12 = vld [vmem:[%s7668_s13 + $0x1] sm:$0x1] }
  0x8c   :  { %7882 = vst [vmem:[#allocation66_spill] sm:$0xff] %v5538_v15  ;;  %v5590_v15 = vld [vmem:[%s7667_s12 + $0x10] sm:$0xff] }
  0x8d   :  { %v5138_v18 = vsub.f32 %v275_v2, %v291_v17  ;;  %v5310_v2 = vld [vmem:[%s7661_s6 + $0x30] sm:$0xff]  ;;  %v5404_v17 = vld [vmem:[%s7664_s10] sm:$0xff]  ;;  %7891 = vst [vmem:[#allocation75_spill] sm:$0xff] %v5590_v15  ;;  %v5965_v15 = vmov 0.0  }
  0x8e   :  { %7841 = vst [vmem:[#allocation31_spill] sm:$0xff] %v5310_v2  ;;  %v5722_v2 = vld [vmem:[%s7667_s12 + $0xb8] sm:$0xff] }
  0x8f   :  { %v295_v19 = vmul.f32 %v5138_v18, %v5138_v18  ;;  %7858 = vst [vmem:[#allocation46_spill] sm:$0xff] %v5404_v17  ;;  %v5973_v17 = vmov 0.0  }
  0x90   :  { %7913 = vst [vmem:[#allocation97_spill] sm:$0xff] %v5722_v2  ;;  %v270_v2 = vld [vmem:[%s7673_s18 + $0x18] sm:$0xff] }
  0x91   :  { %v299_v20 = vsel %vm276_vm0, %v295_v19, 0.0  ;;  %v5360_v19 = vld [vmem:[%s7661_s6 + $0x68] sm:$0xff]  ;;  %7924 = vst [vmem:[#allocation108_spill] sm:$0xff] %v5789_v12 }
  0x92   :  { %300 = vadd.xlane.f32.xlu1 %v299_v20  ;;  %7850 = vst [vmem:[#allocation38_spill] sm:$0xff] %v5360_v19  ;;  %v5365_v20 = vld [vmem:[%s7661_s6 + $0x70] sm:$0xff]  ;;  %v268_v12 = vld [vmem:[%s7673_s18 + $0x8] sm:$0xff] }
  0x93   :  { %7851 = vst [vmem:[#allocation39_spill] sm:$0xff] %v5365_v20  ;;  %v5492_v19 = vld [vmem:[%s7664_s10 + $0x30] sm:$0xff]  ;;  %v5497_v20 = vld [vmem:[%s7664_s10 + $0x38] sm:$0xff] }
  0x94   :  { %7875 = vst [vmem:[#allocation59_spill] sm:$0xff] %v5492_v19  ;;  %v5931_v19 = vmov 0.0  }
  0x95   :  { %7876 = vst [vmem:[#allocation60_spill] sm:$0xff] %v5497_v20  ;;  %v5933_v20 = vmov 0.0  }
  0xfd   :  { %v298_v21 = vpop.xlane.xlu1 %297 }
  0xfe   :  { %v302_v22 = vmul.f32 %v298_v21, %v5129_v10  ;;  %v5370_v21 = vld [vmem:[%s7661_s6 + $0x78] sm:$0xff]  ;;  %s7865_s6 = sld [smem:[#allocation202_spill]] }
  0xff   :  { %7852 = vst [vmem:[#allocation40_spill] sm:$0xff] %v5370_v21  ;;  %v5533_v21 = vld [vmem:[%s7664_s10 + $0x60] sm:$0xff] }
 0x100   :  { %v304_v26 = vadd.f32 1e-12, %v302_v22  ;;  %v5394_v22 = vld [vmem:[%s7662_s7 + $0x3] sm:$0x1]  ;;  %7881 = vst [vmem:[#allocation65_spill] sm:$0xff] %v5533_v21 }
 0x101   :  { %7856 = vst [vmem:[#allocation44_spill] sm:$0xff] %v5394_v22  ;;  %v5466_v22 = vld [vmem:[%s7664_s10 + $0x18] sm:$0xff] }
 0x102   :  { %4240 = vrsqrt.f32 %v304_v26  ;;  %vm312_vm2 = vweird.f32 %v304_v26  ;;  %7869 = vst [vmem:[#allocation56_spill] sm:$0xff] %v5466_v22  ;;  %v5983_v22 = vmov 0.0  }
 0x105   :  { %v301_v48 = vpop.xlane.xlu1 %300 }
 0x106   :  { %v303_v54 = vmul.f32 %v301_v48, %v5129_v10  ;;  %v5379_v48 = vld [vmem:[%s7662_s7] sm:$0x1]  ;;  %v5957_v10 = vmov 0.0  }
 0x107   :  { %7853 = vst [vmem:[#allocation41_spill] sm:$0xff] %v5379_v48  ;;  %v5959_v48 = vmov 0.0  }
 0x108   :  { %v5298_v62 = vpop.eup %4240  ;;  %v305_v63 = vadd.f32 1e-12, %v303_v54  ;;  %v5384_v54 = vld [vmem:[%s7662_s7 + $0x1] sm:$0x1] }
 0x109   :  { %v307_v4 = vmul.f32 %v5298_v62, %v304_v26  ;;  %vm313_vm3 = vweird.f32 %v5298_v62  ;;  %7854 = vst [vmem:[#allocation42_spill] sm:$0xff] %v5384_v54  ;;  %v5399_v26 = vld [vmem:[%s7663_s8] sm:$0x1]  ;;  %v5743_v54 = vld [vmem:[%s7667_s12 + $0xd0] sm:$0xff] }
 0x10a   :  { %vm5338_vm4 = vmor %vm312_vm2, %vm313_vm3  ;;  %4242 = vrsqrt.f32 %v305_v63  ;;  %7857 = vst [vmem:[#allocation45_spill] sm:$0xff] %v5399_v26  ;;  %vm322_vm5 = vweird.f32 %v305_v63  ;;  %v5955_v26 = vmov 0.0  }
 0x10b   :  { %v308_v16 = vmul.f32 %v5298_v62, %v307_v4  ;;  %v5389_v4 = vld [vmem:[%s7662_s7 + $0x2] sm:$0x1]  ;;  %7916 = vst [vmem:[#allocation100_spill] sm:$0xff] %v5743_v54  ;;  %v5804_v54 = vld [vmem:[%s7669_s14] sm:$0x1] }
 0x10c   :  { %7855 = vst [vmem:[#allocation43_spill] sm:$0xff] %v5389_v4  ;;  %v5515_v4 = vld [vmem:[%s7664_s10 + $0x48] sm:$0xff] }
 0x10d   :  { %v309_v14 = vmul.f32 0.5, %v308_v16  ;;  %v5414_v16 = vld [vmem:[%s7663_s8 + $0x2] sm:$0x1]  ;;  %7878 = vst [vmem:[#allocation62_spill] sm:$0xff] %v5515_v4  ;;  %v5616_v4 = vld [vmem:[%s7667_s12 + $0x30] sm:$0xff] }
 0x10e   :  { %7860 = vst [vmem:[#allocation48_spill] sm:$0xff] %v5414_v16  ;;  %v5510_v16 = vld [vmem:[%s7664_s10 + $0x40] sm:$0xff] }
 0x10f   :  { %v310_v5 = vsub.f32 1.5, %v309_v14  ;;  %v5441_v14 = vld [vmem:[%s7865_s6] ss:$0 sm:$0xff]  ;;  %7877 = vst [vmem:[#allocation61_spill] sm:$0xff] %v5510_v16  ;;  %v5570_v16 = vld [vmem:[%s7666_s11 + $0x2] sm:$0x1] }
 0x110   :  { %v5436_v60 = vpop.eup %4242  ;;  %7887 = vst [vmem:[#allocation71_spill] sm:$0xff] %v5570_v16  ;;  %v5655_v16 = vld [vmem:[%s7667_s12 + $0x60] sm:$0xff] }
 0x111   :  { %v311_v31 = vmul.f32 %v5298_v62, %v310_v5  ;;  %v317_v50 = vmul.f32 %v5436_v60, %v305_v63  ;;  %vm323_vm6 = vweird.f32 %v5436_v60  ;;  %v5481_v63 = vld [vmem:[%s7872_s27] ss:$0 sm:$0xff]  ;;  %7896 = vst [vmem:[#allocation80_spill] sm:$0xff] %v5616_v4  ;;  %v5977_v4 = vmov 0.0  }
 0x112   :  { %vm5483_vm7 = vmor %vm322_vm5, %vm323_vm6  ;;  %7902 = vst [vmem:[#allocation86_spill] sm:$0xff] %v5655_v16  ;;  %v5919_v16 = vmov 0.0  }
 0x113   :  { %v315_v55 = vsel %vm5338_vm4, %v5298_v62, %v311_v31  ;;  %v318_v0 = vmul.f32 %v5436_v60, %v317_v50  ;;  %v5526_v50 = vld [vmem:[%s7664_s10 + $0x58] sm:$0xff]  ;;  %7927 = vst [vmem:[#allocation111_spill] sm:$0xff] %v5804_v54  ;;  %v5947_v54 = vmov 0.0  }
 0x114   :  { %v326_v31 = vmul.f32 %v315_v55, %v5132_v13  ;;  %7880 = vst [vmem:[#allocation64_spill] sm:$0xff] %v5526_v50  ;;  %v5545_v55 = vld [vmem:[%s7664_s10 + $0x70] sm:$0xff]  ;;  %v5550_v62 = vld [vmem:[%s7664_s10 + $0x78] sm:$0xff] }
 0x115   :  { %v319_v7 = vmul.f32 0.5, %v318_v0  ;;  %7883 = vst [vmem:[#allocation67_spill] sm:$0xff] %v5545_v55  ;;  %v5557_v0 = vld [vmem:[%s7666_s11] sm:$0x1]  ;;  %v5642_v50 = vld [vmem:[%s7667_s12 + $0x50] sm:$0xff] }
 0x116   :  { %7884 = vst [vmem:[#allocation68_spill] sm:$0xff] %v5550_v62  ;;  %v331_v13 = vmul.f32 %v5441_v14, %v326_v31  ;;  %v5580_v31 = vld [vmem:[%s7667_s12] sm:$0xff]  ;;  %v5608_v62 = vld [vmem:[%s7667_s12 + $0x28] sm:$0xff] }
 0x117   :  { %7885 = vst [vmem:[#allocation69_spill] sm:$0xff] %v5557_v0  ;;  %v320_v21 = vsub.f32 1.5, %v319_v7  ;;  %v5598_v7 = vld [vmem:[%s7667_s12 + $0x18] sm:$0xff]  ;;  %v5951_v0 = vmov 0.0  }
 0x118   :  { %7889 = vst [vmem:[#allocation73_spill] sm:$0xff] %v5580_v31  ;;  %v5593_v55 = vadd.f32 %v5481_v63, %v331_v13  ;;  %v5961_v31 = vmov 0.0  }
 0x119   :  { %7893 = vst [vmem:[#allocation77_spill] sm:$0xff] %v5598_v7  ;;  %v321_v13 = vmul.f32 %v5436_v60, %v320_v21  ;;  %v5630_v21 = vld [vmem:[%s7667_s12 + $0x40] sm:$0xff]  ;;  %v5967_v7 = vmov 0.0  }
 0x11a   :  { %7892 = vst [vmem:[#allocation76_spill] sm:$0xff] %v5593_v55 }
 0x11b   :  { %7895 = vst [vmem:[#allocation79_spill] sm:$0xff] %v5608_v62  ;;  %v325_v46 = vsel %vm5483_vm7, %v5436_v60, %v321_v13  ;;  %v5675_v13 = vld [vmem:[%s7667_s12 + $0x78] sm:$0xff]  ;;  %v5971_v62 = vmov 0.0  }
 0x11c   :  { %7898 = vst [vmem:[#allocation82_spill] sm:$0xff] %v5630_v21  ;;  %v327_v5 = vmul.f32 %v325_v46, %v5138_v18  ;;  %v5694_v46 = vld [vmem:[%s7667_s12 + $0x90] sm:$0xff]  ;;  %v5699_v60 = vld [vmem:[%s7667_s12 + $0x98] sm:$0xff]  ;;  %v5897_v21 = vmov 0.0  }
 0x11d   :  { %7900 = vst [vmem:[#allocation84_spill] sm:$0xff] %v5642_v50  ;;  %v5901_v50 = vmov 0.0  }
 0x11e   :  { %7905 = vst [vmem:[#allocation89_spill] sm:$0xff] %v5675_v13  ;;  %v332_v18 = vmul.f32 %v5441_v14, %v327_v5  ;;  %v5751_v5 = vld [vmem:[%s7667_s12 + $0xd8] sm:$0xff]  ;;  %v5929_v13 = vmov 0.0  }
 0x11f   :  { %7908 = vst [vmem:[#allocation92_spill] sm:$0xff] %v5694_v46  ;;  %v5756_v46 = vld [vmem:[%s7667_s12 + $0xe0] sm:$0xff] }
 0x120   :  { %7909 = vst [vmem:[#allocation93_spill] sm:$0xff] %v5699_v60  ;;  %v5746_v14 = vadd.f32 %v5481_v63, %v332_v18  ;;  %v5761_v60 = vld [vmem:[%s7667_s12 + $0xe8] sm:$0xff]  ;;  %v5768_v63 = vld [vmem:[%s7667_s12 + $0xf0] sm:$0xff]  ;;  %v5773_v18 = vld [vmem:[%s7667_s12 + $0xf8] sm:$0xff] }
 0x121   :  { %7918 = vst [vmem:[#allocation102_spill] sm:$0xff] %v5751_v5  ;;  %v5814_v5 = vld [vmem:[%s7669_s14 + $0x2] sm:$0x1] }
 0x122   :  { %7917 = vst [vmem:[#allocation101_spill] sm:$0xff] %v5746_v14 }
 0x123   :  { %7919 = vst [vmem:[#allocation103_spill] sm:$0xff] %v5756_v46  ;;  %v5819_v46 = vld [vmem:[%s7669_s14 + $0x3] sm:$0x1] }
 0x124   :  { %7920 = vst [vmem:[#allocation104_spill] sm:$0xff] %v5761_v60  ;;  %v5829_v60 = vld [vmem:[%s7670_s15 + $0x1] sm:$0x1] }
 0x125   :  { %7921 = vst [vmem:[#allocation105_spill] sm:$0xff] %v5768_v63  ;;  %v5834_v63 = vld [vmem:[%s7670_s15 + $0x2] sm:$0x1] }
 0x126   :  { %7922 = vst [vmem:[#allocation106_spill] sm:$0xff] %v5773_v18  ;;  %v5839_v18 = vld [vmem:[%s7670_s15 + $0x3] sm:$0x1] }
 0x127   :  { %7929 = vst [vmem:[#allocation113_spill] sm:$0xff] %v5814_v5  ;;  %v5849_v5 = vld [vmem:[%s7671_s16 + $0x8] sm:$0xff] }
 0x128   :  { %7930 = vst [vmem:[#allocation114_spill] sm:$0xff] %v5819_v46  ;;  %v5844_v46 = vld [vmem:[%s7671_s16] sm:$0xff] }
 0x129   :  { %7932 = vst [vmem:[#allocation116_spill] sm:$0xff] %v5829_v60  ;;  %v5868_v60 = vld [vmem:[%s7672_s17] sm:$0x1] }
 0x12a   :  { %7933 = vst [vmem:[#allocation117_spill] sm:$0xff] %v5834_v63  ;;  %v5859_v63 = vld [vmem:[%s7671_s16 + $0x18] sm:$0xff] }
 0x12b   :  { %7934 = vst [vmem:[#allocation118_spill] sm:$0xff] %v5839_v18  ;;  %v269_v18 = vld [vmem:[%s7673_s18 + $0x10] sm:$0xff]  ;;  %s5995_s18 = smov 1  }
 0x12c   :  { %7935 = vst [vmem:[#allocation119_spill] sm:$0xff] %v5844_v46  ;;  %v5882_v46 = vpack.c.bf16 %v268_v12, %v267_v49  ;;  %v5903_v49 = vmov 0.0   ;;  %v5905_v12 = vmov 0.0  }
 0x12d   :  { %7936 = vst [vmem:[#allocation120_spill] sm:$0xff] %v5849_v5  ;;  %v5889_v5 = vpack.c.bf16 %v270_v2, %v269_v18  ;;  %v5909_v2 = vmov 0.0   ;;  %v5911_v18 = vmov 0.0  }
 0x12e   :  { %7938 = vst [vmem:[#allocation122_spill] sm:$0xff] %v5859_v63  ;;  %v5893_v63 = vmov 0.0  }
 0x12f   :  { %7939 = vst [vmem:[#allocation123_spill] sm:$0xff] %v5868_v60  ;;  %v5887_v60 = vld [vmem:[%s7674_s19] sm:$0x1] }
 0x130   :  { %7940 = vst [vmem:[#allocation124_spill] sm:$0xff] %v5882_v46  ;;  %v5907_v46 = vmov 0.0  }
 0x131   :  { %7941 = vst [vmem:[#allocation125_spill] sm:$0xff] %v5887_v60  ;;  %v5913_v60 = vmov 0.0  }
 0x132   :  { %7942 = vst [vmem:[#allocation126_spill] sm:$0xff] %v5889_v5  ;;  %v5915_v5 = vmov 0.0  }
 0x133 LB: > { %v7951_v28 = vld [vmem:[#allocation7_spill] sm:$0xff]  ;;  %v7952_v27 = vld [vmem:[#allocation6_spill] sm:$0xff]  ;;  %v7953_v55 = vld [vmem:[#allocation76_spill] sm:$0xff]  ;;  %7955 = vst [vmem:[#allocation131_spill] sm:$0xff] %v4776_v61  ;;  %s4987_s19 = smov 120   ;;  %s4988_s9 = smov 104   ;;  %v4788_v21 = vphi %v5897_v21, %v8254_v21   ;;  %v4784_v3 = vphi %v5895_v3, %v8253_v3   ;;  %v4780_v63 = vphi %v5893_v63, %v8252_v63   ;;  %v4776_v61 = vphi %v5891_v61, %v8251_v61   ;;  %s4984_s18 = sphi %s5995_s18, %s8317_s18   ;;  %v4964_v56 = vphi %v5985_v56, %v8300_v56   ;;  %v4960_v22 = vphi %v5983_v22, %v8297_v22   ;;  %v4956_v39 = vphi %v5981_v39, %v8295_v39   ;;  %v4952_v11 = vphi %v5979_v11, %v8293_v11   ;;  %v4948_v4 = vphi %v5977_v4, %v3103_v4   ;;  %v4944_v44 = vphi %v5975_v44, %v3104_v44   ;;  %v4940_v17 = vphi %v5973_v17, %v8292_v17   ;;  %v4936_v62 = vphi %v5971_v62, %v8291_v62   ;;  %v4932_v8 = vphi %v5969_v8, %v8290_v8   ;;  %v4928_v7 = vphi %v5967_v7, %v8289_v7   ;;  %v4924_v15 = vphi %v5965_v15, %v8288_v15   ;;  %v4920_v9 = vphi %v5963_v9, %v8287_v9   ;;  %v4916_v31 = vphi %v5961_v31, %v8286_v31   ;;  %v4912_v48 = vphi %v5959_v48, %v8285_v48   ;;  %v4908_v10 = vphi %v5957_v10, %v8284_v10   ;;  %v4904_v26 = vphi %v5955_v26, %v8283_v26   ;;  %v4900_v6 = vphi %v5953_v6, %v8282_v6   ;;  %v4896_v0 = vphi %v5951_v0, %v8281_v0   ;;  %v4892_v42 = vphi %v5949_v42, %v8280_v42   ;;  %v4888_v54 = vphi %v5947_v54, %v8279_v54   ;;  %v4884_v1 = vphi %v5945_v1, %v8278_v1   ;;  %v4880_v52 = vphi %v5943_v52, %v8277_v52   ;;  %v4876_v41 = vphi %v5941_v41, %v8276_v41   ;;  %v4872_v40 = vphi %v5939_v40, %v8275_v40   ;;  %v4868_v38 = vphi %v5937_v38, %v8274_v38   ;;  %v4864_v37 = vphi %v5935_v37, %v8273_v37   ;;  %v4860_v20 = vphi %v5933_v20, %v8272_v20   ;;  %v4856_v19 = vphi %v5931_v19, %v8271_v19   ;;  %v4852_v13 = vphi %v5929_v13, %v8270_v13   ;;  %v4848_v53 = vphi %v5927_v53, %v8269_v53   ;;  %v4844_v30 = vphi %v5925_v30, %v8268_v30   ;;  %v4840_v36 = vphi %v5923_v36, %v8267_v36   ;;  %v4836_v47 = vphi %v5921_v47, %v8266_v47   ;;  %v4832_v16 = vphi %v5919_v16, %v8265_v16   ;;  %v4828_v43 = vphi %v5917_v43, %v8264_v43   ;;  %v4824_v5 = vphi %v5915_v5, %v8263_v5   ;;  %v4820_v60 = vphi %v5913_v60, %v8262_v60   ;;  %v4816_v18 = vphi %v5911_v18, %v8261_v18   ;;  %v4812_v2 = vphi %v5909_v2, %v8260_v2   ;;  %v4808_v46 = vphi %v5907_v46, %v8259_v46   ;;  %v4804_v12 = vphi %v5905_v12, %v8258_v12   ;;  %v4800_v49 = vphi %v5903_v49, %v8257_v49   ;;  %v4796_v50 = vphi %v5901_v50, %v8256_v50   ;;  %v4792_v45 = vphi %v5899_v45, %v8255_v45  }
 0x134   : > { %v7954_v14 = vld [vmem:[#allocation101_spill] sm:$0xff]  ;;  %7956 = vst [vmem:[#allocation132_spill] sm:$0xff] %v4780_v63  ;;  %v7979_v57 = vld [vmem:[#allocation127_spill] sm:$0xff]  ;;  %v7980_v58 = vld [vmem:[#allocation128_spill] sm:$0xff]  ;;  %s4989_s13 = smov 112   ;;  %s4990_s3 = smov 96  }
 0x135   : > { %7957 = vst [vmem:[#allocation133_spill] sm:$0xff] %v4784_v3  ;;  %v7981_v59 = vld [vmem:[#allocation129_spill] sm:$0xff]  ;;  %v7982_v32 = vld [vmem:[#allocation130_spill] sm:$0xff]  ;;  %v7983_v29 = vld [vmem:[#allocation8_spill] sm:$0xff]  ;;  %vm452_vm8 = vcmask 64512   ;;  %vm605_vm9 = vcmask 130048   ;;  %s396_s27 = scvt.s32.f32 %s4984_s18 }
 0x136   : > { %7958 = vst [vmem:[#allocation134_spill] sm:$0xff] %v4788_v21  ;;  %v7984_v25 = vld [vmem:[#allocation5_spill] sm:$0xff]  ;;  %v7988_v24 = vld [vmem:[#allocation4_spill] sm:$0xff]  ;;  %v7989_v23 = vld [vmem:[#allocation3_spill] sm:$0xff]  ;;  %s4991_s7 = smov 64   ;;  %s4992_s25 = smov 8  }
 0x137   : > { %7959 = vst [vmem:[#allocation135_spill] sm:$0xff] %v4792_v45  ;;  %v7991_v51 = vld [vmem:[#allocation21_spill] sm:$0xff]  ;;  %v7992_v35 = vld [vmem:[#allocation12_spill] sm:$0xff]  ;;  %v7993_v34 = vld [vmem:[#allocation11_spill] sm:$0xff]  ;;  %s4993_s0 = smov 16   ;;  %s4994_s26 = smov 24  }
 0x138   : > { %7960 = vst [vmem:[#allocation136_spill] sm:$0xff] %v4796_v50  ;;  %vm862_vm10 = vcmask 195584   ;;  %vm985_vm2 = vcmask 523264   ;;  %s343_s14 = sadd.s32 1, %s4984_s18  }
 0x139   : > { %7961 = vst [vmem:[#allocation137_spill] sm:$0xff] %v4800_v49  ;;  %p7297_p0 = scmp.ge.s32.totalorder %s343_s14, 4   ;;  %s8317_s18 = smov %s343_s14 }
 0x13a   : > { %7962 = vst [vmem:[#allocation138_spill] sm:$0xff] %v4804_v12  ;;  %s4996_s29 = smov (%p7297_p0), 24   ;;  %s4997_s10 = smov (%p7297_p0), 8  }
 0x13b   : > { %7963 = vst [vmem:[#allocation139_spill] sm:$0xff] %v4808_v46  ;;  %s4998_s8 = smov (%p7297_p0), 40   ;;  %s4999_s1 = smov (%p7297_p0), 32  }
 0x13c   : > { %7964 = vst [vmem:[#allocation140_spill] sm:$0xff] %v4816_v18  ;;  %s5000_s12 = smov (%p7297_p0), 16   ;;  %s8331_s21 = sld [smem:[#allocation204_spill]] (%p7297_p0) }
 0x13d   : > { %7965 = vst [vmem:[#allocation141_spill] sm:$0xff] %v4832_v16  ;;  %s5001_s22 = smov (%p7297_p0), 48   ;;  %s5002_s5 = smov (%p7297_p0), 64  }
 0x13e   : > { %7966 = vst [vmem:[#allocation142_spill] sm:$0xff] %v4836_v47  ;;  %s5003_s16 = smov (%p7297_p0), 56   ;;  %s5004_s23 = smov (%p7297_p0), 72  }
 0x13f   : > { %7967 = vst [vmem:[#allocation143_spill] sm:$0xff] %v4904_v26  ;;  %v7985_v26 = vpack.c.bf16 %v7983_v29, %v7984_v25  ;;  %s5005_s11 = smov (%p7297_p0), 88   ;;  %s5006_s2 = smov (%p7297_p0), 80  }
 0x140   : > { %7968 = vst [vmem:[#allocation144_spill] sm:$0xff] %v4908_v10  ;;  %v7990_v10 = vpack.c.bf16 %v7988_v24, %v7989_v23  ;;  %s5007_s17 = smov (%p7297_p0), 96   ;;  %s5008_s24 = smov (%p7297_p0), 120  }
 0x141   : > { %7969 = vst [vmem:[#allocation145_spill] sm:$0xff] %v4912_v48  ;;  %426 = vmatpush.bf16.msra.mxu0 %v7985_v26  ;;  %s5009_s18 = smov (%p7297_p0), 104  }
 0x142   : > { %7970 = vst [vmem:[#allocation146_spill] sm:$0xff] %v4916_v31 }
 0x143   : > { %7971 = vst [vmem:[#allocation147_spill] sm:$0xff] %v4920_v9 }
 0x144   : > { %7972 = vst [vmem:[#allocation148_spill] sm:$0xff] %v4924_v15 }
 0x145   : > { %7973 = vst [vmem:[#allocation149_spill] sm:$0xff] %v4944_v44  ;;  %v6161_v44 = vpack.c.bf16 %v7954_v14, %v7953_v55  ;;  %427 = vmatpush.bf16.msra.mxu0 %v7990_v10 }
 0x146   : > { %7974 = vst [vmem:[#allocation150_spill] sm:$0xff] %v4948_v4  ;;  %v415_v4 = vperm.slane %v7991_v51, 0 }
 0x147   : > { %7975 = vst [vmem:[#allocation151_spill] sm:$0xff] %v4952_v11  ;;  %v7987_v33 = vmov %v6161_v44 }
 0x148   : > { %7976 = vst [vmem:[#allocation152_spill] sm:$0xff] %v4956_v39  ;;  %3648 = vmatmul.msk.bf16.vlgmr.msra.gmra.mxu0 %vm276_vm0, %v7987_v33 }
 0x149   : > { %7977 = vst [vmem:[#allocation153_spill] sm:$0xff] %v4960_v22 }
 0x14a   : > { %7978 = vst [vmem:[#allocation154_spill] sm:$0xff] %v4964_v56 }
 0x14b   : > { %7986 = vst [vmem:[#allocation155_spill] sm:$0xff] %v6161_v44 }
 0x1c5   : > { %v429_v48 = vpop.f32.mrf.mxu0 }
 0x1c6   : > { %v6169_v31 = vadd.f32 %v429_v48, %v415_v4 }
 0x1c8   : > { %436 = vrot.lane.b32.xlu1 %v6169_v31, %s4987_s19 }
 0x1cd   : > { %v431_v26 = vpop.f32.mrf.mxu0 }
 0x1ce   : > { %v6173_v25 = vadd.f32 %v431_v26, %v415_v4 }
 0x1d0   : > { %446 = vrot.lane.b32.xlu2 %v6173_v25, %s4988_s9  ;;  %438 = vrot.lane.b32.xlu0 %v6173_v25, %s4987_s19 }
 0x1d1   : > { %440 = vrot.lane.b32.xlu1 %v6169_v31, %s4989_s13 }
 0x1d8   : > { %442 = vrot.lane.b32.xlu0 %v6173_v25, %s4989_s13  ;;  %444 = vrot.lane.b32.xlu2 %v6169_v31, %s4988_s9 }
 0x22a   : > { %v6203_v26 = vpop.permute.xlu2 %446 }
 0x232   : > { %v6209_v23 = vpop.permute.xlu2 %444 }
 0x23a   : > { %v6185_v10 = vpop.permute.xlu1 %436 }
 0x23b   : > { %484 = vrot.lane.b32.xlu2 %v6185_v10, %s4990_s3 }
 0x242   : > { %v6189_v44 = vpop.permute.xlu0 %438 }
 0x243   : > { %486 = vrot.lane.b32.xlu0 %v6189_v44, %s4990_s3  ;;  %448 = vrot.lane.b32.xlu2 %v6169_v31, %s4990_s3  ;;  %v6195_v48 = vpop.permute.xlu1 %440 }
 0x24a   : > { %v6197_v4 = vpop.permute.xlu0 %442 }
 0x24b   : > { %521 = vrot.lane.b32.xlu1 %v6197_v4, %s4990_s3  ;;  %519 = vrot.lane.b32.xlu0 %v6195_v48, %s4990_s3 }
 0x253   : > { %450 = vrot.lane.b32.xlu1 %v6173_v25, %s4990_s3  ;;  %556 = vrot.lane.b32.xlu0 %v6203_v26, %s4990_s3 }
 0x25b   : > { %554 = vrot.lane.b32.xlu1 %v6209_v23, %s4990_s3 }
 0x295   : > { %v485_v29 = vpop.permute.xlu2 %484 }
 0x2b5   : > { %v487_v24 = vpop.permute.xlu0 %486 }
 0x2b6   : > { %3653 = vmatpush.xpose.msk.msra.mxu2 %vm452_vm8, %v487_v24 }
 0x2ba   : > { %3654 = vmatpush.xpose.msk.msra.mxu2 %vm452_vm8, %v485_v29  ;;  %v449_v29 = vpop.permute.xlu2 %448 }
 0x2bd   : > { %3655 = vmatmul.msk.f32.vlgmr.msra.gmra.mxu2 %vm452_vm8, %v6185_v10  ;;  %v522_v51 = vpop.permute.xlu1 %521  ;;  %v520_v33 = vpop.permute.xlu0 %519 }
 0x2be   : > { %3657 = vmatpush.xpose.msk.msra.mxu3 %vm452_vm8, %v522_v51 }
 0x2c2   : > { %3658 = vmatpush.xpose.msk.msra.mxu3 %vm452_vm8, %v520_v33 }
 0x2c5   : > { %3656 = vmatmul.msk.f32.gmra.mxu2 %vm452_vm8, %v6189_v44  ;;  %v451_v11 = vpop.permute.xlu1 %450  ;;  %3659 = vmatmul.msk.f32.vlgmr.msra.gmra.mxu3 %vm452_vm8, %v6195_v48  ;;  %v557_v24 = vpop.permute.xlu0 %556 }
 0x2c6   : > { %3649 = vmatpush.xpose.msk.msra.mxu1 %vm452_vm8, %v451_v11  ;;  %3661 = vmatpush.xpose.msk.msrb.mxu0 %vm452_vm8, %v557_v24 }
 0x2ca   : > { %3650 = vmatpush.xpose.msk.msra.mxu1 %vm452_vm8, %v449_v29 }
 0x2cd   : > { %3651 = vmatmul.msk.f32.vlgmr.msra.gmra.mxu1 %vm452_vm8, %v6169_v31  ;;  %v555_v33 = vpop.permute.xlu1 %554  ;;  %3660 = vmatmul.msk.f32.gmra.mxu3 %vm452_vm8, %v6197_v4 }
 0x2ce   : > { %3777 = vmatpush.xpose.msk.msrb.mxu1 %vm452_vm8, %v557_v24  ;;  %3662 = vmatpush.xpose.msk.msrb.mxu0 %vm452_vm8, %v555_v33 }
 0x2d1   : > { %3663 = vmatmul.msk.f32.vlgmr.msrb.gmra.mxu0 %vm452_vm8, %v6209_v23 }
 0x2d2   : > { %3778 = vmatpush.xpose.msk.msrb.mxu1 %vm452_vm8, %v555_v33 }
 0x2d5   : > { %3652 = vmatmul.msk.f32.gmra.mxu1 %vm452_vm8, %v6173_v25 }
 0x2dd   : > { %3664 = vmatmul.msk.f32.vlgmr.msrb.gmra.mxu1 %vm452_vm8, %v6203_v26 }
 0x340   : > { %v513_v51 = vpop.f32.mrf.mxu2 }
 0x341   : > { %v591_v50 = vmul.f32 0.35355338, %v513_v51 }
 0x348   : > { %v516_v29 = vpop.f32.mrf.mxu2  ;;  %v548_v49 = vpop.f32.mrf.mxu3 }
 0x349   : > { %v592_v33 = vmul.f32 0.35355338, %v516_v29  ;;  %v599_v29 = vadd.f32 %v591_v50, %v7952_v27 }
 0x34a   : > { %v478_v11 = vpop.f32.mrf.mxu1 }
 0x34b   : > { %v589_v24 = vmul.f32 0.35355338, %v478_v11  ;;  %v600_v63 = vadd.f32 %v592_v33, %v7951_v28 }
 0x34d   : > { %v6240_v39 = vadd.f32 %v589_v24, %v7952_v27 }
 0x34e   : > { %v583_v61 = vpop.f32.mrf.mxu0 }
 0x34f   : > { %v595_v12 = vmul.f32 0.35355338, %v583_v61  ;;  %v606_v3 = vsel %vm605_vm9, %v6240_v39, -inf  ;;  %v615_v61 = vsel %vm605_vm9, %v600_v63, -inf }
 0x350   : > { %607 = vmax.xlane.f32.xlu1 %v606_v3  ;;  %v551_v15 = vpop.f32.mrf.mxu3 }
 0x351   : > { %v603_v45 = vadd.f32 %v595_v12, %v7952_v27  ;;  %v594_v51 = vmul.f32 0.35355338, %v551_v15 }
 0x352   : > { %v481_v21 = vpop.f32.mrf.mxu1 }
 0x353   : > { %v590_v11 = vmul.f32 0.35355338, %v481_v21  ;;  %v624_v9 = vsel %vm605_vm9, %v603_v45, -inf  ;;  %v612_v21 = vsel %vm605_vm9, %v599_v29, -inf  ;;  %v602_v50 = vadd.f32 %v594_v51, %v7951_v28 }
 0x354   : > { %625 = vmax.xlane.f32.xlu2 %v624_v9 }
 0x355   : > { %v6248_v24 = vadd.f32 %v590_v11, %v7951_v28  ;;  %v593_v11 = vmul.f32 0.35355338, %v548_v49 }
 0x357   : > { %v609_v3 = vsel %vm605_vm9, %v6248_v24, -inf  ;;  %v601_v56 = vadd.f32 %v593_v11, %v7952_v27 }
 0x358   : > { %616 = vmax.xlane.f32.xlu1 %v615_v61  ;;  %610 = vmax.xlane.f32.xlu0 %v609_v3  ;;  %v621_v61 = vsel %vm605_vm9, %v602_v50, -inf  ;;  %v4254_v3 = vpack.i.bf16 %v6209_v23, %v6203_v26 }
 0x359   : > { %v618_v15 = vsel %vm605_vm9, %v601_v56, -inf }
 0x35a   : > { %v586_v12 = vpop.f32.mrf.mxu1 }
 0x35b   : > { %v596_v33 = vmul.f32 0.35355338, %v586_v12 }
 0x35c   : > { %613 = vmax.xlane.f32.xlu2 %v612_v21 }
 0x35d   : > { %v6256_v9 = vadd.f32 %v596_v33, %v7951_v28 }
 0x35f   : > { %v627_v22 = vsel %vm605_vm9, %v6256_v9, -inf }
 0x360   : > { %628 = vmax.xlane.f32.xlu0 %v627_v22 }
 0x364   : > { %622 = vmax.xlane.f32.xlu2 %v621_v61 }
 0x368   : > { %619 = vmax.xlane.f32.xlu0 %v618_v15 }
 0x37c   : > { %4255 = vrot.lane.b32.xlu0 %v4254_v3, %s4991_s7 }
 0x3c3   : > { %v608_v49 = vpop.xlane.xlu1 %607 }
 0x3c7   : > { %v626_v12 = vpop.xlane.xlu2 %625 }
 0x3c8   : > { %v636_v51 = vsub.f32 %v603_v45, %v626_v12 }
 0x3ca   : > { %v650_v33 = vmul.f32 1.442695, %v636_v51 }
 0x3cb   : > { %v617_v21 = vpop.xlane.xlu1 %616  ;;  %v611_v22 = vpop.xlane.xlu0 %610 }
 0x3cc   : > { %4384 = vpow2.f32 %v650_v33  ;;  %v633_v11 = vsub.f32 %v600_v63, %v617_v21 }
 0x3ce   : > { %v644_v16 = vmul.f32 1.442695, %v633_v11 }
 0x3cf   : > { %v614_v46 = vpop.xlane.xlu2 %613 }
 0x3d0   : > { %4386 = vpow2.f32 %v644_v16  ;;  %v632_v61 = vsub.f32 %v599_v29, %v614_v46 }
 0x3d2   : > { %v4385_v47 = vpop.eup %4384  ;;  %v642_v15 = vmul.f32 1.442695, %v632_v61 }
 0x3d3   : > { %v629_v18 = vpop.xlane.xlu0 %628  ;;  %v672_v23 = vsel %vm605_vm9, %v4385_v47, 0.0 }
 0x3d4   : > { %4388 = vpow2.f32 %v642_v15  ;;  %673 = vadd.xlane.f32.xlu1 %v672_v23 }
 0x3d6   : > { %v4387_v26 = vpop.eup %4386 }
 0x3d7   : > { %v623_v3 = vpop.xlane.xlu2 %622  ;;  %v663_v45 = vsel %vm605_vm9, %v4387_v26, 0.0 }
 0x3d8   : > { %v635_v12 = vsub.f32 %v602_v50, %v623_v3  ;;  %664 = vadd.xlane.f32.xlu0 %v663_v45  ;;  %v7994_v45 = vpack.c.bf16 %v7992_v35, %v7993_v34 }
 0x3da   : > { %v4389_v51 = vpop.eup %4388  ;;  %v648_v33 = vmul.f32 1.442695, %v635_v12  ;;  %v4259_v12 = vpack.i.bf16 %v6169_v31, %v6173_v25  ;;  %v630_v31 = vsub.f32 %v6240_v39, %v608_v49 }
 0x3db   : > { %v620_v63 = vpop.xlane.xlu0 %619  ;;  %v660_v21 = vsel %vm605_vm9, %v4389_v51, 0.0 }
 0x3dc   : > { %4390 = vpow2.f32 %v648_v33  ;;  %v634_v16 = vsub.f32 %v601_v56, %v620_v63  ;;  %661 = vadd.xlane.f32.xlu2 %v660_v21  ;;  %v4244_v56 = vpack.i.bf16 %v6197_v4, %v6189_v44  ;;  %v7995_v33 = vld [vmem:[#allocation10_spill] sm:$0xff]  ;;  %v7996_v63 = vld [vmem:[#allocation9_spill] sm:$0xff]  ;;  %v637_v44 = vsub.f32 %v6256_v9, %v629_v18 }
 0x3dd   : > { %v7997_v21 = vpack.c.bf16 %v7995_v33, %v7996_v63 }
 0x3de   : > { %v646_v46 = vmul.f32 1.442695, %v634_v16  ;;  %v4249_v16 = vpack.i.bf16 %v6195_v48, %v6185_v10  ;;  %v652_v4 = vmul.f32 1.442695, %v637_v44 }
 0x3e0   : > { %4392 = vpow2.f32 %v646_v46  ;;  %v631_v46 = vsub.f32 %v6248_v24, %v611_v22 }
 0x3e1   : > { %4394 = vpow2.f32 %v652_v4 }
 0x3e2   : > { %v6270_v29 = vpop.eup %4390 }
 0x3e3   : > { %v669_v11 = vsel %vm605_vm9, %v6270_v29, 0.0 }
 0x3e4   : > { %670 = vadd.xlane.f32.xlu0 %v669_v11  ;;  %v640_v11 = vmul.f32 1.442695, %v631_v46 }
 0x3e6   : > { %v6274_v61 = vpop.eup %4392  ;;  %4396 = vpow2.f32 %v640_v11 }
 0x3e7   : > { %v666_v50 = vsel %vm605_vm9, %v6274_v61, 0.0  ;;  %v6295_v25 = vpop.eup %4394 }
 0x3e8   : > { %667 = vadd.xlane.f32.xlu1 %v666_v50  ;;  %v675_v50 = vsel %vm605_vm9, %v6295_v25, 0.0 }
 0x3ec   : > { %v6300_v10 = vpop.eup %4396 }
 0x3ed   : > { %v657_v18 = vsel %vm605_vm9, %v6300_v10, 0.0 }
 0x3ee   : > { %v4256_v15 = vpop.permute.xlu0 %4255 }
 0x3ef   : > { %v4257_v23 = vunpack.i.l.bf16 %v4256_v15  ;;  %v4258_v3 = vunpack.i.h.bf16 %v4256_v15  ;;  %v638_v15 = vmul.f32 1.442695, %v630_v31 }
 0x3f1   : > { %825 = vmatpush.msra.mxu0 %v4257_v23  ;;  %4398 = vpow2.f32 %v638_v15 }
 0x3f3   : > { %826 = vmatpush.msra.mxu0 %v4258_v3 }
 0x3f4   : > { %4245 = vrot.lane.b32.xlu2 %v4244_v56, %s4991_s7 }
 0x3f5   : > { %1095 = vmatpush.bf16.msrb.mxu0 %v7994_v45 }
 0x3f7   : > { %v6304_v48 = vpop.eup %4398 }
 0x3f8   : > { %4260 = vrot.lane.b32.xlu0 %v4259_v12, %s4991_s7  ;;  %v654_v24 = vsel %vm605_vm9, %v6304_v48, 0.0 }
 0x3f9   : > { %1096 = vmatpush.bf16.msrb.mxu0 %v7997_v21 }
 0x401   : > { %4250 = vrot.lane.b32.xlu1 %v4249_v16, %s4991_s7 }
 0x41d   : > { %676 = vadd.xlane.f32.xlu2 %v675_v50  ;;  %v8004_v50 = vld [vmem:[#allocation27_spill] sm:$0xff] }
 0x422   : > { %658 = vadd.xlane.f32.xlu0 %v657_v18 }
 0x42b   : > { %655 = vadd.xlane.f32.xlu1 %v654_v24 }
 0x447   : > { %v674_v9 = vpop.xlane.xlu1 %673 }
 0x448   : > { %4400 = vrcp.f32 %v674_v9 }
 0x44b   : > { %v665_v39 = vpop.xlane.xlu0 %664 }
 0x44c   : > { %4402 = vrcp.f32 %v665_v39  ;;  %v8006_v39 = vld [vmem:[#allocation26_spill] sm:$0xff] }
 0x44e   : > { %v4401_v49 = vpop.eup %4400 }
 0x44f   : > { %v692_v22 = vmul.f32 %v4401_v49, %v4385_v47  ;;  %v662_v23 = vpop.xlane.xlu2 %661 }
 0x450   : > { %4404 = vrcp.f32 %v662_v23 }
 0x451   : > { %v6309_v41 = vadd.f32 %v4876_v41, %v692_v22   ;;  %3671 = vmatmul.msk.f32.vlgmr.msra.gmra.mxu0 %vm605_vm9, %v692_v22 }
 0x452   : > { %v4403_v3 = vpop.eup %4402 }
 0x453   : > { %7998 = vst [vmem:[#allocation156_spill] sm:$0xff] %v6309_v41  ;;  %v689_v56 = vmul.f32 %v4403_v3, %v4387_v26  ;;  %v8012_v3 = vld [vmem:[#allocation81_spill] sm:$0xff] }
 0x455   : > { %v6313_v54 = vadd.f32 %v4888_v54, %v689_v56  }
 0x456   : > { %v4405_v45 = vpop.eup %4404 }
 0x457   : > { %7999 = vst [vmem:[#allocation157_spill] sm:$0xff] %v6313_v54  ;;  %v4246_v12 = vpop.permute.xlu2 %4245  ;;  %v671_v63 = vpop.xlane.xlu0 %670  ;;  %v688_v21 = vmul.f32 %v4405_v45, %v4389_v51  ;;  %v8013_v45 = vld [vmem:[#allocation80_spill] sm:$0xff] }
 0x458   : > { %4406 = vrcp.f32 %v671_v63  ;;  %v4247_v16 = vunpack.i.l.bf16 %v4246_v12  ;;  %v4248_v44 = vunpack.i.h.bf16 %v4246_v12  ;;  %v8014_v12 = vpack.c.bf16 %v8012_v3, %v8013_v45  ;;  %v8015_v63 = vld [vmem:[#allocation52_spill] sm:$0xff] }
 0x459   : > { %v6316_v42 = vadd.f32 %v4892_v42, %v688_v21  }
 0x45a   : > { %755 = vmatpush.msrb.mxu2 %v4247_v16  ;;  %790 = vmatpush.msrb.mxu3 %v4248_v44  ;;  %v8016_v16 = vld [vmem:[#allocation46_spill] sm:$0xff] }
 0x45b   : > { %8000 = vst [vmem:[#allocation158_spill] sm:$0xff] %v6316_v42  ;;  %v668_v41 = vpop.xlane.xlu1 %667  ;;  %v8003_v42 = vld [vmem:[#allocation28_spill] sm:$0xff]  ;;  %v8017_v44 = vpack.c.bf16 %v8015_v63, %v8016_v16 }
 0x45c   : > { %4408 = vrcp.f32 %v668_v41  ;;  %v8005_v15 = vpack.c.bf16 %v8003_v42, %v8004_v50  ;;  %v8018_v41 = vld [vmem:[#allocation79_spill] sm:$0xff] }
 0x45e   : > { %v4407_v47 = vpop.eup %4406 }
 0x45f   : > { %v691_v26 = vmul.f32 %v4407_v47, %v6270_v29  ;;  %v8019_v47 = vld [vmem:[#allocation78_spill] sm:$0xff] }
 0x461   : > { %v6320_v52 = vadd.f32 %v4880_v52, %v691_v26  }
 0x462   : > { %v4409_v54 = vpop.eup %4408 }
 0x463   : > { %8001 = vst [vmem:[#allocation159_spill] sm:$0xff] %v6320_v52  ;;  %v690_v4 = vmul.f32 %v4409_v54, %v6274_v61  ;;  %v8007_v52 = vld [vmem:[#allocation25_spill] sm:$0xff]  ;;  %v8010_v61 = vld [vmem:[#allocation55_spill] sm:$0xff]  ;;  %v8020_v54 = vpack.c.bf16 %v8018_v41, %v8019_v47 }
 0x464   : > { %v8008_v49 = vpack.c.bf16 %v8006_v39, %v8007_v52 }
 0x465   : > { %v6324_v1 = vadd.f32 %v4884_v1, %v690_v4  }
 0x467   : > { %8002 = vst [vmem:[#allocation160_spill] sm:$0xff] %v6324_v1  ;;  %v8009_v1 = vld [vmem:[#allocation56_spill] sm:$0xff] }
 0x468   : > { %v8011_v22 = vpack.c.bf16 %v8009_v1, %v8010_v61 }
 0x46a   : > { %v4261_v46 = vpop.permute.xlu0 %4260 }
 0x46b   : > { %v4262_v11 = vunpack.i.l.bf16 %v4261_v46  ;;  %v4263_v31 = vunpack.i.h.bf16 %v4261_v46 }
 0x46d   : > { %720 = vmatpush.msra.mxu1 %v4262_v11  ;;  %v8024_v11 = vld [vmem:[#allocation74_spill] sm:$0xff] }
 0x46f   : > { %721 = vmatpush.msra.mxu1 %v4263_v31  ;;  %v8025_v31 = vld [vmem:[#allocation73_spill] sm:$0xff] }
 0x470   : > { %v8026_v42 = vpack.c.bf16 %v8024_v11, %v8025_v31 }
 0x471   : > { %878 = vmatpush.bf16.msrb.mxu1 %v8005_v15 }
 0x473   : > { %v4251_v18 = vpop.permute.xlu1 %4250 }
 0x474   : > { %v4252_v29 = vunpack.i.l.bf16 %v4251_v18  ;;  %v4253_v9 = vunpack.i.h.bf16 %v4251_v18 }
 0x475   : > { %879 = vmatpush.bf16.msrb.mxu1 %v8008_v49 }
 0x476   : > { %756 = vmatpush.msrb.mxu2 %v4252_v29  ;;  %791 = vmatpush.msrb.mxu3 %v4253_v9 }
 0x477   : > { %3667 = vmatmul.msk.f32.vlgmr.msrb.gmra.mxu2 %vm605_vm9, %v688_v21  ;;  %3669 = vmatmul.msk.f32.vlgmr.msrb.gmra.mxu3 %vm605_vm9, %v690_v4  ;;  %v8021_v21 = vld [vmem:[#allocation77_spill] sm:$0xff]  ;;  %v8022_v4 = vld [vmem:[#allocation75_spill] sm:$0xff] }
 0x478   : > { %955 = vmatpush.bf16.msra.mxu2 %v8011_v22  ;;  %993 = vmatpush.bf16.msra.mxu3 %v8014_v12  ;;  %v8023_v46 = vpack.c.bf16 %v8021_v21, %v8022_v4 }
 0x47c   : > { %956 = vmatpush.bf16.msra.mxu2 %v8017_v44  ;;  %994 = vmatpush.bf16.msra.mxu3 %v8020_v54 }
 0x47f   : > { %3668 = vmatmul.msk.f32.gmra.mxu2 %vm605_vm9, %v689_v56  ;;  %3670 = vmatmul.msk.f32.gmra.mxu3 %vm605_vm9, %v691_v26 }
 0x480   : > { %995 = vmatpush.bf16.msra.mxu3 %v8023_v46 }
 0x484   : > { %996 = vmatpush.bf16.msra.mxu3 %v8026_v42 }
 0x490   : > { %v677_v50 = vpop.xlane.xlu2 %676 }
 0x491   : > { %4410 = vrcp.f32 %v677_v50 }
 0x495   : > { %v659_v15 = vpop.xlane.xlu0 %658 }
 0x496   : > { %4412 = vrcp.f32 %v659_v15 }
 0x497   : > { %v4411_v18 = vpop.eup %4410 }
 0x498   : > { %v693_v29 = vmul.f32 %v4411_v18, %v6295_v25  ;;  %v8030_v18 = vld [vmem:[#allocation41_spill] sm:$0xff] }
 0x49a   : > { %3672 = vmatmul.msk.f32.gmra.mxu0 %vm605_vm9, %v693_v29  ;;  %v6357_v40 = vadd.f32 %v4872_v40, %v693_v29   ;;  %v867_v29 = vperm.slane %v8030_v18, 0 }
 0x49c   : > { %8027 = vst [vmem:[#allocation161_spill] sm:$0xff] %v6357_v40  ;;  %v4413_v56 = vpop.eup %4412 }
 0x49d   : > { %v687_v26 = vmul.f32 %v4413_v56, %v6300_v10 }
 0x49e   : > { %v656_v9 = vpop.xlane.xlu1 %655 }
 0x49f   : > { %4414 = vrcp.f32 %v656_v9  ;;  %v6361_v0 = vadd.f32 %v4896_v0, %v687_v26  }
 0x4a1   : > { %8028 = vst [vmem:[#allocation162_spill] sm:$0xff] %v6361_v0 }
 0x4a5   : > { %v4415_v39 = vpop.eup %4414 }
 0x4a6   : > { %v686_v52 = vmul.f32 %v4415_v39, %v6304_v48 }
 0x4a8   : > { %v6365_v6 = vadd.f32 %v4900_v6, %v686_v52   ;;  %3665 = vmatmul.msk.f32.vlgmr.msra.gmra.mxu1 %vm605_vm9, %v686_v52 }
 0x4aa   : > { %8029 = vst [vmem:[#allocation163_spill] sm:$0xff] %v6365_v6 }
 0x4b0   : > { %3666 = vmatmul.msk.f32.gmra.mxu1 %vm605_vm9, %v687_v26 }
 0x4ce   : > { %v828_v0 = vpop.f32.mrf.mxu0 }
 0x4fa   : > { %v758_v25 = vpop.f32.mrf.mxu2  ;;  %v793_v40 = vpop.f32.mrf.mxu3 }
 0x502   : > { %v761_v49 = vpop.f32.mrf.mxu2  ;;  %v796_v1 = vpop.f32.mrf.mxu3 }
 0x503   : > { %v4264_v10 = vpack.i.bf16 %v761_v49, %v758_v25  ;;  %v4269_v61 = vpack.i.bf16 %v796_v1, %v793_v40 }
 0x505   : > { %4265 = vrot.lane.b32.xlu2 %v4264_v10, %s4992_s25  ;;  %4270 = vrot.lane.b32.xlu1 %v4269_v61, %s4993_s0  ;;  %v8031_v10 = vld [vmem:[#allocation2_spill] sm:$0xff] }
 0x506   : > { %v8032_v34 = vmov %v8031_v10 }
 0x517   : > { %v831_v48 = vpop.f32.mrf.mxu0 }
 0x518   : > { %v4274_v22 = vpack.i.bf16 %v831_v48, %v828_v0 }
 0x51a   : > { %4275 = vrot.lane.b32.xlu0 %v4274_v22, %s4994_s26 }
 0x525   : > { %v723_v6 = vpop.f32.mrf.mxu1 }
 0x52d   : > { %v726_v41 = vpop.f32.mrf.mxu1 }
 0x55f   : > { %v4266_v3 = vpop.permute.xlu2 %4265 }
 0x560   : > { %v4268_v12 = vunpack.i.h.bf16 %v4266_v3  ;;  %v4267_v63 = vunpack.i.l.bf16 %v4266_v3 }
 0x562   : > { %v858_v54 = vsel %vm452_vm8, %v723_v6, %v4267_v63  ;;  %v859_v21 = vsel %vm452_vm8, %v726_v41, %v4268_v12 }
 0x577   : > { %v4271_v45 = vpop.permute.xlu1 %4270 }
 0x578   : > { %v4273_v16 = vunpack.i.h.bf16 %v4271_v45  ;;  %v4272_v44 = vunpack.i.l.bf16 %v4271_v45 }
 0x57a   : > { %v860_v11 = vsel %vm605_vm9, %v858_v54, %v4272_v44  ;;  %v861_v31 = vsel %vm605_vm9, %v859_v21, %v4273_v16 }
 0x58c   : > { %v4276_v47 = vpop.permute.xlu0 %4275 }
 0x58d   : > { %v4278_v4 = vunpack.i.h.bf16 %v4276_v47  ;;  %v4277_v46 = vunpack.i.l.bf16 %v4276_v47 }
 0x58f   : > { %v864_v42 = vsel %vm862_vm10, %v861_v31, %v4278_v4  ;;  %v863_v50 = vsel %vm862_vm10, %v860_v11, %v4277_v46 }
 0x590   : > { %v865_v15 = vpack.c.bf16 %v864_v42, %v863_v50 }
 0x592   : > { %3673 = vmatmul.msk.bf16.vlgmr.msrb.gmra.mxu1 %vm276_vm0, %v865_v15 }
 0x60f   : > { %v881_v56 = vpop.f32.mrf.mxu1 }
 0x610   : > { %v882_v26 = vadd.f32 %v881_v56, %v867_v29 }
 0x612   : > { %v886_v9 = vadd.f32 %v882_v26, %v7953_v55 }
 0x614   : > { %v888_v39 = vsel %vm276_vm0, %v886_v9, 0.0 }
 0x615   : > { %889 = vadd.xlane.f32.xlu2 %v888_v39 }
 0x617   : > { %v883_v52 = vpop.f32.mrf.mxu1 }
 0x618   : > { %v884_v25 = vadd.f32 %v883_v52, %v867_v29  ;;  %v8033_v52 = vld [vmem:[#allocation45_spill] sm:$0xff] }
 0x61a   : > { %v887_v40 = vadd.f32 %v884_v25, %v7954_v14  ;;  %v933_v25 = vperm.slane %v8033_v52, 0 }
 0x61c   : > { %v891_v49 = vsel %vm276_vm0, %v887_v40, 0.0 }
 0x61d   : > { %892 = vadd.xlane.f32.xlu1 %v891_v49 }
 0x688   : > { %v890_v1 = vpop.xlane.xlu2 %889 }
 0x689   : > { %v894_v61 = vmul.f32 %v890_v1, %v8031_v10 }
 0x68b   : > { %v896_v0 = vsub.f32 %v886_v9, %v894_v61  ;;  %v8034_v61 = vld [vmem:[#allocation50_spill] sm:$0xff] }
 0x68d   : > { %v898_v48 = vmul.f32 %v896_v0, %v896_v0 }
 0x68f   : > { %v900_v22 = vsel %vm276_vm0, %v898_v48, 0.0  ;;  %v938_v48 = vperm.slane %v8034_v61, 0 }
 0x690   : > { %v893_v6 = vpop.xlane.xlu1 %892  ;;  %901 = vadd.xlane.f32.xlu0 %v900_v22 }
 0x691   : > { %v895_v3 = vmul.f32 %v893_v6, %v8032_v34 }
 0x693   : > { %v897_v45 = vsub.f32 %v887_v40, %v895_v3 }
 0x695   : > { %v899_v12 = vmul.f32 %v897_v45, %v897_v45 }
 0x697   : > { %v903_v63 = vsel %vm276_vm0, %v899_v12, 0.0 }
 0x698   : > { %904 = vadd.xlane.f32.xlu2 %v903_v63  ;;  %v8035_v63 = vld [vmem:[#allocation69_spill] sm:$0xff] }
 0x703   : > { %v902_v16 = vpop.xlane.xlu0 %901 }
 0x704   : > { %v906_v44 = vmul.f32 %v902_v16, %v8032_v34  ;;  %v944_v16 = vperm.slane %v8035_v63, 0 }
 0x706   : > { %v908_v41 = vadd.f32 1e-12, %v906_v44 }
 0x708   : > { %4416 = vrsqrt.f32 %v908_v41  ;;  %vm916_vm12 = vweird.f32 %v908_v41 }
 0x70b   : > { %v905_v47 = vpop.xlane.xlu2 %904 }
 0x70c   : > { %v907_v54 = vmul.f32 %v905_v47, %v8032_v34 }
 0x70e   : > { %v4417_v21 = vpop.eup %4416  ;;  %v909_v4 = vadd.f32 1e-12, %v907_v54 }
 0x70f   : > { %v911_v46 = vmul.f32 %v4417_v21, %v908_v41  ;;  %vm917_vm11 = vweird.f32 %v4417_v21 }
 0x710   : > { %4418 = vrsqrt.f32 %v909_v4  ;;  %vm918_vm13 = vmor %vm916_vm12, %vm917_vm11  ;;  %vm926_vm15 = vweird.f32 %v909_v4 }
 0x711   : > { %v912_v11 = vmul.f32 %v4417_v21, %v911_v46 }
 0x713   : > { %v913_v31 = vmul.f32 0.5, %v912_v11 }
 0x715   : > { %v914_v42 = vsub.f32 1.5, %v913_v31 }
 0x716   : > { %v4419_v50 = vpop.eup %4418 }
 0x717   : > { %v915_v15 = vmul.f32 %v4417_v21, %v914_v42  ;;  %v921_v18 = vmul.f32 %v4419_v50, %v909_v4  ;;  %vm927_vm14 = vweird.f32 %v4419_v50 }
 0x718   : > { %vm928_vm1 = vmor %vm926_vm15, %vm927_vm14 }
 0x719   : > { %v922_v29 = vmul.f32 %v4419_v50, %v921_v18  ;;  %v919_v56 = vsel %vm918_vm13, %v4417_v21, %v915_v15 }
 0x71a   : > { %v930_v39 = vmul.f32 %v919_v56, %v896_v0 }
 0x71b   : > { %v923_v26 = vmul.f32 0.5, %v922_v29 }
 0x71c   : > { %v935_v10 = vmul.f32 %v933_v25, %v930_v39 }
 0x71d   : > { %v924_v9 = vsub.f32 1.5, %v923_v26 }
 0x71e   : > { %v940_v6 = vadd.f32 %v938_v48, %v935_v10 }
 0x71f   : > { %v925_v40 = vmul.f32 %v4419_v50, %v924_v9 }
 0x721   : > { %v929_v49 = vsel %vm928_vm1, %v4419_v50, %v925_v40 }
 0x722   : > { %v931_v1 = vmul.f32 %v929_v49, %v897_v45  ;;  %v8036_v49 = vld [vmem:[#allocation107_spill] sm:$0xff] }
 0x724   : > { %v936_v22 = vmul.f32 %v933_v25, %v931_v1  ;;  %v983_v1 = vperm.slane %v8036_v49, 0 }
 0x726   : > { %v941_v3 = vadd.f32 %v938_v48, %v936_v22 }
 0x728   : > { %v942_v12 = vpack.c.bf16 %v941_v3, %v940_v6 }
 0x72a   : > { %3674 = vmatmul.msk.bf16.vlgmr.msra.gmra.mxu2 %vm276_vm0, %v942_v12 }
 0x7ad   : > { %v958_v44 = vpop.f32.mrf.mxu2 }
 0x7ae   : > { %v959_v0 = vadd.f32 %v958_v44, %v944_v16 }
 0x7b0   : > { %v965_v41 = vmul.f32 0.044715, %v959_v0  ;;  %v963_v26 = vmul.f32 0.5, %v959_v0 }
 0x7b2   : > { %v967_v47 = vmul.f32 %v965_v41, %v959_v0 }
 0x7b4   : > { %v969_v54 = vmul.f32 %v967_v47, %v959_v0 }
 0x7b5   : > { %v960_v21 = vpop.f32.mrf.mxu2 }
 0x7b6   : > { %v971_v4 = vadd.f32 %v969_v54, %v959_v0  ;;  %v961_v46 = vadd.f32 %v960_v21, %v944_v16  ;;  %v397_v0 = vstv %s396_s27 }
 0x7b7   : > { %v409_v54 = vand.u32 2147483648, %v397_v0  ;;  %vm403_vm3 = vweird.f32 %v397_v0 }
 0x7b8   : > { %v966_v45 = vmul.f32 0.044715, %v961_v46  ;;  %v973_v11 = vmul.f32 0.7978846, %v971_v4  ;;  %v964_v9 = vmul.f32 0.5, %v961_v46 }
 0x7b9   : > { %v407_v4 = vand.u32 2147483647, %v397_v0 }
 0x7ba   : > { %v968_v31 = vmul.f32 %v966_v45, %v961_v46  ;;  %4420 = vtanh.f32 %v973_v11 }
 0x7bb   : > { %vm408_vm6 = vcmp.eq.f32.partialorder %v407_v4, 8.507059e+37  ;;  %v8038_v4 = vld [vmem:[#allocation115_spill] sm:$0xff] }
 0x7bc   : > { %v970_v42 = vmul.f32 %v968_v31, %v961_v46 }
 0x7be   : > { %v972_v50 = vadd.f32 %v970_v42, %v961_v46  ;;  %v410_v46 = vor.u32 1.1754944e-38, %v409_v54 }
 0x7c0   : > { %v974_v15 = vmul.f32 0.7978846, %v972_v50  ;;  %v4421_v18 = vpop.eup %4420 }
 0x7c1   : > { %v977_v29 = vadd.f32 1.0, %v4421_v18 }
 0x7c2   : > { %4422 = vtanh.f32 %v974_v15 }
 0x7c3   : > { %v979_v52 = vmul.f32 %v977_v29, %v963_v26  ;;  %4424 = vrcp.f32 %v397_v0 }
 0x7c8   : > { %v4423_v56 = vpop.eup %4422 }
 0x7c9   : > { %v978_v39 = vadd.f32 1.0, %v4423_v56  ;;  %v4425_v41 = vpop.eup %4424 }
 0x7ca   : > { %v399_v47 = vmul.f32 %v4425_v41, %v397_v0  ;;  %vm404_vm4 = vweird.f32 %v4425_v41 }
 0x7cb   : > { %v980_v25 = vmul.f32 %v978_v39, %v964_v9  ;;  %vm405_vm5 = vmor %vm403_vm3, %vm404_vm4 }
 0x7cc   : > { %v400_v21 = vsub.f32 1.0, %v399_v47 }
 0x7cd   : > { %v981_v40 = vpack.c.bf16 %v980_v25, %v979_v52 }
 0x7cf   : > { %3675 = vmatmul.msk.bf16.vlgmr.msra.gmra.mxu3 %vm985_vm2, %v981_v40 }
 0x852   : > { %v998_v10 = vpop.f32.mrf.mxu3 }
 0x853   : > { %v999_v61 = vadd.f32 %v998_v10, %v983_v1 }
 0x855   : > { %v1003_v48 = vadd.f32 %v999_v61, %v940_v6  ;;  %v401_v6 = vmul.f32 %v4425_v41, %v400_v21 }
 0x857   : > { %v1005_v22 = vsel %vm276_vm0, %v1003_v48, 0.0  ;;  %v402_v45 = vadd.f32 %v4425_v41, %v401_v6  ;;  %v1055_v6 = vperm.slane %v8038_v4, 0 }
 0x858   : > { %1006 = vadd.xlane.f32.xlu2 %v1005_v22 }
 0x85a   : > { %v1000_v12 = vpop.f32.mrf.mxu3 }
 0x85b   : > { %v1001_v63 = vadd.f32 %v1000_v12, %v983_v1 }
 0x85d   : > { %v1004_v16 = vadd.f32 %v1001_v63, %v941_v3  ;;  %v406_v3 = vsel %vm405_vm5, %v4425_v41, %v402_v45  ;;  %v8037_v41 = vld [vmem:[#allocation111_spill] sm:$0xff] }
 0x85e   : > { %v411_v42 = vsel %vm408_vm6, %v410_v46, %v406_v3  ;;  %v1050_v47 = vperm.slane %v8037_v41, 0 }
 0x85f   : > { %v1008_v44 = vsel %vm276_vm0, %v1004_v16, 0.0  ;;  %3785 = vpush %v411_v42 }
 0x860   : > { %1009 = vadd.xlane.f32.xlu1 %v1008_v44 }
 0x890   : > { %s3786_s20 = spop %3785 }
 0x8cb   : > { %v1007_v11 = vpop.xlane.xlu2 %1006 }
 0x8cc   : > { %v1011_v31 = vmul.f32 %v1007_v11, %v8032_v34 }
 0x8ce   : > { %v1013_v50 = vsub.f32 %v1003_v48, %v1011_v31 }
 0x8d0   : > { %v1015_v15 = vmul.f32 %v1013_v50, %v1013_v50 }
 0x8d2   : > { %v1017_v18 = vsel %vm276_vm0, %v1015_v15, 0.0 }
 0x8d3   : > { %v1010_v29 = vpop.xlane.xlu1 %1009  ;;  %1018 = vadd.xlane.f32.xlu2 %v1017_v18 }
 0x8d4   : > { %v1012_v56 = vmul.f32 %v1010_v29, %v8032_v34  ;;  %v7770_v29 = vmov 0.0  }
 0x8d6   : > { %v1014_v26 = vsub.f32 %v1004_v16, %v1012_v56 }
 0x8d8   : > { %v1016_v9 = vmul.f32 %v1014_v26, %v1014_v26 }
 0x8da   : > { %v1020_v39 = vsel %vm276_vm0, %v1016_v9, 0.0 }
 0x8db   : > { %1021 = vadd.xlane.f32.xlu0 %v1020_v39 }
 0x946   : > { %v1019_v52 = vpop.xlane.xlu2 %1018 }
 0x947   : > { %v1023_v25 = vmul.f32 %v1019_v52, %v8032_v34 }
 0x949   : > { %v1025_v40 = vadd.f32 1e-12, %v1023_v25 }
 0x94b   : > { %4426 = vrsqrt.f32 %v1025_v40  ;;  %vm1033_vm11 = vweird.f32 %v1025_v40 }
 0x94e   : > { %v1022_v49 = vpop.xlane.xlu0 %1021 }
 0x94f   : > { %v1024_v1 = vmul.f32 %v1022_v49, %v8032_v34  ;;  %v8049_v49 = vld [vmem:[#allocation22_spill] sm:$0xff] }
 0x951   : > { %v4427_v10 = vpop.eup %4426  ;;  %v1026_v61 = vadd.f32 1e-12, %v1024_v1  ;;  %v1084_v1 = vperm.slane %v8049_v49, 0 }
 0x952   : > { %v1028_v48 = vmul.f32 %v4427_v10, %v1025_v40  ;;  %vm1034_vm7 = vweird.f32 %v4427_v10 }
 0x953   : > { %4428 = vrsqrt.f32 %v1026_v61  ;;  %vm1035_vm12 = vmor %vm1033_vm11, %vm1034_vm7  ;;  %vm1043_vm14 = vweird.f32 %v1026_v61 }
 0x954   : > { %v1029_v22 = vmul.f32 %v4427_v10, %v1028_v48 }
 0x956   : > { %v1030_v12 = vmul.f32 0.5, %v1029_v22 }
 0x958   : > { %v1031_v63 = vsub.f32 1.5, %v1030_v12 }
 0x959   : > { %v4429_v16 = vpop.eup %4428 }
 0x95a   : > { %v1032_v44 = vmul.f32 %v4427_v10, %v1031_v63  ;;  %v1038_v0 = vmul.f32 %v4429_v16, %v1026_v61  ;;  %vm1044_vm13 = vweird.f32 %v4429_v16 }
 0x95b   : > { %vm1045_vm15 = vmor %vm1043_vm14, %vm1044_vm13 }
 0x95c   : > { %v1036_v54 = vsel %vm1035_vm12, %v4427_v10, %v1032_v44  ;;  %v1039_v21 = vmul.f32 %v4429_v16, %v1038_v0 }
 0x95d   : > { %v1047_v46 = vmul.f32 %v1036_v54, %v1013_v50 }
 0x95e   : > { %v1040_v45 = vmul.f32 0.5, %v1039_v21 }
 0x95f   : > { %v1052_v11 = vmul.f32 %v1050_v47, %v1047_v46 }
 0x960   : > { %v1041_v3 = vsub.f32 1.5, %v1040_v45 }
 0x961   : > { %v1057_v31 = vadd.f32 %v1055_v6, %v1052_v11 }
 0x962   : > { %v1042_v42 = vmul.f32 %v4429_v16, %v1041_v3 }
 0x963   : > { %v6408_v32 = vadd.f32 %v7982_v32, %v1057_v31 }
 0x964   : > { %v1046_v15 = vsel %vm1045_vm15, %v4429_v16, %v1042_v42 }
 0x965   : > { %8039 = vst [vmem:[#allocation130_spill] sm:$0xff] %v6408_v32  ;;  %v1048_v18 = vmul.f32 %v1046_v15, %v1014_v26  ;;  %vm1061_vm1 = vcmp.ge.f32.partialorder %v6408_v32, 1.0  ;;  %v6424_v26 = vstv %s3786_s20 }
 0x966   : > { %v6412_v56 = vsel %vm1061_vm1, 1.0, %v7770_v29 }
 0x967   : > { %8040 = vst [vmem:[#allocation164_spill] sm:$0xff] %v6412_v56  ;;  %v8041_v25 = vmov %v6412_v56  ;;  %v1053_v50 = vmul.f32 %v1050_v47, %v1048_v18 }
 0x968   : > { %v6422_v17 = vadd.f32 %v4940_v17, %v8041_v25  }
 0x969   : > { %v1058_v9 = vadd.f32 %v1055_v6, %v1053_v50 }
 0x96a   : > { %8043 = vst [vmem:[#allocation165_spill] sm:$0xff] %v6422_v17  ;;  %v8044_v55 = vmov %v6422_v17 }
 0x96b   : > { %v6417_v59 = vadd.f32 %v7981_v59, %v1058_v9  ;;  %v6437_v52 = vmul.f32 %v6424_v26, %v8044_v55 }
 0x96d   : > { %8042 = vst [vmem:[#allocation129_spill] sm:$0xff] %v6417_v59  ;;  %vm1062_vm3 = vcmp.ge.f32.partialorder %v6417_v59, 1.0 }
 0x96e   : > { %v6427_v39 = vsel %vm1062_vm3, 1.0, %v7770_v29 }
 0x96f   : > { %8045 = vst [vmem:[#allocation166_spill] sm:$0xff] %v6427_v39  ;;  %v8046_v24 = vmov %v6427_v39 }
 0x970   : > { %v6433_v62 = vadd.f32 %v4936_v62, %v8046_v24  }
 0x972   : > { %8047 = vst [vmem:[#allocation167_spill] sm:$0xff] %v6433_v62  ;;  %v8048_v14 = vmov %v6433_v62 }
 0x973   : > { %v6441_v40 = vmul.f32 %v6424_v26, %v8048_v14 }
 0x975   : > { %v1082_v17 = vpack.c.bf16 %v6441_v40, %v6437_v52 }
 0x977   : > { %3678 = vmatmul.msk.bf16.vlgmr.msrb.gmra.mxu0 %vm276_vm0, %v1082_v17 }
 0x9f4   : > { %v1098_v10 = vpop.f32.mrf.mxu0 }
 0x9f5   : > { %v6447_v61 = vadd.f32 %v1098_v10, %v1084_v1 }
 0x9f7   : > { %1105 = vrot.lane.b32.xlu0 %v6447_v61, %s4987_s19 }
 0x9fc   : > { %v1100_v62 = vpop.f32.mrf.mxu0 }
 0x9fd   : > { %v6451_v48 = vadd.f32 %v1100_v62, %v1084_v1 }
 0x9ff   : > { %1111 = vrot.lane.b32.xlu2 %v6451_v48, %s4989_s13  ;;  %1107 = vrot.lane.b32.xlu1 %v6451_v48, %s4987_s19 }
 0xa00   : > { %1115 = vrot.lane.b32.xlu0 %v6451_v48, %s4988_s9 }
 0xa07   : > { %1113 = vrot.lane.b32.xlu2 %v6447_v61, %s4988_s9  ;;  %1109 = vrot.lane.b32.xlu1 %v6447_v61, %s4989_s13 }
 0xa59   : > { %v6463_v22 = vpop.permute.xlu2 %1111 }
 0xa5a   : > { %1189 = vrot.lane.b32.xlu0 %v6463_v22, %s4990_s3 }
 0xa61   : > { %v6471_v63 = vpop.permute.xlu2 %1113 }
 0xa69   : > { %v6467_v12 = vpop.permute.xlu0 %1105 }
 0xa6a   : > { %1152 = vrot.lane.b32.xlu2 %v6467_v12, %s4990_s3 }
 0xa71   : > { %v6473_v16 = vpop.permute.xlu1 %1107 }
 0xa72   : > { %v6475_v44 = vpop.permute.xlu0 %1115  ;;  %1154 = vrot.lane.b32.xlu1 %v6473_v16, %s4990_s3  ;;  %1222 = vrot.lane.b32.xlu2 %v6471_v63, %s4990_s3 }
 0xa73   : > { %1224 = vrot.lane.b32.xlu0 %v6475_v44, %s4990_s3 }
 0xa79   : > { %v6483_v0 = vpop.permute.xlu1 %1109 }
 0xa7a   : > { %1187 = vrot.lane.b32.xlu1 %v6483_v0, %s4990_s3 }
 0xa7b   : > { %1117 = vrot.lane.b32.xlu0 %v6447_v61, %s4990_s3 }
 0xa82   : > { %1119 = vrot.lane.b32.xlu1 %v6451_v48, %s4990_s3 }
 0xac4   : > { %v1153_v47 = vpop.permute.xlu2 %1152 }
 0xacc   : > { %v1190_v41 = vpop.permute.xlu0 %1189  ;;  %v1223_v4 = vpop.permute.xlu2 %1222 }
 0xacd   : > { %3687 = vmatpush.xpose.msk.msrb.mxu3 %vm452_vm8, %v1190_v41 }
 0xae4   : > { %v1155_v54 = vpop.permute.xlu1 %1154 }
 0xae5   : > { %v1225_v21 = vpop.permute.xlu0 %1224  ;;  %3683 = vmatpush.xpose.msk.msrb.mxu2 %vm452_vm8, %v1155_v54 }
 0xae6   : > { %3691 = vmatpush.xpose.msk.msra.mxu0 %vm452_vm8, %v1225_v21 }
 0xae9   : > { %3684 = vmatpush.xpose.msk.msrb.mxu2 %vm452_vm8, %v1153_v47 }
 0xaea   : > { %3692 = vmatpush.xpose.msk.msra.mxu0 %vm452_vm8, %v1223_v4 }
 0xaec   : > { %v1188_v6 = vpop.permute.xlu1 %1187  ;;  %3685 = vmatmul.msk.f32.vlgmr.msrb.gmra.mxu2 %vm452_vm8, %v6467_v12 }
 0xaed   : > { %3693 = vmatmul.msk.f32.vlgmr.msra.gmra.mxu0 %vm452_vm8, %v6471_v63  ;;  %3688 = vmatpush.xpose.msk.msrb.mxu3 %vm452_vm8, %v1188_v6  ;;  %v1118_v45 = vpop.permute.xlu0 %1117 }
 0xaf0   : > { %3689 = vmatmul.msk.f32.vlgmr.msrb.gmra.mxu3 %vm452_vm8, %v6483_v0 }
 0xaf4   : > { %v1120_v46 = vpop.permute.xlu1 %1119  ;;  %3686 = vmatmul.msk.f32.gmra.mxu2 %vm452_vm8, %v6473_v16 }
 0xaf5   : > { %3694 = vmatmul.msk.f32.gmra.mxu0 %vm452_vm8, %v6475_v44  ;;  %3679 = vmatpush.xpose.msk.msra.mxu1 %vm452_vm8, %v1120_v46 }
 0xaf8   : > { %3690 = vmatmul.msk.f32.gmra.mxu3 %vm452_vm8, %v6463_v22 }
 0xaf9   : > { %3680 = vmatpush.xpose.msk.msra.mxu1 %vm452_vm8, %v1118_v45 }
 0xafc   : > { %3681 = vmatmul.msk.f32.vlgmr.msra.gmra.mxu1 %vm452_vm8, %v6447_v61 }
 0xb04   : > { %3682 = vmatmul.msk.f32.gmra.mxu1 %vm452_vm8, %v6451_v48 }
 0xb6a   : > { %v1251_v11 = vpop.f32.mrf.mxu0 }
 0xb6b   : > { %v1263_v3 = vmul.f32 0.35355338, %v1251_v11 }
 0xb6d   : > { %v1271_v31 = vadd.f32 %v1263_v3, %v7952_v27 }
 0xb6f   : > { %v1181_v42 = vpop.f32.mrf.mxu2  ;;  %v1291_v15 = vsel %vm605_vm9, %v1271_v31, -inf }
 0xb70   : > { %v1259_v18 = vmul.f32 0.35355338, %v1181_v42  ;;  %1292 = vmax.xlane.f32.xlu2 %v1291_v15 }
 0xb72   : > { %v1267_v56 = vadd.f32 %v1259_v18, %v7952_v27  ;;  %v1254_v45 = vpop.f32.mrf.mxu0 }
 0xb73   : > { %v1216_v50 = vpop.f32.mrf.mxu3  ;;  %v1264_v3 = vmul.f32 0.35355338, %v1254_v45 }
 0xb74   : > { %v1261_v9 = vmul.f32 0.35355338, %v1216_v50  ;;  %v1279_v17 = vsel %vm605_vm9, %v1267_v56, -inf }
 0xb75   : > { %v1272_v15 = vadd.f32 %v1264_v3, %v7951_v28 }
 0xb76   : > { %v1269_v39 = vadd.f32 %v1261_v9, %v7952_v27 }
 0xb77   : > { %v1184_v18 = vpop.f32.mrf.mxu2  ;;  %v1294_v9 = vsel %vm605_vm9, %v1272_v15, -inf }
 0xb78   : > { %1280 = vmax.xlane.f32.xlu2 %v1279_v17  ;;  %v1285_v49 = vsel %vm605_vm9, %v1269_v39, -inf  ;;  %v1260_v50 = vmul.f32 0.35355338, %v1184_v18 }
 0xb79   : > { %1286 = vmax.xlane.f32.xlu1 %v1285_v49  ;;  %v1146_v1 = vpop.f32.mrf.mxu1 }
 0xb7a   : > { %v1257_v10 = vmul.f32 0.35355338, %v1146_v1  ;;  %v1268_v17 = vadd.f32 %v1260_v50, %v7951_v28  ;;  %v4289_v1 = vpack.i.bf16 %v6471_v63, %v6475_v44 }
 0xb7b   : > { %v1219_v62 = vpop.f32.mrf.mxu3 }
 0xb7c   : > { %v6522_v41 = vadd.f32 %v1257_v10, %v7952_v27  ;;  %v1262_v47 = vmul.f32 0.35355338, %v1219_v62  ;;  %v1282_v49 = vsel %vm605_vm9, %v1268_v17, -inf }
 0xb7e   : > { %v1270_v54 = vadd.f32 %v1262_v47, %v7951_v28  ;;  %v1273_v21 = vsel %vm605_vm9, %v6522_v41, -inf }
 0xb80   : > { %1274 = vmax.xlane.f32.xlu2 %v1273_v21  ;;  %v1288_v4 = vsel %vm605_vm9, %v1270_v54, -inf }
 0xb81   : > { %1289 = vmax.xlane.f32.xlu1 %v1288_v4  ;;  %v1149_v6 = vpop.f32.mrf.mxu1 }
 0xb82   : > { %v1258_v46 = vmul.f32 0.35355338, %v1149_v6 }
 0xb84   : > { %v6529_v11 = vadd.f32 %v1258_v46, %v7951_v28 }
 0xb86   : > { %v1276_v42 = vsel %vm605_vm9, %v6529_v11, -inf }
 0xb87   : > { %1277 = vmax.xlane.f32.xlu0 %v1276_v42 }
 0xb8f   : > { %1295 = vmax.xlane.f32.xlu0 %v1294_v9 }
 0xb97   : > { %1283 = vmax.xlane.f32.xlu0 %v1282_v49 }
 0xbab   : > { %4290 = vrot.lane.b32.xlu0 %v4289_v1, %s4991_s7 }
 0xbe3   : > { %v1293_v10 = vpop.xlane.xlu2 %1292 }
 0xbe4   : > { %v1303_v62 = vsub.f32 %v1271_v31, %v1293_v10 }
 0xbe6   : > { %v1317_v47 = vmul.f32 1.442695, %v1303_v62 }
 0xbe8   : > { %4430 = vpow2.f32 %v1317_v47  ;;  %v4279_v47 = vpack.i.bf16 %v6463_v22, %v6473_v16 }
 0xbeb   : > { %v1281_v21 = vpop.xlane.xlu2 %1280 }
 0xbec   : > { %v1299_v4 = vsub.f32 %v1267_v56, %v1281_v21  ;;  %v1287_v6 = vpop.xlane.xlu1 %1286  ;;  %v4284_v21 = vpack.i.bf16 %v6483_v0, %v6467_v12  ;;  %v8050_v0 = vld [vmem:[#allocation16_spill] sm:$0xff] }
 0xbed   : > { %v1301_v46 = vsub.f32 %v1269_v39, %v1287_v6 }
 0xbee   : > { %v6540_v45 = vpop.eup %4430  ;;  %v1309_v3 = vmul.f32 1.442695, %v1299_v4 }
 0xbef   : > { %v1313_v42 = vmul.f32 1.442695, %v1301_v46  ;;  %v1339_v18 = vsel %vm605_vm9, %v6540_v45, 0.0 }
 0xbf0   : > { %4432 = vpow2.f32 %v1309_v3  ;;  %1340 = vadd.xlane.f32.xlu2 %v1339_v18  ;;  %v8051_v3 = vld [vmem:[#allocation15_spill] sm:$0xff] }
 0xbf1   : > { %4434 = vpow2.f32 %v1313_v42  ;;  %v8052_v42 = vpack.c.bf16 %v8050_v0, %v8051_v3 }
 0xbf3   : > { %v1275_v18 = vpop.xlane.xlu2 %1274 }
 0xbf4   : > { %v1290_v9 = vpop.xlane.xlu1 %1289 }
 0xbf5   : > { %v1302_v10 = vsub.f32 %v1270_v54, %v1290_v9 }
 0xbf6   : > { %v6544_v63 = vpop.eup %4432 }
 0xbf7   : > { %v6546_v44 = vpop.eup %4434  ;;  %v1327_v31 = vsel %vm605_vm9, %v6544_v63, 0.0  ;;  %v1315_v4 = vmul.f32 1.442695, %v1302_v10 }
 0xbf8   : > { %1328 = vadd.xlane.f32.xlu1 %v1327_v31  ;;  %v1333_v56 = vsel %vm605_vm9, %v6546_v44, 0.0  ;;  %v8053_v31 = vld [vmem:[#allocation14_spill] sm:$0xff] }
 0xbf9   : > { %1334 = vadd.xlane.f32.xlu2 %v1333_v56  ;;  %v8054_v56 = vld [vmem:[#allocation13_spill] sm:$0xff] }
 0xbfa   : > { %v1278_v39 = vpop.xlane.xlu0 %1277  ;;  %v8055_v9 = vpack.c.bf16 %v8053_v31, %v8054_v56 }
 0xc02   : > { %v1296_v50 = vpop.xlane.xlu0 %1295 }
 0xc0a   : > { %v1284_v49 = vpop.xlane.xlu0 %1283 }
 0xc0b   : > { %v1300_v1 = vsub.f32 %v1268_v17, %v1284_v49  ;;  %v1297_v49 = vsub.f32 %v6522_v41, %v1275_v18 }
 0xc0d   : > { %v1311_v62 = vmul.f32 1.442695, %v1300_v1  ;;  %v1304_v1 = vsub.f32 %v1272_v15, %v1296_v50  ;;  %v1305_v10 = vmul.f32 1.442695, %v1297_v49  ;;  %v1298_v15 = vsub.f32 %v6529_v11, %v1278_v39 }
 0xc0f   : > { %4436 = vpow2.f32 %v1311_v62  ;;  %v1319_v62 = vmul.f32 1.442695, %v1304_v1  ;;  %v1307_v50 = vmul.f32 1.442695, %v1298_v15  ;;  %v8063_v1 = vld [vmem:[#allocation88_spill] sm:$0xff]  ;;  %v8069_v15 = vld [vmem:[#allocation86_spill] sm:$0xff] }
 0xc10   : > { %4438 = vpow2.f32 %v1315_v4 }
 0xc11   : > { %4280 = vrot.lane.b32.xlu1 %v4279_v47, %s4991_s7  ;;  %4285 = vrot.lane.b32.xlu2 %v4284_v21, %s4991_s7  ;;  %4440 = vpow2.f32 %v1305_v10  ;;  %v4294_v47 = vpack.i.bf16 %v6447_v61, %v6451_v48 }
 0xc12   : > { %4442 = vpow2.f32 %v1319_v62  ;;  %v8065_v62 = vld [vmem:[#allocation58_spill] sm:$0xff] }
 0xc13   : > { %4444 = vpow2.f32 %v1307_v50 }
 0xc15   : > { %v6558_v6 = vpop.eup %4436 }
 0xc16   : > { %v1330_v17 = vsel %vm605_vm9, %v6558_v6, 0.0  ;;  %v6562_v54 = vpop.eup %4438 }
 0xc17   : > { %1331 = vadd.xlane.f32.xlu0 %v1330_v17  ;;  %v1336_v12 = vsel %vm605_vm9, %v6562_v54, 0.0  ;;  %v6576_v21 = vpop.eup %4440 }
 0xc18   : > { %v6578_v4 = vpop.eup %4442  ;;  %v1321_v17 = vsel %vm605_vm9, %v6576_v21, 0.0 }
 0xc19   : > { %v1342_v41 = vsel %vm605_vm9, %v6578_v4, 0.0 }
 0xc1d   : > { %v4291_v46 = vpop.permute.xlu0 %4290 }
 0xc1e   : > { %v4292_v22 = vunpack.i.l.bf16 %v4291_v46  ;;  %v4293_v16 = vunpack.i.h.bf16 %v4291_v46  ;;  %v6585_v46 = vpop.eup %4444 }
 0xc1f   : > { %1337 = vadd.xlane.f32.xlu0 %v1336_v12  ;;  %v1324_v61 = vsel %vm605_vm9, %v6585_v46, 0.0 }
 0xc20   : > { %1492 = vmatpush.msrb.mxu0 %v4292_v22 }
 0xc22   : > { %1493 = vmatpush.msrb.mxu0 %v4293_v16 }
 0xc24   : > { %1759 = vmatpush.bf16.msra.mxu0 %v8052_v42 }
 0xc28   : > { %1760 = vmatpush.bf16.msra.mxu0 %v8055_v9 }
 0xc33   : > { %4295 = vrot.lane.b32.xlu0 %v4294_v47, %s4991_s7  ;;  %v8066_v47 = vld [vmem:[#allocation57_spill] sm:$0xff] }
 0xc3a   : > { %1322 = vadd.xlane.f32.xlu2 %v1321_v17  ;;  %v8067_v17 = vpack.c.bf16 %v8065_v62, %v8066_v47 }
 0xc3b   : > { %1343 = vadd.xlane.f32.xlu1 %v1342_v41  ;;  %v8068_v41 = vld [vmem:[#allocation87_spill] sm:$0xff] }
 0xc3c   : > { %v8070_v50 = vpack.c.bf16 %v8068_v41, %v8069_v15 }
 0xc5d   : > { %1325 = vadd.xlane.f32.xlu0 %v1324_v61 }
 0xc63   : > { %v1341_v48 = vpop.xlane.xlu2 %1340 }
 0xc64   : > { %4446 = vrcp.f32 %v1341_v48 }
 0xc6a   : > { %v4447_v22 = vpop.eup %4446 }
 0xc6b   : > { %v1359_v12 = vmul.f32 %v4447_v22, %v6540_v45  ;;  %v1329_v16 = vpop.xlane.xlu1 %1328 }
 0xc6c   : > { %4448 = vrcp.f32 %v1329_v16  ;;  %v1335_v0 = vpop.xlane.xlu2 %1334  ;;  %v8072_v16 = vld [vmem:[#allocation84_spill] sm:$0xff] }
 0xc6d   : > { %v6591_v30 = vadd.f32 %v4844_v30, %v1359_v12   ;;  %4450 = vrcp.f32 %v1335_v0  ;;  %3701 = vmatmul.msk.f32.vlgmr.msrb.gmra.mxu0 %vm605_vm9, %v1359_v12  ;;  %v8071_v12 = vld [vmem:[#allocation85_spill] sm:$0xff] }
 0xc6e   : > { %v8073_v0 = vpack.c.bf16 %v8071_v12, %v8072_v16 }
 0xc6f   : > { %8056 = vst [vmem:[#allocation168_spill] sm:$0xff] %v6591_v30 }
 0xc72   : > { %v4449_v11 = vpop.eup %4448 }
 0xc73   : > { %v4451_v39 = vpop.eup %4450  ;;  %v1355_v3 = vmul.f32 %v4449_v11, %v6544_v63  ;;  %v8075_v11 = vld [vmem:[#allocation83_spill] sm:$0xff] }
 0xc74   : > { %v1357_v42 = vmul.f32 %v4451_v39, %v6546_v44  ;;  %v4286_v45 = vpop.permute.xlu2 %4285  ;;  %v8059_v44 = vld [vmem:[#allocation60_spill] sm:$0xff]  ;;  %v8076_v39 = vld [vmem:[#allocation82_spill] sm:$0xff] }
 0xc75   : > { %v6597_v20 = vadd.f32 %v4860_v20, %v1355_v3   ;;  %v4288_v30 = vunpack.i.h.bf16 %v4286_v45  ;;  %v4287_v9 = vunpack.i.l.bf16 %v4286_v45 }
 0xc76   : > { %v6600_v13 = vadd.f32 %v4852_v13, %v1357_v42  }
 0xc77   : > { %8057 = vst [vmem:[#allocation169_spill] sm:$0xff] %v6597_v20  ;;  %v8060_v20 = vld [vmem:[#allocation59_spill] sm:$0xff] }
 0xc78   : > { %8058 = vst [vmem:[#allocation170_spill] sm:$0xff] %v6600_v13  ;;  %v8061_v49 = vpack.c.bf16 %v8059_v44, %v8060_v20  ;;  %v8062_v13 = vld [vmem:[#allocation89_spill] sm:$0xff]  ;;  %v8082_v44 = vld [vmem:[#allocation30_spill] sm:$0xff] }
 0xc79   : > { %v8064_v10 = vpack.c.bf16 %v8062_v13, %v8063_v1 }
 0xc83   : > { %v4281_v18 = vpop.permute.xlu1 %4280 }
 0xc84   : > { %v4283_v31 = vunpack.i.h.bf16 %v4281_v18  ;;  %v4282_v56 = vunpack.i.l.bf16 %v4281_v18 }
 0xc86   : > { %1422 = vmatpush.msra.mxu2 %v4282_v56  ;;  %1457 = vmatpush.msra.mxu3 %v4283_v31  ;;  %v8079_v56 = vld [vmem:[#allocation32_spill] sm:$0xff] }
 0xc88   : > { %1423 = vmatpush.msra.mxu2 %v4287_v9  ;;  %1458 = vmatpush.msra.mxu3 %v4288_v30  ;;  %v8080_v30 = vld [vmem:[#allocation31_spill] sm:$0xff] }
 0xc89   : > { %3697 = vmatmul.msk.f32.vlgmr.msra.gmra.mxu2 %vm605_vm9, %v1355_v3  ;;  %3699 = vmatmul.msk.f32.vlgmr.msra.gmra.mxu3 %vm605_vm9, %v1357_v42  ;;  %v8077_v3 = vpack.c.bf16 %v8075_v11, %v8076_v39 }
 0xc8a   : > { %v1332_v63 = vpop.xlane.xlu0 %1331  ;;  %1621 = vmatpush.bf16.msrb.mxu2 %v8061_v49  ;;  %1658 = vmatpush.bf16.msrb.mxu3 %v8064_v10 }
 0xc8b   : > { %4452 = vrcp.f32 %v1332_v63 }
 0xc8e   : > { %1622 = vmatpush.bf16.msrb.mxu2 %v8067_v17  ;;  %1659 = vmatpush.bf16.msrb.mxu3 %v8070_v50 }
 0xc91   : > { %v4453_v61 = vpop.eup %4452 }
 0xc92   : > { %v1338_v48 = vpop.xlane.xlu0 %1337  ;;  %v1356_v22 = vmul.f32 %v4453_v61, %v6558_v6  ;;  %1660 = vmatpush.bf16.msrb.mxu3 %v8073_v0 }
 0xc93   : > { %4454 = vrcp.f32 %v1338_v48 }
 0xc94   : > { %3698 = vmatmul.msk.f32.gmra.mxu2 %vm605_vm9, %v1356_v22  ;;  %v6622_v19 = vadd.f32 %v4856_v19, %v1356_v22  }
 0xc96   : > { %8074 = vst [vmem:[#allocation171_spill] sm:$0xff] %v6622_v19  ;;  %1661 = vmatpush.bf16.msrb.mxu3 %v8077_v3  ;;  %v8081_v19 = vpack.c.bf16 %v8079_v56, %v8080_v30 }
 0xc99   : > { %v4455_v42 = vpop.eup %4454 }
 0xc9a   : > { %v1358_v45 = vmul.f32 %v4455_v42, %v6562_v54  ;;  %v8083_v54 = vld [vmem:[#allocation29_spill] sm:$0xff] }
 0xc9b   : > { %v8084_v20 = vpack.c.bf16 %v8082_v44, %v8083_v54 }
 0xc9c   : > { %3700 = vmatmul.msk.f32.gmra.mxu3 %vm605_vm9, %v1358_v45  ;;  %v6630_v53 = vadd.f32 %v4848_v53, %v1358_v45  }
 0xc9e   : > { %8078 = vst [vmem:[#allocation172_spill] sm:$0xff] %v6630_v53 }
 0xca5   : > { %v4296_v6 = vpop.permute.xlu0 %4295 }
 0xca6   : > { %v4297_v18 = vunpack.i.l.bf16 %v4296_v6  ;;  %v4298_v31 = vunpack.i.h.bf16 %v4296_v6 }
 0xca8   : > { %1387 = vmatpush.msrb.mxu1 %v4297_v18 }
 0xcaa   : > { %1388 = vmatpush.msrb.mxu1 %v4298_v31 }
 0xcac   : > { %1544 = vmatpush.bf16.msra.mxu1 %v8081_v19 }
 0xcad   : > { %v1323_v9 = vpop.xlane.xlu2 %1322 }
 0xcae   : > { %4456 = vrcp.f32 %v1323_v9  ;;  %v1344_v63 = vpop.xlane.xlu1 %1343  ;;  %v8088_v9 = vld [vmem:[#allocation42_spill] sm:$0xff] }
 0xcaf   : > { %4458 = vrcp.f32 %v1344_v63  ;;  %v1533_v63 = vperm.slane %v8088_v9, 0 }
 0xcb0   : > { %1545 = vmatpush.bf16.msra.mxu1 %v8084_v20 }
 0xcb4   : > { %v4457_v49 = vpop.eup %4456 }
 0xcb5   : > { %v4459_v13 = vpop.eup %4458  ;;  %v1353_v53 = vmul.f32 %v4457_v49, %v6576_v21 }
 0xcb6   : > { %v1360_v1 = vmul.f32 %v4459_v13, %v6578_v4 }
 0xcb7   : > { %v6641_v38 = vadd.f32 %v4868_v38, %v1353_v53   ;;  %3695 = vmatmul.msk.f32.vlgmr.msrb.gmra.mxu1 %vm605_vm9, %v1353_v53 }
 0xcb8   : > { %3702 = vmatmul.msk.f32.gmra.mxu0 %vm605_vm9, %v1360_v1  ;;  %v6646_v36 = vadd.f32 %v4840_v36, %v1360_v1  }
 0xcb9   : > { %8085 = vst [vmem:[#allocation173_spill] sm:$0xff] %v6641_v38 }
 0xcba   : > { %8086 = vst [vmem:[#allocation174_spill] sm:$0xff] %v6646_v36 }
 0xcd0   : > { %v1326_v10 = vpop.xlane.xlu0 %1325 }
 0xcd1   : > { %4460 = vrcp.f32 %v1326_v10 }
 0xcd7   : > { %v4461_v62 = vpop.eup %4460 }
 0xcd8   : > { %v1354_v47 = vmul.f32 %v4461_v62, %v6585_v46 }
 0xcda   : > { %3696 = vmatmul.msk.f32.gmra.mxu1 %vm605_vm9, %v1354_v47  ;;  %v6651_v37 = vadd.f32 %v4864_v37, %v1354_v47  }
 0xcdc   : > { %8087 = vst [vmem:[#allocation175_spill] sm:$0xff] %v6651_v37 }
 0xcea   : > { %v1495_v36 = vpop.f32.mrf.mxu0 }
 0xd0c   : > { %v1425_v21 = vpop.f32.mrf.mxu2  ;;  %v1460_v4 = vpop.f32.mrf.mxu3 }
 0xd17   : > { %v1428_v38 = vpop.f32.mrf.mxu2 }
 0xd18   : > { %v4299_v17 = vpack.i.bf16 %v1428_v38, %v1425_v21 }
 0xd1a   : > { %4300 = vrot.lane.b32.xlu1 %v4299_v17, %s4992_s25 }
 0xd1f   : > { %v1463_v41 = vpop.f32.mrf.mxu3 }
 0xd20   : > { %v4304_v15 = vpack.i.bf16 %v1463_v41, %v1460_v4 }
 0xd22   : > { %4305 = vrot.lane.b32.xlu2 %v4304_v15, %s4993_s0 }
 0xd34   : > { %v1390_v46 = vpop.f32.mrf.mxu1 }
 0xd35   : > { %v1498_v50 = vpop.f32.mrf.mxu0 }
 0xd36   : > { %v4309_v61 = vpack.i.bf16 %v1498_v50, %v1495_v36 }
 0xd38   : > { %4310 = vrot.lane.b32.xlu0 %v4309_v61, %s4994_s26 }
 0xd57   : > { %v1393_v16 = vpop.f32.mrf.mxu1 }
 0xd7c   : > { %v4306_v37 = vpop.permute.xlu2 %4305 }
 0xd7d   : > { %v4308_v39 = vunpack.i.h.bf16 %v4306_v37  ;;  %v4307_v3 = vunpack.i.l.bf16 %v4306_v37 }
 0xd8c   : > { %v4301_v48 = vpop.permute.xlu1 %4300 }
 0xd8d   : > { %v4303_v22 = vunpack.i.h.bf16 %v4301_v48  ;;  %v4302_v12 = vunpack.i.l.bf16 %v4301_v48 }
 0xd8f   : > { %v1525_v0 = vsel %vm452_vm8, %v1390_v46, %v4302_v12  ;;  %v1526_v11 = vsel %vm452_vm8, %v1393_v16, %v4303_v22 }
 0xd90   : > { %v1527_v18 = vsel %vm605_vm9, %v1525_v0, %v4307_v3  ;;  %v1528_v31 = vsel %vm605_vm9, %v1526_v11, %v4308_v39 }
 0xdaa   : > { %v4311_v42 = vpop.permute.xlu0 %4310 }
 0xdab   : > { %v4313_v45 = vunpack.i.h.bf16 %v4311_v42  ;;  %v4312_v6 = vunpack.i.l.bf16 %v4311_v42 }
 0xdad   : > { %v1530_v56 = vsel %vm862_vm10, %v1528_v31, %v4313_v45  ;;  %v1529_v30 = vsel %vm862_vm10, %v1527_v18, %v4312_v6 }
 0xdae   : > { %v1531_v19 = vpack.c.bf16 %v1530_v56, %v1529_v30  ;;  %v8089_v30 = vld [vmem:[#allocation47_spill] sm:$0xff] }
 0xdb0   : > { %3703 = vmatmul.msk.bf16.vlgmr.msra.gmra.mxu1 %vm276_vm0, %v1531_v19  ;;  %v1599_v19 = vperm.slane %v8089_v30, 0 }
 0xe2d   : > { %v1547_v44 = vpop.f32.mrf.mxu1 }
 0xe2e   : > { %v1548_v54 = vadd.f32 %v1547_v44, %v1533_v63 }
 0xe30   : > { %v1552_v20 = vadd.f32 %v1548_v54, %v6437_v52 }
 0xe32   : > { %v1554_v49 = vsel %vm276_vm0, %v1552_v20, 0.0 }
 0xe33   : > { %1555 = vadd.xlane.f32.xlu1 %v1554_v49 }
 0xe35   : > { %v1549_v13 = vpop.f32.mrf.mxu1 }
 0xe36   : > { %v1550_v53 = vadd.f32 %v1549_v13, %v1533_v63 }
 0xe38   : > { %v1553_v1 = vadd.f32 %v1550_v53, %v6441_v40 }
 0xe3a   : > { %v1557_v10 = vsel %vm276_vm0, %v1553_v1, 0.0 }
 0xe3b   : > { %1558 = vadd.xlane.f32.xlu2 %v1557_v10 }
 0xea6   : > { %v1556_v62 = vpop.xlane.xlu1 %1555 }
 0xea7   : > { %v1560_v47 = vmul.f32 %v1556_v62, %v8032_v34  ;;  %v8091_v62 = vld [vmem:[#allocation70_spill] sm:$0xff] }
 0xea9   : > { %v1562_v21 = vsub.f32 %v1552_v20, %v1560_v47  ;;  %v8090_v20 = vld [vmem:[#allocation51_spill] sm:$0xff]  ;;  %v1610_v47 = vperm.slane %v8091_v62, 0 }
 0xeaa   : > { %v1604_v49 = vperm.slane %v8090_v20, 0 }
 0xeab   : > { %v1564_v4 = vmul.f32 %v1562_v21, %v1562_v21 }
 0xead   : > { %v1566_v38 = vsel %vm276_vm0, %v1564_v4, 0.0 }
 0xeae   : > { %v1559_v17 = vpop.xlane.xlu2 %1558  ;;  %1567 = vadd.xlane.f32.xlu0 %v1566_v38 }
 0xeaf   : > { %v1561_v52 = vmul.f32 %v1559_v17, %v8032_v34 }
 0xeb1   : > { %v1563_v41 = vsub.f32 %v1553_v1, %v1561_v52 }
 0xeb3   : > { %v1565_v15 = vmul.f32 %v1563_v41, %v1563_v41 }
 0xeb5   : > { %v1569_v36 = vsel %vm276_vm0, %v1565_v15, 0.0 }
 0xeb6   : > { %1570 = vadd.xlane.f32.xlu1 %v1569_v36 }
 0xf21   : > { %v1568_v40 = vpop.xlane.xlu0 %1567 }
 0xf22   : > { %v1572_v50 = vmul.f32 %v1568_v40, %v8032_v34 }
 0xf24   : > { %v1574_v61 = vadd.f32 1e-12, %v1572_v50 }
 0xf26   : > { %4462 = vrsqrt.f32 %v1574_v61  ;;  %vm1582_vm5 = vweird.f32 %v1574_v61 }
 0xf29   : > { %v1571_v46 = vpop.xlane.xlu1 %1570 }
 0xf2a   : > { %v1573_v48 = vmul.f32 %v1571_v46, %v8032_v34 }
 0xf2c   : > { %v4463_v22 = vpop.eup %4462  ;;  %v1575_v12 = vadd.f32 1e-12, %v1573_v48 }
 0xf2d   : > { %v1577_v37 = vmul.f32 %v4463_v22, %v1574_v61  ;;  %vm1583_vm4 = vweird.f32 %v4463_v22 }
 0xf2e   : > { %4464 = vrsqrt.f32 %v1575_v12  ;;  %vm1584_vm6 = vmor %vm1582_vm5, %vm1583_vm4  ;;  %vm1592_vm11 = vweird.f32 %v1575_v12 }
 0xf2f   : > { %v1578_v16 = vmul.f32 %v4463_v22, %v1577_v37 }
 0xf31   : > { %v1579_v0 = vmul.f32 0.5, %v1578_v16 }
 0xf33   : > { %v1580_v11 = vsub.f32 1.5, %v1579_v0 }
 0xf34   : > { %v4465_v39 = vpop.eup %4464 }
 0xf35   : > { %v1581_v3 = vmul.f32 %v4463_v22, %v1580_v11  ;;  %v1587_v42 = vmul.f32 %v4465_v39, %v1575_v12  ;;  %vm1593_vm7 = vweird.f32 %v4465_v39 }
 0xf36   : > { %vm1594_vm12 = vmor %vm1592_vm11, %vm1593_vm7 }
 0xf37   : > { %v1588_v45 = vmul.f32 %v4465_v39, %v1587_v42  ;;  %v1585_v6 = vsel %vm1584_vm6, %v4463_v22, %v1581_v3 }
 0xf38   : > { %v1596_v56 = vmul.f32 %v1585_v6, %v1562_v21  ;;  %v8092_v6 = vld [vmem:[#allocation108_spill] sm:$0xff] }
 0xf39   : > { %v1589_v18 = vmul.f32 0.5, %v1588_v45 }
 0xf3a   : > { %v1601_v54 = vmul.f32 %v1599_v19, %v1596_v56 }
 0xf3b   : > { %v1590_v31 = vsub.f32 1.5, %v1589_v18  ;;  %v1649_v18 = vperm.slane %v8092_v6, 0 }
 0xf3c   : > { %v1606_v53 = vadd.f32 %v1604_v49, %v1601_v54 }
 0xf3d   : > { %v1591_v9 = vmul.f32 %v4465_v39, %v1590_v31 }
 0xf3f   : > { %v1595_v63 = vsel %vm1594_vm12, %v4465_v39, %v1591_v9 }
 0xf40   : > { %v1597_v44 = vmul.f32 %v1595_v63, %v1563_v41 }
 0xf42   : > { %v1602_v13 = vmul.f32 %v1599_v19, %v1597_v44 }
 0xf44   : > { %v1607_v1 = vadd.f32 %v1604_v49, %v1602_v13 }
 0xf46   : > { %v1608_v10 = vpack.c.bf16 %v1607_v1, %v1606_v53 }
 0xf48   : > { %3704 = vmatmul.msk.bf16.vlgmr.msrb.gmra.mxu2 %vm276_vm0, %v1608_v10 }
 0xfcb   : > { %v1624_v4 = vpop.f32.mrf.mxu2 }
 0xfcc   : > { %v1625_v21 = vadd.f32 %v1624_v4, %v1610_v47 }
 0xfce   : > { %v1631_v38 = vmul.f32 0.044715, %v1625_v21  ;;  %v1629_v0 = vmul.f32 0.5, %v1625_v21 }
 0xfd0   : > { %v1633_v17 = vmul.f32 %v1631_v38, %v1625_v21 }
 0xfd2   : > { %v1635_v52 = vmul.f32 %v1633_v17, %v1625_v21 }
 0xfd3   : > { %v1626_v15 = vpop.f32.mrf.mxu2 }
 0xfd4   : > { %v1637_v36 = vadd.f32 %v1635_v52, %v1625_v21  ;;  %v1627_v40 = vadd.f32 %v1626_v15, %v1610_v47 }
 0xfd6   : > { %v1632_v41 = vmul.f32 0.044715, %v1627_v40  ;;  %v1639_v50 = vmul.f32 0.7978846, %v1637_v36  ;;  %v1630_v11 = vmul.f32 0.5, %v1627_v40 }
 0xfd8   : > { %v1634_v61 = vmul.f32 %v1632_v41, %v1627_v40  ;;  %4466 = vtanh.f32 %v1639_v50 }
 0xfda   : > { %v1636_v46 = vmul.f32 %v1634_v61, %v1627_v40 }
 0xfdc   : > { %v1638_v48 = vadd.f32 %v1636_v46, %v1627_v40 }
 0xfde   : > { %v1640_v22 = vmul.f32 0.7978846, %v1638_v48  ;;  %v4467_v12 = vpop.eup %4466 }
 0xfdf   : > { %v1643_v37 = vadd.f32 1.0, %v4467_v12 }
 0xfe0   : > { %4468 = vtanh.f32 %v1640_v22 }
 0xfe1   : > { %v1645_v3 = vmul.f32 %v1643_v37, %v1629_v0 }
 0xfe6   : > { %v4469_v16 = vpop.eup %4468 }
 0xfe7   : > { %v1644_v39 = vadd.f32 1.0, %v4469_v16  ;;  %v8093_v16 = vld [vmem:[#allocation112_spill] sm:$0xff] }
 0xfe8   : > { %v1715_v0 = vperm.slane %v8093_v16, 0 }
 0xfe9   : > { %v1646_v42 = vmul.f32 %v1644_v39, %v1630_v11 }
 0xfeb   : > { %v1647_v45 = vpack.c.bf16 %v1646_v42, %v1645_v3  ;;  %v8094_v3 = vld [vmem:[#allocation116_spill] sm:$0xff] }
 0xfec   : > { %v1720_v42 = vperm.slane %v8094_v3, 0 }
 0xfed   : > { %3705 = vmatmul.msk.bf16.vlgmr.msrb.gmra.mxu3 %vm985_vm2, %v1647_v45 }
0x1070   : > { %v1663_v31 = vpop.f32.mrf.mxu3 }
0x1071   : > { %v1664_v56 = vadd.f32 %v1663_v31, %v1649_v18 }
0x1073   : > { %v1668_v30 = vadd.f32 %v1664_v56, %v1606_v53 }
0x1075   : > { %v1670_v19 = vsel %vm276_vm0, %v1668_v30, 0.0 }
0x1076   : > { %1671 = vadd.xlane.f32.xlu2 %v1670_v19 }
0x1078   : > { %v1665_v9 = vpop.f32.mrf.mxu3 }
0x1079   : > { %v1666_v63 = vadd.f32 %v1665_v9, %v1649_v18 }
0x107b   : > { %v1669_v44 = vadd.f32 %v1666_v63, %v1607_v1  ;;  %v8096_v63 = vmov 0.0  }
0x107d   : > { %v1673_v54 = vsel %vm276_vm0, %v1669_v44, 0.0 }
0x107e   : > { %1674 = vadd.xlane.f32.xlu1 %v1673_v54 }
0x10e9   : > { %v1672_v20 = vpop.xlane.xlu2 %1671 }
0x10ea   : > { %v1676_v49 = vmul.f32 %v1672_v20, %v8032_v34 }
0x10ec   : > { %v1678_v13 = vsub.f32 %v1668_v30, %v1676_v49 }
0x10ee   : > { %v1680_v10 = vmul.f32 %v1678_v13, %v1678_v13 }
0x10f0   : > { %v1682_v62 = vsel %vm276_vm0, %v1680_v10, 0.0 }
0x10f1   : > { %v1675_v47 = vpop.xlane.xlu1 %1674  ;;  %1683 = vadd.xlane.f32.xlu2 %v1682_v62  ;;  %v8106_v62 = vld [vmem:[#allocation23_spill] sm:$0xff] }
0x10f2   : > { %v1677_v53 = vmul.f32 %v1675_v47, %v8032_v34  ;;  %v1748_v47 = vperm.slane %v8106_v62, 0 }
0x10f4   : > { %v1679_v4 = vsub.f32 %v1669_v44, %v1677_v53 }
0x10f6   : > { %v1681_v21 = vmul.f32 %v1679_v4, %v1679_v4 }
0x10f8   : > { %v1685_v38 = vsel %vm276_vm0, %v1681_v21, 0.0 }
0x10f9   : > { %1686 = vadd.xlane.f32.xlu0 %v1685_v38 }
0x1164   : > { %v1684_v1 = vpop.xlane.xlu2 %1683 }
0x1165   : > { %v1688_v17 = vmul.f32 %v1684_v1, %v8032_v34 }
0x1167   : > { %v1690_v52 = vadd.f32 1e-12, %v1688_v17 }
0x1169   : > { %4470 = vrsqrt.f32 %v1690_v52  ;;  %vm1698_vm14 = vweird.f32 %v1690_v52 }
0x116c   : > { %v1687_v15 = vpop.xlane.xlu0 %1686 }
0x116d   : > { %v1689_v36 = vmul.f32 %v1687_v15, %v8032_v34 }
0x116f   : > { %v4471_v40 = vpop.eup %4470  ;;  %v1691_v41 = vadd.f32 1e-12, %v1689_v36 }
0x1170   : > { %v1693_v50 = vmul.f32 %v4471_v40, %v1690_v52  ;;  %vm1699_vm13 = vweird.f32 %v4471_v40 }
0x1171   : > { %4472 = vrsqrt.f32 %v1691_v41  ;;  %vm1700_vm15 = vmor %vm1698_vm14, %vm1699_vm13  ;;  %vm1708_vm3 = vweird.f32 %v1691_v41 }
0x1172   : > { %v1694_v61 = vmul.f32 %v4471_v40, %v1693_v50 }
0x1174   : > { %v1695_v46 = vmul.f32 0.5, %v1694_v61 }
0x1176   : > { %v1696_v48 = vsub.f32 1.5, %v1695_v46 }
0x1177   : > { %v4473_v22 = vpop.eup %4472 }
0x1178   : > { %v1697_v12 = vmul.f32 %v4471_v40, %v1696_v48  ;;  %v1703_v37 = vmul.f32 %v4473_v22, %v1691_v41  ;;  %vm1709_vm1 = vweird.f32 %v4473_v22 }
0x1179   : > { %vm1710_vm4 = vmor %vm1708_vm3, %vm1709_vm1 }
0x117a   : > { %v1701_v11 = vsel %vm1700_vm15, %v4471_v40, %v1697_v12  ;;  %v1704_v39 = vmul.f32 %v4473_v22, %v1703_v37 }
0x117b   : > { %v1712_v45 = vmul.f32 %v1701_v11, %v1678_v13 }
0x117c   : > { %v1705_v6 = vmul.f32 0.5, %v1704_v39 }
0x117d   : > { %v1717_v18 = vmul.f32 %v1715_v0, %v1712_v45 }
0x117e   : > { %v1706_v31 = vsub.f32 1.5, %v1705_v6 }
0x117f   : > { %v1722_v56 = vadd.f32 %v1720_v42, %v1717_v18 }
0x1180   : > { %v1707_v30 = vmul.f32 %v4473_v22, %v1706_v31 }
0x1181   : > { %v6691_v58 = vadd.f32 %v7980_v58, %v1722_v56 }
0x1182   : > { %v1711_v19 = vsel %vm1710_vm4, %v4473_v22, %v1707_v30 }
0x1183   : > { %8095 = vst [vmem:[#allocation128_spill] sm:$0xff] %v6691_v58  ;;  %v1713_v9 = vmul.f32 %v1711_v19, %v1679_v4  ;;  %vm1726_vm5 = vcmp.ge.f32.partialorder %v6691_v58, 1.0 }
0x1184   : > { %v6695_v44 = vsel %vm1726_vm5, 1.0, %v8096_v63 }
0x1185   : > { %8097 = vst [vmem:[#allocation176_spill] sm:$0xff] %v6695_v44  ;;  %v8098_v32 = vmov %v6695_v44  ;;  %v1718_v54 = vmul.f32 %v1715_v0, %v1713_v9 }
0x1186   : > { %v6705_v8 = vadd.f32 %v4932_v8, %v8098_v32  }
0x1187   : > { %v1723_v20 = vadd.f32 %v1720_v42, %v1718_v54 }
0x1188   : > { %8100 = vst [vmem:[#allocation177_spill] sm:$0xff] %v6705_v8  ;;  %v8101_v35 = vmov %v6705_v8 }
0x1189   : > { %v6700_v57 = vadd.f32 %v7979_v57, %v1723_v20  ;;  %v6718_v13 = vmul.f32 %v8101_v35, %v6424_v26 }
0x118b   : > { %8099 = vst [vmem:[#allocation127_spill] sm:$0xff] %v6700_v57  ;;  %vm1727_vm6 = vcmp.ge.f32.partialorder %v6700_v57, 1.0 }
0x118c   : > { %v6708_v49 = vsel %vm1727_vm6, 1.0, %v8096_v63 }
0x118d   : > { %8102 = vst [vmem:[#allocation178_spill] sm:$0xff] %v6708_v49  ;;  %v8103_v14 = vmov %v6708_v49 }
0x118e   : > { %v6714_v7 = vadd.f32 %v4928_v7, %v8103_v14  }
0x1190   : > { %8104 = vst [vmem:[#allocation179_spill] sm:$0xff] %v6714_v7  ;;  %v8105_v59 = vmov %v6714_v7 }
0x1191   : > { %v6722_v10 = vmul.f32 %v8105_v59, %v6424_v26 }
0x1193   : > { %v1746_v8 = vpack.c.bf16 %v6722_v10, %v6718_v13 }
0x1195   : > { %3708 = vmatmul.msk.bf16.vlgmr.msra.gmra.mxu0 %vm276_vm0, %v1746_v8 }
0x1212   : > { %v1762_v53 = vpop.f32.mrf.mxu0 }
0x1213   : > { %v6728_v4 = vadd.f32 %v1762_v53, %v1748_v47 }
0x1215   : > { %1769 = vrot.lane.b32.xlu0 %v6728_v4, %s4987_s19 }
0x121a   : > { %v1764_v7 = vpop.f32.mrf.mxu0 }
0x121b   : > { %v6732_v21 = vadd.f32 %v1764_v7, %v1748_v47 }
0x121d   : > { %1775 = vrot.lane.b32.xlu2 %v6732_v21, %s4989_s13  ;;  %1771 = vrot.lane.b32.xlu1 %v6732_v21, %s4987_s19 }
0x121e   : > { %1779 = vrot.lane.b32.xlu0 %v6732_v21, %s4988_s9 }
0x1225   : > { %1777 = vrot.lane.b32.xlu2 %v6728_v4, %s4988_s9  ;;  %1773 = vrot.lane.b32.xlu1 %v6728_v4, %s4989_s13 }
0x1277   : > { %v6744_v38 = vpop.permute.xlu2 %1775 }
0x1278   : > { %1853 = vrot.lane.b32.xlu0 %v6744_v38, %s4990_s3 }
0x127f   : > { %v6752_v17 = vpop.permute.xlu2 %1777 }
0x1287   : > { %v6748_v1 = vpop.permute.xlu0 %1769 }
0x1288   : > { %1816 = vrot.lane.b32.xlu2 %v6748_v1, %s4990_s3 }
0x128f   : > { %v6754_v52 = vpop.permute.xlu1 %1771 }
0x1290   : > { %v6756_v15 = vpop.permute.xlu0 %1779  ;;  %1818 = vrot.lane.b32.xlu1 %v6754_v52, %s4990_s3  ;;  %1886 = vrot.lane.b32.xlu2 %v6752_v17, %s4990_s3 }
0x1291   : > { %1888 = vrot.lane.b32.xlu0 %v6756_v15, %s4990_s3 }
0x1297   : > { %v6764_v36 = vpop.permute.xlu1 %1773 }
0x1298   : > { %1851 = vrot.lane.b32.xlu1 %v6764_v36, %s4990_s3 }
0x1299   : > { %1781 = vrot.lane.b32.xlu0 %v6728_v4, %s4990_s3 }
0x12a0   : > { %1783 = vrot.lane.b32.xlu1 %v6732_v21, %s4990_s3 }
0x12e2   : > { %v1817_v41 = vpop.permute.xlu2 %1816 }
0x12ea   : > { %v1854_v40 = vpop.permute.xlu0 %1853  ;;  %v1887_v46 = vpop.permute.xlu2 %1886 }
0x12eb   : > { %3717 = vmatpush.xpose.msk.msra.mxu3 %vm452_vm8, %v1854_v40 }
0x1302   : > { %v1819_v50 = vpop.permute.xlu1 %1818 }
0x1303   : > { %v1889_v61 = vpop.permute.xlu0 %1888  ;;  %3713 = vmatpush.xpose.msk.msra.mxu2 %vm452_vm8, %v1819_v50 }
0x1304   : > { %3721 = vmatpush.xpose.msk.msrb.mxu0 %vm452_vm8, %v1889_v61 }
0x1307   : > { %3714 = vmatpush.xpose.msk.msra.mxu2 %vm452_vm8, %v1817_v41 }
0x1308   : > { %3722 = vmatpush.xpose.msk.msrb.mxu0 %vm452_vm8, %v1887_v46 }
0x130a   : > { %v1852_v48 = vpop.permute.xlu1 %1851  ;;  %3715 = vmatmul.msk.f32.vlgmr.msra.gmra.mxu2 %vm452_vm8, %v6748_v1 }
0x130b   : > { %3723 = vmatmul.msk.f32.vlgmr.msrb.gmra.mxu0 %vm452_vm8, %v6752_v17  ;;  %3718 = vmatpush.xpose.msk.msra.mxu3 %vm452_vm8, %v1852_v48  ;;  %v1782_v12 = vpop.permute.xlu0 %1781 }
0x130e   : > { %3719 = vmatmul.msk.f32.vlgmr.msra.gmra.mxu3 %vm452_vm8, %v6764_v36 }
0x1312   : > { %v1784_v22 = vpop.permute.xlu1 %1783  ;;  %3716 = vmatmul.msk.f32.gmra.mxu2 %vm452_vm8, %v6754_v52 }
0x1313   : > { %3724 = vmatmul.msk.f32.gmra.mxu0 %vm452_vm8, %v6756_v15  ;;  %3709 = vmatpush.xpose.msk.msrb.mxu1 %vm452_vm8, %v1784_v22 }
0x1316   : > { %3720 = vmatmul.msk.f32.gmra.mxu3 %vm452_vm8, %v6744_v38 }
0x1317   : > { %3710 = vmatpush.xpose.msk.msrb.mxu1 %vm452_vm8, %v1782_v12 }
0x131a   : > { %3711 = vmatmul.msk.f32.vlgmr.msrb.gmra.mxu1 %vm452_vm8, %v6728_v4 }
0x1322   : > { %3712 = vmatmul.msk.f32.gmra.mxu1 %vm452_vm8, %v6732_v21 }
0x1388   : > { %v1915_v37 = vpop.f32.mrf.mxu0 }
0x1389   : > { %v1927_v16 = vmul.f32 0.35355338, %v1915_v37  ;;  %v4324_v37 = vpack.i.bf16 %v6752_v17, %v6756_v15 }
0x138b   : > { %v1935_v0 = vadd.f32 %v1927_v16, %v7952_v27 }
0x138d   : > { %v1845_v11 = vpop.f32.mrf.mxu2  ;;  %v1955_v39 = vsel %vm605_vm9, %v1935_v0, -inf }
0x138e   : > { %v1923_v3 = vmul.f32 0.35355338, %v1845_v11  ;;  %1956 = vmax.xlane.f32.xlu2 %v1955_v39 }
0x1390   : > { %v1931_v42 = vadd.f32 %v1923_v3, %v7952_v27  ;;  %v1918_v53 = vpop.f32.mrf.mxu0 }
0x1391   : > { %v1880_v45 = vpop.f32.mrf.mxu3  ;;  %v1928_v40 = vmul.f32 0.35355338, %v1918_v53 }
0x1392   : > { %v1925_v6 = vmul.f32 0.35355338, %v1880_v45  ;;  %v1943_v31 = vsel %vm605_vm9, %v1931_v42, -inf }
0x1393   : > { %v1936_v50 = vadd.f32 %v1928_v40, %v7951_v28  ;;  %v4314_v40 = vpack.i.bf16 %v6744_v38, %v6754_v52 }
0x1394   : > { %v1933_v18 = vadd.f32 %v1925_v6, %v7952_v27 }
0x1395   : > { %v1848_v61 = vpop.f32.mrf.mxu2  ;;  %v1958_v48 = vsel %vm605_vm9, %v1936_v50, -inf }
0x1396   : > { %1944 = vmax.xlane.f32.xlu2 %v1943_v31  ;;  %v1949_v56 = vsel %vm605_vm9, %v1933_v18, -inf  ;;  %v1924_v46 = vmul.f32 0.35355338, %v1848_v61 }
0x1397   : > { %1950 = vmax.xlane.f32.xlu1 %v1949_v56  ;;  %v1810_v30 = vpop.f32.mrf.mxu1 }
0x1398   : > { %v1921_v19 = vmul.f32 0.35355338, %v1810_v30  ;;  %v1932_v22 = vadd.f32 %v1924_v46, %v7951_v28 }
0x1399   : > { %v1883_v9 = vpop.f32.mrf.mxu3 }
0x139a   : > { %v6803_v44 = vadd.f32 %v1921_v19, %v7952_v27  ;;  %v1926_v54 = vmul.f32 0.35355338, %v1883_v9  ;;  %v1946_v12 = vsel %vm605_vm9, %v1932_v22, -inf }
0x139c   : > { %v1934_v20 = vadd.f32 %v1926_v54, %v7951_v28  ;;  %v1937_v49 = vsel %vm605_vm9, %v6803_v44, -inf }
0x139e   : > { %1938 = vmax.xlane.f32.xlu2 %v1937_v49  ;;  %v1952_v8 = vsel %vm605_vm9, %v1934_v20, -inf }
0x139f   : > { %1953 = vmax.xlane.f32.xlu1 %v1952_v8  ;;  %v1813_v62 = vpop.f32.mrf.mxu1 }
0x13a0   : > { %v1922_v47 = vmul.f32 0.35355338, %v1813_v62 }
0x13a2   : > { %v6810_v7 = vadd.f32 %v1922_v47, %v7951_v28 }
0x13a4   : > { %v1940_v41 = vsel %vm605_vm9, %v6810_v7, -inf }
0x13a5   : > { %1941 = vmax.xlane.f32.xlu0 %v1940_v41  ;;  %v4319_v41 = vpack.i.bf16 %v6764_v36, %v6748_v1  ;;  %v8107_v36 = vld [vmem:[#allocation20_spill] sm:$0xff] }
0x13ad   : > { %1959 = vmax.xlane.f32.xlu0 %v1958_v48 }
0x13b5   : > { %1947 = vmax.xlane.f32.xlu0 %v1946_v12  ;;  %v8108_v12 = vld [vmem:[#allocation19_spill] sm:$0xff] }
0x13c9   : > { %4325 = vrot.lane.b32.xlu0 %v4324_v37, %s4991_s7  ;;  %v8109_v37 = vpack.c.bf16 %v8107_v36, %v8108_v12  ;;  %v8123_v12 = vld [vmem:[#allocation62_spill] sm:$0xff] }
0x1401   : > { %v1957_v16 = vpop.xlane.xlu2 %1956 }
0x1402   : > { %v1967_v11 = vsub.f32 %v1935_v0, %v1957_v16 }
0x1404   : > { %v1981_v39 = vmul.f32 1.442695, %v1967_v11  ;;  %v8110_v11 = vld [vmem:[#allocation18_spill] sm:$0xff] }
0x1406   : > { %4474 = vpow2.f32 %v1981_v39  ;;  %v8111_v39 = vld [vmem:[#allocation17_spill] sm:$0xff] }
0x1409   : > { %v1945_v3 = vpop.xlane.xlu2 %1944 }
0x140a   : > { %v1963_v45 = vsub.f32 %v1931_v42, %v1945_v3  ;;  %v1951_v6 = vpop.xlane.xlu1 %1950  ;;  %v8112_v3 = vpack.c.bf16 %v8110_v11, %v8111_v39  ;;  %v8126_v11 = vld [vmem:[#allocation95_spill] sm:$0xff]  ;;  %v8127_v39 = vld [vmem:[#allocation94_spill] sm:$0xff] }
0x140b   : > { %v1965_v31 = vsub.f32 %v1933_v18, %v1951_v6 }
0x140c   : > { %v6821_v56 = vpop.eup %4474  ;;  %v1973_v30 = vmul.f32 1.442695, %v1963_v45 }
0x140d   : > { %v1977_v19 = vmul.f32 1.442695, %v1965_v31  ;;  %v2003_v9 = vsel %vm605_vm9, %v6821_v56, 0.0 }
0x140e   : > { %4476 = vpow2.f32 %v1973_v30  ;;  %2004 = vadd.xlane.f32.xlu2 %v2003_v9 }
0x140f   : > { %4478 = vpow2.f32 %v1977_v19  ;;  %v4329_v19 = vpack.i.bf16 %v6728_v4, %v6732_v21 }
0x1411   : > { %v1939_v16 = vpop.xlane.xlu2 %1938 }
0x1412   : > { %v1954_v49 = vpop.xlane.xlu1 %1953  ;;  %v1961_v45 = vsub.f32 %v6803_v44, %v1939_v16 }
0x1413   : > { %v1966_v47 = vsub.f32 %v1934_v20, %v1954_v49 }
0x1414   : > { %v6825_v17 = vpop.eup %4476  ;;  %v1969_v31 = vmul.f32 1.442695, %v1961_v45 }
0x1415   : > { %v6827_v15 = vpop.eup %4478  ;;  %v1991_v0 = vsel %vm605_vm9, %v6825_v17, 0.0  ;;  %v1979_v61 = vmul.f32 1.442695, %v1966_v47 }
0x1416   : > { %1992 = vadd.xlane.f32.xlu1 %v1991_v0  ;;  %v1997_v42 = vsel %vm605_vm9, %v6827_v15, 0.0 }
0x1417   : > { %1998 = vadd.xlane.f32.xlu2 %v1997_v42 }
0x1418   : > { %v1942_v18 = vpop.xlane.xlu0 %1941 }
0x1420   : > { %v1960_v54 = vpop.xlane.xlu0 %1959 }
0x1421   : > { %v1968_v6 = vsub.f32 %v1936_v50, %v1960_v54  ;;  %v1962_v50 = vsub.f32 %v6810_v7, %v1942_v18 }
0x1423   : > { %v1983_v30 = vmul.f32 1.442695, %v1968_v6  ;;  %v1971_v54 = vmul.f32 1.442695, %v1962_v50  ;;  %v8134_v50 = vld [vmem:[#allocation90_spill] sm:$0xff] }
0x1428   : > { %v1948_v8 = vpop.xlane.xlu0 %1947 }
0x1429   : > { %v1964_v62 = vsub.f32 %v1932_v22, %v1948_v8 }
0x142b   : > { %v1975_v53 = vmul.f32 1.442695, %v1964_v62 }
0x142d   : > { %4480 = vpow2.f32 %v1975_v53 }
0x142e   : > { %4482 = vpow2.f32 %v1979_v61 }
0x142f   : > { %4315 = vrot.lane.b32.xlu1 %v4314_v40, %s4991_s7  ;;  %4320 = vrot.lane.b32.xlu2 %v4319_v41, %s4991_s7  ;;  %4484 = vpow2.f32 %v1969_v31 }
0x1430   : > { %4486 = vpow2.f32 %v1983_v30  ;;  %v8129_v30 = vld [vmem:[#allocation93_spill] sm:$0xff] }
0x1431   : > { %4488 = vpow2.f32 %v1971_v54 }
0x1433   : > { %v6839_v46 = vpop.eup %4480 }
0x1434   : > { %v1994_v48 = vsel %vm605_vm9, %v6839_v46, 0.0  ;;  %v6843_v20 = vpop.eup %4482 }
0x1435   : > { %1995 = vadd.xlane.f32.xlu0 %v1994_v48  ;;  %v2000_v1 = vsel %vm605_vm9, %v6843_v20, 0.0  ;;  %v6857_v9 = vpop.eup %4484 }
0x1436   : > { %v6859_v0 = vpop.eup %4486  ;;  %v1985_v42 = vsel %vm605_vm9, %v6857_v9, 0.0 }
0x1437   : > { %v2006_v44 = vsel %vm605_vm9, %v6859_v0, 0.0  ;;  %v6866_v49 = vpop.eup %4488 }
0x1438   : > { %v1988_v4 = vsel %vm605_vm9, %v6866_v49, 0.0 }
0x143b   : > { %v4326_v22 = vpop.permute.xlu0 %4325 }
0x143c   : > { %v4327_v38 = vunpack.i.l.bf16 %v4326_v22  ;;  %v4328_v52 = vunpack.i.h.bf16 %v4326_v22 }
0x143d   : > { %2001 = vadd.xlane.f32.xlu0 %v2000_v1 }
0x143e   : > { %2156 = vmatpush.msra.mxu0 %v4327_v38 }
0x1440   : > { %2157 = vmatpush.msra.mxu0 %v4328_v52  ;;  %v8121_v52 = vld [vmem:[#allocation96_spill] sm:$0xff] }
0x1442   : > { %2423 = vmatpush.bf16.msrb.mxu0 %v8109_v37  ;;  %v8124_v37 = vld [vmem:[#allocation61_spill] sm:$0xff] }
0x1443   : > { %v8125_v16 = vpack.c.bf16 %v8123_v12, %v8124_v37 }
0x1446   : > { %2424 = vmatpush.bf16.msrb.mxu0 %v8112_v3  ;;  %v8128_v3 = vpack.c.bf16 %v8126_v11, %v8127_v39 }
0x1451   : > { %4330 = vrot.lane.b32.xlu0 %v4329_v19, %s4991_s7  ;;  %v8130_v19 = vld [vmem:[#allocation92_spill] sm:$0xff] }
0x1458   : > { %1986 = vadd.xlane.f32.xlu2 %v1985_v42  ;;  %v8131_v42 = vpack.c.bf16 %v8129_v30, %v8130_v19 }
0x1459   : > { %2007 = vadd.xlane.f32.xlu1 %v2006_v44  ;;  %v8133_v44 = vld [vmem:[#allocation91_spill] sm:$0xff] }
0x145a   : > { %v8135_v54 = vpack.c.bf16 %v8133_v44, %v8134_v50 }
0x147b   : > { %1989 = vadd.xlane.f32.xlu0 %v1988_v4 }
0x1481   : > { %v2005_v21 = vpop.xlane.xlu2 %2004 }
0x1482   : > { %4490 = vrcp.f32 %v2005_v21 }
0x1488   : > { %v4491_v8 = vpop.eup %4490 }
0x1489   : > { %v2023_v62 = vmul.f32 %v4491_v8, %v6821_v56  ;;  %v1993_v47 = vpop.xlane.xlu1 %1992 }
0x148a   : > { %4492 = vrcp.f32 %v1993_v47  ;;  %v1999_v53 = vpop.xlane.xlu2 %1998 }
0x148b   : > { %v6872_v2 = vadd.f32 %v4812_v2, %v2023_v62   ;;  %4494 = vrcp.f32 %v1999_v53  ;;  %3731 = vmatmul.msk.f32.vlgmr.msra.gmra.mxu0 %vm605_vm9, %v2023_v62  ;;  %v8139_v53 = vld [vmem:[#allocation36_spill] sm:$0xff] }
0x148d   : > { %v8113_v33 = vmov %v6872_v2 }
0x1490   : > { %v4493_v7 = vpop.eup %4492 }
0x1491   : > { %v4495_v18 = vpop.eup %4494  ;;  %v2019_v40 = vmul.f32 %v4493_v7, %v6825_v17  ;;  %v8140_v7 = vld [vmem:[#allocation35_spill] sm:$0xff] }
0x1492   : > { %v2021_v41 = vmul.f32 %v4495_v18, %v6827_v15  ;;  %v4321_v56 = vpop.permute.xlu2 %4320  ;;  %v8117_v15 = vld [vmem:[#allocation64_spill] sm:$0xff] }
0x1493   : > { %v6878_v43 = vadd.f32 %v4828_v43, %v2019_v40   ;;  %v4323_v2 = vunpack.i.h.bf16 %v4321_v56  ;;  %v4322_v38 = vunpack.i.l.bf16 %v4321_v56  ;;  %v8142_v56 = vld [vmem:[#allocation34_spill] sm:$0xff] }
0x1494   : > { %v6881_v60 = vadd.f32 %v4820_v60, %v2021_v41  }
0x1495   : > { %8114 = vst [vmem:[#allocation180_spill] sm:$0xff] %v6878_v43  ;;  %v8118_v43 = vld [vmem:[#allocation63_spill] sm:$0xff] }
0x1496   : > { %8115 = vst [vmem:[#allocation181_spill] sm:$0xff] %v6881_v60  ;;  %v8116_v35 = vmov %v6881_v60  ;;  %v8119_v1 = vpack.c.bf16 %v8117_v15, %v8118_v43  ;;  %v8120_v60 = vld [vmem:[#allocation97_spill] sm:$0xff] }
0x1497   : > { %v8122_v36 = vpack.c.bf16 %v8120_v60, %v8121_v52 }
0x14a1   : > { %v4316_v61 = vpop.permute.xlu1 %4315 }
0x14a2   : > { %v4318_v48 = vunpack.i.h.bf16 %v4316_v61  ;;  %v4317_v22 = vunpack.i.l.bf16 %v4316_v61 }
0x14a4   : > { %2086 = vmatpush.msrb.mxu2 %v4317_v22  ;;  %2121 = vmatpush.msrb.mxu3 %v4318_v48 }
0x14a6   : > { %2087 = vmatpush.msrb.mxu2 %v4322_v38  ;;  %2122 = vmatpush.msrb.mxu3 %v4323_v2  ;;  %v8145_v38 = vld [vmem:[#allocation142_spill] sm:$0xff] }
0x14a7   : > { %3727 = vmatmul.msk.f32.vlgmr.msrb.gmra.mxu2 %vm605_vm9, %v2019_v40  ;;  %3729 = vmatmul.msk.f32.vlgmr.msrb.gmra.mxu3 %vm605_vm9, %v2021_v41 }
0x14a8   : > { %v1996_v17 = vpop.xlane.xlu0 %1995  ;;  %2285 = vmatpush.bf16.msra.mxu2 %v8119_v1  ;;  %2322 = vmatpush.bf16.msra.mxu3 %v8122_v36 }
0x14a9   : > { %4496 = vrcp.f32 %v1996_v17  ;;  %v8147_v17 = vld [vmem:[#allocation139_spill] sm:$0xff] }
0x14ac   : > { %2286 = vmatpush.bf16.msra.mxu2 %v8125_v16  ;;  %2323 = vmatpush.bf16.msra.mxu3 %v8128_v3 }
0x14af   : > { %v4497_v45 = vpop.eup %4496 }
0x14b0   : > { %v2002_v6 = vpop.xlane.xlu0 %2001  ;;  %v2020_v31 = vmul.f32 %v4497_v45, %v6839_v46  ;;  %2324 = vmatpush.bf16.msra.mxu3 %v8131_v42  ;;  %v8136_v46 = vld [vmem:[#allocation140_spill] sm:$0xff] }
0x14b1   : > { %4498 = vrcp.f32 %v2002_v6 }
0x14b2   : > { %3728 = vmatmul.msk.f32.gmra.mxu2 %vm605_vm9, %v2020_v31  ;;  %v6903_v5 = vadd.f32 %v4824_v5, %v2020_v31  }
0x14b4   : > { %8132 = vst [vmem:[#allocation182_spill] sm:$0xff] %v6903_v5  ;;  %2325 = vmatpush.bf16.msra.mxu3 %v8135_v54  ;;  %v8141_v5 = vpack.c.bf16 %v8139_v53, %v8140_v7  ;;  %v8152_v7 = vld [vmem:[#allocation43_spill] sm:$0xff] }
0x14b7   : > { %v4499_v4 = vpop.eup %4498 }
0x14b8   : > { %v2022_v21 = vmul.f32 %v4499_v4, %v6843_v20  ;;  %v8143_v20 = vld [vmem:[#allocation33_spill] sm:$0xff] }
0x14b9   : > { %v8144_v61 = vpack.c.bf16 %v8142_v56, %v8143_v20 }
0x14ba   : > { %3730 = vmatmul.msk.f32.gmra.mxu3 %vm605_vm9, %v2022_v21  ;;  %v6911_v18 = vadd.f32 %v8136_v46, %v2022_v21  }
0x14bc   : > { %8137 = vst [vmem:[#allocation183_spill] sm:$0xff] %v6911_v18  ;;  %v8138_v29 = vmov %v6911_v18 }
0x14c3   : > { %v4331_v8 = vpop.permute.xlu0 %4330 }
0x14c4   : > { %v4332_v62 = vunpack.i.l.bf16 %v4331_v8  ;;  %v4333_v47 = vunpack.i.h.bf16 %v4331_v8 }
0x14c6   : > { %2051 = vmatpush.msra.mxu1 %v4332_v62 }
0x14c8   : > { %2052 = vmatpush.msra.mxu1 %v4333_v47 }
0x14ca   : > { %2208 = vmatpush.bf16.msrb.mxu1 %v8141_v5  ;;  %v2197_v5 = vperm.slane %v8152_v7, 0 }
0x14cb   : > { %v1987_v40 = vpop.xlane.xlu2 %1986 }
0x14cc   : > { %4500 = vrcp.f32 %v1987_v40  ;;  %v2008_v41 = vpop.xlane.xlu1 %2007 }
0x14cd   : > { %4502 = vrcp.f32 %v2008_v41 }
0x14ce   : > { %2209 = vmatpush.bf16.msrb.mxu1 %v8144_v61 }
0x14d2   : > { %v4501_v48 = vpop.eup %4500 }
0x14d3   : > { %v4503_v22 = vpop.eup %4502  ;;  %v2017_v18 = vmul.f32 %v4501_v48, %v6857_v9  ;;  %v8150_v9 = vld [vmem:[#allocation141_spill] sm:$0xff] }
0x14d4   : > { %v2024_v2 = vmul.f32 %v4503_v22, %v6859_v0 }
0x14d5   : > { %v6922_v47 = vadd.f32 %v8145_v38, %v2017_v18   ;;  %3725 = vmatmul.msk.f32.vlgmr.msra.gmra.mxu1 %vm605_vm9, %v2017_v18 }
0x14d6   : > { %3732 = vmatmul.msk.f32.gmra.mxu0 %vm605_vm9, %v2024_v2  ;;  %v6927_v46 = vadd.f32 %v8147_v17, %v2024_v2  }
0x14d7   : > { %8146 = vst [vmem:[#allocation184_spill] sm:$0xff] %v6922_v47 }
0x14d8   : > { %8148 = vst [vmem:[#allocation185_spill] sm:$0xff] %v6927_v46  ;;  %v8149_v25 = vmov %v6927_v46 }
0x14ee   : > { %v1990_v15 = vpop.xlane.xlu0 %1989 }
0x14ef   : > { %4504 = vrcp.f32 %v1990_v15 }
0x14f5   : > { %v4505_v43 = vpop.eup %4504 }
0x14f6   : > { %v2018_v1 = vmul.f32 %v4505_v43, %v6866_v49 }
0x14f8   : > { %3726 = vmatmul.msk.f32.gmra.mxu1 %vm605_vm9, %v2018_v1  ;;  %v6932_v16 = vadd.f32 %v8150_v9, %v2018_v1  }
0x14fa   : > { %8151 = vst [vmem:[#allocation186_spill] sm:$0xff] %v6932_v16 }
0x1508   : > { %v2159_v11 = vpop.f32.mrf.mxu0 }
0x152a   : > { %v2089_v0 = vpop.f32.mrf.mxu2  ;;  %v2124_v60 = vpop.f32.mrf.mxu3 }
0x1535   : > { %v2092_v52 = vpop.f32.mrf.mxu2 }
0x1536   : > { %v4334_v36 = vpack.i.bf16 %v2092_v52, %v2089_v0 }
0x1538   : > { %4335 = vrot.lane.b32.xlu1 %v4334_v36, %s4992_s25 }
0x153d   : > { %v2127_v12 = vpop.f32.mrf.mxu3 }
0x153e   : > { %v4339_v37 = vpack.i.bf16 %v2127_v12, %v2124_v60 }
0x1540   : > { %4340 = vrot.lane.b32.xlu2 %v4339_v37, %s4993_s0 }
0x1552   : > { %v2054_v49 = vpop.f32.mrf.mxu1 }
0x1553   : > { %v2162_v39 = vpop.f32.mrf.mxu0 }
0x1554   : > { %v4344_v3 = vpack.i.bf16 %v2162_v39, %v2159_v11 }
0x1556   : > { %4345 = vrot.lane.b32.xlu0 %v4344_v3, %s4994_s26 }
0x1575   : > { %v2057_v30 = vpop.f32.mrf.mxu1 }
0x159a   : > { %v4341_v16 = vpop.permute.xlu2 %4340 }
0x159b   : > { %v4343_v44 = vunpack.i.h.bf16 %v4341_v16  ;;  %v4342_v50 = vunpack.i.l.bf16 %v4341_v16 }
0x15aa   : > { %v4336_v45 = vpop.permute.xlu1 %4335 }
0x15ab   : > { %v4338_v6 = vunpack.i.h.bf16 %v4336_v45  ;;  %v4337_v31 = vunpack.i.l.bf16 %v4336_v45 }
0x15ad   : > { %v2189_v19 = vsel %vm452_vm8, %v2054_v49, %v4337_v31  ;;  %v2190_v42 = vsel %vm452_vm8, %v2057_v30, %v4338_v6 }
0x15ae   : > { %v2191_v46 = vsel %vm605_vm9, %v2189_v19, %v4342_v50  ;;  %v2192_v8 = vsel %vm605_vm9, %v2190_v42, %v4343_v44 }
0x15c8   : > { %v4346_v54 = vpop.permute.xlu0 %4345 }
0x15c9   : > { %v4348_v4 = vunpack.i.h.bf16 %v4346_v54  ;;  %v4347_v21 = vunpack.i.l.bf16 %v4346_v54 }
0x15cb   : > { %v2194_v62 = vsel %vm862_vm10, %v2192_v8, %v4348_v4  ;;  %v2193_v47 = vsel %vm862_vm10, %v2191_v46, %v4347_v21  ;;  %v8153_v4 = vld [vmem:[#allocation48_spill] sm:$0xff] }
0x15cc   : > { %v2195_v53 = vpack.c.bf16 %v2194_v62, %v2193_v47  ;;  %v2263_v21 = vperm.slane %v8153_v4, 0 }
0x15ce   : > { %3733 = vmatmul.msk.bf16.vlgmr.msrb.gmra.mxu1 %vm276_vm0, %v2195_v53  ;;  %v8154_v53 = vld [vmem:[#allocation53_spill] sm:$0xff] }
0x15cf   : > { %v2268_v7 = vperm.slane %v8154_v53, 0 }
0x164b   : > { %v2211_v40 = vpop.f32.mrf.mxu1 }
0x164c   : > { %v2212_v41 = vadd.f32 %v2211_v40, %v2197_v5 }
0x164e   : > { %v2216_v56 = vadd.f32 %v2212_v41, %v6718_v13 }
0x1650   : > { %v2218_v20 = vsel %vm276_vm0, %v2216_v56, 0.0 }
0x1651   : > { %2219 = vadd.xlane.f32.xlu1 %v2218_v20  ;;  %v8155_v20 = vld [vmem:[#allocation71_spill] sm:$0xff] }
0x1653   : > { %v2213_v61 = vpop.f32.mrf.mxu1 }
0x1654   : > { %v2214_v48 = vadd.f32 %v2213_v61, %v2197_v5  ;;  %v2274_v61 = vperm.slane %v8155_v20, 0 }
0x1656   : > { %v2217_v22 = vadd.f32 %v2214_v48, %v6722_v10 }
0x1658   : > { %v2221_v18 = vsel %vm276_vm0, %v2217_v22, 0.0 }
0x1659   : > { %2222 = vadd.xlane.f32.xlu2 %v2221_v18 }
0x16c4   : > { %v2220_v2 = vpop.xlane.xlu1 %2219 }
0x16c5   : > { %v2224_v38 = vmul.f32 %v2220_v2, %v8032_v34 }
0x16c7   : > { %v2226_v17 = vsub.f32 %v2216_v56, %v2224_v38 }
0x16c9   : > { %v2228_v15 = vmul.f32 %v2226_v17, %v2226_v17 }
0x16cb   : > { %v2230_v43 = vsel %vm276_vm0, %v2228_v15, 0.0 }
0x16cc   : > { %v2223_v1 = vpop.xlane.xlu2 %2222  ;;  %2231 = vadd.xlane.f32.xlu0 %v2230_v43 }
0x16cd   : > { %v2225_v13 = vmul.f32 %v2223_v1, %v8032_v34 }
0x16cf   : > { %v2227_v9 = vsub.f32 %v2217_v22, %v2225_v13 }
0x16d1   : > { %v2229_v0 = vmul.f32 %v2227_v9, %v2227_v9 }
0x16d3   : > { %v2233_v60 = vsel %vm276_vm0, %v2229_v0, 0.0 }
0x16d4   : > { %2234 = vadd.xlane.f32.xlu1 %v2233_v60 }
0x173f   : > { %v2232_v10 = vpop.xlane.xlu0 %2231 }
0x1740   : > { %v2236_v52 = vmul.f32 %v2232_v10, %v8032_v34 }
0x1742   : > { %v2238_v36 = vadd.f32 1e-12, %v2236_v52 }
0x1744   : > { %4506 = vrsqrt.f32 %v2238_v36  ;;  %vm2246_vm11 = vweird.f32 %v2238_v36 }
0x1747   : > { %v2235_v12 = vpop.xlane.xlu1 %2234 }
0x1748   : > { %v2237_v37 = vmul.f32 %v2235_v12, %v8032_v34 }
0x174a   : > { %v4507_v11 = vpop.eup %4506  ;;  %v2239_v39 = vadd.f32 1e-12, %v2237_v37 }
0x174b   : > { %v2241_v3 = vmul.f32 %v4507_v11, %v2238_v36  ;;  %vm2247_vm7 = vweird.f32 %v4507_v11 }
0x174c   : > { %4508 = vrsqrt.f32 %v2239_v39  ;;  %vm2248_vm12 = vmor %vm2246_vm11, %vm2247_vm7  ;;  %vm2256_vm14 = vweird.f32 %v2239_v39 }
0x174d   : > { %v2242_v49 = vmul.f32 %v4507_v11, %v2241_v3 }
0x174f   : > { %v2243_v45 = vmul.f32 0.5, %v2242_v49 }
0x1751   : > { %v2244_v6 = vsub.f32 1.5, %v2243_v45 }
0x1752   : > { %v4509_v31 = vpop.eup %4508 }
0x1753   : > { %v2245_v16 = vmul.f32 %v4507_v11, %v2244_v6  ;;  %v2251_v30 = vmul.f32 %v4509_v31, %v2239_v39  ;;  %vm2257_vm13 = vweird.f32 %v4509_v31  ;;  %v8156_v6 = vld [vmem:[#allocation109_spill] sm:$0xff] }
0x1754   : > { %vm2258_vm15 = vmor %vm2256_vm14, %vm2257_vm13 }
0x1755   : > { %v2252_v19 = vmul.f32 %v4509_v31, %v2251_v30  ;;  %v2249_v42 = vsel %vm2248_vm12, %v4507_v11, %v2245_v16 }
0x1756   : > { %v2260_v54 = vmul.f32 %v2249_v42, %v2226_v17 }
0x1757   : > { %v2253_v44 = vmul.f32 0.5, %v2252_v19 }
0x1758   : > { %v2265_v47 = vmul.f32 %v2263_v21, %v2260_v54 }
0x1759   : > { %v2254_v50 = vsub.f32 1.5, %v2253_v44 }
0x175a   : > { %v2270_v40 = vadd.f32 %v2268_v7, %v2265_v47 }
0x175b   : > { %v2255_v46 = vmul.f32 %v4509_v31, %v2254_v50 }
0x175d   : > { %v2259_v8 = vsel %vm2258_vm15, %v4509_v31, %v2255_v46  ;;  %v2313_v31 = vperm.slane %v8156_v6, 0  ;;  %v8159_v6 = vld [vmem:[#allocation154_spill] sm:$0xff] }
0x175e   : > { %v2261_v62 = vmul.f32 %v2259_v8, %v2227_v9 }
0x1760   : > { %v2266_v5 = vmul.f32 %v2263_v21, %v2261_v62 }
0x1762   : > { %v2271_v41 = vadd.f32 %v2268_v7, %v2266_v5 }
0x1764   : > { %v2272_v56 = vpack.c.bf16 %v2271_v41, %v2270_v40 }
0x1766   : > { %3734 = vmatmul.msk.bf16.vlgmr.msra.gmra.mxu2 %vm276_vm0, %v2272_v56 }
0x17e9   : > { %v2288_v48 = vpop.f32.mrf.mxu2 }
0x17ea   : > { %v2289_v22 = vadd.f32 %v2288_v48, %v2274_v61 }
0x17ec   : > { %v2295_v18 = vmul.f32 0.044715, %v2289_v22  ;;  %v2293_v37 = vmul.f32 0.5, %v2289_v22 }
0x17ee   : > { %v2297_v2 = vmul.f32 %v2295_v18, %v2289_v22 }
0x17f0   : > { %v2299_v38 = vmul.f32 %v2297_v2, %v2289_v22 }
0x17f1   : > { %v2290_v17 = vpop.f32.mrf.mxu2 }
0x17f2   : > { %v2301_v15 = vadd.f32 %v2299_v38, %v2289_v22  ;;  %v2291_v43 = vadd.f32 %v2290_v17, %v2274_v61 }
0x17f4   : > { %v2296_v1 = vmul.f32 0.044715, %v2291_v43  ;;  %v2303_v13 = vmul.f32 0.7978846, %v2301_v15  ;;  %v2294_v11 = vmul.f32 0.5, %v2291_v43 }
0x17f6   : > { %v2298_v9 = vmul.f32 %v2296_v1, %v2291_v43  ;;  %4510 = vtanh.f32 %v2303_v13 }
0x17f8   : > { %v2300_v0 = vmul.f32 %v2298_v9, %v2291_v43 }
0x17fa   : > { %v2302_v60 = vadd.f32 %v2300_v0, %v2291_v43  ;;  %v8157_v0 = vld [vmem:[#allocation113_spill] sm:$0xff] }
0x17fc   : > { %v2304_v10 = vmul.f32 0.7978846, %v2302_v60  ;;  %v4511_v52 = vpop.eup %4510  ;;  %v2379_v60 = vperm.slane %v8157_v0, 0 }
0x17fd   : > { %v2307_v36 = vadd.f32 1.0, %v4511_v52 }
0x17fe   : > { %4512 = vtanh.f32 %v2304_v10 }
0x17ff   : > { %v2309_v3 = vmul.f32 %v2307_v36, %v2293_v37  ;;  %v8158_v36 = vld [vmem:[#allocation117_spill] sm:$0xff] }
0x1804   : > { %v4513_v12 = vpop.eup %4512 }
0x1805   : > { %v2308_v39 = vadd.f32 1.0, %v4513_v12  ;;  %v2384_v12 = vperm.slane %v8158_v36, 0 }
0x1807   : > { %v2310_v49 = vmul.f32 %v2308_v39, %v2294_v11 }
0x1809   : > { %v2311_v45 = vpack.c.bf16 %v2310_v49, %v2309_v3 }
0x180b   : > { %3735 = vmatmul.msk.bf16.vlgmr.msra.gmra.mxu3 %vm985_vm2, %v2311_v45 }
0x188e   : > { %v2327_v16 = vpop.f32.mrf.mxu3 }
0x188f   : > { %v2328_v30 = vadd.f32 %v2327_v16, %v2313_v31 }
0x1891   : > { %v2332_v19 = vadd.f32 %v2328_v30, %v2270_v40 }
0x1893   : > { %v2334_v42 = vsel %vm276_vm0, %v2332_v19, 0.0 }
0x1894   : > { %2335 = vadd.xlane.f32.xlu2 %v2334_v42 }
0x1896   : > { %v2329_v44 = vpop.f32.mrf.mxu3 }
0x1897   : > { %v2330_v50 = vadd.f32 %v2329_v44, %v2313_v31  ;;  %v8163_v44 = vld [vmem:[#allocation153_spill] sm:$0xff] }
0x1899   : > { %v2333_v54 = vadd.f32 %v2330_v50, %v2271_v41  ;;  %v8164_v50 = vld [vmem:[#allocation148_spill] sm:$0xff] }
0x189b   : > { %v2337_v4 = vsel %vm276_vm0, %v2333_v54, 0.0 }
0x189c   : > { %2338 = vadd.xlane.f32.xlu1 %v2337_v4  ;;  %v8169_v4 = vld [vmem:[#allocation147_spill] sm:$0xff] }
0x1907   : > { %v2336_v21 = vpop.xlane.xlu2 %2335 }
0x1908   : > { %v2340_v46 = vmul.f32 %v2336_v21, %v8032_v34 }
0x190a   : > { %v2342_v8 = vsub.f32 %v2332_v19, %v2340_v46 }
0x190c   : > { %v2344_v62 = vmul.f32 %v2342_v8, %v2342_v8 }
0x190e   : > { %v2346_v47 = vsel %vm276_vm0, %v2344_v62, 0.0  ;;  %v8172_v62 = vld [vmem:[#allocation24_spill] sm:$0xff] }
0x190f   : > { %v2339_v53 = vpop.xlane.xlu1 %2338  ;;  %2347 = vadd.xlane.f32.xlu2 %v2346_v47  ;;  %v2412_v47 = vperm.slane %v8172_v62, 0 }
0x1910   : > { %v2341_v7 = vmul.f32 %v2339_v53, %v8032_v34 }
0x1912   : > { %v2343_v5 = vsub.f32 %v2333_v54, %v2341_v7 }
0x1914   : > { %v2345_v40 = vmul.f32 %v2343_v5, %v2343_v5 }
0x1916   : > { %v2349_v56 = vsel %vm276_vm0, %v2345_v40, 0.0 }
0x1917   : > { %2350 = vadd.xlane.f32.xlu0 %v2349_v56 }
0x1982   : > { %v2348_v41 = vpop.xlane.xlu2 %2347 }
0x1983   : > { %v2352_v20 = vmul.f32 %v2348_v41, %v8032_v34 }
0x1985   : > { %v2354_v61 = vadd.f32 1e-12, %v2352_v20 }
0x1987   : > { %4514 = vrsqrt.f32 %v2354_v61  ;;  %vm2362_vm3 = vweird.f32 %v2354_v61 }
0x198a   : > { %v2351_v48 = vpop.xlane.xlu0 %2350 }
0x198b   : > { %v2353_v22 = vmul.f32 %v2351_v48, %v8032_v34 }
0x198d   : > { %v4515_v18 = vpop.eup %4514  ;;  %v2355_v2 = vadd.f32 1e-12, %v2353_v22 }
0x198e   : > { %v2357_v38 = vmul.f32 %v4515_v18, %v2354_v61  ;;  %vm2363_vm1 = vweird.f32 %v4515_v18 }
0x198f   : > { %4516 = vrsqrt.f32 %v2355_v2  ;;  %vm2364_vm4 = vmor %vm2362_vm3, %vm2363_vm1  ;;  %vm2372_vm6 = vweird.f32 %v2355_v2 }
0x1990   : > { %v2358_v17 = vmul.f32 %v4515_v18, %v2357_v38 }
0x1992   : > { %v2359_v15 = vmul.f32 0.5, %v2358_v17 }
0x1994   : > { %v2360_v43 = vsub.f32 1.5, %v2359_v15 }
0x1995   : > { %v4517_v1 = vpop.eup %4516 }
0x1996   : > { %v2361_v13 = vmul.f32 %v4515_v18, %v2360_v43  ;;  %v2367_v9 = vmul.f32 %v4517_v1, %v2355_v2  ;;  %vm2373_vm5 = vweird.f32 %v4517_v1 }
0x1997   : > { %vm2374_vm7 = vmor %vm2372_vm6, %vm2373_vm5 }
0x1998   : > { %v2365_v10 = vsel %vm2364_vm4, %v4515_v18, %v2361_v13  ;;  %v2368_v52 = vmul.f32 %v4517_v1, %v2367_v9 }
0x1999   : > { %v2376_v37 = vmul.f32 %v2365_v10, %v2342_v8 }
0x199a   : > { %v2369_v11 = vmul.f32 0.5, %v2368_v52 }
0x199b   : > { %v2381_v39 = vmul.f32 %v2379_v60, %v2376_v37 }
0x199c   : > { %v2370_v3 = vsub.f32 1.5, %v2369_v11 }
0x199d   : > { %v2386_v49 = vadd.f32 %v2384_v12, %v2381_v39 }
0x199e   : > { %v2371_v45 = vmul.f32 %v4517_v1, %v2370_v3 }
0x199f   : > { %v6972_v56 = vadd.f32 %v8159_v6, %v2386_v49 }
0x19a0   : > { %v2375_v31 = vsel %vm2374_vm7, %v4517_v1, %v2371_v45 }
0x19a1   : > { %8160 = vst [vmem:[#allocation187_spill] sm:$0xff] %v6972_v56  ;;  %v2377_v16 = vmul.f32 %v2375_v31, %v2343_v5  ;;  %vm2390_vm11 = vcmp.ge.f32.partialorder %v6972_v56, 1.0 }
0x19a2   : > { %v6976_v30 = vsel %vm2390_vm11, 1.0, %v8096_v63 }
0x19a3   : > { %8161 = vst [vmem:[#allocation188_spill] sm:$0xff] %v6976_v30  ;;  %v8162_v32 = vmov %v6976_v30  ;;  %v2382_v19 = vmul.f32 %v2379_v60, %v2377_v16 }
0x19a4   : > { %v6986_v15 = vadd.f32 %v8164_v50, %v8162_v32  }
0x19a5   : > { %v2387_v42 = vadd.f32 %v2384_v12, %v2382_v19 }
0x19a6   : > { %8165 = vst [vmem:[#allocation189_spill] sm:$0xff] %v6986_v15  ;;  %v8166_v51 = vmov %v6986_v15 }
0x19a7   : > { %v6981_v22 = vadd.f32 %v8163_v44, %v2387_v42  ;;  %v6999_v21 = vmul.f32 %v8166_v51, %v6424_v26 }
0x19a9   : > { %vm2391_vm12 = vcmp.ge.f32.partialorder %v6981_v22, 1.0 }
0x19aa   : > { %v6989_v54 = vsel %vm2391_vm12, 1.0, %v8096_v63 }
0x19ab   : > { %8167 = vst [vmem:[#allocation190_spill] sm:$0xff] %v6989_v54  ;;  %v8168_v57 = vmov %v6989_v54 }
0x19ac   : > { %v6995_v9 = vadd.f32 %v8169_v4, %v8168_v57  }
0x19ae   : > { %8170 = vst [vmem:[#allocation191_spill] sm:$0xff] %v6995_v9  ;;  %v8171_v58 = vmov %v6995_v9 }
0x19af   : > { %v7003_v46 = vmul.f32 %v8171_v58, %v6424_v26 }
0x19b1   : > { %v2410_v8 = vpack.c.bf16 %v7003_v46, %v6999_v21 }
0x19b3   : > { %3738 = vmatmul.msk.bf16.vlgmr.msrb.gmra.mxu0 %vm276_vm0, %v2410_v8 }
0x1a30   : > { %v2426_v53 = vpop.f32.mrf.mxu0 }
0x1a31   : > { %v7009_v7 = vadd.f32 %v2426_v53, %v2412_v47 }
0x1a33   : > { %2433 = vrot.lane.b32.xlu0 %v7009_v7, %s4987_s19 }
0x1a38   : > { %v2428_v5 = vpop.f32.mrf.mxu0 }
0x1a39   : > { %v7013_v40 = vadd.f32 %v2428_v5, %v2412_v47 }
0x1a3b   : > { %2439 = vrot.lane.b32.xlu2 %v7013_v40, %s4989_s13  ;;  %2435 = vrot.lane.b32.xlu1 %v7013_v40, %s4987_s19  ;;  %s5010_s19 = smov (%p7297_p0), 112  }
0x1a3c   : > { %2443 = vrot.lane.b32.xlu0 %v7013_v40, %s4988_s9 }
0x1a43   : > { %2441 = vrot.lane.b32.xlu2 %v7009_v7, %s4988_s9  ;;  %2437 = vrot.lane.b32.xlu1 %v7009_v7, %s4989_s13 }
0x1a95   : > { %v7025_v41 = vpop.permute.xlu2 %2439 }
0x1a96   : > { %2517 = vrot.lane.b32.xlu0 %v7025_v41, %s4990_s3 }
0x1a9d   : > { %v7033_v61 = vpop.permute.xlu2 %2441 }
0x1aa5   : > { %v7029_v20 = vpop.permute.xlu0 %2433 }
0x1aa6   : > { %2480 = vrot.lane.b32.xlu2 %v7029_v20, %s4990_s3 }
0x1aad   : > { %v7035_v48 = vpop.permute.xlu1 %2435 }
0x1aae   : > { %v7037_v18 = vpop.permute.xlu0 %2443  ;;  %2482 = vrot.lane.b32.xlu1 %v7035_v48, %s4990_s3  ;;  %2550 = vrot.lane.b32.xlu2 %v7033_v61, %s4990_s3 }
0x1aaf   : > { %2552 = vrot.lane.b32.xlu0 %v7037_v18, %s4990_s3 }
0x1ab5   : > { %v7045_v2 = vpop.permute.xlu1 %2437 }
0x1ab6   : > { %2515 = vrot.lane.b32.xlu1 %v7045_v2, %s4990_s3 }
0x1ab7   : > { %2445 = vrot.lane.b32.xlu0 %v7009_v7, %s4990_s3 }
0x1abe   : > { %2447 = vrot.lane.b32.xlu1 %v7013_v40, %s4990_s3 }
0x1b00   : > { %v2481_v17 = vpop.permute.xlu2 %2480 }
0x1b08   : > { %v2518_v38 = vpop.permute.xlu0 %2517  ;;  %v2551_v1 = vpop.permute.xlu2 %2550 }
0x1b09   : > { %3747 = vmatpush.xpose.msk.msrb.mxu3 %vm452_vm8, %v2518_v38 }
0x1b20   : > { %v2483_v15 = vpop.permute.xlu1 %2482 }
0x1b21   : > { %v2553_v43 = vpop.permute.xlu0 %2552  ;;  %3743 = vmatpush.xpose.msk.msrb.mxu2 %vm452_vm8, %v2483_v15 }
0x1b22   : > { %3751 = vmatpush.xpose.msk.msra.mxu0 %vm452_vm8, %v2553_v43 }
0x1b25   : > { %3744 = vmatpush.xpose.msk.msrb.mxu2 %vm452_vm8, %v2481_v17 }
0x1b26   : > { %3752 = vmatpush.xpose.msk.msra.mxu0 %vm452_vm8, %v2551_v1 }
0x1b28   : > { %v2516_v13 = vpop.permute.xlu1 %2515  ;;  %3745 = vmatmul.msk.f32.vlgmr.msrb.gmra.mxu2 %vm452_vm8, %v7029_v20 }
0x1b29   : > { %3753 = vmatmul.msk.f32.vlgmr.msra.gmra.mxu0 %vm452_vm8, %v7033_v61  ;;  %3748 = vmatpush.xpose.msk.msrb.mxu3 %vm452_vm8, %v2516_v13  ;;  %v2446_v0 = vpop.permute.xlu0 %2445 }
0x1b2c   : > { %3749 = vmatmul.msk.f32.vlgmr.msrb.gmra.mxu3 %vm452_vm8, %v7045_v2 }
0x1b30   : > { %v2448_v9 = vpop.permute.xlu1 %2447  ;;  %3746 = vmatmul.msk.f32.gmra.mxu2 %vm452_vm8, %v7035_v48 }
0x1b31   : > { %3754 = vmatmul.msk.f32.gmra.mxu0 %vm452_vm8, %v7037_v18  ;;  %3739 = vmatpush.xpose.msk.msra.mxu1 %vm452_vm8, %v2448_v9  ;;  %v4359_v9 = vpack.i.bf16 %v7033_v61, %v7037_v18 }
0x1b34   : > { %3750 = vmatmul.msk.f32.gmra.mxu3 %vm452_vm8, %v7025_v41 }
0x1b35   : > { %3740 = vmatpush.xpose.msk.msra.mxu1 %vm452_vm8, %v2446_v0 }
0x1b38   : > { %3741 = vmatmul.msk.f32.vlgmr.msra.gmra.mxu1 %vm452_vm8, %v7009_v7 }
0x1b40   : > { %3742 = vmatmul.msk.f32.gmra.mxu1 %vm452_vm8, %v7013_v40 }
0x1ba6   : > { %v2579_v60 = vpop.f32.mrf.mxu0 }
0x1ba7   : > { %v2591_v10 = vmul.f32 0.35355338, %v2579_v60 }
0x1ba9   : > { %v2599_v52 = vadd.f32 %v2591_v10, %v7952_v27 }
0x1bab   : > { %v2509_v36 = vpop.f32.mrf.mxu2  ;;  %v2619_v12 = vsel %vm605_vm9, %v2599_v52, -inf }
0x1bac   : > { %v2587_v37 = vmul.f32 0.35355338, %v2509_v36  ;;  %2620 = vmax.xlane.f32.xlu2 %v2619_v12 }
0x1bae   : > { %v2595_v11 = vadd.f32 %v2587_v37, %v7952_v27  ;;  %v2582_v62 = vpop.f32.mrf.mxu0 }
0x1baf   : > { %v2544_v39 = vpop.f32.mrf.mxu3  ;;  %v2592_v53 = vmul.f32 0.35355338, %v2582_v62  ;;  %v4354_v62 = vpack.i.bf16 %v7045_v2, %v7029_v20  ;;  %v8173_v2 = vld [vmem:[#allocation122_spill] sm:$0xff] }
0x1bb0   : > { %v2589_v3 = vmul.f32 0.35355338, %v2544_v39  ;;  %v2607_v45 = vsel %vm605_vm9, %v2595_v11, -inf }
0x1bb1   : > { %v2600_v38 = vadd.f32 %v2592_v53, %v7951_v28 }
0x1bb2   : > { %v2597_v49 = vadd.f32 %v2589_v3, %v7952_v27 }
0x1bb3   : > { %v2512_v17 = vpop.f32.mrf.mxu2  ;;  %v2622_v43 = vsel %vm605_vm9, %v2600_v38, -inf }
0x1bb4   : > { %2608 = vmax.xlane.f32.xlu2 %v2607_v45  ;;  %v2613_v6 = vsel %vm605_vm9, %v2597_v49, -inf  ;;  %v2588_v15 = vmul.f32 0.35355338, %v2512_v17 }
0x1bb5   : > { %2614 = vmax.xlane.f32.xlu1 %v2613_v6  ;;  %v2474_v31 = vpop.f32.mrf.mxu1 }
0x1bb6   : > { %v2585_v16 = vmul.f32 0.35355338, %v2474_v31  ;;  %v2596_v1 = vadd.f32 %v2588_v15, %v7951_v28 }
0x1bb7   : > { %v2547_v30 = vpop.f32.mrf.mxu3 }
0x1bb8   : > { %v7084_v19 = vadd.f32 %v2585_v16, %v7952_v27  ;;  %v2590_v42 = vmul.f32 0.35355338, %v2547_v30  ;;  %v2610_v13 = vsel %vm605_vm9, %v2596_v1, -inf }
0x1bba   : > { %v2598_v44 = vadd.f32 %v2590_v42, %v7951_v28  ;;  %v2601_v50 = vsel %vm605_vm9, %v7084_v19, -inf }
0x1bbc   : > { %2602 = vmax.xlane.f32.xlu2 %v2601_v50  ;;  %v2616_v54 = vsel %vm605_vm9, %v2598_v44, -inf }
0x1bbd   : > { %2617 = vmax.xlane.f32.xlu1 %v2616_v54  ;;  %v2477_v4 = vpop.f32.mrf.mxu1 }
0x1bbe   : > { %v2586_v8 = vmul.f32 0.35355338, %v2477_v4 }
0x1bc0   : > { %v7091_v47 = vadd.f32 %v2586_v8, %v7951_v28  ;;  %v4349_v8 = vpack.i.bf16 %v7025_v41, %v7035_v48 }
0x1bc2   : > { %v2604_v5 = vsel %vm605_vm9, %v7091_v47, -inf }
0x1bc3   : > { %2605 = vmax.xlane.f32.xlu0 %v2604_v5 }
0x1bcb   : > { %2623 = vmax.xlane.f32.xlu0 %v2622_v43  ;;  %v8174_v43 = vld [vmem:[#allocation121_spill] sm:$0xff] }
0x1bd3   : > { %2611 = vmax.xlane.f32.xlu0 %v2610_v13 }
0x1be7   : > { %4360 = vrot.lane.b32.xlu0 %v4359_v9, %s4991_s7  ;;  %v8176_v9 = vld [vmem:[#allocation120_spill] sm:$0xff] }
0x1c1f   : > { %v2621_v0 = vpop.xlane.xlu2 %2620 }
0x1c20   : > { %v2631_v60 = vsub.f32 %v2599_v52, %v2621_v0  ;;  %v8177_v0 = vld [vmem:[#allocation119_spill] sm:$0xff] }
0x1c22   : > { %v2645_v10 = vmul.f32 1.442695, %v2631_v60  ;;  %v8178_v60 = vpack.c.bf16 %v8176_v9, %v8177_v0  ;;  %v8191_v9 = vld [vmem:[#allocation106_spill] sm:$0xff]  ;;  %v8192_v0 = vld [vmem:[#allocation105_spill] sm:$0xff] }
0x1c24   : > { %4518 = vpow2.f32 %v2645_v10 }
0x1c27   : > { %v2609_v36 = vpop.xlane.xlu2 %2608 }
0x1c28   : > { %v2627_v12 = vsub.f32 %v2595_v11, %v2609_v36  ;;  %v2615_v37 = vpop.xlane.xlu1 %2614 }
0x1c29   : > { %v2629_v39 = vsub.f32 %v2597_v49, %v2615_v37 }
0x1c2a   : > { %v7102_v3 = vpop.eup %4518  ;;  %v2637_v45 = vmul.f32 1.442695, %v2627_v12 }
0x1c2b   : > { %v2641_v6 = vmul.f32 1.442695, %v2629_v39  ;;  %v2667_v31 = vsel %vm605_vm9, %v7102_v3, 0.0  ;;  %v4364_v39 = vpack.i.bf16 %v7009_v7, %v7013_v40 }
0x1c2c   : > { %4520 = vpow2.f32 %v2637_v45  ;;  %2668 = vadd.xlane.f32.xlu2 %v2667_v31 }
0x1c2d   : > { %4522 = vpow2.f32 %v2641_v6 }
0x1c2f   : > { %v2603_v13 = vpop.xlane.xlu2 %2602 }
0x1c30   : > { %v2618_v30 = vpop.xlane.xlu1 %2617  ;;  %v2625_v10 = vsub.f32 %v7084_v19, %v2603_v13 }
0x1c31   : > { %v2630_v54 = vsub.f32 %v2598_v44, %v2618_v30 }
0x1c32   : > { %v7106_v61 = vpop.eup %4520  ;;  %v2633_v12 = vmul.f32 1.442695, %v2625_v10  ;;  %v8194_v10 = vld [vmem:[#allocation66_spill] sm:$0xff] }
0x1c33   : > { %v7108_v18 = vpop.eup %4522  ;;  %v2655_v52 = vsel %vm605_vm9, %v7106_v61, 0.0  ;;  %v2643_v53 = vmul.f32 1.442695, %v2630_v54  ;;  %v8179_v54 = vld [vmem:[#allocation132_spill] sm:$0xff] }
0x1c34   : > { %2656 = vadd.xlane.f32.xlu1 %v2655_v52  ;;  %v2661_v11 = vsel %vm605_vm9, %v7108_v18, 0.0 }
0x1c35   : > { %2662 = vadd.xlane.f32.xlu2 %v2661_v11 }
0x1c36   : > { %v2606_v49 = vpop.xlane.xlu0 %2605 }
0x1c3e   : > { %v2624_v16 = vpop.xlane.xlu0 %2623 }
0x1c3f   : > { %v2632_v36 = vsub.f32 %v2600_v38, %v2624_v16  ;;  %v2626_v38 = vsub.f32 %v7091_v47, %v2606_v49 }
0x1c41   : > { %v2647_v37 = vmul.f32 1.442695, %v2632_v36  ;;  %v2635_v52 = vmul.f32 1.442695, %v2626_v38  ;;  %v8195_v36 = vld [vmem:[#allocation65_spill] sm:$0xff] }
0x1c46   : > { %v2612_v42 = vpop.xlane.xlu0 %2611 }
0x1c47   : > { %v2628_v50 = vsub.f32 %v2596_v1, %v2612_v42  ;;  %v8175_v1 = vpack.c.bf16 %v8173_v2, %v8174_v43 }
0x1c49   : > { %v2639_v4 = vmul.f32 1.442695, %v2628_v50 }
0x1c4b   : > { %4524 = vpow2.f32 %v2639_v4 }
0x1c4c   : > { %4526 = vpow2.f32 %v2643_v53  ;;  %v8182_v53 = vld [vmem:[#allocation136_spill] sm:$0xff] }
0x1c4d   : > { %4350 = vrot.lane.b32.xlu1 %v4349_v8, %s4991_s7  ;;  %4355 = vrot.lane.b32.xlu2 %v4354_v62, %s4991_s7  ;;  %4528 = vpow2.f32 %v2633_v12  ;;  %v8196_v12 = vpack.c.bf16 %v8194_v10, %v8195_v36 }
0x1c4e   : > { %4530 = vpow2.f32 %v2647_v37  ;;  %v8197_v37 = vld [vmem:[#allocation104_spill] sm:$0xff] }
0x1c4f   : > { %4532 = vpow2.f32 %v2635_v52 }
0x1c51   : > { %v7120_v5 = vpop.eup %4524 }
0x1c52   : > { %v2658_v17 = vsel %vm605_vm9, %v7120_v5, 0.0  ;;  %v7124_v44 = vpop.eup %4526 }
0x1c53   : > { %2659 = vadd.xlane.f32.xlu0 %v2658_v17  ;;  %v2664_v20 = vsel %vm605_vm9, %v7124_v44, 0.0  ;;  %v7138_v45 = vpop.eup %4528  ;;  %v8185_v17 = vld [vmem:[#allocation134_spill] sm:$0xff] }
0x1c54   : > { %v7140_v6 = vpop.eup %4530  ;;  %v2649_v31 = vsel %vm605_vm9, %v7138_v45, 0.0 }
0x1c55   : > { %v2670_v19 = vsel %vm605_vm9, %v7140_v6, 0.0  ;;  %v7147_v11 = vpop.eup %4532 }
0x1c56   : > { %v2652_v7 = vsel %vm605_vm9, %v7147_v11, 0.0 }
0x1c59   : > { %v4361_v15 = vpop.permute.xlu0 %4360 }
0x1c5a   : > { %v4362_v41 = vunpack.i.l.bf16 %v4361_v15  ;;  %v4363_v48 = vunpack.i.h.bf16 %v4361_v15 }
0x1c5b   : > { %2665 = vadd.xlane.f32.xlu0 %v2664_v20 }
0x1c5c   : > { %2820 = vmatpush.msrb.mxu0 %v4362_v41 }
0x1c5e   : > { %2821 = vmatpush.msrb.mxu0 %v4363_v48 }
0x1c60   : > { %3087 = vmatpush.bf16.msra.mxu0 %v8175_v1  ;;  %v8189_v1 = vld [vmem:[#allocation67_spill] sm:$0xff] }
0x1c64   : > { %3088 = vmatpush.bf16.msra.mxu0 %v8178_v60  ;;  %v8193_v60 = vpack.c.bf16 %v8191_v9, %v8192_v0  ;;  %v8221_v9 = vld [vmem:[#allocation131_spill] sm:$0xff] }
0x1c6f   : > { %4365 = vrot.lane.b32.xlu0 %v4364_v39, %s4991_s7  ;;  %v8198_v39 = vld [vmem:[#allocation103_spill] sm:$0xff] }
0x1c76   : > { %2650 = vadd.xlane.f32.xlu2 %v2649_v31  ;;  %v8199_v31 = vpack.c.bf16 %v8197_v37, %v8198_v39 }
0x1c77   : > { %2671 = vadd.xlane.f32.xlu1 %v2670_v19 }
0x1c99   : > { %2653 = vadd.xlane.f32.xlu0 %v2652_v7  ;;  %v8200_v7 = vld [vmem:[#allocation102_spill] sm:$0xff] }
0x1c9f   : > { %v2669_v40 = vpop.xlane.xlu2 %2668 }
0x1ca0   : > { %4534 = vrcp.f32 %v2669_v40  ;;  %v8201_v40 = vld [vmem:[#allocation100_spill] sm:$0xff] }
0x1ca6   : > { %v4535_v16 = vpop.eup %4534 }
0x1ca7   : > { %v2687_v30 = vmul.f32 %v4535_v16, %v7102_v3  ;;  %v2657_v42 = vpop.xlane.xlu1 %2656  ;;  %v8202_v16 = vpack.c.bf16 %v8200_v7, %v8201_v40 }
0x1ca8   : > { %4536 = vrcp.f32 %v2657_v42  ;;  %v2663_v50 = vpop.xlane.xlu2 %2662 }
0x1ca9   : > { %v7153_v4 = vadd.f32 %v8179_v54, %v2687_v30   ;;  %4538 = vrcp.f32 %v2663_v50  ;;  %3761 = vmatmul.msk.f32.vlgmr.msrb.gmra.mxu0 %vm605_vm9, %v2687_v30  ;;  %v8203_v30 = vld [vmem:[#allocation135_spill] sm:$0xff]  ;;  %v8207_v54 = vld [vmem:[#allocation98_spill] sm:$0xff] }
0x1cab   : > { %8180 = vst [vmem:[#allocation192_spill] sm:$0xff] %v7153_v4  ;;  %v8181_v23 = vmov %v7153_v4 }
0x1cae   : > { %v4537_v47 = vpop.eup %4536 }
0x1caf   : > { %v4539_v49 = vpop.eup %4538  ;;  %v2683_v8 = vmul.f32 %v4537_v47, %v7106_v61 }
0x1cb0   : > { %v2685_v62 = vmul.f32 %v4539_v49, %v7108_v18  ;;  %v4356_v15 = vpop.permute.xlu2 %4355  ;;  %v8188_v18 = vld [vmem:[#allocation68_spill] sm:$0xff] }
0x1cb1   : > { %v7159_v50 = vadd.f32 %v8182_v53, %v2683_v8   ;;  %v4358_v2 = vunpack.i.h.bf16 %v4356_v15  ;;  %v4357_v43 = vunpack.i.l.bf16 %v4356_v15  ;;  %v8190_v13 = vpack.c.bf16 %v8188_v18, %v8189_v1  ;;  %v8213_v15 = vld [vmem:[#allocation39_spill] sm:$0xff] }
0x1cb2   : > { %v7162_v3 = vadd.f32 %v8185_v17, %v2685_v62   ;;  %v8212_v17 = vld [vmem:[#allocation40_spill] sm:$0xff] }
0x1cb3   : > { %8183 = vst [vmem:[#allocation193_spill] sm:$0xff] %v7159_v50  ;;  %v8184_v27 = vmov %v7159_v50  ;;  %v8206_v50 = vld [vmem:[#allocation99_spill] sm:$0xff] }
0x1cb4   : > { %8186 = vst [vmem:[#allocation194_spill] sm:$0xff] %v7162_v3  ;;  %v8187_v28 = vmov %v7162_v3  ;;  %v8208_v4 = vpack.c.bf16 %v8206_v50, %v8207_v54 }
0x1cbf   : > { %v4351_v41 = vpop.permute.xlu1 %4350 }
0x1cc0   : > { %v4353_v20 = vunpack.i.h.bf16 %v4351_v41  ;;  %v4352_v48 = vunpack.i.l.bf16 %v4351_v41  ;;  %v8214_v41 = vpack.c.bf16 %v8212_v17, %v8213_v15 }
0x1cc2   : > { %2750 = vmatpush.msra.mxu2 %v4352_v48  ;;  %2785 = vmatpush.msra.mxu3 %v4353_v20 }
0x1cc4   : > { %2751 = vmatpush.msra.mxu2 %v4357_v43  ;;  %2786 = vmatpush.msra.mxu3 %v4358_v2  ;;  %v8215_v2 = vld [vmem:[#allocation38_spill] sm:$0xff] }
0x1cc5   : > { %3757 = vmatmul.msk.f32.vlgmr.msra.gmra.mxu2 %vm605_vm9, %v2683_v8  ;;  %3759 = vmatmul.msk.f32.vlgmr.msra.gmra.mxu3 %vm605_vm9, %v2685_v62 }
0x1cc6   : > { %v2660_v61 = vpop.xlane.xlu0 %2659  ;;  %2949 = vmatpush.bf16.msrb.mxu2 %v8190_v13  ;;  %2986 = vmatpush.bf16.msrb.mxu3 %v8193_v60  ;;  %v8218_v13 = vld [vmem:[#allocation138_spill] sm:$0xff] }
0x1cc7   : > { %4540 = vrcp.f32 %v2660_v61 }
0x1cca   : > { %2950 = vmatpush.bf16.msrb.mxu2 %v8196_v12  ;;  %2987 = vmatpush.bf16.msrb.mxu3 %v8199_v31 }
0x1ccd   : > { %v4541_v19 = vpop.eup %4540 }
0x1cce   : > { %v2666_v38 = vpop.xlane.xlu0 %2665  ;;  %v2684_v52 = vmul.f32 %v4541_v19, %v7120_v5  ;;  %2988 = vmatpush.bf16.msrb.mxu3 %v8202_v16  ;;  %v8209_v5 = vld [vmem:[#allocation133_spill] sm:$0xff] }
0x1ccf   : > { %4542 = vrcp.f32 %v2666_v38 }
0x1cd0   : > { %3758 = vmatmul.msk.f32.gmra.mxu2 %vm605_vm9, %v2684_v52  ;;  %v7184_v42 = vadd.f32 %v8203_v30, %v2684_v52  }
0x1cd2   : > { %8204 = vst [vmem:[#allocation195_spill] sm:$0xff] %v7184_v42  ;;  %v8205_v51 = vmov %v7184_v42  ;;  %2989 = vmatpush.bf16.msrb.mxu3 %v8208_v4 }
0x1cd5   : > { %v4543_v47 = vpop.eup %4542 }
0x1cd6   : > { %v2686_v49 = vmul.f32 %v4543_v47, %v7124_v44  ;;  %v8216_v44 = vld [vmem:[#allocation37_spill] sm:$0xff] }
0x1cd7   : > { %v8217_v43 = vpack.c.bf16 %v8215_v2, %v8216_v44 }
0x1cd8   : > { %3760 = vmatmul.msk.f32.gmra.mxu3 %vm605_vm9, %v2686_v49  ;;  %v7192_v3 = vadd.f32 %v8209_v5, %v2686_v49  }
0x1cda   : > { %8210 = vst [vmem:[#allocation196_spill] sm:$0xff] %v7192_v3  ;;  %v8211_v58 = vmov %v7192_v3 }
0x1ce1   : > { %v4366_v8 = vpop.permute.xlu0 %4365 }
0x1ce2   : > { %v4367_v62 = vunpack.i.l.bf16 %v4366_v8  ;;  %v4368_v53 = vunpack.i.h.bf16 %v4366_v8 }
0x1ce4   : > { %2715 = vmatpush.msrb.mxu1 %v4367_v62 }
0x1ce6   : > { %2716 = vmatpush.msrb.mxu1 %v4368_v53 }
0x1ce8   : > { %2872 = vmatpush.bf16.msra.mxu1 %v8214_v41 }
0x1ce9   : > { %v2651_v20 = vpop.xlane.xlu2 %2650 }
0x1cea   : > { %4544 = vrcp.f32 %v2651_v20  ;;  %v2672_v48 = vpop.xlane.xlu1 %2671  ;;  %v8227_v20 = vld [vmem:[#allocation44_spill] sm:$0xff] }
0x1ceb   : > { %4546 = vrcp.f32 %v2672_v48  ;;  %v2861_v48 = vperm.slane %v8227_v20, 0 }
0x1cec   : > { %2873 = vmatpush.bf16.msra.mxu1 %v8217_v43 }
0x1cf0   : > { %v4545_v61 = vpop.eup %4544 }
0x1cf1   : > { %v4547_v18 = vpop.eup %4546  ;;  %v2681_v3 = vmul.f32 %v4545_v61, %v7138_v45  ;;  %v8224_v45 = vld [vmem:[#allocation137_spill] sm:$0xff] }
0x1cf2   : > { %v2688_v1 = vmul.f32 %v4547_v18, %v7140_v6 }
0x1cf3   : > { %v7203_v12 = vadd.f32 %v8218_v13, %v2681_v3   ;;  %3755 = vmatmul.msk.f32.vlgmr.msrb.gmra.mxu1 %vm605_vm9, %v2681_v3 }
0x1cf4   : > { %3762 = vmatmul.msk.f32.gmra.mxu0 %vm605_vm9, %v2688_v1  ;;  %v7208_v61 = vadd.f32 %v8221_v9, %v2688_v1  }
0x1cf5   : > { %8219 = vst [vmem:[#allocation197_spill] sm:$0xff] %v7203_v12  ;;  %v8220_v24 = vmov %v7203_v12 }
0x1cf6   : > { %8222 = vst [vmem:[#allocation198_spill] sm:$0xff] %v7208_v61  ;;  %v8223_v55 = vmov %v7208_v61 }
0x1d0c   : > { %v2654_v0 = vpop.xlane.xlu0 %2653 }
0x1d0d   : > { %4548 = vrcp.f32 %v2654_v0 }
0x1d13   : > { %v4549_v60 = vpop.eup %4548 }
0x1d14   : > { %v2682_v10 = vmul.f32 %v4549_v60, %v7147_v11 }
0x1d16   : > { %3756 = vmatmul.msk.f32.gmra.mxu1 %vm605_vm9, %v2682_v10  ;;  %v7213_v49 = vadd.f32 %v8224_v45, %v2682_v10  }
0x1d18   : > { %8225 = vst [vmem:[#allocation199_spill] sm:$0xff] %v7213_v49  ;;  %v8226_v14 = vmov %v7213_v49 }
0x1d26   : > { %v2823_v19 = vpop.f32.mrf.mxu0 }
0x1d48   : > { %v2753_v6 = vpop.f32.mrf.mxu2  ;;  %v2788_v36 = vpop.f32.mrf.mxu3 }
0x1d53   : > { %v2756_v12 = vpop.f32.mrf.mxu2 }
0x1d54   : > { %v4369_v37 = vpack.i.bf16 %v2756_v12, %v2753_v6 }
0x1d56   : > { %4370 = vrot.lane.b32.xlu1 %v4369_v37, %s4992_s25 }
0x1d5b   : > { %v2791_v39 = vpop.f32.mrf.mxu3 }
0x1d5c   : > { %v4374_v31 = vpack.i.bf16 %v2791_v39, %v2788_v36 }
0x1d5e   : > { %4375 = vrot.lane.b32.xlu2 %v4374_v31, %s4993_s0 }
0x1d70   : > { %v2718_v11 = vpop.f32.mrf.mxu1 }
0x1d71   : > { %v2826_v38 = vpop.f32.mrf.mxu0 }
0x1d72   : > { %v4379_v52 = vpack.i.bf16 %v2826_v38, %v2823_v19 }
0x1d74   : > { %4380 = vrot.lane.b32.xlu0 %v4379_v52, %s4994_s26 }
0x1d93   : > { %v2721_v42 = vpop.f32.mrf.mxu1 }
0x1db8   : > { %v4376_v30 = vpop.permute.xlu2 %4375 }
0x1db9   : > { %v4378_v4 = vunpack.i.h.bf16 %v4376_v30  ;;  %v4377_v47 = vunpack.i.l.bf16 %v4376_v30 }
0x1dc8   : > { %v4371_v7 = vpop.permute.xlu1 %4370 }
0x1dc9   : > { %v4373_v40 = vunpack.i.h.bf16 %v4371_v7  ;;  %v4372_v16 = vunpack.i.l.bf16 %v4371_v7 }
0x1dcb   : > { %v2853_v50 = vsel %vm452_vm8, %v2718_v11, %v4372_v16  ;;  %v2854_v54 = vsel %vm452_vm8, %v2721_v42, %v4373_v40 }
0x1dcc   : > { %v2855_v62 = vsel %vm605_vm9, %v2853_v50, %v4377_v47  ;;  %v2856_v53 = vsel %vm605_vm9, %v2854_v54, %v4378_v4 }
0x1de6   : > { %v4381_v49 = vpop.permute.xlu0 %4380 }
0x1de7   : > { %v4383_v5 = vunpack.i.h.bf16 %v4381_v49  ;;  %v4382_v8 = vunpack.i.l.bf16 %v4381_v49 }
0x1de9   : > { %v2858_v17 = vsel %vm862_vm10, %v2856_v53, %v4383_v5  ;;  %v2857_v15 = vsel %vm862_vm10, %v2855_v62, %v4382_v8  ;;  %v8228_v62 = vld [vmem:[#allocation49_spill] sm:$0xff] }
0x1dea   : > { %v2859_v41 = vpack.c.bf16 %v2858_v17, %v2857_v15  ;;  %v2927_v53 = vperm.slane %v8228_v62, 0 }
0x1dec   : > { %3763 = vmatmul.msk.bf16.vlgmr.msra.gmra.mxu1 %vm276_vm0, %v2859_v41 }
0x1e69   : > { %v2875_v2 = vpop.f32.mrf.mxu1 }
0x1e6a   : > { %v2876_v44 = vadd.f32 %v2875_v2, %v2861_v48 }
0x1e6c   : > { %v2880_v43 = vadd.f32 %v2876_v44, %v6999_v21 }
0x1e6e   : > { %v2882_v61 = vsel %vm276_vm0, %v2880_v43, 0.0 }
0x1e6f   : > { %2883 = vadd.xlane.f32.xlu1 %v2882_v61 }
0x1e71   : > { %v2877_v18 = vpop.f32.mrf.mxu1 }
0x1e72   : > { %v2878_v3 = vadd.f32 %v2877_v18, %v2861_v48  ;;  %v8229_v48 = vld [vmem:[#allocation54_spill] sm:$0xff] }
0x1e73   : > { %v2932_v2 = vperm.slane %v8229_v48, 0 }
0x1e74   : > { %v2881_v1 = vadd.f32 %v2878_v3, %v7003_v46  ;;  %v8230_v3 = vld [vmem:[#allocation72_spill] sm:$0xff] }
0x1e76   : > { %v2885_v13 = vsel %vm276_vm0, %v2881_v1, 0.0 }
0x1e77   : > { %2886 = vadd.xlane.f32.xlu2 %v2885_v13 }
0x1ee2   : > { %v2884_v9 = vpop.xlane.xlu1 %2883 }
0x1ee3   : > { %v2888_v0 = vmul.f32 %v2884_v9, %v8032_v34 }
0x1ee5   : > { %v2890_v60 = vsub.f32 %v2880_v43, %v2888_v0 }
0x1ee7   : > { %v2892_v10 = vmul.f32 %v2890_v60, %v2890_v60 }
0x1ee9   : > { %v2894_v45 = vsel %vm276_vm0, %v2892_v10, 0.0 }
0x1eea   : > { %v2887_v6 = vpop.xlane.xlu2 %2886  ;;  %2895 = vadd.xlane.f32.xlu0 %v2894_v45 }
0x1eeb   : > { %v2889_v21 = vmul.f32 %v2887_v6, %v8032_v34 }
0x1eed   : > { %v2891_v36 = vsub.f32 %v2881_v1, %v2889_v21  ;;  %v2938_v1 = vperm.slane %v8230_v3, 0 }
0x1eef   : > { %v2893_v12 = vmul.f32 %v2891_v36, %v2891_v36 }
0x1ef1   : > { %v2897_v37 = vsel %vm276_vm0, %v2893_v12, 0.0 }
0x1ef2   : > { %2898 = vadd.xlane.f32.xlu1 %v2897_v37 }
0x1f5d   : > { %v2896_v46 = vpop.xlane.xlu0 %2895 }
0x1f5e   : > { %v2900_v39 = vmul.f32 %v2896_v46, %v8032_v34 }
0x1f60   : > { %v2902_v31 = vadd.f32 1e-12, %v2900_v39 }
0x1f62   : > { %4550 = vrsqrt.f32 %v2902_v31  ;;  %vm2910_vm14 = vweird.f32 %v2902_v31 }
0x1f65   : > { %v2899_v19 = vpop.xlane.xlu1 %2898 }
0x1f66   : > { %v2901_v38 = vmul.f32 %v2899_v19, %v8032_v34 }
0x1f68   : > { %v4551_v52 = vpop.eup %4550  ;;  %v2903_v11 = vadd.f32 1e-12, %v2901_v38 }
0x1f69   : > { %v2905_v7 = vmul.f32 %v4551_v52, %v2902_v31  ;;  %vm2911_vm13 = vweird.f32 %v4551_v52 }
0x1f6a   : > { %4552 = vrsqrt.f32 %v2903_v11  ;;  %vm2912_vm15 = vmor %vm2910_vm14, %vm2911_vm13  ;;  %vm2920_vm3 = vweird.f32 %v2903_v11 }
0x1f6b   : > { %v2906_v40 = vmul.f32 %v4551_v52, %v2905_v7 }
0x1f6d   : > { %v2907_v16 = vmul.f32 0.5, %v2906_v40 }
0x1f6f   : > { %v2908_v30 = vsub.f32 1.5, %v2907_v16 }
0x1f70   : > { %v4553_v42 = vpop.eup %4552 }
0x1f71   : > { %v2909_v50 = vmul.f32 %v4551_v52, %v2908_v30  ;;  %v2915_v54 = vmul.f32 %v4553_v42, %v2903_v11  ;;  %vm2921_vm1 = vweird.f32 %v4553_v42 }
0x1f72   : > { %vm2922_vm4 = vmor %vm2920_vm3, %vm2921_vm1 }
0x1f73   : > { %v2916_v4 = vmul.f32 %v4553_v42, %v2915_v54  ;;  %v2913_v47 = vsel %vm2912_vm15, %v4551_v52, %v2909_v50  ;;  %v8231_v50 = vld [vmem:[#allocation110_spill] sm:$0xff] }
0x1f74   : > { %v2924_v8 = vmul.f32 %v2913_v47, %v2890_v60  ;;  %v2977_v54 = vperm.slane %v8231_v50, 0 }
0x1f75   : > { %v2917_v49 = vmul.f32 0.5, %v2916_v4 }
0x1f76   : > { %v2929_v20 = vmul.f32 %v2927_v53, %v2924_v8 }
0x1f77   : > { %v2918_v5 = vsub.f32 1.5, %v2917_v49 }
0x1f78   : > { %v2934_v43 = vadd.f32 %v2932_v2, %v2929_v20 }
0x1f79   : > { %v2919_v17 = vmul.f32 %v4553_v42, %v2918_v5 }
0x1f7b   : > { %v2923_v15 = vsel %vm2922_vm4, %v4553_v42, %v2919_v17  ;;  %vm3296_vm4 = vcmask (%p7297_p0), 326656  }
0x1f7c   : > { %v2925_v41 = vmul.f32 %v2923_v15, %v2891_v36 }
0x1f7e   : > { %v2930_v44 = vmul.f32 %v2927_v53, %v2925_v41 }
0x1f80   : > { %v2935_v61 = vadd.f32 %v2932_v2, %v2930_v44 }
0x1f82   : > { %v2936_v18 = vpack.c.bf16 %v2935_v61, %v2934_v43 }
0x1f84   : > { %3764 = vmatmul.msk.bf16.vlgmr.msrb.gmra.mxu2 %vm276_vm0, %v2936_v18 }
0x2007   : > { %v2952_v13 = vpop.f32.mrf.mxu2 }
0x2008   : > { %v2953_v9 = vadd.f32 %v2952_v13, %v2938_v1 }
0x200a   : > { %v2959_v0 = vmul.f32 0.044715, %v2953_v9  ;;  %v2957_v11 = vmul.f32 0.5, %v2953_v9 }
0x200c   : > { %v2961_v60 = vmul.f32 %v2959_v0, %v2953_v9 }
0x200e   : > { %v2963_v10 = vmul.f32 %v2961_v60, %v2953_v9 }
0x200f   : > { %v2954_v45 = vpop.f32.mrf.mxu2 }
0x2010   : > { %v2965_v6 = vadd.f32 %v2963_v10, %v2953_v9  ;;  %v2955_v21 = vadd.f32 %v2954_v45, %v2938_v1 }
0x2012   : > { %v2960_v36 = vmul.f32 0.044715, %v2955_v21  ;;  %v2967_v12 = vmul.f32 0.7978846, %v2965_v6  ;;  %v2958_v7 = vmul.f32 0.5, %v2955_v21 }
0x2014   : > { %v2962_v37 = vmul.f32 %v2960_v36, %v2955_v21  ;;  %4554 = vtanh.f32 %v2967_v12 }
0x2016   : > { %v2964_v46 = vmul.f32 %v2962_v37, %v2955_v21 }
0x2018   : > { %v2966_v39 = vadd.f32 %v2964_v46, %v2955_v21 }
0x201a   : > { %v2968_v31 = vmul.f32 0.7978846, %v2966_v39  ;;  %v4555_v19 = vpop.eup %4554 }
0x201b   : > { %v2971_v38 = vadd.f32 1.0, %v4555_v19 }
0x201c   : > { %4556 = vtanh.f32 %v2968_v31  ;;  %v8232_v31 = vld [vmem:[#allocation114_spill] sm:$0xff] }
0x201d   : > { %v2973_v16 = vmul.f32 %v2971_v38, %v2957_v11  ;;  %v3043_v19 = vperm.slane %v8232_v31, 0  ;;  %v8233_v11 = vld [vmem:[#allocation118_spill] sm:$0xff] }
0x2022   : > { %v4557_v52 = vpop.eup %4556 }
0x2023   : > { %v2972_v40 = vadd.f32 1.0, %v4557_v52 }
0x2025   : > { %v2974_v30 = vmul.f32 %v2972_v40, %v2958_v7  ;;  %v3048_v7 = vperm.slane %v8233_v11, 0 }
0x2027   : > { %v2975_v42 = vpack.c.bf16 %v2974_v30, %v2973_v16 }
0x2029   : > { %3765 = vmatmul.msk.bf16.vlgmr.msrb.gmra.mxu3 %vm985_vm2, %v2975_v42 }
0x20ac   : > { %v2991_v4 = vpop.f32.mrf.mxu3 }
0x20ad   : > { %v2992_v47 = vadd.f32 %v2991_v4, %v2977_v54  ;;  %v8234_v4 = vld [vmem:[#allocation152_spill] sm:$0xff] }
0x20af   : > { %v2996_v49 = vadd.f32 %v2992_v47, %v2934_v43 }
0x20b1   : > { %v2998_v5 = vsel %vm276_vm0, %v2996_v49, 0.0 }
0x20b2   : > { %2999 = vadd.xlane.f32.xlu1 %v2998_v5 }
0x20b4   : > { %v2993_v8 = vpop.f32.mrf.mxu3 }
0x20b5   : > { %v2994_v62 = vadd.f32 %v2993_v8, %v2977_v54 }
0x20b7   : > { %v2997_v53 = vadd.f32 %v2994_v62, %v2935_v61 }
0x20b9   : > { %v3001_v17 = vsel %vm276_vm0, %v2997_v53, 0.0 }
0x20ba   : > { %3002 = vadd.xlane.f32.xlu2 %v3001_v17  ;;  %v8238_v17 = vld [vmem:[#allocation146_spill] sm:$0xff] }
0x2125   : > { %v3000_v15 = vpop.xlane.xlu1 %2999 }
0x2126   : > { %v3004_v41 = vmul.f32 %v3000_v15, %v8032_v34 }
0x2128   : > { %v3006_v20 = vsub.f32 %v2996_v49, %v3004_v41  ;;  %v8241_v41 = vld [vmem:[#allocation145_spill] sm:$0xff] }
0x212a   : > { %v3008_v48 = vmul.f32 %v3006_v20, %v3006_v20 }
0x212c   : > { %v3010_v2 = vsel %vm276_vm0, %v3008_v48, 0.0 }
0x212d   : > { %v3003_v44 = vpop.xlane.xlu2 %3002  ;;  %3011 = vadd.xlane.f32.xlu1 %v3010_v2 }
0x212e   : > { %v3005_v43 = vmul.f32 %v3003_v44, %v8032_v34 }
0x2130   : > { %v3007_v18 = vsub.f32 %v2997_v53, %v3005_v43  ;;  %v8237_v53 = vld [vmem:[#allocation151_spill] sm:$0xff]  ;;  %v8243_v43 = vld [vmem:[#allocation123_spill] sm:$0xff] }
0x2132   : > { %v3009_v3 = vmul.f32 %v3007_v18, %v3007_v18 }
0x2134   : > { %v3013_v1 = vsel %vm276_vm0, %v3009_v3, 0.0 }
0x2135   : > { %3014 = vadd.xlane.f32.xlu0 %v3013_v1 }
0x21a0   : > { %v3012_v61 = vpop.xlane.xlu1 %3011 }
0x21a1   : > { %v3016_v13 = vmul.f32 %v3012_v61, %v8032_v34  ;;  %v8244_v61 = vld [vmem:[#allocation150_spill] sm:$0xff] }
0x21a3   : > { %v3018_v9 = vadd.f32 1e-12, %v3016_v13 }
0x21a5   : > { %4558 = vrsqrt.f32 %v3018_v9  ;;  %vm3026_vm6 = vweird.f32 %v3018_v9 }
0x21a8   : > { %v3015_v0 = vpop.xlane.xlu0 %3014 }
0x21a9   : > { %v3017_v60 = vmul.f32 %v3015_v0, %v8032_v34 }
0x21ab   : > { %v4559_v10 = vpop.eup %4558  ;;  %v3019_v45 = vadd.f32 1e-12, %v3017_v60 }
0x21ac   : > { %v3021_v6 = vmul.f32 %v4559_v10, %v3018_v9  ;;  %vm3027_vm5 = vweird.f32 %v4559_v10 }
0x21ad   : > { %4560 = vrsqrt.f32 %v3019_v45  ;;  %vm3028_vm7 = vmor %vm3026_vm6, %vm3027_vm5  ;;  %vm3036_vm12 = vweird.f32 %v3019_v45  ;;  %vm3304_vm5 = vcmask (%p7297_p0), 588800   ;;  %vm3310_vm6 = vcmask (%p7297_p0), 785408  }
0x21ae   : > { %v3022_v21 = vmul.f32 %v4559_v10, %v3021_v6 }
0x21b0   : > { %v3023_v36 = vmul.f32 0.5, %v3022_v21  ;;  %v8248_v21 = vld [vmem:[#allocation143_spill] sm:$0xff] }
0x21b2   : > { %v3024_v12 = vsub.f32 1.5, %v3023_v36  ;;  %v8267_v36 = vld [vmem:[#allocation174_spill] sm:$0xff] }
0x21b3   : > { %v4561_v37 = vpop.eup %4560  ;;  %v8325_v36 = vld [vmem:[#allocation165_spill] sm:$0xff] (%p7297_p0) }
0x21b4   : > { %v3025_v46 = vmul.f32 %v4559_v10, %v3024_v12  ;;  %v3031_v39 = vmul.f32 %v4561_v37, %v3019_v45  ;;  %vm3037_vm11 = vweird.f32 %v4561_v37  ;;  %v8247_v45 = vld [vmem:[#allocation149_spill] sm:$0xff]  ;;  %v8258_v12 = vmov %v8220_v24  ;;  %v8313_v24 = vld [vmem:[#allocation130_spill] sm:$0xff] }
0x21b5   : > { %vm3038_vm13 = vmor %vm3036_vm12, %vm3037_vm11  ;;  %v3107_v12 = vmul.f32 (%p7297_p0), 0.33333334, %v8325_v36  ;;  %v8354_v36 = vld [vmem:[#allocation192_spill] sm:$0xff] (%p7297_p0)  ;;  %vm3314_vm11 = vcmask (%p7297_p0), 916480   ;;  %vm3316_vm12 = vcmask (%p7297_p0), 982016  }
0x21b6   : > { %v3029_v38 = vsel %vm3028_vm7, %v4559_v10, %v3025_v46  ;;  %v3032_v52 = vmul.f32 %v4561_v37, %v3031_v39  ;;  %v8259_v46 = vmov %v8149_v25  ;;  %vm3312_vm7 = vcmask (%p7297_p0), 850944  }
0x21b7   : > { %v3040_v40 = vmul.f32 %v3029_v38, %v3006_v20  ;;  %v8274_v38 = vld [vmem:[#allocation173_spill] sm:$0xff] }
0x21b8   : > { %v3033_v16 = vmul.f32 0.5, %v3032_v52  ;;  %v8277_v52 = vld [vmem:[#allocation159_spill] sm:$0xff] }
0x21b9   : > { %v3045_v30 = vmul.f32 %v3043_v19, %v3040_v40  ;;  %v8275_v40 = vld [vmem:[#allocation161_spill] sm:$0xff] }
0x21ba   : > { %v3034_v42 = vsub.f32 1.5, %v3033_v16  ;;  %v8265_v16 = vld [vmem:[#allocation186_spill] sm:$0xff]  ;;  %v8329_v40 = vld [vmem:[#allocation155_spill] sm:$0xff] (%p7297_p0) }
0x21bb   : > { %v3050_v50 = vadd.f32 %v3048_v7, %v3045_v30  ;;  %v8268_v30 = vld [vmem:[#allocation168_spill] sm:$0xff]  ;;  %v8330_v16 = vld [vmem:[#allocation170_spill] sm:$0xff] (%p7297_p0) }
0x21bc   : > { %v3035_v54 = vmul.f32 %v4561_v37, %v3034_v42  ;;  %v8280_v42 = vld [vmem:[#allocation158_spill] sm:$0xff]  ;;  %v3209_v30 = vmul.f32 (%p7297_p0), 0.33333334, %v8330_v16 }
0x21bd   : > { %v7253_v39 = vadd.f32 %v8234_v4, %v3050_v50  ;;  %v8256_v50 = vmov %v8184_v27  ;;  %v8302_v27 = vld [vmem:[#allocation178_spill] sm:$0xff] }
0x21be   : > { %v3039_v47 = vsel %vm3038_vm13, %v4561_v37, %v3035_v54  ;;  %v8273_v37 = vld [vmem:[#allocation175_spill] sm:$0xff]  ;;  %v8279_v54 = vld [vmem:[#allocation157_spill] sm:$0xff]  ;;  %v8333_v50 = vld [vmem:[#allocation168_spill] sm:$0xff] (%p7297_p0) }
0x21bf   : > { %vm3054_vm14 = vcmp.ge.f32.partialorder %v7253_v39, 1.0  ;;  %v3041_v49 = vmul.f32 %v3039_v47, %v3007_v18  ;;  %v3076_v18 = vperm.slane %v8243_v43, 0  ;;  %v8264_v43 = vld [vmem:[#allocation180_spill] sm:$0xff]  ;;  %v8326_v37 = vld [vmem:[#allocation167_spill] sm:$0xff] (%p7297_p0)  ;;  %v3211_v54 = vmul.f32 (%p7297_p0), 0.33333334, %v8333_v50 }
0x21c0   : > { %v7257_v5 = vsel %vm3054_vm14, 1.0, %v8096_v63  ;;  %v8266_v47 = vld [vmem:[#allocation184_spill] sm:$0xff]  ;;  %v3108_v46 = vmul.f32 (%p7297_p0), 0.33333334, %v8326_v37  ;;  %v8339_v43 = vld [vmem:[#allocation159_spill] sm:$0xff] (%p7297_p0) }
0x21c1   : > { %8235 = vst [vmem:[#allocation200_spill] sm:$0xff] %v7257_v5  ;;  %v8236_v34 = vmov %v7257_v5  ;;  %v3046_v8 = vmul.f32 %v3043_v19, %v3041_v49  ;;  %v8257_v49 = vmov %v8226_v14  ;;  %v8263_v5 = vld [vmem:[#allocation182_spill] sm:$0xff]  ;;  %v8271_v19 = vld [vmem:[#allocation171_spill] sm:$0xff]  ;;  %v8306_v14 = vld [vmem:[#allocation176_spill] sm:$0xff] }
0x21c2   : > { %v7267_v31 = vadd.f32 %v8238_v17, %v8236_v34   ;;  %v8292_v17 = vld [vmem:[#allocation165_spill] sm:$0xff]  ;;  %v8328_v19 = vld [vmem:[#allocation160_spill] sm:$0xff] (%p7297_p0)  ;;  %v3118_v52 = vpack.c.bf16 (%p7297_p0), %v3108_v46, %v3107_v12  ;;  %v3227_v12 = vmul.f32 (%p7297_p0), 0.33333334, %v8354_v36 }
0x21c3   : > { %v3051_v62 = vadd.f32 %v3048_v7, %v3046_v8  ;;  %v8289_v7 = vld [vmem:[#allocation179_spill] sm:$0xff]  ;;  %v8290_v8 = vld [vmem:[#allocation177_spill] sm:$0xff]  ;;  %v3201_v38 = vmul.f32 (%p7297_p0), 0.33333334, %v8328_v19  ;;  %v8355_v37 = vld [vmem:[#allocation196_spill] sm:$0xff] (%p7297_p0) }
0x21c4   : > { %v8239_v59 = vmov %v7267_v31  ;;  %v8334_v49 = vld [vmem:[#allocation177_spill] sm:$0xff] (%p7297_p0)  ;;  %v8335_v8 = vld [vmem:[#allocation179_spill] sm:$0xff] (%p7297_p0)  ;;  %v3226_v46 = vmul.f32 (%p7297_p0), 0.33333334, %v8355_v37 }
0x21c5   : > { %v7262_v11 = vadd.f32 %v8237_v53, %v3051_v62  ;;  %v3072_v20 = vmul.f32 %v8239_v59, %v6424_v26  ;;  %v8269_v53 = vld [vmem:[#allocation172_spill] sm:$0xff]  ;;  %v8286_v31 = vmov %v8239_v59  ;;  %v8291_v62 = vld [vmem:[#allocation167_spill] sm:$0xff]  ;;  %v3109_v5 = vmul.f32 (%p7297_p0), 0.33333334, %v8334_v49 }
0x21c6   :  { %v3110_v62 = vmul.f32 (%p7297_p0), 0.33333334, %v8335_v8  ;;  %v8336_v53 = vld [vmem:[#allocation180_spill] sm:$0xff] (%p7297_p0) }
0x21c7   : > { %vm3055_vm15 = vcmp.ge.f32.partialorder %v7262_v11, 1.0  ;;  %v3215_v17 = vmul.f32 (%p7297_p0), 0.33333334, %v8336_v53 }
0x21c8   : > { %v7270_v15 = vsel %vm3055_vm15, 1.0, %v8096_v63 }
0x21c9   : > { %v8240_v56 = vmov %v7270_v15  ;;  %v8288_v15 = vld [vmem:[#allocation189_spill] sm:$0xff] }
0x21ca   : > { %v7276_v48 = vadd.f32 %v8241_v41, %v8240_v56   ;;  %v8276_v41 = vld [vmem:[#allocation156_spill] sm:$0xff]  ;;  %v8293_v11 = vsub.f32 %v7262_v11, %v8240_v56   ;;  %v8298_v56 = vld [vmem:[#allocation187_spill] sm:$0xff] }
0x21cb   :  { %v3119_v41 = vpack.c.bf16 (%p7297_p0), %v3110_v62, %v3109_v5 }
0x21cc   : > { %v8242_v32 = vmov %v7276_v48  ;;  %v8245_v48 = vld [vmem:[#allocation144_spill] sm:$0xff] }
0x21cd   : > { %v3073_v2 = vmul.f32 %v8242_v32, %v6424_v26  ;;  %v3114_v47 = vmul.f32 (%p7297_p0), 0.33333334, %v8242_v32 }
0x21cf   : > { %v3074_v44 = vpack.c.bf16 %v3073_v2, %v3072_v20  ;;  %v8260_v2 = vmov %v8113_v33  ;;  %v8272_v20 = vld [vmem:[#allocation169_spill] sm:$0xff] }
0x21d0   :  { %v3219_v20 = vmul.f32 (%p7297_p0), 0.33333334, %v8113_v33  ;;  %v8337_v2 = vld [vmem:[#allocation181_spill] sm:$0xff] (%p7297_p0) }
0x21d1   : > { %3768 = vmatmul.msk.bf16.vlgmr.msra.gmra.mxu0 %vm276_vm0, %v3074_v44 }
0x224e   : > { %v3090_v3 = vpop.f32.mrf.mxu0 }
0x224f   : > { %v3091_v1 = vadd.f32 %v3090_v3, %v3076_v18  ;;  %v8253_v3 = vmov %v8211_v58  ;;  %v8296_v58 = vld [vmem:[#allocation190_spill] sm:$0xff] }
0x2250   : > { %v8297_v22 = vsub.f32 %v6981_v22, %v8296_v58   ;;  %v8305_v58 = vld [vmem:[#allocation128_spill] sm:$0xff]  ;;  %v8340_v3 = vld [vmem:[#allocation162_spill] sm:$0xff] (%p7297_p0) }
0x2251   : > { %v3095_v13 = vadd.f32 %v8244_v61, %v3091_v1  ;;  %v8251_v61 = vmov %v8223_v55  ;;  %v8278_v1 = vld [vmem:[#allocation160_spill] sm:$0xff]  ;;  %v8307_v58 = vsub.f32 %v8305_v58, %v8306_v14   ;;  %v8319_v14 = vld [vmem:[#allocation158_spill] sm:$0xff] (%p7297_p0)  ;;  %v3198_v33 = vmul.f32 (%p7297_p0), 0.33333334, %v8340_v3 }
0x2252   : > { %v8294_v55 = vld [vmem:[#allocation200_spill] sm:$0xff]  ;;  %v8341_v1 = vld [vmem:[#allocation161_spill] sm:$0xff] (%p7297_p0) }
0x2253   : > { %vm3097_vm1 = vcmp.ge.f32.partialorder %v3095_v13, 1.0  ;;  %v8295_v39 = vsub.f32 %v7253_v39, %v8294_v55   ;;  %8308 = vst [vmem:[#allocation128_spill] sm:$0xff] %v8307_v58  ;;  %v8309_v55 = vld [vmem:[#allocation129_spill] sm:$0xff]  ;;  %v8320_v58 = vld [vmem:[#allocation126_spill] sm:$0xff] (%p7297_p0)  ;;  %v3204_v61 = vmul.f32 (%p7297_p0), 0.33333334, %v8341_v1 }
0x2254   : > { %v3769_v9 = vsel %vm3097_vm1, 1.0, %v8096_v63  ;;  %3780 = vmatpush.bf16.msra.mxu2 (%p7297_p0), %v8320_v58  ;;  %3779 = vmatpush.bf16.msra.mxu1 (%p7297_p0), %v8320_v58  ;;  %v8327_v39 = vld [vmem:[#allocation173_spill] sm:$0xff] (%p7297_p0) }
0x2255   : > { %v3103_v4 = vsub.f32 %v3095_v13, %v3769_v9   ;;  %v7287_v10 = vadd.f32 %v8245_v48, %v3769_v9   ;;  %v8270_v13 = vld [vmem:[#allocation170_spill] sm:$0xff]  ;;  %v8285_v48 = vmov %v8242_v32  ;;  %v8287_v9 = vld [vmem:[#allocation191_spill] sm:$0xff]  ;;  %3781 = vmatpush.bf16.msra.mxu3 (%p7297_p0), %v8320_v58  ;;  %3150 = vmatpush.bf16.msra.mxu0 (%p7297_p0), %v8320_v58  ;;  %v3205_v31 = vmul.f32 (%p7297_p0), 0.33333334, %v8327_v39  ;;  %v8338_v32 = vld [vmem:[#allocation197_spill] sm:$0xff] (%p7297_p0) }
0x2256   : > { %v3092_v0 = vpop.f32.mrf.mxu0  ;;  %v3113_v4 = vmul.f32 (%p7297_p0), 0.33333334, %v8239_v59  ;;  %v3217_v59 = vmul.f32 (%p7297_p0), 0.33333334, %v8337_v2  ;;  %v8342_v13 = vld [vmem:[#allocation171_spill] sm:$0xff] (%p7297_p0)  ;;  %v8356_v39 = vld [vmem:[#allocation198_spill] sm:$0xff] (%p7297_p0) }
0x2257   : > { %v8246_v57 = vmov %v7287_v10  ;;  %v3093_v60 = vadd.f32 %v3092_v0, %v3076_v18  ;;  %v8261_v18 = vmov %v8138_v29  ;;  %v8281_v0 = vld [vmem:[#allocation162_spill] sm:$0xff]  ;;  %v3208_v9 = vmul.f32 (%p7297_p0), 0.33333334, %v8342_v13  ;;  %v8343_v48 = vld [vmem:[#allocation175_spill] sm:$0xff] (%p7297_p0) }
0x2258   : > { %v8284_v10 = vmov %v8246_v57  ;;  %v8310_v29 = vld [vmem:[#allocation166_spill] sm:$0xff]  ;;  %v3115_v11 = vmul.f32 (%p7297_p0), 0.33333334, %v8246_v57  ;;  %v3121_v15 = vpack.c.bf16 (%p7297_p0), %v3114_v47, %v3113_v4  ;;  %v3202_v18 = vmul.f32 (%p7297_p0), 0.33333334, %v8339_v43 }
0x2259   : > { %v3096_v26 = vadd.f32 %v8247_v45, %v3093_v60  ;;  %v8255_v45 = vmov %v8205_v51  ;;  %v8262_v60 = vmov %v8116_v35  ;;  %v8311_v25 = vsub.f32 %v8309_v55, %v8310_v29   ;;  %v8314_v35 = vld [vmem:[#allocation164_spill] sm:$0xff]  ;;  %v8322_v29 = vld [vmem:[#allocation191_spill] sm:$0xff] (%p7297_p0) }
0x225a   :  { %3195 = vst.msk [vmem:[%s8331_s21 + $0x60] sm:$0xff] (%p7297_p0), %vm276_vm0, %v3115_v11  ;;  %v3206_v0 = vmul.f32 (%p7297_p0), 0.33333334, %v8343_v48  ;;  %v8344_v60 = vld [vmem:[#allocation172_spill] sm:$0xff] (%p7297_p0)  ;;  %v8358_v48 = vld [vmem:[#allocation163_spill] sm:$0xff] (%p7297_p0) }
0x225b   : > { %vm3098_vm3 = vcmp.ge.f32.partialorder %v3096_v26, 1.0  ;;  %8312 = vst [vmem:[#allocation129_spill] sm:$0xff] %v8311_v25  ;;  %v3112_v25 = vmul.f32 (%p7297_p0), 0.33333334, %v8322_v29  ;;  %v3210_v45 = vmul.f32 (%p7297_p0), 0.33333334, %v8344_v60 }
0x225c   : > { %v3770_v6 = vsel %vm3098_vm3, 1.0, %v8096_v63  ;;  %v8252_v63 = vmov %v8181_v23  ;;  %v8299_v23 = vld [vmem:[#allocation188_spill] sm:$0xff]  ;;  %v8351_v29 = vld [vmem:[#allocation195_spill] sm:$0xff] (%p7297_p0) }
0x225d   : > { %v3104_v44 = vsub.f32 %v3096_v26, %v3770_v6   ;;  %v7292_v26 = vadd.f32 %v8248_v21, %v3770_v6   ;;  %v8254_v21 = vmov %v8187_v28  ;;  %v8282_v6 = vld [vmem:[#allocation163_spill] sm:$0xff]  ;;  %v8300_v56 = vsub.f32 %v8298_v56, %v8299_v23   ;;  %v8323_v63 = vld [vmem:[#allocation124_spill] sm:$0xff] (%p7297_p0) }
0x225e   : > { %v8301_v28 = vld [vmem:[#allocation127_spill] sm:$0xff]  ;;  %v8315_v23 = vsub.f32 %v8313_v24, %v8314_v35   ;;  %342 = sbr.rel (!%p7297_p0) target bundleno = 307 (0x133), region = 151  ;;  %v8321_v35 = vld [vmem:[#allocation189_spill] sm:$0xff] (%p7297_p0)  ;;  %3783 = vmatpush.bf16.msra.mxu2 (%p7297_p0), %v8323_v63  ;;  %3782 = vmatpush.bf16.msra.mxu1 (%p7297_p0), %v8323_v63  ;;  %v3221_v44 = vmul.f32 (%p7297_p0), 0.33333334, %v8338_v32  ;;  %v8346_v21 = vld [vmem:[#allocation174_spill] sm:$0xff] (%p7297_p0) }
0x225f   : > { %v8249_v34 = vmov %v7292_v26  ;;  %v8303_v51 = vsub.f32 %v8301_v28, %v8302_v27   ;;  %v8318_v27 = vld [vmem:[#allocation156_spill] sm:$0xff] (%p7297_p0)  ;;  %v3111_v24 = vmul.f32 (%p7297_p0), 0.33333334, %v8321_v35  ;;  %v8324_v56 = vld [vmem:[#allocation169_spill] sm:$0xff] (%p7297_p0)  ;;  %3784 = vmatpush.bf16.msra.mxu3 (%p7297_p0), %v8323_v63  ;;  %3151 = vmatpush.bf16.msra.mxu0 (%p7297_p0), %v8323_v63  ;;  %v3212_v55 = vmul.f32 (%p7297_p0), 0.33333334, %v8346_v21 }
0x2260   : > { %v8283_v26 = vmov %v8249_v34  ;;  %8316 = vst [vmem:[#allocation130_spill] sm:$0xff] %v8315_v23  ;;  %v3203_v28 = vmul.f32 (%p7297_p0), 0.33333334, %v8318_v27  ;;  %v3207_v22 = vmul.f32 (%p7297_p0), 0.33333334, %v8324_v56  ;;  %v8347_v23 = vld [vmem:[#allocation182_spill] sm:$0xff] (%p7297_p0) }
0x2261   : > { %8304 = vst [vmem:[#allocation127_spill] sm:$0xff] %v8303_v51  ;;  %v3199_v51 = vmul.f32 (%p7297_p0), 0.33333334, %v8319_v14  ;;  %v3120_v10 = vpack.c.bf16 (%p7297_p0), %v3112_v25, %v3111_v24  ;;  %v3116_v7 = vmul.f32 (%p7297_p0), 0.33333334, %v8249_v34  ;;  %3772 = vmatmul.msk.bf16.vlgmr.msra.gmra.mxu1 (%p7297_p0), %vm276_vm0, %v3118_v52  ;;  %v8332_v34 = vld [vmem:[#allocation184_spill] sm:$0xff] (%p7297_p0) }
0x2262   :  { %3238 = vrot.lane.b32.xlu1 (%p7297_p0), %v3203_v28, %s4996_s29  ;;  %3246 = vrot.lane.b32.xlu2 (%p7297_p0), %v3207_v22, %s4998_s8  ;;  %v3213_v57 = vmul.f32 (%p7297_p0), 0.33333334, %v8332_v34  ;;  %v8345_v26 = vld [vmem:[#allocation186_spill] sm:$0xff] (%p7297_p0)  ;;  %v3216_v27 = vmul.f32 (%p7297_p0), 0.33333334, %v8347_v23  ;;  %v8348_v28 = vld [vmem:[#allocation185_spill] sm:$0xff] (%p7297_p0) }
0x2263   :  { %3230 = vrot.lane.b32.xlu0 %v3199_v51, %s4997_s10  ;;  %3774 = vmatmul.msk.bf16.vlgmr.msra.gmra.mxu2 %vm276_vm0, %v3120_v10  ;;  %v3122_v42 = vpack.c.bf16 %v3116_v7, %v3115_v11  ;;  %3196 = vst.msk [vmem:[%s8331_s21 + $0x68] sm:$0xff] %vm276_vm0, %v3116_v7  ;;  %v3214_v6 = vmul.f32 0.33333334, %v8345_v26  ;;  %v3220_v14 = vmul.f32 0.33333334, %v8348_v28  ;;  %v8349_v51 = vld [vmem:[#allocation183_spill] sm:$0xff] }
0x2264   :  { %3771 = vmatmul.msk.bf16.vlgmr.msra.gmra.mxu0 %vm276_vm0, %v8329_v40  ;;  %v3218_v58 = vmul.f32 0.33333334, %v8349_v51  ;;  %v8350_v35 = vld [vmem:[#allocation199_spill] sm:$0xff]  ;;  %v3224_v25 = vmul.f32 0.33333334, %v8351_v29  ;;  %v8352_v63 = vld [vmem:[#allocation193_spill] sm:$0xff] }
0x2265   :  { %3776 = vmatmul.msk.bf16.vlgmr.msra.gmra.mxu3 %vm276_vm0, %v3122_v42  ;;  %v3222_v24 = vmul.f32 0.33333334, %v8350_v35  ;;  %v3223_v56 = vmul.f32 0.33333334, %v8352_v63  ;;  %v8353_v22 = vld [vmem:[#allocation194_spill] sm:$0xff]  ;;  %v8357_v42 = vld [vmem:[#allocation125_spill] sm:$0xff] }
0x2266   :  { %v3225_v10 = vmul.f32 0.33333334, %v8353_v22  ;;  %v3124_v34 = vperm.slane %v8357_v42, 0  ;;  %v8359_v26 = vld [vmem:[#allocation157_spill] sm:$0xff] }
0x226a   :  { %3242 = vrot.lane.b32.xlu1 %v3205_v31, %s4999_s1  ;;  %3250 = vrot.lane.b32.xlu2 %v3209_v30, %s5001_s22  ;;  %v3228_v31 = vmul.f32 0.33333334, %v8356_v39 }
0x226b   :  { %3234 = vrot.lane.b32.xlu0 %v3201_v38, %s5000_s12 }
0x2271   :  { %3773 = vmatmul.msk.bf16.gmra.mxu1 %vm276_vm0, %v3119_v41 }
0x2272   :  { %3258 = vrot.lane.b32.xlu1 %v3213_v57, %s5002_s5  ;;  %3262 = vrot.lane.b32.xlu2 %v3215_v17, %s5004_s23 }
0x2273   :  { %3254 = vrot.lane.b32.xlu0 %v3211_v54, %s5003_s16  ;;  %3775 = vmatmul.msk.bf16.gmra.mxu2 %vm276_vm0, %v3121_v15 }
0x227a   :  { %3270 = vrot.lane.b32.xlu1 %v3219_v20, %s5005_s11  ;;  %3274 = vrot.lane.b32.xlu2 %v3221_v44, %s5007_s17 }
0x227b   :  { %3266 = vrot.lane.b32.xlu0 %v3217_v59, %s5006_s2 }
0x2282   :  { %3323 = vrot.lane.b32.xlu1 %v3202_v18, %s4997_s10  ;;  %3327 = vrot.lane.b32.xlu2 %v3204_v61, %s5000_s12 }
0x2283   :  { %3319 = vrot.lane.b32.xlu0 %v3198_v33, %s5008_s24 }
0x228a   :  { %3335 = vrot.lane.b32.xlu1 %v3208_v9, %s4999_s1  ;;  %3339 = vrot.lane.b32.xlu2 %v3210_v45, %s4998_s8 }
0x228b   :  { %3331 = vrot.lane.b32.xlu0 %v3206_v0, %s4996_s29  ;;  %v3197_v0 = vmul.f32 0.33333334, %v8358_v48 }
0x2292   :  { %3347 = vrot.lane.b32.xlu1 %v3214_v6, %s5003_s16  ;;  %3351 = vrot.lane.b32.xlu2 %v3216_v27, %s5002_s5  ;;  %v3200_v6 = vmul.f32 0.33333334, %v8359_v26 }
0x2293   :  { %3343 = vrot.lane.b32.xlu0 %v3212_v55, %s5001_s22 }
0x229a   :  { %3359 = vrot.lane.b32.xlu1 %v3220_v14, %s5006_s2  ;;  %3363 = vrot.lane.b32.xlu2 %v3222_v24, %s5005_s11  ;;  %s8360_s2 = sld [smem:[#allocation205_spill]] }
0x229b   :  { %3355 = vrot.lane.b32.xlu0 %v3218_v58, %s5004_s23 }
0x22a2   :  { %3367 = vrot.lane.b32.xlu1 %v3224_v25, %s5007_s17  ;;  %3282 = vrot.lane.b32.xlu2 %v3225_v10, %s5010_s19 }
0x22a3   :  { %3278 = vrot.lane.b32.xlu0 %v3223_v56, %s5009_s18 }
0x22aa   :  { %3286 = vrot.lane.b32.xlu1 %v3227_v12, %s5008_s24  ;;  %3375 = vrot.lane.b32.xlu2 %v3228_v31, %s5010_s19 }
0x22ab   :  { %3371 = vrot.lane.b32.xlu0 %v3226_v46, %s5009_s18 }
0x22bc   :  { %v7562_v19 = vpop.permute.xlu2 %3246 }
0x22c4   :  { %v7564_v38 = vpop.permute.xlu2 %3250 }
0x22cc   :  { %v7566_v7 = vpop.permute.xlu2 %3262 }
0x22d4   :  { %v3239_v52 = vpop.permute.xlu1 %3238  ;;  %v7568_v30 = vpop.permute.xlu2 %3274 }
0x22d5   :  { %v3231_v11 = vpop.permute.xlu0 %3230 }
0x22d6   :  { %v3290_v23 = vsel %vm452_vm8, %v3197_v0, %v3231_v11 }
0x22dc   :  { %v3243_v40 = vpop.permute.xlu1 %3242  ;;  %v3328_v47 = vpop.permute.xlu2 %3327 }
0x22dd   :  { %v3235_v16 = vpop.permute.xlu0 %3234 }
0x22de   :  { %v3158_v54 = vpop.f32.mrf.mxu1  ;;  %v3292_v28 = vsel %vm605_vm9, %v3290_v23, %v3235_v16 }
0x22df   :  { %v3159_v4 = vadd.f32 %v3158_v54, %v3124_v34  ;;  %v3294_v35 = vsel %vm862_vm10, %v3292_v28, %v3239_v52 }
0x22e0   :  { %v3295_v63 = vsel %vm276_vm0, %v3294_v35, %v3243_v40 }
0x22e1   :  { %3185 = vst.msk [vmem:[%s8331_s21 + $0x10] sm:$0xff] %vm276_vm0, %v3159_v4  ;;  %v3153_v53 = vpop.f32.mrf.mxu0  ;;  %v3297_v36 = vsel %vm3296_vm4, %v3295_v63, %v7562_v19 }
0x22e2   :  { %v3154_v15 = vadd.f32 %v3153_v53, %v3124_v34 }
0x22e4   :  { %v7571_v57 = vpop.permute.xlu1 %3258  ;;  %3183 = vst.msk [vmem:[%s8331_s21] sm:$0xff] %vm276_vm0, %v3154_v15  ;;  %v3340_v32 = vpop.permute.xlu2 %3339 }
0x22e5   :  { %v7573_v50 = vpop.permute.xlu0 %3254 }
0x22e6   :  { %v3168_v49 = vpop.f32.mrf.mxu2  ;;  %v3160_v17 = vpop.f32.mrf.mxu1 }
0x22e7   :  { %v3169_v5 = vadd.f32 %v3168_v49, %v3124_v34  ;;  %v3161_v41 = vadd.f32 %v3160_v17, %v3124_v34 }
0x22e8   :  { %v3178_v20 = vpop.f32.mrf.mxu3 }
0x22e9   :  { %3189 = vst.msk [vmem:[%s8331_s21 + $0x30] sm:$0xff] %vm276_vm0, %v3169_v5  ;;  %v3179_v2 = vadd.f32 %v3178_v20, %v3124_v34  ;;  %v3155_v3 = vpop.f32.mrf.mxu0 }
0x22ea   :  { %3186 = vst.msk [vmem:[%s8331_s21 + $0x18] sm:$0xff] %vm276_vm0, %v3161_v41  ;;  %v3156_v1 = vadd.f32 %v3155_v3, %v3124_v34 }
0x22eb   :  { %3193 = vst.msk [vmem:[%s8331_s21 + $0x50] sm:$0xff] %vm276_vm0, %v3179_v2 }
0x22ec   :  { %v7579_v8 = vpop.permute.xlu1 %3270  ;;  %3184 = vst.msk [vmem:[%s8331_s21 + $0x8] sm:$0xff] %vm276_vm0, %v3156_v1  ;;  %v3352_v27 = vpop.permute.xlu2 %3351 }
0x22ed   :  { %v7581_v62 = vpop.permute.xlu0 %3266 }
0x22ee   :  { %v3170_v59 = vpop.f32.mrf.mxu2  ;;  %v3163_v33 = vpop.f32.mrf.mxu1 }
0x22ef   :  { %v3171_v44 = vadd.f32 %v3170_v59, %v3124_v34  ;;  %v3164_v61 = vadd.f32 %v3163_v33, %v3124_v34 }
0x22f0   :  { %v3180_v13 = vpop.f32.mrf.mxu3 }
0x22f1   :  { %3190 = vst.msk [vmem:[%s8331_s21 + $0x38] sm:$0xff] %vm276_vm0, %v3171_v44  ;;  %v3181_v9 = vadd.f32 %v3180_v13, %v3124_v34 }
0x22f2   :  { %3187 = vst.msk [vmem:[%s8331_s21 + $0x20] sm:$0xff] %vm276_vm0, %v3164_v61 }
0x22f3   :  { %3194 = vst.msk [vmem:[%s8331_s21 + $0x58] sm:$0xff] %vm276_vm0, %v3181_v9 }
0x22f4   :  { %v3324_v43 = vpop.permute.xlu1 %3323  ;;  %v3364_v37 = vpop.permute.xlu2 %3363 }
0x22f5   :  { %v3320_v18 = vpop.permute.xlu0 %3319 }
0x22f6   :  { %v3173_v60 = vpop.f32.mrf.mxu2  ;;  %v3165_v14 = vpop.f32.mrf.mxu1  ;;  %v3378_v58 = vsel %vm452_vm8, %v3320_v18, %v3200_v6  ;;  %vm3298_vm8 = vcmask 392192  }
0x22f7   :  { %v3174_v45 = vadd.f32 %v3173_v60, %v3124_v34  ;;  %v3166_v51 = vadd.f32 %v3165_v14, %v3124_v34  ;;  %v3379_v29 = vsel %vm605_vm9, %v3378_v58, %v3324_v43  ;;  %vm3300_vm9 = vcmask 457728  }
0x22f8   :  { %v3380_v10 = vsel %vm862_vm10, %v3379_v29, %v3328_v47  ;;  %v3299_v46 = vsel %vm3298_vm8, %v3297_v36, %v7564_v38  ;;  %vm3306_vm10 = vcmask 654336  }
0x22f9   :  { %3191 = vst.msk [vmem:[%s8331_s21 + $0x40] sm:$0xff] %vm276_vm0, %v3174_v45  ;;  %v3301_v31 = vsel %vm3300_vm9, %v3299_v46, %v7573_v50 }
0x22fa   :  { %3188 = vst.msk [vmem:[%s8331_s21 + $0x28] sm:$0xff] %vm276_vm0, %v3166_v51  ;;  %v3303_v16 = vsel %vm985_vm2, %v3301_v31, %v7571_v57 }
0x22fb   :  { %v3305_v19 = vsel %vm3304_vm5, %v3303_v16, %v7566_v7 }
0x22fc   :  { %v3336_v21 = vpop.permute.xlu1 %3335  ;;  %v3283_v54 = vpop.permute.xlu2 %3282  ;;  %v3307_v4 = vsel %vm3306_vm10, %v3305_v19, %v7581_v62 }
0x22fd   :  { %v3332_v55 = vpop.permute.xlu0 %3331 }
0x22fe   :  { %v3175_v24 = vpop.f32.mrf.mxu2  ;;  %v3381_v12 = vsel %vm276_vm0, %v3380_v10, %v3332_v55 }
0x22ff   :  { %v3176_v25 = vadd.f32 %v3175_v24, %v3124_v34  ;;  %v3382_v39 = vsel %vm3296_vm4, %v3381_v12, %v3336_v21 }
0x2300   :  { %v3383_v40 = vsel %vm3298_vm8, %v3382_v39, %v3340_v32 }
0x2301   :  { %3192 = vst.msk [vmem:[%s8331_s21 + $0x48] sm:$0xff] %vm276_vm0, %v3176_v25  ;;  %vm3308_vm0 = vcmask 719872  }
0x2302   :  { %v3309_v49 = vsel %vm3308_vm0, %v3307_v4, %v7579_v8 }
0x2303   :  { %v3311_v57 = vsel %vm3310_vm6, %v3309_v49, %v7568_v30 }
0x2304   :  { %v3348_v56 = vpop.permute.xlu1 %3347  ;;  %v3376_v15 = vpop.permute.xlu2 %3375 }
0x2305   :  { %v3344_v22 = vpop.permute.xlu0 %3343 }
0x2306   :  { %v3384_v42 = vsel %vm3300_vm9, %v3383_v40, %v3344_v22 }
0x2307   :  { %v3385_v34 = vsel %vm985_vm2, %v3384_v42, %v3348_v56 }
0x2308   :  { %v3386_v38 = vsel %vm3304_vm5, %v3385_v34, %v3352_v27 }
0x230c   :  { %v3360_v52 = vpop.permute.xlu1 %3359 }
0x230d   :  { %v3356_v11 = vpop.permute.xlu0 %3355 }
0x230e   :  { %v3387_v5 = vsel %vm3306_vm10, %v3386_v38, %v3356_v11 }
0x230f   :  { %v3388_v53 = vsel %vm3308_vm0, %v3387_v5, %v3360_v52 }
0x2310   :  { %v3389_v7 = vsel %vm3310_vm6, %v3388_v53, %v3364_v37 }
0x2314   :  { %v3368_v47 = vpop.permute.xlu1 %3367 }
0x2315   :  { %v3279_v50 = vpop.permute.xlu0 %3278  ;;  %v3390_v41 = vsel %vm3312_vm7, %v3389_v7, %v3368_v47 }
0x2316   :  { %v3313_v17 = vsel %vm3312_vm7, %v3311_v57, %v3279_v50 }
0x2317   :  { %v3315_v20 = vsel %vm3314_vm11, %v3313_v17, %v3283_v54 }
0x231c   :  { %v3287_v62 = vpop.permute.xlu1 %3286 }
0x231d   :  { %v3372_v2 = vpop.permute.xlu0 %3371  ;;  %v3317_v59 = vsel %vm3316_vm12, %v3315_v20, %v3287_v62 }
0x231e   :  { %v3391_v32 = vsel %vm3314_vm11, %v3390_v41, %v3372_v2  ;;  %3393 = vst [vmem:[%s8360_s2] sm:$0xff] %v3317_v59 }
0x231f   :  { %v3392_v8 = vsel %vm3316_vm12, %v3391_v32, %v3376_v15 }
0x2320   :  { %3394 = vst [vmem:[%s8360_s2 + $0x8] sm:$0xff] %v3392_v8 }

</bundles_post_ra>
